<compile_context>
chip_gen: v7x
topology: tpu7x:2x2x1
jax: 0.10.0
libtpu: 0.0.40
codegen_flags: <defaults>
</compile_context>

<pallas_src>
import math

import jax
import jax.numpy as jnp
from jax.experimental import pallas as pl
from jax.experimental.pallas import tpu as pltpu

K = 4                       # ConvTranspose2d kernel size used throughout
EPS = 1e-5                  # PyTorch BatchNorm2d default eps
LANE = 128                  # Cout is padded to a multiple of this (lane-dense)
TM_MATMUL = 512             # max row tile for the BN matmul passes
TM_STREAM = 2048            # max row tile for streaming passes (affine / tanh)
VMEM_LIMIT = 32 * 1024 * 1024


def _round_up(v, m):
    return ((v + m - 1) // m) * m


def _pick_tm(m, cap):
    """Row tile: no padding for small layers, `cap` rows for big ones."""
    return min(cap, _round_up(m, 32))


def _pick_rows_tile(r, cap=TM_STREAM):
    """Row tile for streaming passes; must divide r (r is a multiple of 32)."""
    if r <= cap:
        return r
    return max(math.gcd(r, cap), 32)


# ---------------------------------------------------------------------------
# Pallas kernels
# ---------------------------------------------------------------------------
def _matmul_stats_kernel(p_ref, w_ref, y_ref, stat_ref, sum_acc, sq_acc):
    """bf16 matmul, f32 MXU accumulation, fused per-column sum / sum-of-sq.

    Grid = (phase, m_tiles).  Stats accumulate in (8, C) f32 VMEM scratch
    (VALU adds only); the cross-sublane reduce + (2, C) output store happen
    once per phase on the last m step.
    """
    i = pl.program_id(1)

    @pl.when(i == 0)
    def _():
        sum_acc[...] = jnp.zeros_like(sum_acc)
        sq_acc[...] = jnp.zeros_like(sq_acc)

    y = jnp.dot(p_ref[...], w_ref[...], preferred_element_type=jnp.float32)
    y_ref[...] = y.astype(y_ref.dtype)

    rows, cols = y.shape
    yg = y.reshape(rows // 8, 8, cols)           # keep (8, lane) layout intact
    sum_acc[...] += jnp.sum(yg, axis=0)
    sq_acc[...] += jnp.sum(yg * yg, axis=0)

    @pl.when(i == pl.num_programs(1) - 1)
    def _():
        stat_ref[...] = jnp.concatenate(
            [jnp.sum(sum_acc[...], axis=0, keepdims=True),
             jnp.sum(sq_acc[...], axis=0, keepdims=True)], axis=0)


def _matmul_tanh_kernel(p_ref, w_ref, o_ref):
    """Final layer: matmul + tanh; only the real output channels are stored."""
    y = jnp.dot(p_ref[...], w_ref[...], preferred_element_type=jnp.float32)
    o_ref[...] = jnp.tanh(y[:, : o_ref.shape[-1]])


def _affine_relu_kernel(x_ref, a_ref, c_ref, o_ref):
    """y = relu(x * a + c); a, c fold the BatchNorm scale/shift (f32 math)."""
    y = x_ref[...].astype(jnp.float32) * a_ref[...] + c_ref[...]
    o_ref[...] = jnp.maximum(y, 0.0).astype(o_ref.dtype)


# ---------------------------------------------------------------------------
# Pallas wrappers
# ---------------------------------------------------------------------------
def pallas_matmul_stats(patches, wmats, tm):
    """patches: (P, M, Kd) bf16, wmats: (P, Kd, C) bf16 -> y (P, M, C) bf16,
    per-phase stats (P, 2, C) f32 (sum, sum-of-squares)."""
    p, m, kd = patches.shape
    c = wmats.shape[2]
    flops = 2 * p * m * kd * c + 3 * p * m * c
    bytes_accessed = (patches.size * 2 + wmats.size * 2
                      + p * m * c * 2 + p * 2 * c * 4)
    return pl.pallas_call(
        _matmul_stats_kernel,
        out_shape=(jax.ShapeDtypeStruct((p, m, c), jnp.bfloat16),
                   jax.ShapeDtypeStruct((p, 2, c), jnp.float32)),
        grid=(p, m // tm),
        in_specs=[pl.BlockSpec((None, tm, kd), lambda ph, i: (ph, i, 0)),
                  pl.BlockSpec((None, kd, c), lambda ph, i: (ph, 0, 0))],
        out_specs=(pl.BlockSpec((None, tm, c), lambda ph, i: (ph, i, 0)),
                   pl.BlockSpec((None, 2, c), lambda ph, i: (ph, 0, 0))),
        scratch_shapes=[pltpu.VMEM((8, c), jnp.float32),
                        pltpu.VMEM((8, c), jnp.float32)],
        compiler_params=pltpu.CompilerParams(
            dimension_semantics=("parallel", "arbitrary"),
            vmem_limit_bytes=VMEM_LIMIT),
        cost_estimate=pl.CostEstimate(flops=flops, transcendentals=0,
                                      bytes_accessed=bytes_accessed),
    )(patches, wmats)


def pallas_matmul_tanh(patches, wmats, cout, tm):
    """Final layer: (P, M, Kd) @ (P, Kd, C_pad) -> (P, M, cout) f32 with tanh."""
    p, m, kd = patches.shape
    c_pad = wmats.shape[2]
    flops = 2 * p * m * kd * c_pad
    bytes_accessed = patches.size * 2 + wmats.size * 2 + p * m * cout * 4
    return pl.pallas_call(
        _matmul_tanh_kernel,
        out_shape=jax.ShapeDtypeStruct((p, m, cout), jnp.float32),
        grid=(p, m // tm),
        in_specs=[pl.BlockSpec((None, tm, kd), lambda ph, i: (ph, i, 0)),
                  pl.BlockSpec((None, kd, c_pad), lambda ph, i: (ph, 0, 0))],
        out_specs=pl.BlockSpec((None, tm, cout), lambda ph, i: (ph, i, 0)),
        compiler_params=pltpu.CompilerParams(
            dimension_semantics=("parallel", "parallel"),
            vmem_limit_bytes=VMEM_LIMIT),
        cost_estimate=pl.CostEstimate(flops=flops,
                                      transcendentals=p * m * cout,
                                      bytes_accessed=bytes_accessed),
    )(patches, wmats)


def pallas_affine_relu(y2d, a, c, tr):
    r, ch = y2d.shape
    bytes_accessed = 2 * r * ch * 2 + 2 * ch * 4
    return pl.pallas_call(
        _affine_relu_kernel,
        out_shape=jax.ShapeDtypeStruct((r, ch), jnp.bfloat16),
        grid=(r // tr,),
        in_specs=[pl.BlockSpec((tr, ch), lambda i: (i, 0)),
                  pl.BlockSpec((1, ch), lambda i: (0, 0)),
                  pl.BlockSpec((1, ch), lambda i: (0, 0))],
        out_specs=pl.BlockSpec((tr, ch), lambda i: (i, 0)),
        compiler_params=pltpu.CompilerParams(
            dimension_semantics=("parallel",),
            vmem_limit_bytes=VMEM_LIMIT),
        cost_estimate=pl.CostEstimate(flops=3 * r * ch, transcendentals=0,
                                      bytes_accessed=bytes_accessed),
    )(y2d, a, c)


# ---------------------------------------------------------------------------
# ConvTranspose2d glue: sub-pixel phase decomposition (stride 2, K=4, pad=1)
# ---------------------------------------------------------------------------
# out[n, 2y+rh, 2x+rw, co] = sum_{jh,jw in {0,1}, ci}
#       xpad[n, y+jh+rh, x+jw+rw, ci] * w[ci, co, (3-rh)-2*jh, (3-rw)-2*jw]
# with xpad = x padded by 1 on each spatial side.  Dense 4-tap matmul / phase.
def _phase_patches(x):
    """x: (N, H, W, Cin) bf16 -> (4, N*H*W, 4*Cin) phase patches."""
    n, h, w, cin = x.shape
    xp = jnp.pad(x, ((0, 0), (1, 1), (1, 1), (0, 0)))
    phases = []
    for rh in range(2):
        for rw in range(2):
            taps = [xp[:, rh + jh:rh + jh + h, rw + jw:rw + jw + w, :]
                    for jh in range(2) for jw in range(2)]
            ph = jnp.stack(taps, axis=3)               # (N, H, W, 4, Cin)
            phases.append(ph.reshape(n * h * w, 4 * cin))
    return jnp.stack(phases, axis=0)


def _phase_weights(w, c_pad):
    """PyTorch (Cin, Cout, 4, 4) -> (4, 4*Cin, c_pad) per-phase 2x2 sub-kernels."""
    cin, cout = w.shape[0], w.shape[1]
    mats = []
    for rh in range(2):
        for rw in range(2):
            taps = [w[:, :, (3 - rh) - 2 * jh, (3 - rw) - 2 * jw]
                    for jh in range(2) for jw in range(2)]
            mats.append(jnp.stack(taps, axis=0).reshape(4 * cin, cout))
    wmats = jnp.stack(mats, axis=0)
    wmats = jnp.pad(wmats, ((0, 0), (0, 0), (0, c_pad - cout)))
    return wmats.astype(jnp.bfloat16)


def _interleave_phases(y, n, h, w):
    """y: (4, N*H*W, C) phase-major -> (N, 2H, 2W, C)."""
    c = y.shape[-1]
    y = y.reshape(2, 2, n, h, w, c)
    y = jnp.transpose(y, (2, 3, 0, 4, 1, 5))
    return y.reshape(n, 2 * h, 2 * w, c)


def _bn_scale_shift(s, sq, count, gamma, beta, c_pad):
    """Fold BatchNorm (training-mode batch stats) into y*a + c."""
    cout = gamma.shape[0]
    mean = s / count
    var = jnp.maximum(sq / count - mean * mean, 0.0)   # guard f32 cancellation
    a = jnp.pad(gamma, (0, c_pad - cout)) * jax.lax.rsqrt(var + EPS)
    c = jnp.pad(beta, (0, c_pad - cout)) - mean * a
    return a[None, :].astype(jnp.float32), c[None, :].astype(jnp.float32)


# ---------------------------------------------------------------------------
# Layers
# ---------------------------------------------------------------------------
def deconv_first_layer(x2d, w, gamma, beta):
    """ConvTranspose2d(K=4, s=1, p=0) on a 1x1 input + BN + ReLU.

    With a 1x1 input this is exactly x @ W with W of shape (Cin, 4*4*Cout);
    BN stats are fused in the matmul and reduced over the 16 taps here."""
    n, cin = x2d.shape
    cout = w.shape[1]
    c_pad = _round_up(cout, LANE)

    wmat = jnp.transpose(w, (0, 2, 3, 1))                    # (Cin, 4, 4, Cout)
    wmat = jnp.pad(wmat, ((0, 0), (0, 0), (0, 0), (0, c_pad - cout)))
    wmat = wmat.reshape(cin, K * K * c_pad).astype(jnp.bfloat16)

    tm = _pick_tm(n, TM_MATMUL)
    m_pad = _round_up(n, tm)
    patches = x2d.astype(jnp.bfloat16)
    if m_pad != n:
        patches = jnp.pad(patches, ((0, m_pad - n), (0, 0)))

    y, stats = pallas_matmul_stats(patches[None], wmat[None], tm)
    s = stats[0, 0].reshape(K * K, c_pad).sum(axis=0)
    sq = stats[0, 1].reshape(K * K, c_pad).sum(axis=0)
    a, c = _bn_scale_shift(s, sq, n * K * K, gamma, beta, c_pad)

    y2d = y.reshape(m_pad * K * K, c_pad)
    act = pallas_affine_relu(y2d, a, c, _pick_rows_tile(y2d.shape[0]))
    return act.reshape(m_pad, K, K, c_pad)[:n, :, :, :cout]   # (N, 4, 4, Cout)


def deconv_up_layer(x, w, gamma, beta):
    """Stride-2 ConvTranspose2d (K=4, p=1) + BN + ReLU via sub-pixel phases."""
    n, h, wd, cin = x.shape
    cout = w.shape[1]
    c_pad = _round_up(cout, LANE)

    patches = _phase_patches(x)                              # (4, M, 4*Cin)
    wmats = _phase_weights(w, c_pad)                         # (4, 4*Cin, c_pad)

    m = patches.shape[1]
    tm = _pick_tm(m, TM_MATMUL)
    m_pad = _round_up(m, tm)
    if m_pad != m:
        patches = jnp.pad(patches, ((0, 0), (0, m_pad - m), (0, 0)))

    y, stats = pallas_matmul_stats(patches, wmats, tm)       # (4, m_pad, c_pad)
    s = stats[:, 0, :].sum(axis=0)
    sq = stats[:, 1, :].sum(axis=0)
    a, c = _bn_scale_shift(s, sq, 4 * m, gamma, beta, c_pad)

    y2d = y.reshape(4 * m_pad, c_pad)
    act = pallas_affine_relu(y2d, a, c, _pick_rows_tile(y2d.shape[0]))
    act = act.reshape(4, m_pad, c_pad)[:, :m, :cout]
    return _interleave_phases(act, n, h, wd)                 # (N, 2H, 2W, Cout)


def deconv_last_layer(x, w):
    """Final stride-2 ConvTranspose2d (Cout=3) with tanh fused in the epilogue.
    Only the 3 real channels are written back (f32), not a padded slab."""
    n, h, wd, cin = x.shape
    cout = w.shape[1]
    c_pad = _round_up(cout, LANE)

    patches = _phase_patches(x)
    wmats = _phase_weights(w, c_pad)

    m = patches.shape[1]
    tm = _pick_tm(m, TM_STREAM)
    m_pad = _round_up(m, tm)
    if m_pad != m:
        patches = jnp.pad(patches, ((0, 0), (0, m_pad - m), (0, 0)))

    y = pallas_matmul_tanh(patches, wmats, cout, tm)          # (4, m_pad, 3) f32
    return _interleave_phases(y[:, :m, :], n, h, wd)          # (N, 2H, 2W, 3)


# ---------------------------------------------------------------------------
# Generator (parameter init + forward)
# ---------------------------------------------------------------------------
def init_generator_params(key, lvs, fms):
    chans = [lvs, fms * 8, fms * 4, fms * 2, fms, 3]
    params = []
    for i in range(5):
        key, sub = jax.random.split(key)
        w = 0.02 * jax.random.normal(sub, (chans[i], chans[i + 1], K, K),
                                     jnp.float32)        # DCGAN-style init
        gamma = jnp.ones((chans[i + 1],), jnp.float32)   # BN default init
        beta = jnp.zeros((chans[i + 1],), jnp.float32)
        params.append((w, gamma, beta))
    return params


def generator_forward(x_nchw, params):
    """x_nchw: (N, lvs, 1, 1) -> (N, 3, 64, 64), matching the PyTorch module."""
    n = x_nchw.shape[0]
    x2d = x_nchw.reshape(n, -1)                              # (N, lvs)
    w0, g0, b0 = params[0]
    x = deconv_first_layer(x2d, w0, g0, b0)                  # (N, 4, 4, fms*8)
    for w, g, b in params[1:-1]:
        x = deconv_up_layer(x, w, g, b)                      # spatial x2 each
    w4, _, _ = params[-1]
    x = deconv_last_layer(x, w4)                             # (N, 64, 64, 3)
    return jnp.transpose(x, (0, 3, 1, 2))                    # -> NCHW f32


if __name__ == "__main__":
    key = jax.random.PRNGKey(0)
    kx, kp = jax.random.split(key)
    latent_vector_size, feature_map_size, batch = 16, 8, 2

    x = jax.random.normal(kx, (batch, latent_vector_size, 1, 1), jnp.float32)
    params = init_generator_params(kp, latent_vector_size, feature_map_size)

    out = jax.jit(generator_forward)(x, params)
    out = jax.block_until_ready(out)

    assert out.shape == (batch, 3, 64, 64), out.shape
    assert bool(jnp.all(jnp.isfinite(out)))
    assert bool(jnp.all(jnp.abs(out) <= 1.0 + 1e-6))   # tanh output range
    print("KERNEL_OK")
</pallas_src>

<mosaic_0001>
module attributes {stable_mosaic.version = 11 : i64} {
  func.func @_matmul_stats_kernel(%arg0: i32, %arg1: i32, %arg2: memref<1x32x16xbf16, #tpu.memory_space<vmem>>, %arg3: memref<1x16x2048xbf16, #tpu.memory_space<vmem>>, %arg4: memref<1x32x2048xbf16, #tpu.memory_space<vmem>>, %arg5: memref<1x2x2048xf32, #tpu.memory_space<vmem>>, %arg6: memref<8x2048xf32, #tpu.memory_space<vmem>>, %arg7: memref<8x2048xf32, #tpu.memory_space<vmem>>) attributes {dimension_semantics = [#tpu.dimension_semantics<parallel>, #tpu.dimension_semantics<arbitrary>], iteration_bounds = array<i64: 1, 1>, scalar_prefetch = 0 : i64, scratch_operands = 2 : i64, tpu.core_type = #tpu.core_type<tc>, window_params = [{transform_indices = @transform_0, window_bounds = array<i64: 1, 32, 16>}, {transform_indices = @transform_1, window_bounds = array<i64: 1, 16, 2048>}, {transform_indices = @transform_2, window_bounds = array<i64: 1, 32, 2048>}, {transform_indices = @transform_3, window_bounds = array<i64: 1, 2, 2048>}]} {
    %c0_i32 = arith.constant 0 : i32
    %0 = arith.cmpi eq, %arg1, %c0_i32 : i32
    %1 = arith.extui %0 : i1 to i32
    %c0_i32_0 = arith.constant 0 : i32
    %2 = arith.cmpi ne, %1, %c0_i32_0 : i32
    scf.if %2 {
      %cst_21 = arith.constant 0.000000e+00 : f32
      %25 = vector.broadcast %cst_21 : f32 to vector<8x2048xf32>
      %c0_22 = arith.constant 0 : index
      %c0_23 = arith.constant 0 : index
      %26 = vector.load %arg6[%c0_22, %c0_23] : memref<8x2048xf32, #tpu.memory_space<vmem>>, vector<8x2048xf32>
      tpu.vector_store %arg6[%c0_22, %c0_23], %25 {strides = array<i32>} : memref<8x2048xf32, #tpu.memory_space<vmem>>, vector<8x2048xf32>,
      %cst_24 = arith.constant 0.000000e+00 : f32
      %27 = vector.broadcast %cst_24 : f32 to vector<8x2048xf32>
      %c0_25 = arith.constant 0 : index
      %c0_26 = arith.constant 0 : index
      %28 = vector.load %arg7[%c0_25, %c0_26] : memref<8x2048xf32, #tpu.memory_space<vmem>>, vector<8x2048xf32>
      tpu.vector_store %arg7[%c0_25, %c0_26], %27 {strides = array<i32>} : memref<8x2048xf32, #tpu.memory_space<vmem>>, vector<8x2048xf32>,
    } else {
    }
    %c0 = arith.constant 0 : index
    %c0_1 = arith.constant 0 : index
    %c0_2 = arith.constant 0 : index
    %3 = vector.load %arg2[%c0, %c0_1, %c0_2] : memref<1x32x16xbf16, #tpu.memory_space<vmem>>, vector<1x32x16xbf16>
    %4 = vector.shape_cast %3 : vector<1x32x16xbf16> to vector<32x16xbf16>
    %c0_3 = arith.constant 0 : index
    %c0_4 = arith.constant 0 : index
    %c0_5 = arith.constant 0 : index
    %5 = vector.load %arg3[%c0_3, %c0_4, %c0_5] : memref<1x16x2048xbf16, #tpu.memory_space<vmem>>, vector<1x16x2048xbf16>
    %6 = vector.shape_cast %5 : vector<1x16x2048xbf16> to vector<16x2048xbf16>
    %cst = arith.constant dense<0.000000e+00> : vector<32x2048xf32>
    %7 = tpu.matmul %4, %6, %cst {dimension_numbers = #tpu.dot_dimension_numbers<[1], [0], [0], [1], [0, 0, 1, 1], [], []>} : vector<32x16xbf16>, vector<16x2048xbf16>, vector<32x2048xf32> -> vector<32x2048xf32>
    %8 = arith.truncf %7 : vector<32x2048xf32> to vector<32x2048xbf16>
    %c0_6 = arith.constant 0 : index
    %c0_7 = arith.constant 0 : index
    %c0_8 = arith.constant 0 : index
    %9 = vector.load %arg4[%c0_6, %c0_7, %c0_8] : memref<1x32x2048xbf16, #tpu.memory_space<vmem>>, vector<1x32x2048xbf16>
    %10 = vector.shape_cast %9 : vector<1x32x2048xbf16> to vector<32x2048xbf16>
    %11 = vector.shape_cast %8 : vector<32x2048xbf16> to vector<1x32x2048xbf16>
    tpu.vector_store %arg4[%c0_6, %c0_7, %c0_8], %11 {strides = array<i32>} : memref<1x32x2048xbf16, #tpu.memory_space<vmem>>, vector<1x32x2048xbf16>,
    %12 = vector.shape_cast %7 : vector<32x2048xf32> to vector<4x8x2048xf32>
    %c0_9 = arith.constant 0 : index
    %c0_10 = arith.constant 0 : index
    %13 = vector.load %arg6[%c0_9, %c0_10] : memref<8x2048xf32, #tpu.memory_space<vmem>>, vector<8x2048xf32>
    %cst_11 = arith.constant dense<0.000000e+00> : vector<8x2048xf32>
    %14 = vector.multi_reduction <add>, %12, %cst_11 [0] : vector<4x8x2048xf32> to vector<8x2048xf32>
    %15 = arith.addf %13, %14 : vector<8x2048xf32>
    %c0_12 = arith.constant 0 : index
    %c0_13 = arith.constant 0 : index
    %16 = vector.load %arg6[%c0_12, %c0_13] : memref<8x2048xf32, #tpu.memory_space<vmem>>, vector<8x2048xf32>
    tpu.vector_store %arg6[%c0_12, %c0_13], %15 {strides = array<i32>} : memref<8x2048xf32, #tpu.memory_space<vmem>>, vector<8x2048xf32>,
    %c0_14 = arith.constant 0 : index
    %c0_15 = arith.constant 0 : index
    %17 = vector.load %arg7[%c0_14, %c0_15] : memref<8x2048xf32, #tpu.memory_space<vmem>>, vector<8x2048xf32>
    %18 = arith.mulf %12, %12 : vector<4x8x2048xf32>
    %cst_16 = arith.constant dense<0.000000e+00> : vector<8x2048xf32>
    %19 = vector.multi_reduction <add>, %18, %cst_16 [0] : vector<4x8x2048xf32> to vector<8x2048xf32>
    %20 = arith.addf %17, %19 : vector<8x2048xf32>
    %c0_17 = arith.constant 0 : index
    %c0_18 = arith.constant 0 : index
    %21 = vector.load %arg7[%c0_17, %c0_18] : memref<8x2048xf32, #tpu.memory_space<vmem>>, vector<8x2048xf32>
    tpu.vector_store %arg7[%c0_17, %c0_18], %20 {strides = array<i32>} : memref<8x2048xf32, #tpu.memory_space<vmem>>, vector<8x2048xf32>,
    %c0_i32_19 = arith.constant 0 : i32
    %22 = arith.cmpi eq, %arg1, %c0_i32_19 : i32
    %23 = arith.extui %22 : i1 to i32
    %c0_i32_20 = arith.constant 0 : i32
    %24 = arith.cmpi ne, %23, %c0_i32_20 : i32
    scf.if %24 {
      %c0_21 = arith.constant 0 : index
      %c0_22 = arith.constant 0 : index
      %25 = vector.load %arg6[%c0_21, %c0_22] : memref<8x2048xf32, #tpu.memory_space<vmem>>, vector<8x2048xf32>
      %cst_23 = arith.constant dense<0.000000e+00> : vector<2048xf32>
      %26 = vector.multi_reduction <add>, %25, %cst_23 [0] : vector<8x2048xf32> to vector<2048xf32>
      %27 = vector.shape_cast %26 : vector<2048xf32> to vector<1x2048xf32>
      %c0_24 = arith.constant 0 : index
      %c0_25 = arith.constant 0 : index
      %28 = vector.load %arg7[%c0_24, %c0_25] : memref<8x2048xf32, #tpu.memory_space<vmem>>, vector<8x2048xf32>
      %cst_26 = arith.constant dense<0.000000e+00> : vector<2048xf32>
      %29 = vector.multi_reduction <add>, %28, %cst_26 [0] : vector<8x2048xf32> to vector<2048xf32>
      %30 = vector.shape_cast %29 : vector<2048xf32> to vector<1x2048xf32>
      %31 = tpu.concatenate %27, %30 in 0 : vector<1x2048xf32>, vector<1x2048xf32> -> vector<2x2048xf32>
      %c0_27 = arith.constant 0 : index
      %c0_28 = arith.constant 0 : index
      %c0_29 = arith.constant 0 : index
      %32 = vector.load %arg5[%c0_27, %c0_28, %c0_29] : memref<1x2x2048xf32, #tpu.memory_space<vmem>>, vector<1x2x2048xf32>
      %33 = vector.shape_cast %32 : vector<1x2x2048xf32> to vector<2x2048xf32>
      %34 = vector.shape_cast %31 : vector<2x2048xf32> to vector<1x2x2048xf32>
      tpu.vector_store %arg5[%c0_27, %c0_28, %c0_29], %34 {strides = array<i32>} : memref<1x2x2048xf32, #tpu.memory_space<vmem>>, vector<1x2x2048xf32>,
    } else {
    }
    return
  }
  func.func @transform_0(%arg0: i32, %arg1: i32) -> (i32, i32, i32) {
    %c0_i32 = arith.constant 0 : i32
    %c0_i32_0 = arith.constant 0 : i32
    return %arg0, %arg1, %c0_i32 : i32, i32, i32
  }
  func.func @transform_1(%arg0: i32, %arg1: i32) -> (i32, i32, i32) {
    %c0_i32 = arith.constant 0 : i32
    %c0_i32_0 = arith.constant 0 : i32
    %c0_i32_1 = arith.constant 0 : i32
    return %arg0, %c0_i32, %c0_i32_0 : i32, i32, i32
  }
  func.func @transform_2(%arg0: i32, %arg1: i32) -> (i32, i32, i32) {
    %c0_i32 = arith.constant 0 : i32
    %c0_i32_0 = arith.constant 0 : i32
    return %arg0, %arg1, %c0_i32 : i32, i32, i32
  }
  func.func @transform_3(%arg0: i32, %arg1: i32) -> (i32, i32, i32) {
    %c0_i32 = arith.constant 0 : i32
    %c0_i32_0 = arith.constant 0 : i32
    %c0_i32_1 = arith.constant 0 : i32
    return %arg0, %c0_i32, %c0_i32_0 : i32, i32, i32
  }
}

module attributes {stable_mosaic.version = 11 : i64} {
  func.func @_affine_relu_kernel(%arg0: i32, %arg1: memref<512x128xbf16, #tpu.memory_space<vmem>>, %arg2: memref<1x128xf32, #tpu.memory_space<vmem>>, %arg3: memref<1x128xf32, #tpu.memory_space<vmem>>, %arg4: memref<512x128xbf16, #tpu.memory_space<vmem>>) attributes {dimension_semantics = [#tpu.dimension_semantics<parallel>], iteration_bounds = array<i64: 1>, scalar_prefetch = 0 : i64, scratch_operands = 0 : i64, tpu.core_type = #tpu.core_type<tc>, window_params = [{transform_indices = @transform_0, window_bounds = array<i64: 512, 128>}, {pipeline_mode = #tpu.pipeline_mode<synchronous>, transform_indices = @transform_1, window_bounds = array<i64: 1, 128>}, {pipeline_mode = #tpu.pipeline_mode<synchronous>, transform_indices = @transform_2, window_bounds = array<i64: 1, 128>}, {transform_indices = @transform_3, window_bounds = array<i64: 512, 128>}]} {
    %c0 = arith.constant 0 : index
    %c0_0 = arith.constant 0 : index
    %0 = vector.load %arg1[%c0, %c0_0] : memref<512x128xbf16, #tpu.memory_space<vmem>>, vector<512x128xbf16>
    %1 = arith.extf %0 : vector<512x128xbf16> to vector<512x128xf32>
    %c0_1 = arith.constant 0 : index
    %c0_2 = arith.constant 0 : index
    %2 = vector.load %arg2[%c0_1, %c0_2] : memref<1x128xf32, #tpu.memory_space<vmem>>, vector<1x128xf32>
    %3 = vector.broadcast %2 : vector<1x128xf32> to vector<512x128xf32>
    %4 = arith.mulf %1, %3 : vector<512x128xf32>
    %c0_3 = arith.constant 0 : index
    %c0_4 = arith.constant 0 : index
    %5 = vector.load %arg3[%c0_3, %c0_4] : memref<1x128xf32, #tpu.memory_space<vmem>>, vector<1x128xf32>
    %6 = vector.broadcast %5 : vector<1x128xf32> to vector<512x128xf32>
    %7 = arith.addf %4, %6 : vector<512x128xf32>
    %cst = arith.constant 0.000000e+00 : f32
    %8 = vector.broadcast %cst : f32 to vector<512x128xf32>
    %9 = arith.maximumf %7, %8 : vector<512x128xf32>
    %10 = arith.truncf %9 : vector<512x128xf32> to vector<512x128xbf16>
    %c0_5 = arith.constant 0 : index
    %c0_6 = arith.constant 0 : index
    %11 = vector.load %arg4[%c0_5, %c0_6] : memref<512x128xbf16, #tpu.memory_space<vmem>>, vector<512x128xbf16>
    tpu.vector_store %arg4[%c0_5, %c0_6], %10 {strides = array<i32>} : memref<512x128xbf16, #tpu.memory_space<vmem>>, vector<512x128xbf16>,
    return
  }
  func.func @transform_0(%arg0: i32) -> (i32, i32) {
    %c0_i32 = arith.constant 0 : i32
    %c0_i32_0 = arith.constant 0 : i32
    return %arg0, %c0_i32 : i32, i32
  }
  func.func @transform_1(%arg0: i32) -> (i32, i32) {
    %c0_i32 = arith.constant 0 : i32
    %c0_i32_0 = arith.constant 0 : i32
    %c0_i32_1 = arith.constant 0 : i32
    return %c0_i32, %c0_i32_0 : i32, i32
  }
  func.func @transform_2(%arg0: i32) -> (i32, i32) {
    %c0_i32 = arith.constant 0 : i32
    %c0_i32_0 = arith.constant 0 : i32
    %c0_i32_1 = arith.constant 0 : i32
    return %c0_i32, %c0_i32_0 : i32, i32
  }
  func.func @transform_3(%arg0: i32) -> (i32, i32) {
    %c0_i32 = arith.constant 0 : i32
    %c0_i32_0 = arith.constant 0 : i32
    return %arg0, %c0_i32 : i32, i32
  }
}

module attributes {stable_mosaic.version = 11 : i64} {
  func.func @_matmul_stats_kernel(%arg0: i32, %arg1: i32, %arg2: memref<1x32x256xbf16, #tpu.memory_space<vmem>>, %arg3: memref<1x256x128xbf16, #tpu.memory_space<vmem>>, %arg4: memref<1x32x128xbf16, #tpu.memory_space<vmem>>, %arg5: memref<1x2x128xf32, #tpu.memory_space<vmem>>, %arg6: memref<8x128xf32, #tpu.memory_space<vmem>>, %arg7: memref<8x128xf32, #tpu.memory_space<vmem>>) attributes {dimension_semantics = [#tpu.dimension_semantics<parallel>, #tpu.dimension_semantics<arbitrary>], iteration_bounds = array<i64: 4, 1>, scalar_prefetch = 0 : i64, scratch_operands = 2 : i64, tpu.core_type = #tpu.core_type<tc>, window_params = [{transform_indices = @transform_0, window_bounds = array<i64: 1, 32, 256>}, {transform_indices = @transform_1, window_bounds = array<i64: 1, 256, 128>}, {transform_indices = @transform_2, window_bounds = array<i64: 1, 32, 128>}, {transform_indices = @transform_3, window_bounds = array<i64: 1, 2, 128>}]} {
    %c0_i32 = arith.constant 0 : i32
    %0 = arith.cmpi eq, %arg1, %c0_i32 : i32
    %1 = arith.extui %0 : i1 to i32
    %c0_i32_0 = arith.constant 0 : i32
    %2 = arith.cmpi ne, %1, %c0_i32_0 : i32
    scf.if %2 {
      %cst_21 = arith.constant 0.000000e+00 : f32
      %25 = vector.broadcast %cst_21 : f32 to vector<8x128xf32>
      %c0_22 = arith.constant 0 : index
      %c0_23 = arith.constant 0 : index
      %26 = vector.load %arg6[%c0_22, %c0_23] : memref<8x128xf32, #tpu.memory_space<vmem>>, vector<8x128xf32>
      tpu.vector_store %arg6[%c0_22, %c0_23], %25 {strides = array<i32>} : memref<8x128xf32, #tpu.memory_space<vmem>>, vector<8x128xf32>,
      %cst_24 = arith.constant 0.000000e+00 : f32
      %27 = vector.broadcast %cst_24 : f32 to vector<8x128xf32>
      %c0_25 = arith.constant 0 : index
      %c0_26 = arith.constant 0 : index
      %28 = vector.load %arg7[%c0_25, %c0_26] : memref<8x128xf32, #tpu.memory_space<vmem>>, vector<8x128xf32>
      tpu.vector_store %arg7[%c0_25, %c0_26], %27 {strides = array<i32>} : memref<8x128xf32, #tpu.memory_space<vmem>>, vector<8x128xf32>,
    } else {
    }
    %c0 = arith.constant 0 : index
    %c0_1 = arith.constant 0 : index
    %c0_2 = arith.constant 0 : index
    %3 = vector.load %arg2[%c0, %c0_1, %c0_2] : memref<1x32x256xbf16, #tpu.memory_space<vmem>>, vector<1x32x256xbf16>
    %4 = vector.shape_cast %3 : vector<1x32x256xbf16> to vector<32x256xbf16>
    %c0_3 = arith.constant 0 : index
    %c0_4 = arith.constant 0 : index
    %c0_5 = arith.constant 0 : index
    %5 = vector.load %arg3[%c0_3, %c0_4, %c0_5] : memref<1x256x128xbf16, #tpu.memory_space<vmem>>, vector<1x256x128xbf16>
    %6 = vector.shape_cast %5 : vector<1x256x128xbf16> to vector<256x128xbf16>
    %cst = arith.constant dense<0.000000e+00> : vector<32x128xf32>
    %7 = tpu.matmul %4, %6, %cst {dimension_numbers = #tpu.dot_dimension_numbers<[1], [0], [0], [1], [0, 0, 1, 1], [], []>} : vector<32x256xbf16>, vector<256x128xbf16>, vector<32x128xf32> -> vector<32x128xf32>
    %8 = arith.truncf %7 : vector<32x128xf32> to vector<32x128xbf16>
    %c0_6 = arith.constant 0 : index
    %c0_7 = arith.constant 0 : index
    %c0_8 = arith.constant 0 : index
    %9 = vector.load %arg4[%c0_6, %c0_7, %c0_8] : memref<1x32x128xbf16, #tpu.memory_space<vmem>>, vector<1x32x128xbf16>
    %10 = vector.shape_cast %9 : vector<1x32x128xbf16> to vector<32x128xbf16>
    %11 = vector.shape_cast %8 : vector<32x128xbf16> to vector<1x32x128xbf16>
    tpu.vector_store %arg4[%c0_6, %c0_7, %c0_8], %11 {strides = array<i32>} : memref<1x32x128xbf16, #tpu.memory_space<vmem>>, vector<1x32x128xbf16>,
    %12 = vector.shape_cast %7 : vector<32x128xf32> to vector<4x8x128xf32>
    %c0_9 = arith.constant 0 : index
    %c0_10 = arith.constant 0 : index
    %13 = vector.load %arg6[%c0_9, %c0_10] : memref<8x128xf32, #tpu.memory_space<vmem>>, vector<8x128xf32>
    %cst_11 = arith.constant dense<0.000000e+00> : vector<8x128xf32>
    %14 = vector.multi_reduction <add>, %12, %cst_11 [0] : vector<4x8x128xf32> to vector<8x128xf32>
    %15 = arith.addf %13, %14 : vector<8x128xf32>
    %c0_12 = arith.constant 0 : index
    %c0_13 = arith.constant 0 : index
    %16 = vector.load %arg6[%c0_12, %c0_13] : memref<8x128xf32, #tpu.memory_space<vmem>>, vector<8x128xf32>
    tpu.vector_store %arg6[%c0_12, %c0_13], %15 {strides = array<i32>} : memref<8x128xf32, #tpu.memory_space<vmem>>, vector<8x128xf32>,
    %c0_14 = arith.constant 0 : index
    %c0_15 = arith.constant 0 : index
    %17 = vector.load %arg7[%c0_14, %c0_15] : memref<8x128xf32, #tpu.memory_space<vmem>>, vector<8x128xf32>
    %18 = arith.mulf %12, %12 : vector<4x8x128xf32>
    %cst_16 = arith.constant dense<0.000000e+00> : vector<8x128xf32>
    %19 = vector.multi_reduction <add>, %18, %cst_16 [0] : vector<4x8x128xf32> to vector<8x128xf32>
    %20 = arith.addf %17, %19 : vector<8x128xf32>
    %c0_17 = arith.constant 0 : index
    %c0_18 = arith.constant 0 : index
    %21 = vector.load %arg7[%c0_17, %c0_18] : memref<8x128xf32, #tpu.memory_space<vmem>>, vector<8x128xf32>
    tpu.vector_store %arg7[%c0_17, %c0_18], %20 {strides = array<i32>} : memref<8x128xf32, #tpu.memory_space<vmem>>, vector<8x128xf32>,
    %c0_i32_19 = arith.constant 0 : i32
    %22 = arith.cmpi eq, %arg1, %c0_i32_19 : i32
    %23 = arith.extui %22 : i1 to i32
    %c0_i32_20 = arith.constant 0 : i32
    %24 = arith.cmpi ne, %23, %c0_i32_20 : i32
    scf.if %24 {
      %c0_21 = arith.constant 0 : index
      %c0_22 = arith.constant 0 : index
      %25 = vector.load %arg6[%c0_21, %c0_22] : memref<8x128xf32, #tpu.memory_space<vmem>>, vector<8x128xf32>
      %cst_23 = arith.constant dense<0.000000e+00> : vector<128xf32>
      %26 = vector.multi_reduction <add>, %25, %cst_23 [0] : vector<8x128xf32> to vector<128xf32>
      %27 = vector.shape_cast %26 : vector<128xf32> to vector<1x128xf32>
      %c0_24 = arith.constant 0 : index
      %c0_25 = arith.constant 0 : index
      %28 = vector.load %arg7[%c0_24, %c0_25] : memref<8x128xf32, #tpu.memory_space<vmem>>, vector<8x128xf32>
      %cst_26 = arith.constant dense<0.000000e+00> : vector<128xf32>
      %29 = vector.multi_reduction <add>, %28, %cst_26 [0] : vector<8x128xf32> to vector<128xf32>
      %30 = vector.shape_cast %29 : vector<128xf32> to vector<1x128xf32>
      %31 = tpu.concatenate %27, %30 in 0 : vector<1x128xf32>, vector<1x128xf32> -> vector<2x128xf32>
      %c0_27 = arith.constant 0 : index
      %c0_28 = arith.constant 0 : index
      %c0_29 = arith.constant 0 : index
      %32 = vector.load %arg5[%c0_27, %c0_28, %c0_29] : memref<1x2x128xf32, #tpu.memory_space<vmem>>, vector<1x2x128xf32>
      %33 = vector.shape_cast %32 : vector<1x2x128xf32> to vector<2x128xf32>
      %34 = vector.shape_cast %31 : vector<2x128xf32> to vector<1x2x128xf32>
      tpu.vector_store %arg5[%c0_27, %c0_28, %c0_29], %34 {strides = array<i32>} : memref<1x2x128xf32, #tpu.memory_space<vmem>>, vector<1x2x128xf32>,
    } else {
    }
    return
  }
  func.func @transform_0(%arg0: i32, %arg1: i32) -> (i32, i32, i32) {
    %c0_i32 = arith.constant 0 : i32
    %c0_i32_0 = arith.constant 0 : i32
    return %arg0, %arg1, %c0_i32 : i32, i32, i32
  }
  func.func @transform_1(%arg0: i32, %arg1: i32) -> (i32, i32, i32) {
    %c0_i32 = arith.constant 0 : i32
    %c0_i32_0 = arith.constant 0 : i32
    %c0_i32_1 = arith.constant 0 : i32
    return %arg0, %c0_i32, %c0_i32_0 : i32, i32, i32
  }
  func.func @transform_2(%arg0: i32, %arg1: i32) -> (i32, i32, i32) {
    %c0_i32 = arith.constant 0 : i32
    %c0_i32_0 = arith.constant 0 : i32
    return %arg0, %arg1, %c0_i32 : i32, i32, i32
  }
  func.func @transform_3(%arg0: i32, %arg1: i32) -> (i32, i32, i32) {
    %c0_i32 = arith.constant 0 : i32
    %c0_i32_0 = arith.constant 0 : i32
    %c0_i32_1 = arith.constant 0 : i32
    return %arg0, %c0_i32, %c0_i32_0 : i32, i32, i32
  }
}

module attributes {stable_mosaic.version = 11 : i64} {
  func.func @_affine_relu_kernel(%arg0: i32, %arg1: memref<128x128xbf16, #tpu.memory_space<vmem>>, %arg2: memref<1x128xf32, #tpu.memory_space<vmem>>, %arg3: memref<1x128xf32, #tpu.memory_space<vmem>>, %arg4: memref<128x128xbf16, #tpu.memory_space<vmem>>) attributes {dimension_semantics = [#tpu.dimension_semantics<parallel>], iteration_bounds = array<i64: 1>, scalar_prefetch = 0 : i64, scratch_operands = 0 : i64, tpu.core_type = #tpu.core_type<tc>, window_params = [{transform_indices = @transform_0, window_bounds = array<i64: 128, 128>}, {pipeline_mode = #tpu.pipeline_mode<synchronous>, transform_indices = @transform_1, window_bounds = array<i64: 1, 128>}, {pipeline_mode = #tpu.pipeline_mode<synchronous>, transform_indices = @transform_2, window_bounds = array<i64: 1, 128>}, {transform_indices = @transform_3, window_bounds = array<i64: 128, 128>}]} {
    %c0 = arith.constant 0 : index
    %c0_0 = arith.constant 0 : index
    %0 = vector.load %arg1[%c0, %c0_0] : memref<128x128xbf16, #tpu.memory_space<vmem>>, vector<128x128xbf16>
    %1 = arith.extf %0 : vector<128x128xbf16> to vector<128x128xf32>
    %c0_1 = arith.constant 0 : index
    %c0_2 = arith.constant 0 : index
    %2 = vector.load %arg2[%c0_1, %c0_2] : memref<1x128xf32, #tpu.memory_space<vmem>>, vector<1x128xf32>
    %3 = vector.broadcast %2 : vector<1x128xf32> to vector<128x128xf32>
    %4 = arith.mulf %1, %3 : vector<128x128xf32>
    %c0_3 = arith.constant 0 : index
    %c0_4 = arith.constant 0 : index
    %5 = vector.load %arg3[%c0_3, %c0_4] : memref<1x128xf32, #tpu.memory_space<vmem>>, vector<1x128xf32>
    %6 = vector.broadcast %5 : vector<1x128xf32> to vector<128x128xf32>
    %7 = arith.addf %4, %6 : vector<128x128xf32>
    %cst = arith.constant 0.000000e+00 : f32
    %8 = vector.broadcast %cst : f32 to vector<128x128xf32>
    %9 = arith.maximumf %7, %8 : vector<128x128xf32>
    %10 = arith.truncf %9 : vector<128x128xf32> to vector<128x128xbf16>
    %c0_5 = arith.constant 0 : index
    %c0_6 = arith.constant 0 : index
    %11 = vector.load %arg4[%c0_5, %c0_6] : memref<128x128xbf16, #tpu.memory_space<vmem>>, vector<128x128xbf16>
    tpu.vector_store %arg4[%c0_5, %c0_6], %10 {strides = array<i32>} : memref<128x128xbf16, #tpu.memory_space<vmem>>, vector<128x128xbf16>,
    return
  }
  func.func @transform_0(%arg0: i32) -> (i32, i32) {
    %c0_i32 = arith.constant 0 : i32
    %c0_i32_0 = arith.constant 0 : i32
    return %arg0, %c0_i32 : i32, i32
  }
  func.func @transform_1(%arg0: i32) -> (i32, i32) {
    %c0_i32 = arith.constant 0 : i32
    %c0_i32_0 = arith.constant 0 : i32
    %c0_i32_1 = arith.constant 0 : i32
    return %c0_i32, %c0_i32_0 : i32, i32
  }
  func.func @transform_2(%arg0: i32) -> (i32, i32) {
    %c0_i32 = arith.constant 0 : i32
    %c0_i32_0 = arith.constant 0 : i32
    %c0_i32_1 = arith.constant 0 : i32
    return %c0_i32, %c0_i32_0 : i32, i32
  }
  func.func @transform_3(%arg0: i32) -> (i32, i32) {
    %c0_i32 = arith.constant 0 : i32
    %c0_i32_0 = arith.constant 0 : i32
    return %arg0, %c0_i32 : i32, i32
  }
}

module attributes {stable_mosaic.version = 11 : i64} {
  func.func @_matmul_stats_kernel(%arg0: i32, %arg1: i32, %arg2: memref<1x128x128xbf16, #tpu.memory_space<vmem>>, %arg3: memref<1x128x128xbf16, #tpu.memory_space<vmem>>, %arg4: memref<1x128x128xbf16, #tpu.memory_space<vmem>>, %arg5: memref<1x2x128xf32, #tpu.memory_space<vmem>>, %arg6: memref<8x128xf32, #tpu.memory_space<vmem>>, %arg7: memref<8x128xf32, #tpu.memory_space<vmem>>) attributes {dimension_semantics = [#tpu.dimension_semantics<parallel>, #tpu.dimension_semantics<arbitrary>], iteration_bounds = array<i64: 4, 1>, scalar_prefetch = 0 : i64, scratch_operands = 2 : i64, tpu.core_type = #tpu.core_type<tc>, window_params = [{transform_indices = @transform_0, window_bounds = array<i64: 1, 128, 128>}, {transform_indices = @transform_1, window_bounds = array<i64: 1, 128, 128>}, {transform_indices = @transform_2, window_bounds = array<i64: 1, 128, 128>}, {transform_indices = @transform_3, window_bounds = array<i64: 1, 2, 128>}]} {
    %c0_i32 = arith.constant 0 : i32
    %0 = arith.cmpi eq, %arg1, %c0_i32 : i32
    %1 = arith.extui %0 : i1 to i32
    %c0_i32_0 = arith.constant 0 : i32
    %2 = arith.cmpi ne, %1, %c0_i32_0 : i32
    scf.if %2 {
      %cst_21 = arith.constant 0.000000e+00 : f32
      %25 = vector.broadcast %cst_21 : f32 to vector<8x128xf32>
      %c0_22 = arith.constant 0 : index
      %c0_23 = arith.constant 0 : index
      %26 = vector.load %arg6[%c0_22, %c0_23] : memref<8x128xf32, #tpu.memory_space<vmem>>, vector<8x128xf32>
      tpu.vector_store %arg6[%c0_22, %c0_23], %25 {strides = array<i32>} : memref<8x128xf32, #tpu.memory_space<vmem>>, vector<8x128xf32>,
      %cst_24 = arith.constant 0.000000e+00 : f32
      %27 = vector.broadcast %cst_24 : f32 to vector<8x128xf32>
      %c0_25 = arith.constant 0 : index
      %c0_26 = arith.constant 0 : index
      %28 = vector.load %arg7[%c0_25, %c0_26] : memref<8x128xf32, #tpu.memory_space<vmem>>, vector<8x128xf32>
      tpu.vector_store %arg7[%c0_25, %c0_26], %27 {strides = array<i32>} : memref<8x128xf32, #tpu.memory_space<vmem>>, vector<8x128xf32>,
    } else {
    }
    %c0 = arith.constant 0 : index
    %c0_1 = arith.constant 0 : index
    %c0_2 = arith.constant 0 : index
    %3 = vector.load %arg2[%c0, %c0_1, %c0_2] : memref<1x128x128xbf16, #tpu.memory_space<vmem>>, vector<1x128x128xbf16>
    %4 = vector.shape_cast %3 : vector<1x128x128xbf16> to vector<128x128xbf16>
    %c0_3 = arith.constant 0 : index
    %c0_4 = arith.constant 0 : index
    %c0_5 = arith.constant 0 : index
    %5 = vector.load %arg3[%c0_3, %c0_4, %c0_5] : memref<1x128x128xbf16, #tpu.memory_space<vmem>>, vector<1x128x128xbf16>
    %6 = vector.shape_cast %5 : vector<1x128x128xbf16> to vector<128x128xbf16>
    %cst = arith.constant dense<0.000000e+00> : vector<128x128xf32>
    %7 = tpu.matmul %4, %6, %cst {dimension_numbers = #tpu.dot_dimension_numbers<[1], [0], [0], [1], [0, 0, 1, 1], [], []>} : vector<128x128xbf16>, vector<128x128xbf16>, vector<128x128xf32> -> vector<128x128xf32>
    %8 = arith.truncf %7 : vector<128x128xf32> to vector<128x128xbf16>
    %c0_6 = arith.constant 0 : index
    %c0_7 = arith.constant 0 : index
    %c0_8 = arith.constant 0 : index
    %9 = vector.load %arg4[%c0_6, %c0_7, %c0_8] : memref<1x128x128xbf16, #tpu.memory_space<vmem>>, vector<1x128x128xbf16>
    %10 = vector.shape_cast %9 : vector<1x128x128xbf16> to vector<128x128xbf16>
    %11 = vector.shape_cast %8 : vector<128x128xbf16> to vector<1x128x128xbf16>
    tpu.vector_store %arg4[%c0_6, %c0_7, %c0_8], %11 {strides = array<i32>} : memref<1x128x128xbf16, #tpu.memory_space<vmem>>, vector<1x128x128xbf16>,
    %12 = vector.shape_cast %7 : vector<128x128xf32> to vector<16x8x128xf32>
    %c0_9 = arith.constant 0 : index
    %c0_10 = arith.constant 0 : index
    %13 = vector.load %arg6[%c0_9, %c0_10] : memref<8x128xf32, #tpu.memory_space<vmem>>, vector<8x128xf32>
    %cst_11 = arith.constant dense<0.000000e+00> : vector<8x128xf32>
    %14 = vector.multi_reduction <add>, %12, %cst_11 [0] : vector<16x8x128xf32> to vector<8x128xf32>
    %15 = arith.addf %13, %14 : vector<8x128xf32>
    %c0_12 = arith.constant 0 : index
    %c0_13 = arith.constant 0 : index
    %16 = vector.load %arg6[%c0_12, %c0_13] : memref<8x128xf32, #tpu.memory_space<vmem>>, vector<8x128xf32>
    tpu.vector_store %arg6[%c0_12, %c0_13], %15 {strides = array<i32>} : memref<8x128xf32, #tpu.memory_space<vmem>>, vector<8x128xf32>,
    %c0_14 = arith.constant 0 : index
    %c0_15 = arith.constant 0 : index
    %17 = vector.load %arg7[%c0_14, %c0_15] : memref<8x128xf32, #tpu.memory_space<vmem>>, vector<8x128xf32>
    %18 = arith.mulf %12, %12 : vector<16x8x128xf32>
    %cst_16 = arith.constant dense<0.000000e+00> : vector<8x128xf32>
    %19 = vector.multi_reduction <add>, %18, %cst_16 [0] : vector<16x8x128xf32> to vector<8x128xf32>
    %20 = arith.addf %17, %19 : vector<8x128xf32>
    %c0_17 = arith.constant 0 : index
    %c0_18 = arith.constant 0 : index
    %21 = vector.load %arg7[%c0_17, %c0_18] : memref<8x128xf32, #tpu.memory_space<vmem>>, vector<8x128xf32>
    tpu.vector_store %arg7[%c0_17, %c0_18], %20 {strides = array<i32>} : memref<8x128xf32, #tpu.memory_space<vmem>>, vector<8x128xf32>,
    %c0_i32_19 = arith.constant 0 : i32
    %22 = arith.cmpi eq, %arg1, %c0_i32_19 : i32
    %23 = arith.extui %22 : i1 to i32
    %c0_i32_20 = arith.constant 0 : i32
    %24 = arith.cmpi ne, %23, %c0_i32_20 : i32
    scf.if %24 {
      %c0_21 = arith.constant 0 : index
      %c0_22 = arith.constant 0 : index
      %25 = vector.load %arg6[%c0_21, %c0_22] : memref<8x128xf32, #tpu.memory_space<vmem>>, vector<8x128xf32>
      %cst_23 = arith.constant dense<0.000000e+00> : vector<128xf32>
      %26 = vector.multi_reduction <add>, %25, %cst_23 [0] : vector<8x128xf32> to vector<128xf32>
      %27 = vector.shape_cast %26 : vector<128xf32> to vector<1x128xf32>
      %c0_24 = arith.constant 0 : index
      %c0_25 = arith.constant 0 : index
      %28 = vector.load %arg7[%c0_24, %c0_25] : memref<8x128xf32, #tpu.memory_space<vmem>>, vector<8x128xf32>
      %cst_26 = arith.constant dense<0.000000e+00> : vector<128xf32>
      %29 = vector.multi_reduction <add>, %28, %cst_26 [0] : vector<8x128xf32> to vector<128xf32>
      %30 = vector.shape_cast %29 : vector<128xf32> to vector<1x128xf32>
      %31 = tpu.concatenate %27, %30 in 0 : vector<1x128xf32>, vector<1x128xf32> -> vector<2x128xf32>
      %c0_27 = arith.constant 0 : index
      %c0_28 = arith.constant 0 : index
      %c0_29 = arith.constant 0 : index
      %32 = vector.load %arg5[%c0_27, %c0_28, %c0_29] : memref<1x2x128xf32, #tpu.memory_space<vmem>>, vector<1x2x128xf32>
      %33 = vector.shape_cast %32 : vector<1x2x128xf32> to vector<2x128xf32>
      %34 = vector.shape_cast %31 : vector<2x128xf32> to vector<1x2x128xf32>
      tpu.vector_store %arg5[%c0_27, %c0_28, %c0_29], %34 {strides = array<i32>} : memref<1x2x128xf32, #tpu.memory_space<vmem>>, vector<1x2x128xf32>,
    } else {
    }
    return
  }
  func.func @transform_0(%arg0: i32, %arg1: i32) -> (i32, i32, i32) {
    %c0_i32 = arith.constant 0 : i32
    %c0_i32_0 = arith.constant 0 : i32
    return %arg0, %arg1, %c0_i32 : i32, i32, i32
  }
  func.func @transform_1(%arg0: i32, %arg1: i32) -> (i32, i32, i32) {
    %c0_i32 = arith.constant 0 : i32
    %c0_i32_0 = arith.constant 0 : i32
    %c0_i32_1 = arith.constant 0 : i32
    return %arg0, %c0_i32, %c0_i32_0 : i32, i32, i32
  }
  func.func @transform_2(%arg0: i32, %arg1: i32) -> (i32, i32, i32) {
    %c0_i32 = arith.constant 0 : i32
    %c0_i32_0 = arith.constant 0 : i32
    return %arg0, %arg1, %c0_i32 : i32, i32, i32
  }
  func.func @transform_3(%arg0: i32, %arg1: i32) -> (i32, i32, i32) {
    %c0_i32 = arith.constant 0 : i32
    %c0_i32_0 = arith.constant 0 : i32
    %c0_i32_1 = arith.constant 0 : i32
    return %arg0, %c0_i32, %c0_i32_0 : i32, i32, i32
  }
}

module attributes {stable_mosaic.version = 11 : i64} {
  func.func @_matmul_stats_kernel(%arg0: i32, %arg1: i32, %arg2: memref<1x512x64xbf16, #tpu.memory_space<vmem>>, %arg3: memref<1x64x128xbf16, #tpu.memory_space<vmem>>, %arg4: memref<1x512x128xbf16, #tpu.memory_space<vmem>>, %arg5: memref<1x2x128xf32, #tpu.memory_space<vmem>>, %arg6: memref<8x128xf32, #tpu.memory_space<vmem>>, %arg7: memref<8x128xf32, #tpu.memory_space<vmem>>) attributes {dimension_semantics = [#tpu.dimension_semantics<parallel>, #tpu.dimension_semantics<arbitrary>], iteration_bounds = array<i64: 4, 1>, scalar_prefetch = 0 : i64, scratch_operands = 2 : i64, tpu.core_type = #tpu.core_type<tc>, window_params = [{transform_indices = @transform_0, window_bounds = array<i64: 1, 512, 64>}, {transform_indices = @transform_1, window_bounds = array<i64: 1, 64, 128>}, {transform_indices = @transform_2, window_bounds = array<i64: 1, 512, 128>}, {transform_indices = @transform_3, window_bounds = array<i64: 1, 2, 128>}]} {
    %c0_i32 = arith.constant 0 : i32
    %0 = arith.cmpi eq, %arg1, %c0_i32 : i32
    %1 = arith.extui %0 : i1 to i32
    %c0_i32_0 = arith.constant 0 : i32
    %2 = arith.cmpi ne, %1, %c0_i32_0 : i32
    scf.if %2 {
      %cst_21 = arith.constant 0.000000e+00 : f32
      %25 = vector.broadcast %cst_21 : f32 to vector<8x128xf32>
      %c0_22 = arith.constant 0 : index
      %c0_23 = arith.constant 0 : index
      %26 = vector.load %arg6[%c0_22, %c0_23] : memref<8x128xf32, #tpu.memory_space<vmem>>, vector<8x128xf32>
      tpu.vector_store %arg6[%c0_22, %c0_23], %25 {strides = array<i32>} : memref<8x128xf32, #tpu.memory_space<vmem>>, vector<8x128xf32>,
      %cst_24 = arith.constant 0.000000e+00 : f32
      %27 = vector.broadcast %cst_24 : f32 to vector<8x128xf32>
      %c0_25 = arith.constant 0 : index
      %c0_26 = arith.constant 0 : index
      %28 = vector.load %arg7[%c0_25, %c0_26] : memref<8x128xf32, #tpu.memory_space<vmem>>, vector<8x128xf32>
      tpu.vector_store %arg7[%c0_25, %c0_26], %27 {strides = array<i32>} : memref<8x128xf32, #tpu.memory_space<vmem>>, vector<8x128xf32>,
    } else {
    }
    %c0 = arith.constant 0 : index
    %c0_1 = arith.constant 0 : index
    %c0_2 = arith.constant 0 : index
    %3 = vector.load %arg2[%c0, %c0_1, %c0_2] : memref<1x512x64xbf16, #tpu.memory_space<vmem>>, vector<1x512x64xbf16>
    %4 = vector.shape_cast %3 : vector<1x512x64xbf16> to vector<512x64xbf16>
    %c0_3 = arith.constant 0 : index
    %c0_4 = arith.constant 0 : index
    %c0_5 = arith.constant 0 : index
    %5 = vector.load %arg3[%c0_3, %c0_4, %c0_5] : memref<1x64x128xbf16, #tpu.memory_space<vmem>>, vector<1x64x128xbf16>
    %6 = vector.shape_cast %5 : vector<1x64x128xbf16> to vector<64x128xbf16>
    %cst = arith.constant dense<0.000000e+00> : vector<512x128xf32>
    %7 = tpu.matmul %4, %6, %cst {dimension_numbers = #tpu.dot_dimension_numbers<[1], [0], [0], [1], [0, 0, 1, 1], [], []>} : vector<512x64xbf16>, vector<64x128xbf16>, vector<512x128xf32> -> vector<512x128xf32>
    %8 = arith.truncf %7 : vector<512x128xf32> to vector<512x128xbf16>
    %c0_6 = arith.constant 0 : index
    %c0_7 = arith.constant 0 : index
    %c0_8 = arith.constant 0 : index
    %9 = vector.load %arg4[%c0_6, %c0_7, %c0_8] : memref<1x512x128xbf16, #tpu.memory_space<vmem>>, vector<1x512x128xbf16>
    %10 = vector.shape_cast %9 : vector<1x512x128xbf16> to vector<512x128xbf16>
    %11 = vector.shape_cast %8 : vector<512x128xbf16> to vector<1x512x128xbf16>
    tpu.vector_store %arg4[%c0_6, %c0_7, %c0_8], %11 {strides = array<i32>} : memref<1x512x128xbf16, #tpu.memory_space<vmem>>, vector<1x512x128xbf16>,
    %12 = vector.shape_cast %7 : vector<512x128xf32> to vector<64x8x128xf32>
    %c0_9 = arith.constant 0 : index
    %c0_10 = arith.constant 0 : index
    %13 = vector.load %arg6[%c0_9, %c0_10] : memref<8x128xf32, #tpu.memory_space<vmem>>, vector<8x128xf32>
    %cst_11 = arith.constant dense<0.000000e+00> : vector<8x128xf32>
    %14 = vector.multi_reduction <add>, %12, %cst_11 [0] : vector<64x8x128xf32> to vector<8x128xf32>
    %15 = arith.addf %13, %14 : vector<8x128xf32>
    %c0_12 = arith.constant 0 : index
    %c0_13 = arith.constant 0 : index
    %16 = vector.load %arg6[%c0_12, %c0_13] : memref<8x128xf32, #tpu.memory_space<vmem>>, vector<8x128xf32>
    tpu.vector_store %arg6[%c0_12, %c0_13], %15 {strides = array<i32>} : memref<8x128xf32, #tpu.memory_space<vmem>>, vector<8x128xf32>,
    %c0_14 = arith.constant 0 : index
    %c0_15 = arith.constant 0 : index
    %17 = vector.load %arg7[%c0_14, %c0_15] : memref<8x128xf32, #tpu.memory_space<vmem>>, vector<8x128xf32>
    %18 = arith.mulf %12, %12 : vector<64x8x128xf32>
    %cst_16 = arith.constant dense<0.000000e+00> : vector<8x128xf32>
    %19 = vector.multi_reduction <add>, %18, %cst_16 [0] : vector<64x8x128xf32> to vector<8x128xf32>
    %20 = arith.addf %17, %19 : vector<8x128xf32>
    %c0_17 = arith.constant 0 : index
    %c0_18 = arith.constant 0 : index
    %21 = vector.load %arg7[%c0_17, %c0_18] : memref<8x128xf32, #tpu.memory_space<vmem>>, vector<8x128xf32>
    tpu.vector_store %arg7[%c0_17, %c0_18], %20 {strides = array<i32>} : memref<8x128xf32, #tpu.memory_space<vmem>>, vector<8x128xf32>,
    %c0_i32_19 = arith.constant 0 : i32
    %22 = arith.cmpi eq, %arg1, %c0_i32_19 : i32
    %23 = arith.extui %22 : i1 to i32
    %c0_i32_20 = arith.constant 0 : i32
    %24 = arith.cmpi ne, %23, %c0_i32_20 : i32
    scf.if %24 {
      %c0_21 = arith.constant 0 : index
      %c0_22 = arith.constant 0 : index
      %25 = vector.load %arg6[%c0_21, %c0_22] : memref<8x128xf32, #tpu.memory_space<vmem>>, vector<8x128xf32>
      %cst_23 = arith.constant dense<0.000000e+00> : vector<128xf32>
      %26 = vector.multi_reduction <add>, %25, %cst_23 [0] : vector<8x128xf32> to vector<128xf32>
      %27 = vector.shape_cast %26 : vector<128xf32> to vector<1x128xf32>
      %c0_24 = arith.constant 0 : index
      %c0_25 = arith.constant 0 : index
      %28 = vector.load %arg7[%c0_24, %c0_25] : memref<8x128xf32, #tpu.memory_space<vmem>>, vector<8x128xf32>
      %cst_26 = arith.constant dense<0.000000e+00> : vector<128xf32>
      %29 = vector.multi_reduction <add>, %28, %cst_26 [0] : vector<8x128xf32> to vector<128xf32>
      %30 = vector.shape_cast %29 : vector<128xf32> to vector<1x128xf32>
      %31 = tpu.concatenate %27, %30 in 0 : vector<1x128xf32>, vector<1x128xf32> -> vector<2x128xf32>
      %c0_27 = arith.constant 0 : index
      %c0_28 = arith.constant 0 : index
      %c0_29 = arith.constant 0 : index
      %32 = vector.load %arg5[%c0_27, %c0_28, %c0_29] : memref<1x2x128xf32, #tpu.memory_space<vmem>>, vector<1x2x128xf32>
      %33 = vector.shape_cast %32 : vector<1x2x128xf32> to vector<2x128xf32>
      %34 = vector.shape_cast %31 : vector<2x128xf32> to vector<1x2x128xf32>
      tpu.vector_store %arg5[%c0_27, %c0_28, %c0_29], %34 {strides = array<i32>} : memref<1x2x128xf32, #tpu.memory_space<vmem>>, vector<1x2x128xf32>,
    } else {
    }
    return
  }
  func.func @transform_0(%arg0: i32, %arg1: i32) -> (i32, i32, i32) {
    %c0_i32 = arith.constant 0 : i32
    %c0_i32_0 = arith.constant 0 : i32
    return %arg0, %arg1, %c0_i32 : i32, i32, i32
  }
  func.func @transform_1(%arg0: i32, %arg1: i32) -> (i32, i32, i32) {
    %c0_i32 = arith.constant 0 : i32
    %c0_i32_0 = arith.constant 0 : i32
    %c0_i32_1 = arith.constant 0 : i32
    return %arg0, %c0_i32, %c0_i32_0 : i32, i32, i32
  }
  func.func @transform_2(%arg0: i32, %arg1: i32) -> (i32, i32, i32) {
    %c0_i32 = arith.constant 0 : i32
    %c0_i32_0 = arith.constant 0 : i32
    return %arg0, %arg1, %c0_i32 : i32, i32, i32
  }
  func.func @transform_3(%arg0: i32, %arg1: i32) -> (i32, i32, i32) {
    %c0_i32 = arith.constant 0 : i32
    %c0_i32_0 = arith.constant 0 : i32
    %c0_i32_1 = arith.constant 0 : i32
    return %arg0, %c0_i32, %c0_i32_0 : i32, i32, i32
  }
}

module attributes {stable_mosaic.version = 11 : i64} {
  func.func @_affine_relu_kernel(%arg0: i32, %arg1: memref<2048x128xbf16, #tpu.memory_space<vmem>>, %arg2: memref<1x128xf32, #tpu.memory_space<vmem>>, %arg3: memref<1x128xf32, #tpu.memory_space<vmem>>, %arg4: memref<2048x128xbf16, #tpu.memory_space<vmem>>) attributes {dimension_semantics = [#tpu.dimension_semantics<parallel>], iteration_bounds = array<i64: 1>, scalar_prefetch = 0 : i64, scratch_operands = 0 : i64, tpu.core_type = #tpu.core_type<tc>, window_params = [{transform_indices = @transform_0, window_bounds = array<i64: 2048, 128>}, {pipeline_mode = #tpu.pipeline_mode<synchronous>, transform_indices = @transform_1, window_bounds = array<i64: 1, 128>}, {pipeline_mode = #tpu.pipeline_mode<synchronous>, transform_indices = @transform_2, window_bounds = array<i64: 1, 128>}, {transform_indices = @transform_3, window_bounds = array<i64: 2048, 128>}]} {
    %c0 = arith.constant 0 : index
    %c0_0 = arith.constant 0 : index
    %0 = vector.load %arg1[%c0, %c0_0] : memref<2048x128xbf16, #tpu.memory_space<vmem>>, vector<2048x128xbf16>
    %1 = arith.extf %0 : vector<2048x128xbf16> to vector<2048x128xf32>
    %c0_1 = arith.constant 0 : index
    %c0_2 = arith.constant 0 : index
    %2 = vector.load %arg2[%c0_1, %c0_2] : memref<1x128xf32, #tpu.memory_space<vmem>>, vector<1x128xf32>
    %3 = vector.broadcast %2 : vector<1x128xf32> to vector<2048x128xf32>
    %4 = arith.mulf %1, %3 : vector<2048x128xf32>
    %c0_3 = arith.constant 0 : index
    %c0_4 = arith.constant 0 : index
    %5 = vector.load %arg3[%c0_3, %c0_4] : memref<1x128xf32, #tpu.memory_space<vmem>>, vector<1x128xf32>
    %6 = vector.broadcast %5 : vector<1x128xf32> to vector<2048x128xf32>
    %7 = arith.addf %4, %6 : vector<2048x128xf32>
    %cst = arith.constant 0.000000e+00 : f32
    %8 = vector.broadcast %cst : f32 to vector<2048x128xf32>
    %9 = arith.maximumf %7, %8 : vector<2048x128xf32>
    %10 = arith.truncf %9 : vector<2048x128xf32> to vector<2048x128xbf16>
    %c0_5 = arith.constant 0 : index
    %c0_6 = arith.constant 0 : index
    %11 = vector.load %arg4[%c0_5, %c0_6] : memref<2048x128xbf16, #tpu.memory_space<vmem>>, vector<2048x128xbf16>
    tpu.vector_store %arg4[%c0_5, %c0_6], %10 {strides = array<i32>} : memref<2048x128xbf16, #tpu.memory_space<vmem>>, vector<2048x128xbf16>,
    return
  }
  func.func @transform_0(%arg0: i32) -> (i32, i32) {
    %c0_i32 = arith.constant 0 : i32
    %c0_i32_0 = arith.constant 0 : i32
    return %arg0, %c0_i32 : i32, i32
  }
  func.func @transform_1(%arg0: i32) -> (i32, i32) {
    %c0_i32 = arith.constant 0 : i32
    %c0_i32_0 = arith.constant 0 : i32
    %c0_i32_1 = arith.constant 0 : i32
    return %c0_i32, %c0_i32_0 : i32, i32
  }
  func.func @transform_2(%arg0: i32) -> (i32, i32) {
    %c0_i32 = arith.constant 0 : i32
    %c0_i32_0 = arith.constant 0 : i32
    %c0_i32_1 = arith.constant 0 : i32
    return %c0_i32, %c0_i32_0 : i32, i32
  }
  func.func @transform_3(%arg0: i32) -> (i32, i32) {
    %c0_i32 = arith.constant 0 : i32
    %c0_i32_0 = arith.constant 0 : i32
    return %arg0, %c0_i32 : i32, i32
  }
}

module attributes {stable_mosaic.version = 11 : i64} {
  func.func @_matmul_tanh_kernel(%arg0: i32, %arg1: i32, %arg2: memref<1x2048x32xbf16, #tpu.memory_space<vmem>>, %arg3: memref<1x32x128xbf16, #tpu.memory_space<vmem>>, %arg4: memref<1x2048x3xf32, #tpu.memory_space<vmem>>) attributes {dimension_semantics = [#tpu.dimension_semantics<parallel>, #tpu.dimension_semantics<parallel>], iteration_bounds = array<i64: 4, 1>, scalar_prefetch = 0 : i64, scratch_operands = 0 : i64, tpu.core_type = #tpu.core_type<tc>, window_params = [{transform_indices = @transform_0, window_bounds = array<i64: 1, 2048, 32>}, {transform_indices = @transform_1, window_bounds = array<i64: 1, 32, 128>}, {transform_indices = @transform_2, window_bounds = array<i64: 1, 2048, 3>}]} {
    %c0 = arith.constant 0 : index
    %c0_0 = arith.constant 0 : index
    %c0_1 = arith.constant 0 : index
    %0 = vector.load %arg2[%c0, %c0_0, %c0_1] : memref<1x2048x32xbf16, #tpu.memory_space<vmem>>, vector<1x2048x32xbf16>
    %1 = vector.shape_cast %0 : vector<1x2048x32xbf16> to vector<2048x32xbf16>
    %c0_2 = arith.constant 0 : index
    %c0_3 = arith.constant 0 : index
    %c0_4 = arith.constant 0 : index
    %2 = vector.load %arg3[%c0_2, %c0_3, %c0_4] : memref<1x32x128xbf16, #tpu.memory_space<vmem>>, vector<1x32x128xbf16>
    %3 = vector.shape_cast %2 : vector<1x32x128xbf16> to vector<32x128xbf16>
    %cst = arith.constant dense<0.000000e+00> : vector<2048x128xf32>
    %4 = tpu.matmul %1, %3, %cst {dimension_numbers = #tpu.dot_dimension_numbers<[1], [0], [0], [1], [0, 0, 1, 1], [], []>} : vector<2048x32xbf16>, vector<32x128xbf16>, vector<2048x128xf32> -> vector<2048x128xf32>
    %5 = vector.extract_strided_slice %4 {offsets = [0, 0], sizes = [2048, 3], strides = [1, 1]} : vector<2048x128xf32> to vector<2048x3xf32>
    %6 = math.tanh %5 : vector<2048x3xf32>
    %c0_5 = arith.constant 0 : index
    %c0_6 = arith.constant 0 : index
    %c0_7 = arith.constant 0 : index
    %7 = vector.load %arg4[%c0_5, %c0_6, %c0_7] : memref<1x2048x3xf32, #tpu.memory_space<vmem>>, vector<1x2048x3xf32>
    %8 = vector.shape_cast %7 : vector<1x2048x3xf32> to vector<2048x3xf32>
    %9 = vector.shape_cast %6 : vector<2048x3xf32> to vector<1x2048x3xf32>
    tpu.vector_store %arg4[%c0_5, %c0_6, %c0_7], %9 {strides = array<i32>} : memref<1x2048x3xf32, #tpu.memory_space<vmem>>, vector<1x2048x3xf32>,
    return
  }
  func.func @transform_0(%arg0: i32, %arg1: i32) -> (i32, i32, i32) {
    %c0_i32 = arith.constant 0 : i32
    %c0_i32_0 = arith.constant 0 : i32
    return %arg0, %arg1, %c0_i32 : i32, i32, i32
  }
  func.func @transform_1(%arg0: i32, %arg1: i32) -> (i32, i32, i32) {
    %c0_i32 = arith.constant 0 : i32
    %c0_i32_0 = arith.constant 0 : i32
    %c0_i32_1 = arith.constant 0 : i32
    return %arg0, %c0_i32, %c0_i32_0 : i32, i32, i32
  }
  func.func @transform_2(%arg0: i32, %arg1: i32) -> (i32, i32, i32) {
    %c0_i32 = arith.constant 0 : i32
    %c0_i32_0 = arith.constant 0 : i32
    return %arg0, %arg1, %c0_i32 : i32, i32, i32
  }
}

</mosaic_0001>

<bundles_post_ra>
// kernel: generator_forward.10
= control target key start
LH: loop header
LB: loop body
LE: loop exit
PB: predicated region body
PF: predicated region fallthrough
CT: control target
= control target key end

     0   :  { %s1502_s0 = inlined_call_operand.vmem [shape: bf16[512,128], index: 0, kind: input, shape index: {}]   ;;  %s1503_s1 = inlined_call_operand.vmem [shape: f32[1,128], index: 1, kind: input, shape index: {}]   ;;  %s1504_s2 = inlined_call_operand.vmem [shape: f32[1,128], index: 2, kind: input, shape index: {}]   ;;  %s1505_s3 = inlined_call_operand.vmem [shape: bf16[512,128], index: 3, kind: output, shape index: {}]  }
   0x1   :  { %v803_v0 = vld [vmem:[%s1502_s0] sm:$0xff]   ;;  %v1090_v4 = vld [vmem:[%s1502_s0 + $0x8] sm:$0xff]   ;;  %v1091_v5 = vld [vmem:[%s1502_s0 + $0x10] sm:$0xff]  }
   0x2   :  { %v1178_v1 = vld [vmem:[%s1503_s1] ss:$0 sm:$0xff]  ;;  %v804_v2 = vunpack.c.l.bf16 %v803_v0  ;;  %v805_v3 = vunpack.c.h.bf16 %v803_v0  ;;  %v1092_v6 = vld [vmem:[%s1502_s0 + $0x18] sm:$0xff]   ;;  %v808_v8 = vunpack.c.l.bf16 %v1090_v4  ;;  %v809_v9 = vunpack.c.h.bf16 %v1090_v4  ;;  %v1094_v33 = vld [vmem:[%s1502_s0 + $0x28] sm:$0xff]  }
   0x3   :  { %v1192_v7 = vld [vmem:[%s1504_s2] ss:$0 sm:$0xff]  ;;  %v812_v10 = vunpack.c.l.bf16 %v1091_v5  ;;  %v813_v11 = vunpack.c.h.bf16 %v1091_v5  ;;  %v816_v14 = vunpack.c.l.bf16 %v1092_v6  ;;  %v817_v15 = vunpack.c.h.bf16 %v1092_v6  ;;  %v1095_v38 = vld [vmem:[%s1502_s0 + $0x30] sm:$0xff]   ;;  %v1096_v43 = vld [vmem:[%s1502_s0 + $0x38] sm:$0xff]  }
   0x4   :  { %v149_v12 = vmul.f32 %v804_v2, %v1178_v1  ;;  %v150_v13 = vmul.f32 %v805_v3, %v1178_v1  ;;  %v151_v16 = vmul.f32 %v808_v8, %v1178_v1  ;;  %v152_v17 = vmul.f32 %v809_v9, %v1178_v1  ;;  %v1093_v28 = vld [vmem:[%s1502_s0 + $0x20] sm:$0xff]  }
   0x5   :  { %v153_v18 = vmul.f32 %v812_v10, %v1178_v1  ;;  %v154_v19 = vmul.f32 %v813_v11, %v1178_v1  ;;  %v155_v22 = vmul.f32 %v816_v14, %v1178_v1  ;;  %v156_v23 = vmul.f32 %v817_v15, %v1178_v1  ;;  %v1097_v0 = vld [vmem:[%s1502_s0 + $0x40] sm:$0xff]   ;;  %v1098_v11 = vld [vmem:[%s1502_s0 + $0x48] sm:$0xff]  }
   0x6   :  { %v220_v20 = vadd.f32 %v1192_v7, %v149_v12  ;;  %v221_v21 = vadd.f32 %v1192_v7, %v150_v13  ;;  %v222_v24 = vadd.f32 %v1192_v7, %v151_v16  ;;  %v223_v25 = vadd.f32 %v1192_v7, %v152_v17  ;;  %v1099_v16 = vld [vmem:[%s1502_s0 + $0x50] sm:$0xff]  }
   0x7   :  { %v224_v26 = vadd.f32 %v1192_v7, %v153_v18  ;;  %v225_v27 = vadd.f32 %v1192_v7, %v154_v19  ;;  %v226_v31 = vadd.f32 %v1192_v7, %v155_v22  ;;  %v227_v32 = vadd.f32 %v1192_v7, %v156_v23 }
   0x8   :  { %v284_v29 = vmax.f32 %v220_v20, 0.0  ;;  %v285_v30 = vmax.f32 %v221_v21, 0.0  ;;  %v286_v34 = vmax.f32 %v222_v24, 0.0  ;;  %v287_v35 = vmax.f32 %v223_v25, 0.0  ;;  %v1100_v25 = vld [vmem:[%s1502_s0 + $0x58] sm:$0xff]  }
   0x9   :  { %v288_v36 = vmax.f32 %v224_v26, 0.0  ;;  %v289_v37 = vmax.f32 %v225_v27, 0.0  ;;  %v290_v40 = vmax.f32 %v226_v31, 0.0  ;;  %v291_v41 = vmax.f32 %v227_v32, 0.0 }
   0xa   :  { %v933_v39 = vpack.c.bf16 %v285_v30, %v284_v29  ;;  %v820_v42 = vunpack.c.l.bf16 %v1093_v28  ;;  %v938_v44 = vpack.c.bf16 %v287_v35, %v286_v34  ;;  %v821_v46 = vunpack.c.h.bf16 %v1093_v28 }
   0xb   :  { %v943_v45 = vpack.c.bf16 %v289_v37, %v288_v36  ;;  %v824_v47 = vunpack.c.l.bf16 %v1094_v33  ;;  %v948_v48 = vpack.c.bf16 %v291_v41, %v290_v40  ;;  %v825_v50 = vunpack.c.h.bf16 %v1094_v33 }
   0xc   :  { %934 = vst [vmem:[%s1505_s3] sm:$0xff] %v933_v39   ;;  %v157_v49 = vmul.f32 %v820_v42, %v1178_v1  ;;  %v828_v51 = vunpack.c.l.bf16 %v1095_v38  ;;  %1121 = vst [vmem:[%s1505_s3 + $0x8] sm:$0xff] %v938_v44   ;;  %v158_v52 = vmul.f32 %v821_v46, %v1178_v1  ;;  %v829_v54 = vunpack.c.h.bf16 %v1095_v38  ;;  %v1101_v38 = vld [vmem:[%s1502_s0 + $0x60] sm:$0xff]  }
   0xd   :  { %1122 = vst [vmem:[%s1505_s3 + $0x10] sm:$0xff] %v943_v45   ;;  %v159_v53 = vmul.f32 %v824_v47, %v1178_v1  ;;  %v832_v55 = vunpack.c.l.bf16 %v1096_v43  ;;  %1123 = vst [vmem:[%s1505_s3 + $0x18] sm:$0xff] %v948_v48   ;;  %v160_v57 = vmul.f32 %v825_v50, %v1178_v1  ;;  %v833_v59 = vunpack.c.h.bf16 %v1096_v43 }
   0xe   :  { %v228_v56 = vadd.f32 %v1192_v7, %v157_v49  ;;  %v161_v58 = vmul.f32 %v828_v51, %v1178_v1  ;;  %v229_v60 = vadd.f32 %v1192_v7, %v158_v52  ;;  %v162_v62 = vmul.f32 %v829_v54, %v1178_v1  ;;  %v1102_v51 = vld [vmem:[%s1502_s0 + $0x68] sm:$0xff]  }
   0xf   :  { %v230_v61 = vadd.f32 %v1192_v7, %v159_v53  ;;  %v163_v63 = vmul.f32 %v832_v55, %v1178_v1  ;;  %v231_v3 = vadd.f32 %v1192_v7, %v160_v57  ;;  %v164_v5 = vmul.f32 %v833_v59, %v1178_v1 }
  0x10   :  { %v292_v2 = vmax.f32 %v228_v56, 0.0  ;;  %v232_v4 = vadd.f32 %v1192_v7, %v161_v58  ;;  %v293_v6 = vmax.f32 %v229_v60, 0.0  ;;  %v233_v9 = vadd.f32 %v1192_v7, %v162_v62  ;;  %v1103_v60 = vld [vmem:[%s1502_s0 + $0x70] sm:$0xff]  }
  0x11   :  { %v294_v8 = vmax.f32 %v230_v61, 0.0  ;;  %v234_v10 = vadd.f32 %v1192_v7, %v163_v63  ;;  %v295_v12 = vmax.f32 %v231_v3, 0.0  ;;  %v235_v14 = vadd.f32 %v1192_v7, %v164_v5 }
  0x12   :  { %v296_v13 = vmax.f32 %v232_v4, 0.0  ;;  %v836_v15 = vunpack.c.l.bf16 %v1097_v0  ;;  %v953_v17 = vpack.c.bf16 %v293_v6, %v292_v2  ;;  %v297_v18 = vmax.f32 %v233_v9, 0.0  ;;  %v1104_v2 = vld [vmem:[%s1502_s0 + $0x78] sm:$0xff]  }
  0x13   :  { %v298_v19 = vmax.f32 %v234_v10, 0.0  ;;  %v837_v20 = vunpack.c.h.bf16 %v1097_v0  ;;  %v958_v21 = vpack.c.bf16 %v295_v12, %v294_v8  ;;  %v299_v22 = vmax.f32 %v235_v14, 0.0  ;;  %v1105_v12 = vld [vmem:[%s1502_s0 + $0x80] sm:$0xff]  }
  0x14   :  { %v165_v23 = vmul.f32 %v836_v15, %v1178_v1  ;;  %v840_v24 = vunpack.c.l.bf16 %v1098_v11  ;;  %1124 = vst [vmem:[%s1505_s3 + $0x20] sm:$0xff] %v953_v17   ;;  %v963_v26 = vpack.c.bf16 %v297_v18, %v296_v13  ;;  %v841_v28 = vunpack.c.h.bf16 %v1098_v11 }
  0x15   :  { %v166_v27 = vmul.f32 %v837_v20, %v1178_v1  ;;  %v844_v29 = vunpack.c.l.bf16 %v1099_v16  ;;  %1125 = vst [vmem:[%s1505_s3 + $0x28] sm:$0xff] %v958_v21   ;;  %v968_v30 = vpack.c.bf16 %v299_v22, %v298_v19  ;;  %v845_v33 = vunpack.c.h.bf16 %v1099_v16 }
  0x16   :  { %v236_v31 = vadd.f32 %v1192_v7, %v165_v23  ;;  %v167_v32 = vmul.f32 %v840_v24, %v1178_v1  ;;  %1126 = vst [vmem:[%s1505_s3 + $0x30] sm:$0xff] %v963_v26   ;;  %v168_v35 = vmul.f32 %v841_v28, %v1178_v1  ;;  %v848_v37 = vunpack.c.l.bf16 %v1100_v25 }
  0x17   :  { %v237_v34 = vadd.f32 %v1192_v7, %v166_v27  ;;  %v169_v36 = vmul.f32 %v844_v29, %v1178_v1  ;;  %1127 = vst [vmem:[%s1505_s3 + $0x38] sm:$0xff] %v968_v30   ;;  %v170_v41 = vmul.f32 %v845_v33, %v1178_v1  ;;  %v849_v42 = vunpack.c.h.bf16 %v1100_v25  ;;  %v1106_v29 = vld [vmem:[%s1502_s0 + $0x88] sm:$0xff]  }
  0x18   :  { %v300_v39 = vmax.f32 %v236_v31, 0.0  ;;  %v238_v40 = vadd.f32 %v1192_v7, %v167_v32  ;;  %v239_v44 = vadd.f32 %v1192_v7, %v168_v35  ;;  %v171_v46 = vmul.f32 %v848_v37, %v1178_v1 }
  0x19   :  { %v301_v43 = vmax.f32 %v237_v34, 0.0  ;;  %v240_v45 = vadd.f32 %v1192_v7, %v169_v36  ;;  %v241_v48 = vadd.f32 %v1192_v7, %v170_v41  ;;  %v172_v49 = vmul.f32 %v849_v42, %v1178_v1  ;;  %v1107_v34 = vld [vmem:[%s1502_s0 + $0x90] sm:$0xff]  }
  0x1a   :  { %v302_v47 = vmax.f32 %v238_v40, 0.0  ;;  %v852_v50 = vunpack.c.l.bf16 %v1101_v38  ;;  %v303_v53 = vmax.f32 %v239_v44, 0.0  ;;  %v242_v55 = vadd.f32 %v1192_v7, %v171_v46 }
  0x1b   :  { %v973_v52 = vpack.c.bf16 %v301_v43, %v300_v39  ;;  %v304_v54 = vmax.f32 %v240_v45, 0.0  ;;  %v305_v56 = vmax.f32 %v241_v48, 0.0  ;;  %v243_v57 = vadd.f32 %v1192_v7, %v172_v49  ;;  %v1108_v43 = vld [vmem:[%s1502_s0 + $0x98] sm:$0xff]  }
  0x1c   :  { %v853_v58 = vunpack.c.h.bf16 %v1101_v38  ;;  %v173_v59 = vmul.f32 %v852_v50, %v1178_v1  ;;  %v978_v61 = vpack.c.bf16 %v303_v53, %v302_v47  ;;  %v306_v62 = vmax.f32 %v242_v55, 0.0 }
  0x1d   :  { %1128 = vst [vmem:[%s1505_s3 + $0x40] sm:$0xff] %v973_v52   ;;  %v856_v63 = vunpack.c.l.bf16 %v1102_v51  ;;  %v857_v0 = vunpack.c.h.bf16 %v1102_v51  ;;  %v983_v3 = vpack.c.bf16 %v305_v56, %v304_v54  ;;  %v307_v4 = vmax.f32 %v243_v57, 0.0  ;;  %v1109_v56 = vld [vmem:[%s1502_s0 + $0xa0] sm:$0xff]  }
  0x1e   :  { %v174_v5 = vmul.f32 %v853_v58, %v1178_v1  ;;  %v244_v6 = vadd.f32 %v1192_v7, %v173_v59  ;;  %1129 = vst [vmem:[%s1505_s3 + $0x48] sm:$0xff] %v978_v61   ;;  %v860_v10 = vunpack.c.l.bf16 %v1103_v60  ;;  %v861_v11 = vunpack.c.h.bf16 %v1103_v60 }
  0x1f   :  { %v175_v8 = vmul.f32 %v856_v63, %v1178_v1  ;;  %v176_v9 = vmul.f32 %v857_v0, %v1178_v1  ;;  %1130 = vst [vmem:[%s1505_s3 + $0x50] sm:$0xff] %v983_v3   ;;  %v988_v13 = vpack.c.bf16 %v307_v4, %v306_v62  ;;  %v864_v16 = vunpack.c.l.bf16 %v1104_v2 }
  0x20   :  { %v245_v14 = vadd.f32 %v1192_v7, %v174_v5  ;;  %v308_v15 = vmax.f32 %v244_v6, 0.0  ;;  %v177_v19 = vmul.f32 %v860_v10, %v1178_v1  ;;  %v178_v20 = vmul.f32 %v861_v11, %v1178_v1 }
  0x21   :  { %v246_v17 = vadd.f32 %v1192_v7, %v175_v8  ;;  %v247_v18 = vadd.f32 %v1192_v7, %v176_v9  ;;  %1131 = vst [vmem:[%s1505_s3 + $0x58] sm:$0xff] %v988_v13   ;;  %v865_v22 = vunpack.c.h.bf16 %v1104_v2  ;;  %v179_v23 = vmul.f32 %v864_v16, %v1178_v1  ;;  %v1110_v2 = vld [vmem:[%s1502_s0 + $0xa8] sm:$0xff]   ;;  %v1111_v16 = vld [vmem:[%s1502_s0 + $0xb0] sm:$0xff]  }
  0x22   :  { %v309_v21 = vmax.f32 %v245_v14, 0.0  ;;  %v868_v24 = vunpack.c.l.bf16 %v1105_v12  ;;  %v248_v27 = vadd.f32 %v1192_v7, %v177_v19  ;;  %v249_v28 = vadd.f32 %v1192_v7, %v178_v20 }
  0x23   :  { %v310_v25 = vmax.f32 %v246_v17, 0.0  ;;  %v311_v26 = vmax.f32 %v247_v18, 0.0  ;;  %v180_v31 = vmul.f32 %v865_v22, %v1178_v1  ;;  %v250_v32 = vadd.f32 %v1192_v7, %v179_v23 }
  0x24   :  { %v993_v30 = vpack.c.bf16 %v309_v21, %v308_v15  ;;  %v869_v33 = vunpack.c.h.bf16 %v1105_v12  ;;  %v312_v36 = vmax.f32 %v248_v27, 0.0  ;;  %v313_v37 = vmax.f32 %v249_v28, 0.0  ;;  %v1112_v21 = vld [vmem:[%s1502_s0 + $0xb8] sm:$0xff]  }
  0x25   :  { %v998_v35 = vpack.c.bf16 %v311_v26, %v310_v25  ;;  %v181_v38 = vmul.f32 %v868_v24, %v1178_v1  ;;  %v251_v39 = vadd.f32 %v1192_v7, %v180_v31  ;;  %v314_v40 = vmax.f32 %v250_v32, 0.0 }
  0x26   :  { %1132 = vst [vmem:[%s1505_s3 + $0x60] sm:$0xff] %v993_v30   ;;  %v182_v41 = vmul.f32 %v869_v33, %v1178_v1  ;;  %v872_v42 = vunpack.c.l.bf16 %v1106_v29  ;;  %v1003_v44 = vpack.c.bf16 %v313_v37, %v312_v36  ;;  %v873_v46 = vunpack.c.h.bf16 %v1106_v29 }
  0x27   :  { %1133 = vst [vmem:[%s1505_s3 + $0x68] sm:$0xff] %v998_v35   ;;  %v252_v45 = vadd.f32 %v1192_v7, %v181_v38  ;;  %v876_v47 = vunpack.c.l.bf16 %v1107_v34  ;;  %v315_v48 = vmax.f32 %v251_v39, 0.0  ;;  %v877_v51 = vunpack.c.h.bf16 %v1107_v34  ;;  %v1113_v34 = vld [vmem:[%s1502_s0 + $0xc0] sm:$0xff]  }
  0x28   :  { %v253_v49 = vadd.f32 %v1192_v7, %v182_v41  ;;  %v183_v50 = vmul.f32 %v872_v42, %v1178_v1  ;;  %1134 = vst [vmem:[%s1505_s3 + $0x70] sm:$0xff] %v1003_v44   ;;  %v184_v53 = vmul.f32 %v873_v46, %v1178_v1  ;;  %v880_v55 = vunpack.c.l.bf16 %v1108_v43 }
  0x29   :  { %v316_v52 = vmax.f32 %v252_v45, 0.0  ;;  %v185_v54 = vmul.f32 %v876_v47, %v1178_v1  ;;  %v1008_v57 = vpack.c.bf16 %v315_v48, %v314_v40  ;;  %v186_v60 = vmul.f32 %v877_v51, %v1178_v1  ;;  %v1114_v47 = vld [vmem:[%s1502_s0 + $0xc8] sm:$0xff]  }
  0x2a   :  { %v317_v58 = vmax.f32 %v253_v49, 0.0  ;;  %v254_v59 = vadd.f32 %v1192_v7, %v183_v50  ;;  %v255_v61 = vadd.f32 %v1192_v7, %v184_v53  ;;  %v881_v63 = vunpack.c.h.bf16 %v1108_v43 }
  0x2b   :  { %v256_v62 = vadd.f32 %v1192_v7, %v185_v54  ;;  %v187_v0 = vmul.f32 %v880_v55, %v1178_v1  ;;  %1135 = vst [vmem:[%s1505_s3 + $0x78] sm:$0xff] %v1008_v57   ;;  %v257_v5 = vadd.f32 %v1192_v7, %v186_v60  ;;  %v884_v6 = vunpack.c.l.bf16 %v1109_v56 }
  0x2c   :  { %v1013_v3 = vpack.c.bf16 %v317_v58, %v316_v52  ;;  %v318_v4 = vmax.f32 %v254_v59, 0.0  ;;  %v319_v8 = vmax.f32 %v255_v61, 0.0  ;;  %v188_v10 = vmul.f32 %v881_v63, %v1178_v1  ;;  %v1115_v52 = vld [vmem:[%s1502_s0 + $0xd0] sm:$0xff]   ;;  %v1116_v61 = vld [vmem:[%s1502_s0 + $0xd8] sm:$0xff]  }
  0x2d   :  { %v320_v9 = vmax.f32 %v256_v62, 0.0  ;;  %v258_v11 = vadd.f32 %v1192_v7, %v187_v0  ;;  %v321_v12 = vmax.f32 %v257_v5, 0.0  ;;  %v885_v13 = vunpack.c.h.bf16 %v1109_v56 }
  0x2e   :  { %1136 = vst [vmem:[%s1505_s3 + $0x80] sm:$0xff] %v1013_v3   ;;  %v189_v14 = vmul.f32 %v884_v6, %v1178_v1  ;;  %v888_v15 = vunpack.c.l.bf16 %v1110_v2  ;;  %v1018_v17 = vpack.c.bf16 %v319_v8, %v318_v4  ;;  %v259_v18 = vadd.f32 %v1192_v7, %v188_v10 }
  0x2f   :  { %v322_v19 = vmax.f32 %v258_v11, 0.0  ;;  %v889_v20 = vunpack.c.h.bf16 %v1110_v2  ;;  %v1023_v22 = vpack.c.bf16 %v321_v12, %v320_v9  ;;  %v190_v23 = vmul.f32 %v885_v13, %v1178_v1  ;;  %v1117_v12 = vld [vmem:[%s1502_s0 + $0xe0] sm:$0xff]  }
  0x30   :  { %v260_v24 = vadd.f32 %v1192_v7, %v189_v14  ;;  %v191_v25 = vmul.f32 %v888_v15, %v1178_v1  ;;  %1137 = vst [vmem:[%s1505_s3 + $0x88] sm:$0xff] %v1018_v17   ;;  %v323_v26 = vmax.f32 %v259_v18, 0.0  ;;  %v892_v28 = vunpack.c.l.bf16 %v1111_v16 }
  0x31   :  { %v192_v27 = vmul.f32 %v889_v20, %v1178_v1  ;;  %v893_v29 = vunpack.c.h.bf16 %v1111_v16  ;;  %1138 = vst [vmem:[%s1505_s3 + $0x90] sm:$0xff] %v1023_v22   ;;  %v261_v30 = vadd.f32 %v1192_v7, %v190_v23  ;;  %v896_v33 = vunpack.c.l.bf16 %v1112_v21 }
  0x32   :  { %v324_v31 = vmax.f32 %v260_v24, 0.0  ;;  %v262_v32 = vadd.f32 %v1192_v7, %v191_v25  ;;  %v1028_v35 = vpack.c.bf16 %v323_v26, %v322_v19  ;;  %v193_v37 = vmul.f32 %v892_v28, %v1178_v1 }
  0x33   :  { %v263_v36 = vadd.f32 %v1192_v7, %v192_v27  ;;  %v194_v38 = vmul.f32 %v893_v29, %v1178_v1  ;;  %v325_v39 = vmax.f32 %v261_v30, 0.0  ;;  %v897_v41 = vunpack.c.h.bf16 %v1112_v21  ;;  %v1118_v21 = vld [vmem:[%s1502_s0 + $0xe8] sm:$0xff]  }
  0x34   :  { %v326_v40 = vmax.f32 %v262_v32, 0.0  ;;  %v195_v42 = vmul.f32 %v896_v33, %v1178_v1  ;;  %1139 = vst [vmem:[%s1505_s3 + $0x98] sm:$0xff] %v1028_v35   ;;  %v264_v44 = vadd.f32 %v1192_v7, %v193_v37  ;;  %v900_v46 = vunpack.c.l.bf16 %v1113_v34 }
  0x35   :  { %v327_v43 = vmax.f32 %v263_v36, 0.0  ;;  %v265_v45 = vadd.f32 %v1192_v7, %v194_v38  ;;  %v1033_v48 = vpack.c.bf16 %v325_v39, %v324_v31  ;;  %v196_v49 = vmul.f32 %v897_v41, %v1178_v1  ;;  %v1120_v39 = vld [vmem:[%s1502_s0 + $0xf8] sm:$0xff]  }
  0x36   :  { %v266_v50 = vadd.f32 %v1192_v7, %v195_v42  ;;  %v901_v51 = vunpack.c.h.bf16 %v1113_v34  ;;  %v328_v54 = vmax.f32 %v264_v44, 0.0  ;;  %v197_v56 = vmul.f32 %v900_v46, %v1178_v1  ;;  %v1119_v34 = vld [vmem:[%s1502_s0 + $0xf0] sm:$0xff]  }
  0x37   :  { %v1038_v53 = vpack.c.bf16 %v327_v43, %v326_v40  ;;  %v329_v55 = vmax.f32 %v265_v45, 0.0  ;;  %1140 = vst [vmem:[%s1505_s3 + $0xa0] sm:$0xff] %v1033_v48   ;;  %v267_v57 = vadd.f32 %v1192_v7, %v196_v49  ;;  %v904_v60 = vunpack.c.l.bf16 %v1114_v47 }
  0x38   :  { %v330_v58 = vmax.f32 %v266_v50, 0.0  ;;  %v198_v59 = vmul.f32 %v901_v51, %v1178_v1  ;;  %v268_v63 = vadd.f32 %v1192_v7, %v197_v56  ;;  %v905_v0 = vunpack.c.h.bf16 %v1114_v47 }
  0x39   :  { %1141 = vst [vmem:[%s1505_s3 + $0xa8] sm:$0xff] %v1038_v53   ;;  %v1043_v62 = vpack.c.bf16 %v329_v55, %v328_v54  ;;  %v908_v2 = vunpack.c.l.bf16 %v1115_v52  ;;  %v331_v3 = vmax.f32 %v267_v57, 0.0  ;;  %v199_v5 = vmul.f32 %v904_v60, %v1178_v1 }
  0x3a   :  { %v269_v4 = vadd.f32 %v1192_v7, %v198_v59  ;;  %v909_v6 = vunpack.c.h.bf16 %v1115_v52  ;;  %v332_v8 = vmax.f32 %v268_v63, 0.0  ;;  %v200_v9 = vmul.f32 %v905_v0, %v1178_v1 }
  0x3b   :  { %1142 = vst [vmem:[%s1505_s3 + $0xb0] sm:$0xff] %v1043_v62   ;;  %v201_v10 = vmul.f32 %v908_v2, %v1178_v1  ;;  %v912_v11 = vunpack.c.l.bf16 %v1116_v61  ;;  %v1048_v13 = vpack.c.bf16 %v331_v3, %v330_v58  ;;  %v270_v15 = vadd.f32 %v1192_v7, %v199_v5 }
  0x3c   :  { %v333_v14 = vmax.f32 %v269_v4, 0.0  ;;  %v202_v16 = vmul.f32 %v909_v6, %v1178_v1  ;;  %v271_v17 = vadd.f32 %v1192_v7, %v200_v9  ;;  %v913_v19 = vunpack.c.h.bf16 %v1116_v61 }
  0x3d   :  { %v272_v18 = vadd.f32 %v1192_v7, %v201_v10  ;;  %v203_v20 = vmul.f32 %v912_v11, %v1178_v1  ;;  %1143 = vst [vmem:[%s1505_s3 + $0xb8] sm:$0xff] %v1048_v13   ;;  %v334_v23 = vmax.f32 %v270_v15, 0.0  ;;  %v916_v25 = vunpack.c.l.bf16 %v1117_v12 }
  0x3e   :  { %v1053_v22 = vpack.c.bf16 %v333_v14, %v332_v8  ;;  %v273_v24 = vadd.f32 %v1192_v7, %v202_v16  ;;  %v335_v26 = vmax.f32 %v271_v17, 0.0  ;;  %v204_v28 = vmul.f32 %v913_v19, %v1178_v1 }
  0x3f   :  { %v336_v27 = vmax.f32 %v272_v18, 0.0  ;;  %v274_v29 = vadd.f32 %v1192_v7, %v203_v20  ;;  %v917_v31 = vunpack.c.h.bf16 %v1117_v12  ;;  %v205_v32 = vmul.f32 %v916_v25, %v1178_v1 }
  0x40   :  { %1144 = vst [vmem:[%s1505_s3 + $0xc0] sm:$0xff] %v1053_v22   ;;  %v337_v30 = vmax.f32 %v273_v24, 0.0  ;;  %v920_v33 = vunpack.c.l.bf16 %v1118_v21  ;;  %v1058_v35 = vpack.c.bf16 %v335_v26, %v334_v23  ;;  %v275_v36 = vadd.f32 %v1192_v7, %v204_v28 }
  0x41   :  { %v338_v37 = vmax.f32 %v274_v29, 0.0  ;;  %v921_v38 = vunpack.c.h.bf16 %v1118_v21  ;;  %v206_v41 = vmul.f32 %v917_v31, %v1178_v1  ;;  %v276_v42 = vadd.f32 %v1192_v7, %v205_v32 }
  0x42   :  { %v1063_v40 = vpack.c.bf16 %v337_v30, %v336_v27  ;;  %v207_v43 = vmul.f32 %v920_v33, %v1178_v1  ;;  %1145 = vst [vmem:[%s1505_s3 + $0xc8] sm:$0xff] %v1058_v35   ;;  %v339_v44 = vmax.f32 %v275_v36, 0.0  ;;  %v924_v46 = vunpack.c.l.bf16 %v1119_v34 }
  0x43   :  { %v208_v45 = vmul.f32 %v921_v38, %v1178_v1  ;;  %v925_v47 = vunpack.c.h.bf16 %v1119_v34  ;;  %v277_v48 = vadd.f32 %v1192_v7, %v206_v41  ;;  %v340_v49 = vmax.f32 %v276_v42, 0.0 }
  0x44   :  { %1146 = vst [vmem:[%s1505_s3 + $0xd0] sm:$0xff] %v1063_v40   ;;  %v278_v50 = vadd.f32 %v1192_v7, %v207_v43  ;;  %v928_v51 = vunpack.c.l.bf16 %v1120_v39  ;;  %v1068_v52 = vpack.c.bf16 %v339_v44, %v338_v37  ;;  %v209_v54 = vmul.f32 %v924_v46, %v1178_v1 }
  0x45   :  { %v279_v53 = vadd.f32 %v1192_v7, %v208_v45  ;;  %v210_v55 = vmul.f32 %v925_v47, %v1178_v1  ;;  %v341_v56 = vmax.f32 %v277_v48, 0.0  ;;  %v929_v58 = vunpack.c.h.bf16 %v1120_v39 }
  0x46   :  { %v342_v57 = vmax.f32 %v278_v50, 0.0  ;;  %v211_v59 = vmul.f32 %v928_v51, %v1178_v1  ;;  %1147 = vst [vmem:[%s1505_s3 + $0xd8] sm:$0xff] %v1068_v52   ;;  %v280_v61 = vadd.f32 %v1192_v7, %v209_v54 }
  0x47   :  { %v343_v60 = vmax.f32 %v279_v53, 0.0  ;;  %v281_v62 = vadd.f32 %v1192_v7, %v210_v55  ;;  %v1073_v63 = vpack.c.bf16 %v341_v56, %v340_v49  ;;  %v212_v0 = vmul.f32 %v929_v58, %v1178_v1 }
  0x48   :  { %v282_v2 = vadd.f32 %v1192_v7, %v211_v59  ;;  %v344_v4 = vmax.f32 %v280_v61, 0.0 }
  0x49   :  { %v1078_v3 = vpack.c.bf16 %v343_v60, %v342_v57  ;;  %v345_v5 = vmax.f32 %v281_v62, 0.0  ;;  %1148 = vst [vmem:[%s1505_s3 + $0xe0] sm:$0xff] %v1073_v63   ;;  %v283_v6 = vadd.f32 %v1192_v7, %v212_v0 }
  0x4a   :  { %v346_v8 = vmax.f32 %v282_v2, 0.0 }
  0x4b   :  { %1149 = vst [vmem:[%s1505_s3 + $0xe8] sm:$0xff] %v1078_v3   ;;  %v1083_v9 = vpack.c.bf16 %v345_v5, %v344_v4  ;;  %v347_v10 = vmax.f32 %v283_v6, 0.0 }
  0x4d   :  { %1150 = vst [vmem:[%s1505_s3 + $0xf0] sm:$0xff] %v1083_v9   ;;  %v1088_v1 = vpack.c.bf16 %v347_v10, %v346_v8 }
  0x4f   :  { %1151 = vst [vmem:[%s1505_s3 + $0xf8] sm:$0xff] %v1088_v1  }

// kernel: generator_forward.9
= control target key start
LH: loop header
LB: loop body
LE: loop exit
PB: predicated region body
PF: predicated region fallthrough
CT: control target
= control target key end

     0   :  { %v1517_v3 = vmov 0   ;;  %vm160_vm0 = vcmask 130048   ;;  %v1518_v35 = vmov 1983009808   ;;  %v1336_v37 = vlaneseq  ;;  %s2057_s1 = inlined_call_operand.vmem [shape: bf16[1,16,2048], index: 1, kind: input, shape index: {}]   ;;  %s2058_s0 = inlined_call_operand.vmem [shape: bf16[1,32,16], index: 0, kind: input, shape index: {}]   ;;  %s2059_s2 = inlined_call_operand.vmem [shape: bf16[1,32,2048], index: 2, kind: output, shape index: {0}]   ;;  %s2060_s3 = inlined_call_operand.vmem [shape: f32[1,2,2048], index: 3, kind: output, shape index: {1}]  }
   0x1   :  { %v54_v0 = vld [vmem:[%s2057_s1] sm:$0xff]  ;;  %v55_v2 = vld [vmem:[%s2057_s1 + $0x8] sm:$0xff]  ;;  %199 = vmatprep.mubr.bf16.mxu0 %v1517_v3  ;;  %252 = vmatprep.mubr.bf16.mxu1 %v1517_v3  ;;  %v56_v10 = vld [vmem:[%s2057_s1 + $0x10] sm:$0xff]  ;;  %v1334_v36 = vunpack.c.l.s4 %v1518_v35  ;;  %vm1298_vm1 = vcmask 1040384  }
   0x2   :  { %v62_v1 = vld [vmem:[%s2057_s1 + $0x40] sm:$0xff]  ;;  %v63_v5 = vld [vmem:[%s2057_s1 + $0x48] sm:$0xff]  ;;  %v64_v11 = vld [vmem:[%s2057_s1 + $0x50] sm:$0xff]  ;;  %v1337_v47 = vshrl.u32 %v1336_v37, 7 }
   0x3   :  { %v1418_v4 = vcombine.high %v54_v0, %v62_v1  ;;  %v1417_v6 = vcombine.low %v54_v0, %v62_v1  ;;  %v1420_v7 = vcombine.high %v55_v2, %v63_v5  ;;  %v1419_v8 = vcombine.low %v55_v2, %v63_v5  ;;  %v1556_v9 = vld [vmem:[%s2058_s0] sm:$0xff]   ;;  %v57_v13 = vld [vmem:[%s2057_s1 + $0x18] sm:$0xff]  ;;  %v59_v20 = vld [vmem:[%s2057_s1 + $0x28] sm:$0xff] }
   0x4   :  { %v1422_v12 = vcombine.high %v56_v10, %v64_v11  ;;  %v65_v14 = vld [vmem:[%s2057_s1 + $0x58] sm:$0xff]  ;;  %v1421_v15 = vcombine.low %v56_v10, %v64_v11  ;;  %v58_v17 = vld [vmem:[%s2057_s1 + $0x20] sm:$0xff]  ;;  %v67_v21 = vld [vmem:[%s2057_s1 + $0x68] sm:$0xff]  ;;  %v1335_v41 = vunpack.c.0.s8 %v1334_v36 }
   0x5   :  { %167 = vmatprep.subr.bf16.mxu0 %v1418_v4  ;;  %220 = vmatprep.subr.bf16.mxu1 %v1420_v7  ;;  %v1424_v16 = vcombine.high %v57_v13, %v65_v14  ;;  %v1423_v18 = vcombine.low %v57_v13, %v65_v14  ;;  %v66_v19 = vld [vmem:[%s2057_s1 + $0x60] sm:$0xff]  ;;  %v1428_v23 = vcombine.high %v59_v20, %v67_v21  ;;  %v1516_v24 = vld [vmem:[%s2058_s0 + $0x8] sm:$0xff]   ;;  %v60_v25 = vld [vmem:[%s2057_s1 + $0x30] sm:$0xff] }
   0x6   :  { %168 = vmatpush1.bf16.msra.mxu0 %v1417_v6  ;;  %221 = vmatpush1.bf16.msra.mxu1 %v1419_v8  ;;  %v1426_v22 = vcombine.high %v58_v17, %v66_v19  ;;  %v68_v26 = vld [vmem:[%s2057_s1 + $0x70] sm:$0xff]  ;;  %v1425_v27 = vcombine.low %v58_v17, %v66_v19  ;;  %v61_v28 = vld [vmem:[%s2057_s1 + $0x38] sm:$0xff]  ;;  %v1427_v30 = vcombine.low %v59_v20, %v67_v21 }
   0x7   :  { %273 = vmatprep.subr.bf16.mxu0 %v1422_v12  ;;  %326 = vmatprep.subr.bf16.mxu1 %v1424_v16  ;;  %v69_v29 = vld [vmem:[%s2057_s1 + $0x78] sm:$0xff]  ;;  %v1430_v31 = vcombine.high %v60_v25, %v68_v26  ;;  %v1429_v33 = vcombine.low %v60_v25, %v68_v26 }
   0x8   :  { %v1432_v32 = vcombine.high %v61_v28, %v69_v29  ;;  %v1431_v34 = vcombine.low %v61_v28, %v69_v29 }
   0x9   :  { %1433 = vmatmul.mubr.msk.bf16.vlgmr.msra.gmra.mrb[0].mxu0 %vm160_vm0, %v1556_v9  ;;  %1435 = vmatmul.mubr.msk.bf16.vlgmr.msra.gmra.mrb[0].mxu1 %vm160_vm0, %v1556_v9 }
   0xa   :  { %274 = vmatpush1.bf16.msra.mxu0 %v1421_v15  ;;  %327 = vmatpush1.bf16.msra.mxu1 %v1423_v18 }
   0xb   :  { %209 = vmatprep.mubr.bf16.mxu0 %v1517_v3  ;;  %262 = vmatprep.mubr.bf16.mxu1 %v1517_v3 }
   0xc   :  { %379 = vmatprep.subr.bf16.mxu0 %v1426_v22  ;;  %432 = vmatprep.subr.bf16.mxu1 %v1428_v23 }
  0x11   :  { %1434 = vmatmul.mubr.msk.bf16.gmra.mrb[4].mxu0 %vm160_vm0, %v1516_v24  ;;  %1436 = vmatmul.mubr.msk.bf16.gmra.mrb[4].mxu1 %vm160_vm0, %v1516_v24 }
  0x12   :  { %305 = vmatprep.mubr.bf16.mxu0 %v1517_v3  ;;  %358 = vmatprep.mubr.bf16.mxu1 %v1517_v3 }
  0x19   :  { %1437 = vmatmul.mubr.msk.bf16.vlgmr.msra.gmra.mrb[8].mxu0 %vm160_vm0, %v1556_v9  ;;  %1439 = vmatmul.mubr.msk.bf16.vlgmr.msra.gmra.mrb[8].mxu1 %vm160_vm0, %v1556_v9 }
  0x1a   :  { %380 = vmatpush1.bf16.msra.mxu0 %v1425_v27  ;;  %433 = vmatpush1.bf16.msra.mxu1 %v1427_v30 }
  0x1b   :  { %315 = vmatprep.mubr.bf16.mxu0 %v1517_v3  ;;  %368 = vmatprep.mubr.bf16.mxu1 %v1517_v3 }
  0x1c   :  { %485 = vmatprep.subr.bf16.mxu0 %v1430_v31  ;;  %538 = vmatprep.subr.bf16.mxu1 %v1432_v32 }
  0x21   :  { %1438 = vmatmul.mubr.msk.bf16.gmra.mrb[12].mxu0 %vm160_vm0, %v1516_v24  ;;  %1440 = vmatmul.mubr.msk.bf16.gmra.mrb[12].mxu1 %vm160_vm0, %v1516_v24 }
  0x22   :  { %411 = vmatprep.mubr.bf16.mxu0 %v1517_v3  ;;  %464 = vmatprep.mubr.bf16.mxu1 %v1517_v3 }
  0x29   :  { %1441 = vmatmul.mubr.msk.bf16.vlgmr.msra.gmra.mrb[16].mxu0 %vm160_vm0, %v1556_v9  ;;  %1443 = vmatmul.mubr.msk.bf16.vlgmr.msra.gmra.mrb[16].mxu1 %vm160_vm0, %v1556_v9 }
  0x2a   :  { %486 = vmatpush1.bf16.msra.mxu0 %v1429_v33  ;;  %539 = vmatpush1.bf16.msra.mxu1 %v1431_v34 }
  0x2b   :  { %421 = vmatprep.mubr.bf16.mxu0 %v1517_v3  ;;  %474 = vmatprep.mubr.bf16.mxu1 %v1517_v3 }
  0x31   :  { %1442 = vmatmul.mubr.msk.bf16.gmra.mrb[20].mxu0 %vm160_vm0, %v1516_v24  ;;  %1444 = vmatmul.mubr.msk.bf16.gmra.mrb[20].mxu1 %vm160_vm0, %v1516_v24 }
  0x32   :  { %517 = vmatprep.mubr.bf16.mxu0 %v1517_v3  ;;  %570 = vmatprep.mubr.bf16.mxu1 %v1517_v3 }
  0x39   :  { %1445 = vmatmul.mubr.msk.bf16.vlgmr.msra.gmra.mrb[24].mxu0 %vm160_vm0, %v1556_v9  ;;  %1447 = vmatmul.mubr.msk.bf16.vlgmr.msra.gmra.mrb[24].mxu1 %vm160_vm0, %v1556_v9  ;;  %v1647_v9 = vsub.s32 %v1335_v41, %v1337_v47 }
  0x3a   :  { %527 = vmatprep.mubr.bf16.mxu0 %v1517_v3  ;;  %580 = vmatprep.mubr.bf16.mxu1 %v1517_v3 }
  0x41   :  { %1446 = vmatmul.mubr.msk.bf16.gmra.mrb[28].mxu0 %vm160_vm0, %v1516_v24  ;;  %1448 = vmatmul.mubr.msk.bf16.gmra.mrb[28].mxu1 %vm160_vm0, %v1516_v24 }
  0xdc   :  { %v201_v38 = vpop.f32.mrb[0].mxu0  ;;  %v254_v39 = vpop.f32.mrb[0].mxu1 }
  0xdd   :  { %v203_v40 = vpop.f32.mrb[1].mxu0  ;;  %v927_v42 = vmul.f32 %v201_v38, %v201_v38  ;;  %v929_v43 = vmul.f32 %v254_v39, %v254_v39  ;;  %v256_v45 = vpop.f32.mrb[1].mxu1 }
  0xde   :  { %v1481_v44 = vpack.c.bf16 %v203_v40, %v201_v38  ;;  %v205_v46 = vpop.f32.mrb[2].mxu0  ;;  %v928_v48 = vmul.f32 %v203_v40, %v203_v40  ;;  %v1482_v49 = vpack.c.bf16 %v256_v45, %v254_v39  ;;  %v258_v52 = vpop.f32.mrb[2].mxu1  ;;  %v930_v63 = vmul.f32 %v256_v45, %v256_v45 }
  0xdf   :  { %v831_v50 = vadd.f32 %v205_v46, %v201_v38  ;;  %v943_v51 = vmul.f32 %v205_v46, %v205_v46  ;;  %v207_v53 = vpop.f32.mrb[3].mxu0  ;;  %v837_v54 = vadd.f32 %v258_v52, %v254_v39  ;;  %v945_v55 = vmul.f32 %v258_v52, %v258_v52  ;;  %v260_v58 = vpop.f32.mrb[3].mxu1 }
  0xe0   :  { %783 = vst [vmem:[%s2059_s2] sm:$0xff] %v1481_v44  ;;  %v1489_v56 = vpack.c.bf16 %v207_v53, %v205_v46  ;;  %v834_v57 = vadd.f32 %v207_v53, %v203_v40  ;;  %784 = vst [vmem:[%s2059_s2 + $0x8] sm:$0xff] %v1482_v49  ;;  %v944_v60 = vmul.f32 %v207_v53, %v207_v53 }
  0xe1   :  { %v991_v59 = vadd.f32 %v943_v51, %v927_v42  ;;  %v1490_v61 = vpack.c.bf16 %v260_v58, %v258_v52  ;;  %v840_v62 = vadd.f32 %v260_v58, %v256_v45  ;;  %v997_v0 = vadd.f32 %v945_v55, %v929_v43 }
  0xe2   :  { %791 = vst [vmem:[%s2059_s2 + $0x40] sm:$0xff] %v1489_v56  ;;  %v946_v1 = vmul.f32 %v260_v58, %v260_v58  ;;  %v994_v2 = vadd.f32 %v944_v60, %v928_v48 }
  0xe3   :  { %792 = vst [vmem:[%s2059_s2 + $0x48] sm:$0xff] %v1490_v61 }
  0xe4   :  { %v1000_v3 = vadd.f32 %v946_v1, %v930_v63  ;;  %v211_v4 = vpop.f32.mrb[4].mxu0  ;;  %v264_v7 = vpop.f32.mrb[4].mxu1 }
  0xe5   :  { %v832_v5 = vadd.f32 %v831_v50, %v211_v4  ;;  %v959_v6 = vmul.f32 %v211_v4, %v211_v4  ;;  %v213_v8 = vpop.f32.mrb[5].mxu0  ;;  %v838_v10 = vadd.f32 %v837_v54, %v264_v7  ;;  %v961_v11 = vmul.f32 %v264_v7, %v264_v7  ;;  %v266_v14 = vpop.f32.mrb[5].mxu1 }
  0xe6   :  { %v1497_v12 = vpack.c.bf16 %v213_v8, %v211_v4  ;;  %v835_v13 = vadd.f32 %v834_v57, %v213_v8  ;;  %v215_v15 = vpop.f32.mrb[6].mxu0  ;;  %v960_v17 = vmul.f32 %v213_v8, %v213_v8  ;;  %v1498_v18 = vpack.c.bf16 %v266_v14, %v264_v7  ;;  %v268_v20 = vpop.f32.mrb[6].mxu1 }
  0xe7   :  { %v992_v16 = vadd.f32 %v991_v59, %v959_v6  ;;  %v841_v19 = vadd.f32 %v840_v62, %v266_v14  ;;  %v217_v21 = vpop.f32.mrb[7].mxu0  ;;  %v998_v22 = vadd.f32 %v997_v0, %v961_v11  ;;  %v962_v23 = vmul.f32 %v266_v14, %v266_v14  ;;  %v270_v26 = vpop.f32.mrb[7].mxu1 }
  0xe8   :  { %799 = vst [vmem:[%s2059_s2 + $0x80] sm:$0xff] %v1497_v12  ;;  %v833_v24 = vadd.f32 %v832_v5, %v215_v15  ;;  %v975_v25 = vmul.f32 %v215_v15, %v215_v15  ;;  %v995_v27 = vadd.f32 %v994_v2, %v960_v17  ;;  %800 = vst [vmem:[%s2059_s2 + $0x88] sm:$0xff] %v1498_v18 }
  0xe9   :  { %v839_v28 = vadd.f32 %v838_v10, %v268_v20  ;;  %v977_v29 = vmul.f32 %v268_v20, %v268_v20  ;;  %v1505_v30 = vpack.c.bf16 %v217_v21, %v215_v15  ;;  %v1001_v31 = vadd.f32 %v1000_v3, %v962_v23 }
  0xea   :  { %v993_v32 = vadd.f32 %v992_v16, %v975_v25  ;;  %v1090_v33 = vrot.slane %v833_v24, 4  ;;  %v836_v34 = vadd.f32 %v835_v13, %v217_v21  ;;  %v976_v37 = vmul.f32 %v217_v21, %v217_v21 }
  0xeb   :  { %v999_v35 = vadd.f32 %v998_v22, %v977_v29  ;;  %v1102_v36 = vrot.slane %v839_v28, 4  ;;  %807 = vst [vmem:[%s2059_s2 + $0xc0] sm:$0xff] %v1505_v30  ;;  %v1506_v38 = vpack.c.bf16 %v270_v26, %v268_v20  ;;  %v842_v42 = vadd.f32 %v841_v19, %v270_v26 }
  0xec   :  { %v1091_v39 = vadd.f32 %v1090_v33, %v833_v24  ;;  %v1202_v40 = vrot.slane %v993_v32, 4  ;;  %v1096_v41 = vrot.slane %v836_v34, 4  ;;  %v1658_v43 = vpop.f32.mrb[8].mxu0  ;;  %v996_v46 = vadd.f32 %v995_v27, %v976_v37  ;;  %v1663_v48 = vpop.f32.mrb[8].mxu1 }
  0xed   :  { %v1103_v44 = vadd.f32 %v1102_v36, %v839_v28  ;;  %v1214_v45 = vrot.slane %v999_v35, 4  ;;  %808 = vst [vmem:[%s2059_s2 + $0xc8] sm:$0xff] %v1506_v38  ;;  %v978_v47 = vmul.f32 %v270_v26, %v270_v26  ;;  %v1665_v49 = vpop.f32.mrb[9].mxu0  ;;  %v1108_v53 = vrot.slane %v842_v42, 4  ;;  %v1667_v54 = vpop.f32.mrb[9].mxu1 }
  0xee   :  { %v1092_v50 = vrot.slane %v1091_v39, 2  ;;  %v1203_v51 = vadd.f32 %v1202_v40, %v993_v32  ;;  %v1097_v52 = vadd.f32 %v1096_v41, %v836_v34  ;;  %v1669_v55 = vpop.f32.mrb[10].mxu0  ;;  %v1208_v58 = vrot.slane %v996_v46, 4  ;;  %v1671_v60 = vpop.f32.mrb[10].mxu1 }
  0xef   :  { %v1104_v56 = vrot.slane %v1103_v44, 2  ;;  %v1215_v57 = vadd.f32 %v1214_v45, %v999_v35  ;;  %v1002_v59 = vadd.f32 %v1001_v31, %v978_v47  ;;  %v1673_v61 = vpop.f32.mrb[11].mxu0  ;;  %v1109_v1 = vadd.f32 %v1108_v53, %v842_v42  ;;  %v1675_v2 = vpop.f32.mrb[11].mxu1 }
  0xf0   :  { %v1093_v62 = vadd.f32 %v1092_v50, %v1091_v39  ;;  %v1204_v63 = vrot.slane %v1203_v51, 2  ;;  %v1098_v0 = vrot.slane %v1097_v52, 2  ;;  %v1209_v5 = vadd.f32 %v1208_v58, %v996_v46 }
  0xf1   :  { %v1105_v3 = vadd.f32 %v1104_v56, %v1103_v44  ;;  %v1216_v4 = vrot.slane %v1215_v57, 2  ;;  %v1220_v6 = vrot.slane %v1002_v59, 4  ;;  %v1110_v11 = vrot.slane %v1109_v1, 2 }
  0xf2   :  { %v1094_v7 = vrot.slane %v1093_v62, 1  ;;  %v1205_v8 = vadd.f32 %v1204_v63, %v1203_v51  ;;  %v1099_v10 = vadd.f32 %v1098_v0, %v1097_v52  ;;  %v1210_v14 = vrot.slane %v1209_v5, 2 }
  0xf3   :  { %v1106_v12 = vrot.slane %v1105_v3, 1  ;;  %v1217_v13 = vadd.f32 %v1216_v4, %v1215_v57  ;;  %v1221_v15 = vadd.f32 %v1220_v6, %v1002_v59  ;;  %v1111_v19 = vadd.f32 %v1110_v11, %v1109_v1 }
  0xf4   :  { %v1095_v16 = vadd.f32 %v1094_v7, %v1093_v62  ;;  %v1206_v17 = vrot.slane %v1205_v8, 1  ;;  %v1100_v18 = vrot.slane %v1099_v10, 1  ;;  %v1677_v20 = vpop.f32.mrb[12].mxu0  ;;  %v1211_v23 = vadd.f32 %v1210_v14, %v1209_v5  ;;  %v1679_v25 = vpop.f32.mrb[12].mxu1 }
  0xf5   :  { %v1107_v21 = vadd.f32 %v1106_v12, %v1105_v3  ;;  %v1218_v22 = vrot.slane %v1217_v13, 1  ;;  %v1222_v24 = vrot.slane %v1221_v15, 2  ;;  %v1681_v26 = vpop.f32.mrb[13].mxu0  ;;  %v1112_v29 = vrot.slane %v1111_v19, 1  ;;  %v1685_v31 = vpop.f32.mrb[13].mxu1 }
  0xf6   :  { %v1207_v27 = vadd.f32 %v1206_v17, %v1205_v8  ;;  %v1101_v28 = vadd.f32 %v1100_v18, %v1099_v10  ;;  %v931_v30 = vmul.f32 %v1658_v43, %v1658_v43  ;;  %v1687_v32 = vpop.f32.mrb[14].mxu0  ;;  %v1212_v34 = vrot.slane %v1211_v23, 1  ;;  %v1691_v37 = vpop.f32.mrb[14].mxu1 }
  0xf7   :  { %v1219_v33 = vadd.f32 %v1218_v22, %v1217_v13  ;;  %v1223_v35 = vadd.f32 %v1222_v24, %v1221_v15  ;;  %v933_v36 = vmul.f32 %v1663_v48, %v1663_v48  ;;  %v1693_v38 = vpop.f32.mrb[15].mxu0  ;;  %v1113_v40 = vadd.f32 %v1112_v29, %v1111_v19  ;;  %v1700_v44 = vpop.f32.mrb[15].mxu1 }
  0xf8   :  { %v1299_v39 = vsel %vm1298_vm1, %v1095_v16, %v1207_v27  ;;  %v1483_v41 = vpack.c.bf16 %v1665_v49, %v1658_v43  ;;  %v932_v42 = vmul.f32 %v1665_v49, %v1665_v49  ;;  %v1213_v46 = vadd.f32 %v1212_v34, %v1211_v23 }
  0xf9   :  { %v1301_v45 = vsel %vm1298_vm1, %v1107_v21, %v1219_v33  ;;  %v1224_v47 = vrot.slane %v1223_v35, 1  ;;  %v1484_v50 = vpack.c.bf16 %v1667_v54, %v1663_v48  ;;  %v934_v51 = vmul.f32 %v1667_v54, %v1667_v54 }
  0xfa   :  { %785 = vst [vmem:[%s2059_s2 + $0x10] sm:$0xff] %v1483_v41  ;;  %v843_v52 = vadd.f32 %v1669_v55, %v1658_v43  ;;  %v947_v53 = vmul.f32 %v1669_v55, %v1669_v55  ;;  %v849_v56 = vadd.f32 %v1671_v60, %v1663_v48  ;;  %v1300_v57 = vsel %vm1298_vm1, %v1101_v28, %v1213_v46 }
  0xfb   :  { %v1225_v58 = vadd.f32 %v1224_v47, %v1223_v35  ;;  %786 = vst [vmem:[%s2059_s2 + $0x18] sm:$0xff] %v1484_v50  ;;  %v949_v59 = vmul.f32 %v1671_v60, %v1671_v60  ;;  %v1491_v62 = vpack.c.bf16 %v1673_v61, %v1669_v55  ;;  %v1331_v43 = vcombine.low %v1299_v39, %v1300_v57 }
  0xfc   :  { %v1003_v63 = vadd.f32 %v947_v53, %v931_v30  ;;  %v846_v0 = vadd.f32 %v1673_v61, %v1665_v49  ;;  %v948_v48 = vmul.f32 %v1673_v61, %v1673_v61  ;;  %v1728_v1 = vpop.f32.mrb[16].mxu0  ;;  %v1492_v55 = vpack.c.bf16 %v1675_v2, %v1671_v60  ;;  %v1738_v6 = vpop.f32.mrb[16].mxu1 }
  0xfd   :  { %v1302_v3 = vsel %vm1298_vm1, %v1113_v40, %v1225_v58  ;;  %v1009_v4 = vadd.f32 %v949_v59, %v933_v36  ;;  %793 = vst [vmem:[%s2059_s2 + $0x50] sm:$0xff] %v1491_v62  ;;  %v852_v5 = vadd.f32 %v1675_v2, %v1667_v54  ;;  %v1740_v49 = vpop.f32.mrb[17].mxu0  ;;  %v1339_v61 = vrot.slane %v1331_v43, %v1647_v9  ;;  %v1745_v11 = vpop.f32.mrb[17].mxu1 }
  0xfe   :  { %v1332_v7 = vcombine.low %v1301_v45, %v1302_v3  ;;  %v1006_v8 = vadd.f32 %v948_v48, %v932_v42  ;;  %v950_v10 = vmul.f32 %v1675_v2, %v1675_v2  ;;  %v1747_v12 = vpop.f32.mrb[18].mxu0  ;;  %794 = vst [vmem:[%s2059_s2 + $0x58] sm:$0xff] %v1492_v55  ;;  %v844_v54 = vadd.f32 %v843_v52, %v1677_v20  ;;  %v1758_v15 = vpop.f32.mrb[18].mxu1 }
  0xff   :  { %v963_v60 = vmul.f32 %v1677_v20, %v1677_v20  ;;  %v850_v13 = vadd.f32 %v849_v56, %v1679_v25  ;;  %v965_v14 = vmul.f32 %v1679_v25, %v1679_v25  ;;  %v1760_v2 = vpop.f32.mrb[19].mxu0  ;;  %v1499_v18 = vpack.c.bf16 %v1681_v26, %v1677_v20  ;;  %v1766_v21 = vpop.f32.mrb[19].mxu1 }
 0x100   :  { %v1346_v16 = vrot.slane %v1332_v7, %v1647_v9  ;;  %v1012_v17 = vadd.f32 %v950_v10, %v934_v51  ;;  %v847_v19 = vadd.f32 %v846_v0, %v1681_v26  ;;  %v964_v24 = vmul.f32 %v1681_v26, %v1681_v26 }
 0x101   :  { %v1004_v22 = vadd.f32 %v1003_v63, %v963_v60  ;;  %v1010_v23 = vadd.f32 %v1009_v4, %v965_v14  ;;  %v1500_v27 = vpack.c.bf16 %v1685_v31, %v1679_v25  ;;  %801 = vst [vmem:[%s2059_s2 + $0x90] sm:$0xff] %v1499_v18  ;;  %v853_v29 = vadd.f32 %v852_v5, %v1685_v31 }
 0x102   :  { %v1347_v28 = vcombine.low %v1339_v61, %v1346_v16  ;;  %v966_v20 = vmul.f32 %v1685_v31, %v1685_v31  ;;  %v845_v30 = vadd.f32 %v844_v54, %v1687_v32  ;;  %v1007_v33 = vadd.f32 %v1006_v8, %v964_v24 }
 0x103   :  { %802 = vst [vmem:[%s2059_s2 + $0x98] sm:$0xff] %v1500_v27  ;;  %v979_v25 = vmul.f32 %v1687_v32, %v1687_v32  ;;  %v851_v26 = vadd.f32 %v850_v13, %v1691_v37  ;;  %v981_v34 = vmul.f32 %v1691_v37, %v1691_v37  ;;  %v1507_v36 = vpack.c.bf16 %v1693_v38, %v1687_v32 }
 0x104   :  { %1403 = vst [vmem:[%s2060_s3] sm:$0xff] %v1347_v28  ;;  %v1013_v31 = vadd.f32 %v1012_v17, %v966_v20  ;;  %v1114_v35 = vrot.slane %v845_v30, 4  ;;  %v848_v39 = vadd.f32 %v847_v19, %v1693_v38  ;;  %v1793_v40 = vpop.f32.mrb[20].mxu0  ;;  %v980_v46 = vmul.f32 %v1693_v38, %v1693_v38  ;;  %v1797_v47 = vpop.f32.mrb[20].mxu1 }
 0x105   :  { %v1005_v41 = vadd.f32 %v1004_v22, %v979_v25  ;;  %v1011_v42 = vadd.f32 %v1010_v23, %v981_v34  ;;  %v1126_v45 = vrot.slane %v851_v26, 4  ;;  %v1799_v50 = vpop.f32.mrb[21].mxu0  ;;  %809 = vst [vmem:[%s2059_s2 + $0xd0] sm:$0xff] %v1507_v36  ;;  %v1508_v52 = vpack.c.bf16 %v1700_v44, %v1691_v37  ;;  %v1807_v56 = vpop.f32.mrb[21].mxu1 }
 0x106   :  { %v1115_v51 = vadd.f32 %v1114_v35, %v845_v30  ;;  %v1120_v32 = vrot.slane %v848_v39, 4  ;;  %v854_v53 = vadd.f32 %v853_v29, %v1700_v44  ;;  %v1809_v57 = vpop.f32.mrb[22].mxu0  ;;  %v1008_v62 = vadd.f32 %v1007_v33, %v980_v46  ;;  %v1811_v43 = vpop.f32.mrb[22].mxu1 }
 0x107   :  { %v1226_v38 = vrot.slane %v1005_v41, 4  ;;  %v1127_v58 = vadd.f32 %v1126_v45, %v851_v26  ;;  %v1238_v59 = vrot.slane %v1011_v42, 4  ;;  %v1813_v63 = vpop.f32.mrb[23].mxu0  ;;  %810 = vst [vmem:[%s2059_s2 + $0xd8] sm:$0xff] %v1508_v52  ;;  %v982_v37 = vmul.f32 %v1700_v44, %v1700_v44  ;;  %v1820_v4 = vpop.f32.mrb[23].mxu1 }
 0x108   :  { %v1116_v0 = vrot.slane %v1115_v51, 2  ;;  %v1121_v48 = vadd.f32 %v1120_v32, %v848_v39  ;;  %v1132_v3 = vrot.slane %v854_v53, 4  ;;  %v1232_v7 = vrot.slane %v1008_v62, 4 }
 0x109   :  { %v1227_v55 = vadd.f32 %v1226_v38, %v1005_v41  ;;  %v1128_v5 = vrot.slane %v1127_v58, 2  ;;  %v1239_v61 = vadd.f32 %v1238_v59, %v1011_v42  ;;  %v1014_v54 = vadd.f32 %v1013_v31, %v982_v37 }
 0x10a   :  { %v1117_v8 = vadd.f32 %v1116_v0, %v1115_v51  ;;  %v1122_v10 = vrot.slane %v1121_v48, 2  ;;  %v1133_v60 = vadd.f32 %v1132_v3, %v854_v53  ;;  %v1233_v17 = vadd.f32 %v1232_v7, %v1008_v62 }
 0x10b   :  { %v1228_v13 = vrot.slane %v1227_v55, 2  ;;  %v1129_v14 = vadd.f32 %v1128_v5, %v1127_v58  ;;  %v1240_v16 = vrot.slane %v1239_v61, 2  ;;  %v1244_v23 = vrot.slane %v1014_v54, 4 }
 0x10c   :  { %v1118_v18 = vrot.slane %v1117_v8, 1  ;;  %v1123_v19 = vadd.f32 %v1122_v10, %v1121_v48  ;;  %v1134_v22 = vrot.slane %v1133_v60, 2  ;;  %v1822_v44 = vpop.f32.mrb[24].mxu0  ;;  %v1234_v29 = vrot.slane %v1233_v17, 2  ;;  %v1824_v20 = vpop.f32.mrb[24].mxu1 }
 0x10d   :  { %v1229_v24 = vadd.f32 %v1228_v13, %v1227_v55  ;;  %v1130_v27 = vrot.slane %v1129_v14, 1  ;;  %v1241_v28 = vadd.f32 %v1240_v16, %v1239_v61  ;;  %v1826_v30 = vpop.f32.mrb[25].mxu0  ;;  %v1245_v34 = vadd.f32 %v1244_v23, %v1014_v54  ;;  %v1828_v31 = vpop.f32.mrb[25].mxu1 }
 0x10e   :  { %v1119_v33 = vadd.f32 %v1118_v18, %v1117_v8  ;;  %v1124_v25 = vrot.slane %v1123_v19, 1  ;;  %v1135_v26 = vadd.f32 %v1134_v22, %v1133_v60  ;;  %v1830_v35 = vpop.f32.mrb[26].mxu0  ;;  %v1235_v42 = vadd.f32 %v1234_v29, %v1233_v17  ;;  %v1832_v45 = vpop.f32.mrb[26].mxu1 }
 0x10f   :  { %v1230_v36 = vrot.slane %v1229_v24, 1  ;;  %v1131_v39 = vadd.f32 %v1130_v27, %v1129_v14  ;;  %v1242_v41 = vrot.slane %v1241_v28, 1  ;;  %v1834_v46 = vpop.f32.mrb[27].mxu0  ;;  %v1246_v52 = vrot.slane %v1245_v34, 2  ;;  %v1838_v38 = vpop.f32.mrb[27].mxu1 }
 0x110   :  { %v1125_v51 = vadd.f32 %v1124_v25, %v1123_v19  ;;  %v1136_v32 = vrot.slane %v1135_v26, 1  ;;  %v935_v53 = vmul.f32 %v1728_v1, %v1728_v1  ;;  %v1236_v62 = vrot.slane %v1235_v42, 1 }
 0x111   :  { %v1231_v58 = vadd.f32 %v1230_v36, %v1229_v24  ;;  %v1243_v59 = vadd.f32 %v1242_v41, %v1241_v28  ;;  %v937_v0 = vmul.f32 %v1738_v6, %v1738_v6  ;;  %v1247_v37 = vadd.f32 %v1246_v52, %v1245_v34 }
 0x112   :  { %v1137_v48 = vadd.f32 %v1136_v32, %v1135_v26  ;;  %v1485_v3 = vpack.c.bf16 %v1740_v49, %v1728_v1  ;;  %v936_v55 = vmul.f32 %v1740_v49, %v1740_v49  ;;  %v1237_v7 = vadd.f32 %v1236_v62, %v1235_v42 }
 0x113   :  { %v1303_v5 = vsel %vm1298_vm1, %v1119_v33, %v1231_v58  ;;  %v1305_v61 = vsel %vm1298_vm1, %v1131_v39, %v1243_v59  ;;  %v1486_v8 = vpack.c.bf16 %v1745_v11, %v1738_v6  ;;  %v1248_v10 = vrot.slane %v1247_v37, 1 }
 0x114   :  { %787 = vst [vmem:[%s2059_s2 + $0x20] sm:$0xff] %v1485_v3  ;;  %v938_v54 = vmul.f32 %v1745_v11, %v1745_v11  ;;  %v855_v60 = vadd.f32 %v1747_v12, %v1728_v1  ;;  %v951_v13 = vmul.f32 %v1747_v12, %v1747_v12  ;;  %v1859_v14 = vpop.f32.mrb[28].mxu0  ;;  %v1304_v16 = vsel %vm1298_vm1, %v1125_v51, %v1237_v7  ;;  %v1871_v19 = vpop.f32.mrb[28].mxu1 }
 0x115   :  { %788 = vst [vmem:[%s2059_s2 + $0x28] sm:$0xff] %v1486_v8  ;;  %v861_v17 = vadd.f32 %v1758_v15, %v1738_v6  ;;  %v953_v18 = vmul.f32 %v1758_v15, %v1758_v15  ;;  %v1493_v1 = vpack.c.bf16 %v1760_v2, %v1747_v12  ;;  %v1873_v22 = vpop.f32.mrb[29].mxu0  ;;  %v1348_v23 = vcombine.low %v1303_v5, %v1304_v16  ;;  %v1877_v29 = vpop.f32.mrb[29].mxu1 }
 0x116   :  { %v1249_v24 = vadd.f32 %v1248_v10, %v1247_v37  ;;  %v1015_v27 = vadd.f32 %v951_v13, %v935_v53  ;;  %v858_v28 = vadd.f32 %v1760_v2, %v1740_v49  ;;  %v1879_v33 = vpop.f32.mrb[30].mxu0  ;;  %v952_v12 = vmul.f32 %v1760_v2, %v1760_v2  ;;  %v1890_v34 = vpop.f32.mrb[30].mxu1 }
 0x117   :  { %v1021_v6 = vadd.f32 %v953_v18, %v937_v0  ;;  %795 = vst [vmem:[%s2059_s2 + $0x60] sm:$0xff] %v1493_v1  ;;  %v1494_v25 = vpack.c.bf16 %v1766_v21, %v1758_v15  ;;  %v864_v26 = vadd.f32 %v1766_v21, %v1745_v11  ;;  %v1892_v49 = vpop.f32.mrb[31].mxu0  ;;  %v1356_v36 = vrot.slane %v1348_v23, %v1647_v9  ;;  %v1899_v2 = vpop.f32.mrb[31].mxu1 }
 0x118   :  { %v1306_v39 = vsel %vm1298_vm1, %v1137_v48, %v1249_v24  ;;  %v954_v41 = vmul.f32 %v1766_v21, %v1766_v21  ;;  %v856_v42 = vadd.f32 %v855_v60, %v1793_v40  ;;  %v1018_v15 = vadd.f32 %v952_v12, %v936_v55 }
 0x119   :  { %v1349_v51 = vcombine.low %v1305_v61, %v1306_v39  ;;  %796 = vst [vmem:[%s2059_s2 + $0x68] sm:$0xff] %v1494_v25  ;;  %v967_v11 = vmul.f32 %v1793_v40, %v1793_v40  ;;  %v862_v32 = vadd.f32 %v861_v17, %v1797_v47  ;;  %v969_v53 = vmul.f32 %v1797_v47, %v1797_v47 }
 0x11a   :  { %v1024_v52 = vadd.f32 %v954_v41, %v938_v54  ;;  %v1501_v21 = vpack.c.bf16 %v1799_v50, %v1793_v40  ;;  %v859_v58 = vadd.f32 %v858_v28, %v1799_v50  ;;  %v968_v0 = vmul.f32 %v1799_v50, %v1799_v50 }
 0x11b   :  { %v1363_v59 = vrot.slane %v1349_v51, %v1647_v9  ;;  %v1016_v62 = vadd.f32 %v1015_v27, %v967_v11  ;;  %v1502_v48 = vpack.c.bf16 %v1807_v56, %v1797_v47  ;;  %v1022_v37 = vadd.f32 %v1021_v6, %v969_v53 }
 0x11c   :  { %803 = vst [vmem:[%s2059_s2 + $0xa0] sm:$0xff] %v1501_v21  ;;  %v865_v3 = vadd.f32 %v864_v26, %v1807_v56  ;;  %v970_v40 = vmul.f32 %v1807_v56, %v1807_v56  ;;  %v857_v55 = vadd.f32 %v856_v42, %v1809_v57  ;;  %v1019_v61 = vadd.f32 %v1018_v15, %v968_v0 }
 0x11d   :  { %v1364_v5 = vcombine.low %v1356_v36, %v1363_v59  ;;  %804 = vst [vmem:[%s2059_s2 + $0xa8] sm:$0xff] %v1502_v48  ;;  %v983_v47 = vmul.f32 %v1809_v57, %v1809_v57  ;;  %v863_v50 = vadd.f32 %v862_v32, %v1811_v43  ;;  %v985_v10 = vmul.f32 %v1811_v43, %v1811_v43 }
 0x11e   :  { %v1025_v7 = vadd.f32 %v1024_v52, %v970_v40  ;;  %v1138_v8 = vrot.slane %v857_v55, 4  ;;  %v1509_v56 = vpack.c.bf16 %v1813_v63, %v1809_v57  ;;  %v860_v13 = vadd.f32 %v859_v58, %v1813_v63 }
 0x11f   :  { %1404 = vst [vmem:[%s2060_s3 + $0x8] sm:$0xff] %v1364_v5  ;;  %v1017_v54 = vadd.f32 %v1016_v62, %v983_v47  ;;  %v1150_v60 = vrot.slane %v863_v50, 4  ;;  %v984_v16 = vmul.f32 %v1813_v63, %v1813_v63  ;;  %v1023_v18 = vadd.f32 %v1022_v37, %v985_v10 }
 0x120   :  { %v1139_v17 = vadd.f32 %v1138_v8, %v857_v55  ;;  %811 = vst [vmem:[%s2059_s2 + $0xe0] sm:$0xff] %v1509_v56  ;;  %v1510_v57 = vpack.c.bf16 %v1820_v4, %v1811_v43  ;;  %v866_v1 = vadd.f32 %v865_v3, %v1820_v4  ;;  %v1144_v28 = vrot.slane %v860_v13, 4 }
 0x121   :  { %v1250_v23 = vrot.slane %v1017_v54, 4  ;;  %v1151_v24 = vadd.f32 %v1150_v60, %v863_v50  ;;  %v1020_v27 = vadd.f32 %v1019_v61, %v984_v16  ;;  %v1262_v12 = vrot.slane %v1023_v18, 4 }
 0x122   :  { %v1140_v6 = vrot.slane %v1139_v17, 2  ;;  %812 = vst [vmem:[%s2059_s2 + $0xe8] sm:$0xff] %v1510_v57  ;;  %v986_v63 = vmul.f32 %v1820_v4, %v1820_v4  ;;  %v1156_v25 = vrot.slane %v866_v1, 4  ;;  %v1145_v39 = vadd.f32 %v1144_v28, %v860_v13 }
 0x123   :  { %v1251_v26 = vadd.f32 %v1250_v23, %v1017_v54  ;;  %v1152_v36 = vrot.slane %v1151_v24, 2  ;;  %v1256_v43 = vrot.slane %v1020_v27, 4  ;;  %v1263_v42 = vadd.f32 %v1262_v12, %v1023_v18 }
 0x124   :  { %v1141_v41 = vadd.f32 %v1140_v6, %v1139_v17  ;;  %v1026_v51 = vadd.f32 %v1025_v7, %v986_v63  ;;  %v1157_v15 = vadd.f32 %v1156_v25, %v866_v1  ;;  %v1146_v52 = vrot.slane %v1145_v39, 2 }
 0x125   :  { %v1252_v11 = vrot.slane %v1251_v26, 2  ;;  %v1153_v32 = vadd.f32 %v1152_v36, %v1151_v24  ;;  %v1257_v53 = vadd.f32 %v1256_v43, %v1020_v27  ;;  %v1264_v58 = vrot.slane %v1263_v42, 2 }
 0x126   :  { %v1142_v21 = vrot.slane %v1141_v41, 1  ;;  %v1158_v59 = vrot.slane %v1157_v15, 2  ;;  %v1268_v62 = vrot.slane %v1026_v51, 4  ;;  %v1147_v4 = vadd.f32 %v1146_v52, %v1145_v39 }
 0x127   :  { %v1253_v0 = vadd.f32 %v1252_v11, %v1251_v26  ;;  %v1154_v48 = vrot.slane %v1153_v32, 1  ;;  %v1258_v37 = vrot.slane %v1257_v53, 2  ;;  %v1265_v40 = vadd.f32 %v1264_v58, %v1263_v42 }
 0x128   :  { %v1143_v3 = vadd.f32 %v1142_v21, %v1141_v41  ;;  %v1159_v55 = vadd.f32 %v1158_v59, %v1157_v15  ;;  %v1269_v5 = vadd.f32 %v1268_v62, %v1026_v51  ;;  %v1148_v50 = vrot.slane %v1147_v4, 1 }
 0x129   :  { %v1254_v61 = vrot.slane %v1253_v0, 1  ;;  %v1155_v47 = vadd.f32 %v1154_v48, %v1153_v32  ;;  %v1259_v7 = vadd.f32 %v1258_v37, %v1257_v53  ;;  %v1266_v8 = vrot.slane %v1265_v40, 1 }
 0x12a   :  { %v1160_v10 = vrot.slane %v1159_v55, 1  ;;  %v1270_v56 = vrot.slane %v1269_v5, 2  ;;  %v939_v54 = vmul.f32 %v1822_v44, %v1822_v44  ;;  %v1149_v13 = vadd.f32 %v1148_v50, %v1147_v4 }
 0x12b   :  { %v1255_v60 = vadd.f32 %v1254_v61, %v1253_v0  ;;  %v1260_v16 = vrot.slane %v1259_v7, 1  ;;  %v941_v17 = vmul.f32 %v1824_v20, %v1824_v20  ;;  %v1267_v18 = vadd.f32 %v1266_v8, %v1265_v40 }
 0x12c   :  { %v1161_v57 = vadd.f32 %v1160_v10, %v1159_v55  ;;  %v1271_v1 = vadd.f32 %v1270_v56, %v1269_v5  ;;  %v1487_v23 = vpack.c.bf16 %v1826_v30, %v1822_v44  ;;  %v940_v28 = vmul.f32 %v1826_v30, %v1826_v30 }
 0x12d   :  { %v1307_v24 = vsel %vm1298_vm1, %v1143_v3, %v1255_v60  ;;  %v1261_v27 = vadd.f32 %v1260_v16, %v1259_v7  ;;  %v1488_v6 = vpack.c.bf16 %v1828_v31, %v1824_v20  ;;  %v1309_v12 = vsel %vm1298_vm1, %v1155_v47, %v1267_v18 }
 0x12e   :  { %v1272_v63 = vrot.slane %v1271_v1, 1  ;;  %789 = vst [vmem:[%s2059_s2 + $0x30] sm:$0xff] %v1487_v23  ;;  %v942_v25 = vmul.f32 %v1828_v31, %v1828_v31  ;;  %v867_v26 = vadd.f32 %v1830_v35, %v1822_v44  ;;  %v955_v39 = vmul.f32 %v1830_v35, %v1830_v35 }
 0x12f   :  { %v1308_v36 = vsel %vm1298_vm1, %v1149_v13, %v1261_v27  ;;  %790 = vst [vmem:[%s2059_s2 + $0x38] sm:$0xff] %v1488_v6  ;;  %v873_v43 = vadd.f32 %v1832_v45, %v1824_v20  ;;  %v957_v41 = vmul.f32 %v1832_v45, %v1832_v45  ;;  %v1495_v44 = vpack.c.bf16 %v1834_v46, %v1830_v35 }
 0x130   :  { %v1365_v42 = vcombine.low %v1307_v24, %v1308_v36  ;;  %v1273_v51 = vadd.f32 %v1272_v63, %v1271_v1  ;;  %v870_v15 = vadd.f32 %v1834_v46, %v1826_v30  ;;  %v1027_v11 = vadd.f32 %v955_v39, %v939_v54 }
 0x131   :  { %v1033_v32 = vadd.f32 %v957_v41, %v941_v17  ;;  %v956_v52 = vmul.f32 %v1834_v46, %v1834_v46  ;;  %v1496_v53 = vpack.c.bf16 %v1838_v38, %v1832_v45  ;;  %797 = vst [vmem:[%s2059_s2 + $0x70] sm:$0xff] %v1495_v44  ;;  %v876_v35 = vadd.f32 %v1838_v38, %v1828_v31 }
 0x132   :  { %v1373_v20 = vrot.slane %v1365_v42, %v1647_v9  ;;  %v1310_v21 = vsel %vm1298_vm1, %v1161_v57, %v1273_v51  ;;  %v958_v30 = vmul.f32 %v1838_v38, %v1838_v38  ;;  %v868_v45 = vadd.f32 %v867_v26, %v1859_v14 }
 0x133   :  { %v1366_v58 = vcombine.low %v1309_v12, %v1310_v21  ;;  %v1030_v59 = vadd.f32 %v956_v52, %v940_v28  ;;  %798 = vst [vmem:[%s2059_s2 + $0x78] sm:$0xff] %v1496_v53  ;;  %v971_v46 = vmul.f32 %v1859_v14, %v1859_v14  ;;  %v874_v0 = vadd.f32 %v873_v43, %v1871_v19 }
 0x134   :  { %v1036_v62 = vadd.f32 %v958_v30, %v942_v25  ;;  %v973_v31 = vmul.f32 %v1871_v19, %v1871_v19  ;;  %v1503_v38 = vpack.c.bf16 %v1873_v22, %v1859_v14  ;;  %v871_v37 = vadd.f32 %v870_v15, %v1873_v22 }
 0x135   :  { %v1380_v48 = vrot.slane %v1366_v58, %v1647_v9  ;;  %v1028_v4 = vadd.f32 %v1027_v11, %v971_v46  ;;  %v972_v3 = vmul.f32 %v1873_v22, %v1873_v22  ;;  %v1504_v55 = vpack.c.bf16 %v1877_v29, %v1871_v19 }
 0x136   :  { %v1034_v40 = vadd.f32 %v1033_v32, %v973_v31  ;;  %805 = vst [vmem:[%s2059_s2 + $0xb0] sm:$0xff] %v1503_v38  ;;  %v877_v5 = vadd.f32 %v876_v35, %v1877_v29  ;;  %v974_v14 = vmul.f32 %v1877_v29, %v1877_v29  ;;  %v869_v50 = vadd.f32 %v868_v45, %v1879_v33 }
 0x137   :  { %v1381_v61 = vcombine.low %v1373_v20, %v1380_v48  ;;  %v1031_v47 = vadd.f32 %v1030_v59, %v972_v3  ;;  %v987_v22 = vmul.f32 %v1879_v33, %v1879_v33  ;;  %806 = vst [vmem:[%s2059_s2 + $0xb8] sm:$0xff] %v1504_v55  ;;  %v875_v8 = vadd.f32 %v874_v0, %v1890_v34 }
 0x138   :  { %v1037_v7 = vadd.f32 %v1036_v62, %v974_v14  ;;  %v989_v19 = vmul.f32 %v1890_v34, %v1890_v34  ;;  %v1511_v29 = vpack.c.bf16 %v1892_v49, %v1879_v33  ;;  %v1162_v56 = vrot.slane %v869_v50, 4 }
 0x139   :  { %1405 = vst [vmem:[%s2060_s3 + $0x10] sm:$0xff] %v1381_v61  ;;  %v1029_v10 = vadd.f32 %v1028_v4, %v987_v22  ;;  %v872_v54 = vadd.f32 %v871_v37, %v1892_v49  ;;  %v988_v60 = vmul.f32 %v1892_v49, %v1892_v49  ;;  %v1174_v16 = vrot.slane %v875_v8, 4 }
 0x13a   :  { %v1035_v13 = vadd.f32 %v1034_v40, %v989_v19  ;;  %813 = vst [vmem:[%s2059_s2 + $0xf0] sm:$0xff] %v1511_v29  ;;  %v1512_v33 = vpack.c.bf16 %v1899_v2, %v1890_v34  ;;  %v878_v17 = vadd.f32 %v877_v5, %v1899_v2  ;;  %v1163_v18 = vadd.f32 %v1162_v56, %v869_v50 }
 0x13b   :  { %v1274_v57 = vrot.slane %v1029_v10, 4  ;;  %v1032_v1 = vadd.f32 %v1031_v47, %v988_v60  ;;  %v1168_v23 = vrot.slane %v872_v54, 4  ;;  %v1175_v24 = vadd.f32 %v1174_v16, %v875_v8 }
 0x13c   :  { %v1286_v27 = vrot.slane %v1035_v13, 4  ;;  %814 = vst [vmem:[%s2059_s2 + $0xf8] sm:$0xff] %v1512_v33  ;;  %v990_v49 = vmul.f32 %v1899_v2, %v1899_v2  ;;  %v1180_v28 = vrot.slane %v878_v17, 4  ;;  %v1164_v6 = vrot.slane %v1163_v18, 2 }
 0x13d   :  { %v1275_v12 = vadd.f32 %v1274_v57, %v1029_v10  ;;  %v1169_v63 = vadd.f32 %v1168_v23, %v872_v54  ;;  %v1280_v34 = vrot.slane %v1032_v1, 4  ;;  %v1176_v25 = vrot.slane %v1175_v24, 2 }
 0x13e   :  { %v1287_v26 = vadd.f32 %v1286_v27, %v1035_v13  ;;  %v1038_v36 = vadd.f32 %v1037_v7, %v990_v49  ;;  %v1181_v39 = vadd.f32 %v1180_v28, %v878_v17  ;;  %v1165_v43 = vadd.f32 %v1164_v6, %v1163_v18 }
 0x13f   :  { %v1276_v41 = vrot.slane %v1275_v12, 2  ;;  %v1170_v42 = vrot.slane %v1169_v63, 2  ;;  %v1281_v51 = vadd.f32 %v1280_v34, %v1032_v1  ;;  %v1177_v44 = vadd.f32 %v1176_v25, %v1175_v24 }
 0x140   :  { %v1288_v15 = vrot.slane %v1287_v26, 2  ;;  %v1182_v11 = vrot.slane %v1181_v39, 2  ;;  %v1292_v32 = vrot.slane %v1038_v36, 4  ;;  %v1166_v52 = vrot.slane %v1165_v43, 1 }
 0x141   :  { %v1277_v53 = vadd.f32 %v1276_v41, %v1275_v12  ;;  %v1171_v2 = vadd.f32 %v1170_v42, %v1169_v63  ;;  %v1282_v20 = vrot.slane %v1281_v51, 2  ;;  %v1178_v21 = vrot.slane %v1177_v44, 1 }
 0x142   :  { %v1289_v35 = vadd.f32 %v1288_v15, %v1287_v26  ;;  %v1183_v30 = vadd.f32 %v1182_v11, %v1181_v39  ;;  %v1293_v58 = vadd.f32 %v1292_v32, %v1038_v36  ;;  %v1167_v31 = vadd.f32 %v1166_v52, %v1165_v43 }
 0x143   :  { %v1278_v59 = vrot.slane %v1277_v53, 1  ;;  %v1172_v45 = vrot.slane %v1171_v2, 1  ;;  %v1283_v46 = vadd.f32 %v1282_v20, %v1281_v51  ;;  %v1179_v4 = vadd.f32 %v1178_v21, %v1177_v44 }
 0x144   :  { %v1290_v62 = vrot.slane %v1289_v35, 1  ;;  %v1294_v0 = vrot.slane %v1293_v58, 2  ;;  %v1184_v3 = vrot.slane %v1183_v30, 1 }
 0x145   :  { %v1279_v38 = vadd.f32 %v1278_v59, %v1277_v53  ;;  %v1284_v48 = vrot.slane %v1283_v46, 1  ;;  %v1173_v5 = vadd.f32 %v1172_v45, %v1171_v2 }
 0x146   :  { %v1291_v37 = vadd.f32 %v1290_v62, %v1289_v35  ;;  %v1295_v40 = vadd.f32 %v1294_v0, %v1293_v58  ;;  %v1185_v7 = vadd.f32 %v1184_v3, %v1183_v30 }
 0x147   :  { %v1311_v55 = vsel %vm1298_vm1, %v1167_v31, %v1279_v38  ;;  %v1285_v14 = vadd.f32 %v1284_v48, %v1283_v46 }
 0x148   :  { %v1313_v61 = vsel %vm1298_vm1, %v1179_v4, %v1291_v37  ;;  %v1296_v47 = vrot.slane %v1295_v40, 1 }
 0x149   :  { %v1312_v50 = vsel %vm1298_vm1, %v1173_v5, %v1285_v14 }
 0x14a   :  { %v1382_v22 = vcombine.low %v1311_v55, %v1312_v50  ;;  %v1297_v8 = vadd.f32 %v1296_v47, %v1295_v40 }
 0x14c   :  { %v1314_v19 = vsel %vm1298_vm1, %v1185_v7, %v1297_v8  ;;  %v1390_v29 = vrot.slane %v1382_v22, %v1647_v9 }
 0x14d   :  { %v1383_v10 = vcombine.low %v1313_v61, %v1314_v19 }
 0x14f   :  { %v1397_v56 = vrot.slane %v1383_v10, %v1647_v9 }
 0x151   :  { %v1398_v54 = vcombine.low %v1390_v29, %v1397_v56 }
 0x153   :  { %1406 = vst [vmem:[%s2060_s3 + $0x18] sm:$0xff] %v1398_v54 }

// kernel: generator_forward.11
= control target key start
LH: loop header
LB: loop body
LE: loop exit
PB: predicated region body
PF: predicated region fallthrough
CT: control target
= control target key end

     0   :  { %s831_s12 = smov 0   ;;  %s833_s13 = smov 0   ;;  %s894_s0 = inlined_call_operand.vmem [shape: bf16[4,32,256], index: 0, kind: input, shape index: {}]   ;;  %s895_s1 = inlined_call_operand.vmem [shape: bf16[4,256,128], index: 1, kind: input, shape index: {}]   ;;  %s896_s2 = inlined_call_operand.vmem [shape: bf16[4,32,128], index: 2, kind: output, shape index: {0}]   ;;  %s897_s3 = inlined_call_operand.vmem [shape: f32[4,2,128], index: 3, kind: output, shape index: {1}]  }
   0x1   :  { %s835_s14 = smov 0  }
   0x2 LB: > { %s26_s15 = sadd.s32 1, %s805_s13  ;;  %p645_p0 = scmp.ge.s32.totalorder %s809_s14, 1  ;;  %s809_s14 = sphi %s835_s14, %s14_s14   ;;  %s805_s13 = sphi %s833_s13, %s899_s13   ;;  %s801_s12 = sphi %s831_s12, %s898_s12  }
   0x3   : > { %p28_p1 = scmp.ge.s32.totalorder %s26_s15, 4  ;;  %p172_p2 = scmp.lt.s32.totalorder %s809_s14, 5 }
   0x5   : > { %s901_s15 = smov (%p28_p1, %s26_s15), 0  ;;  %p173_p3 = pnand %p645_p0, %p172_p2 }
   0x6   : > { %p215_p4 = scmp.lt.s32.totalorder (!%p173_p3), %s801_s12, 3  ;;  %vm505_vm0 = vcmask (!%p173_p3), 1040384  }
   0x7   : > { %176 = sbr.rel (%p173_p3) target bundleno = 289 (0x121), region = 28 }
   0xe   : > { %s903_s12 = smov (!%p215_p4, %s801_s12), 3 }
   0xf   : > { %s680_s16 = sshll.u32 %s903_s12, 7  ;;  %s679_s20 = sshll.u32 %s903_s12, 5 }
  0x10   : > { %s855_s19 = scalar_lea.vmem %s895_s1, %s680_s16  ;;  %s223_s23 = scalar_lea.vmem %s894_s0, %s679_s20 }
  0x11   : > { %v765_v0 = vld [vmem:[%s855_s19 + $0x40] sm:$0xff]   ;;  %v767_v2 = vld [vmem:[%s855_s19 + $0x48] sm:$0xff]   ;;  %v769_v4 = vld [vmem:[%s855_s19 + $0x50] sm:$0xff]   ;;  %s681_s24 = sshll.u32 %s903_s12, 4  ;;  %s652_s28 = sshll.u32 %s903_s12, 1 }
  0x12   : > { %v766_v1 = vld [vmem:[%s855_s19] sm:$0xff]   ;;  %697 = vmatprep.subr.bf16.mxu0 %v765_v0  ;;  %725 = vmatprep.subr.bf16.mxu1 %v765_v0  ;;  %v768_v3 = vld [vmem:[%s855_s19 + $0x8] sm:$0xff]   ;;  %v770_v5 = vld [vmem:[%s855_s19 + $0x10] sm:$0xff]   ;;  %s238_s27 = scalar_lea.vmem %s896_s2, %s681_s24  ;;  %s243_s4 = scalar_lea.vmem %s897_s3, %s652_s28 }
  0x13   : > { %698 = vmatpush3.bf16.msra.mxu0 %v766_v1  ;;  %733 = vmatpush3.bf16.msra.mxu1 %v766_v1  ;;  %v771_v6 = vld [vmem:[%s855_s19 + $0x58] sm:$0xff]   ;;  %v773_v8 = vld [vmem:[%s855_s19 + $0x60] sm:$0xff]   ;;  %v775_v10 = vld [vmem:[%s855_s19 + $0x68] sm:$0xff]  }
  0x14   : > { %699 = vmatprep.subr.bf16.mxu0 %v767_v2  ;;  %726 = vmatprep.subr.bf16.mxu1 %v767_v2  ;;  %v772_v7 = vld [vmem:[%s855_s19 + $0x18] sm:$0xff]   ;;  %v774_v9 = vld [vmem:[%s855_s19 + $0x20] sm:$0xff]   ;;  %v776_v13 = vld [vmem:[%s855_s19 + $0x28] sm:$0xff]  }
  0x15   : > { %v783_v11 = vld [vmem:[%s223_s23 + $0x4] ss:$8 sps:$4 sm:$0xff]   ;;  %v786_v12 = vld [vmem:[%s223_s23 + $0x14] ss:$8 sps:$4 sm:$0xff]   ;;  %v781_v18 = vld [vmem:[%s223_s23] ss:$8 sps:$4 sm:$0xff]  }
  0x16   : > { %v777_v14 = vld [vmem:[%s855_s19 + $0x70] sm:$0xff]   ;;  %435 = vmatprep.mubr.bf16.mxu0 %v783_v11  ;;  %443 = vmatprep.mubr.bf16.mxu1 %v786_v12  ;;  %v779_v16 = vld [vmem:[%s855_s19 + $0x78] sm:$0xff]  }
  0x17   : > { %700 = vmatpush3.bf16.msra.mxu0 %v768_v3  ;;  %734 = vmatpush3.bf16.msra.mxu1 %v768_v3  ;;  %v778_v15 = vld [vmem:[%s855_s19 + $0x30] sm:$0xff]   ;;  %v780_v17 = vld [vmem:[%s855_s19 + $0x38] sm:$0xff]  }
  0x18   : > { %701 = vmatprep.subr.bf16.mxu0 %v769_v4  ;;  %727 = vmatprep.subr.bf16.mxu1 %v769_v4  ;;  %v784_v19 = vld [vmem:[%s223_s23 + $0x10] ss:$8 sps:$4 sm:$0xff]  }
  0x1b   : > { %702 = vmatpush3.bf16.msra.mxu0 %v770_v5  ;;  %735 = vmatpush3.bf16.msra.mxu1 %v770_v5 }
  0x1c   : > { %703 = vmatprep.subr.bf16.mxu0 %v771_v6  ;;  %728 = vmatprep.subr.bf16.mxu1 %v771_v6 }
  0x1f   : > { %704 = vmatpush3.bf16.msra.mxu0 %v772_v7  ;;  %736 = vmatpush3.bf16.msra.mxu1 %v772_v7 }
  0x20   : > { %705 = vmatprep.subr.bf16.mxu0 %v773_v8  ;;  %729 = vmatprep.subr.bf16.mxu1 %v773_v8 }
  0x23   : > { %706 = vmatpush3.bf16.msra.mxu0 %v774_v9  ;;  %737 = vmatpush3.bf16.msra.mxu1 %v774_v9 }
  0x24   : > { %707 = vmatprep.subr.bf16.mxu0 %v775_v10  ;;  %730 = vmatprep.subr.bf16.mxu1 %v775_v10 }
  0x27   : > { %708 = vmatpush3.bf16.msra.mxu0 %v776_v13  ;;  %738 = vmatpush3.bf16.msra.mxu1 %v776_v13 }
  0x28   : > { %709 = vmatprep.subr.bf16.mxu0 %v777_v14  ;;  %731 = vmatprep.subr.bf16.mxu1 %v777_v14 }
  0x2b   : > { %710 = vmatpush3.bf16.msra.mxu0 %v778_v15  ;;  %739 = vmatpush3.bf16.msra.mxu1 %v778_v15 }
  0x2c   : > { %711 = vmatprep.subr.bf16.mxu0 %v779_v16  ;;  %732 = vmatprep.subr.bf16.mxu1 %v779_v16 }
  0x2f   : > { %712 = vmatpush3.bf16.msra.mxu0 %v780_v17  ;;  %740 = vmatpush3.bf16.msra.mxu1 %v780_v17 }
  0x32   : > { %436 = vmatmul.mubr.bf16.vlgmr.msra.gmra.mrb[0].mxu0 %v781_v18  ;;  %444 = vmatmul.mubr.bf16.vlgmr.msra.gmra.mrb[0].mxu1 %v784_v19 }
 0x105   : > { %v713_v20 = vpop.f32.mrb[0].mxu0  ;;  %v719_v21 = vpop.f32.mrb[0].mxu1 }
 0x106   : > { %v714_v22 = vpop.f32.mrb[1].mxu0  ;;  %v720_v23 = vpop.f32.mrb[1].mxu1 }
 0x107   : > { %v715_v24 = vadd.f32 %v714_v22, %v713_v20  ;;  %v716_v25 = vpop.f32.mrb[2].mxu0  ;;  %v721_v26 = vadd.f32 %v720_v23, %v719_v21  ;;  %v722_v27 = vpop.f32.mrb[2].mxu1 }
 0x108   : > { %v717_v28 = vpop.f32.mrb[3].mxu0  ;;  %v723_v29 = vpop.f32.mrb[3].mxu1 }
 0x109   : > { %v718_v30 = vadd.f32 %v717_v28, %v716_v25  ;;  %v724_v31 = vadd.f32 %v723_v29, %v722_v27  ;;  %v479_v32 = vmul.f32 %v715_v24, %v715_v24  ;;  %v481_v33 = vmul.f32 %v721_v26, %v721_v26 }
 0x10b   : > { %v689_v34 = vpack.c.bf16 %v718_v30, %v715_v24  ;;  %v473_v35 = vadd.f32 %v718_v30, %v715_v24  ;;  %v480_v36 = vmul.f32 %v718_v30, %v718_v30  ;;  %v694_v37 = vpack.c.bf16 %v724_v31, %v721_v26 }
 0x10c   : > { %v482_v41 = vmul.f32 %v724_v31, %v724_v31 }
 0x10d   : > { %690 = vst [vmem:[%s238_s27] sm:$0xff] %v689_v34   ;;  %v483_v38 = vadd.f32 %v480_v36, %v479_v32  ;;  %696 = vst [vmem:[%s238_s27 + $0x8] sm:$0xff] %v694_v37   ;;  %v474_v39 = vadd.f32 %v721_v26, %v473_v35 }
 0x10f   : > { %v475_v40 = vadd.f32 %v724_v31, %v474_v39  ;;  %v484_v42 = vadd.f32 %v483_v38, %v481_v33 }
 0x111   : > { %v485_v43 = vadd.f32 %v484_v42, %v482_v41  ;;  %v492_v44 = vrot.slane %v475_v40, 4 }
 0x113   : > { %v493_v45 = vadd.f32 %v492_v44, %v475_v40  ;;  %v499_v46 = vrot.slane %v485_v43, 4 }
 0x115   : > { %v494_v47 = vrot.slane %v493_v45, 2  ;;  %v500_v48 = vadd.f32 %v499_v46, %v485_v43 }
 0x117   : > { %v495_v49 = vadd.f32 %v494_v47, %v493_v45  ;;  %v501_v50 = vrot.slane %v500_v48, 2 }
 0x119   : > { %v496_v51 = vrot.slane %v495_v49, 1  ;;  %v502_v52 = vadd.f32 %v501_v50, %v500_v48 }
 0x11b   : > { %v503_v53 = vrot.slane %v502_v52, 1  ;;  %v497_v54 = vadd.f32 %v496_v51, %v495_v49 }
 0x11d   : > { %v504_v55 = vadd.f32 %v503_v53, %v502_v52 }
 0x11f   : > { %v506_v56 = vsel %vm505_vm0, %v497_v54, %v504_v55 }
 0x120   : > { %507 = vst [vmem:[%s243_s4] sm:$0x3] %v506_v56 }
 0x121 PF: > { %s14_s14 = sadd.s32 1, %s809_s14   ;;  %s898_s12 = smov %s805_s13 }
 0x122   : > { %p11_p5 = scmp.ge.s32.totalorder %s14_s14, 6   ;;  %s899_s13 = smov %s901_s15 }
 0x124   :  { %13 = sbr.rel (!%p11_p5) target bundleno = 2 (0x2), region = 81 }

// kernel: generator_forward.12
= control target key start
LH: loop header
LB: loop body
LE: loop exit
PB: predicated region body
PF: predicated region fallthrough
CT: control target
= control target key end

     0   :  { %s422_s0 = inlined_call_operand.vmem [shape: bf16[128,128], index: 0, kind: input, shape index: {}]   ;;  %s423_s1 = inlined_call_operand.vmem [shape: f32[1,128], index: 1, kind: input, shape index: {}]   ;;  %s424_s2 = inlined_call_operand.vmem [shape: f32[1,128], index: 2, kind: input, shape index: {}]   ;;  %s425_s3 = inlined_call_operand.vmem [shape: bf16[128,128], index: 3, kind: output, shape index: {}]  }
   0x1   :  { %v227_v0 = vld [vmem:[%s422_s0] sm:$0xff]   ;;  %v298_v4 = vld [vmem:[%s422_s0 + $0x8] sm:$0xff]   ;;  %v299_v5 = vld [vmem:[%s422_s0 + $0x10] sm:$0xff]  }
   0x2   :  { %v338_v1 = vld [vmem:[%s423_s1] ss:$0 sm:$0xff]  ;;  %v228_v2 = vunpack.c.l.bf16 %v227_v0  ;;  %v229_v3 = vunpack.c.h.bf16 %v227_v0  ;;  %v300_v6 = vld [vmem:[%s422_s0 + $0x18] sm:$0xff]   ;;  %v232_v8 = vunpack.c.l.bf16 %v298_v4  ;;  %v233_v9 = vunpack.c.h.bf16 %v298_v4  ;;  %v302_v33 = vld [vmem:[%s422_s0 + $0x28] sm:$0xff]  }
   0x3   :  { %v352_v7 = vld [vmem:[%s424_s2] ss:$0 sm:$0xff]  ;;  %v236_v10 = vunpack.c.l.bf16 %v299_v5  ;;  %v237_v11 = vunpack.c.h.bf16 %v299_v5  ;;  %v240_v14 = vunpack.c.l.bf16 %v300_v6  ;;  %v241_v15 = vunpack.c.h.bf16 %v300_v6  ;;  %v303_v38 = vld [vmem:[%s422_s0 + $0x30] sm:$0xff]   ;;  %v304_v43 = vld [vmem:[%s422_s0 + $0x38] sm:$0xff]  }
   0x4   :  { %v53_v12 = vmul.f32 %v228_v2, %v338_v1  ;;  %v54_v13 = vmul.f32 %v229_v3, %v338_v1  ;;  %v55_v16 = vmul.f32 %v232_v8, %v338_v1  ;;  %v56_v17 = vmul.f32 %v233_v9, %v338_v1  ;;  %v301_v28 = vld [vmem:[%s422_s0 + $0x20] sm:$0xff]  }
   0x5   :  { %v57_v18 = vmul.f32 %v236_v10, %v338_v1  ;;  %v58_v19 = vmul.f32 %v237_v11, %v338_v1  ;;  %v59_v22 = vmul.f32 %v240_v14, %v338_v1  ;;  %v60_v23 = vmul.f32 %v241_v15, %v338_v1 }
   0x6   :  { %v76_v20 = vadd.f32 %v352_v7, %v53_v12  ;;  %v77_v21 = vadd.f32 %v352_v7, %v54_v13  ;;  %v78_v24 = vadd.f32 %v352_v7, %v55_v16  ;;  %v79_v25 = vadd.f32 %v352_v7, %v56_v17 }
   0x7   :  { %v80_v26 = vadd.f32 %v352_v7, %v57_v18  ;;  %v81_v27 = vadd.f32 %v352_v7, %v58_v19  ;;  %v82_v31 = vadd.f32 %v352_v7, %v59_v22  ;;  %v83_v32 = vadd.f32 %v352_v7, %v60_v23 }
   0x8   :  { %v92_v29 = vmax.f32 %v76_v20, 0.0  ;;  %v93_v30 = vmax.f32 %v77_v21, 0.0  ;;  %v94_v34 = vmax.f32 %v78_v24, 0.0  ;;  %v95_v35 = vmax.f32 %v79_v25, 0.0 }
   0x9   :  { %v96_v36 = vmax.f32 %v80_v26, 0.0  ;;  %v97_v37 = vmax.f32 %v81_v27, 0.0  ;;  %v98_v40 = vmax.f32 %v82_v31, 0.0  ;;  %v99_v41 = vmax.f32 %v83_v32, 0.0 }
   0xa   :  { %v261_v39 = vpack.c.bf16 %v93_v30, %v92_v29  ;;  %v244_v42 = vunpack.c.l.bf16 %v301_v28  ;;  %v266_v44 = vpack.c.bf16 %v95_v35, %v94_v34  ;;  %v245_v46 = vunpack.c.h.bf16 %v301_v28 }
   0xb   :  { %v271_v45 = vpack.c.bf16 %v97_v37, %v96_v36  ;;  %v248_v47 = vunpack.c.l.bf16 %v302_v33  ;;  %v276_v48 = vpack.c.bf16 %v99_v41, %v98_v40  ;;  %v249_v50 = vunpack.c.h.bf16 %v302_v33 }
   0xc   :  { %262 = vst [vmem:[%s425_s3] sm:$0xff] %v261_v39   ;;  %v61_v49 = vmul.f32 %v244_v42, %v338_v1  ;;  %v252_v51 = vunpack.c.l.bf16 %v303_v38  ;;  %305 = vst [vmem:[%s425_s3 + $0x8] sm:$0xff] %v266_v44   ;;  %v62_v52 = vmul.f32 %v245_v46, %v338_v1  ;;  %v253_v54 = vunpack.c.h.bf16 %v303_v38 }
   0xd   :  { %306 = vst [vmem:[%s425_s3 + $0x10] sm:$0xff] %v271_v45   ;;  %v63_v53 = vmul.f32 %v248_v47, %v338_v1  ;;  %v256_v55 = vunpack.c.l.bf16 %v304_v43  ;;  %307 = vst [vmem:[%s425_s3 + $0x18] sm:$0xff] %v276_v48   ;;  %v64_v57 = vmul.f32 %v249_v50, %v338_v1  ;;  %v257_v59 = vunpack.c.h.bf16 %v304_v43 }
   0xe   :  { %v84_v56 = vadd.f32 %v352_v7, %v61_v49  ;;  %v65_v58 = vmul.f32 %v252_v51, %v338_v1  ;;  %v85_v60 = vadd.f32 %v352_v7, %v62_v52  ;;  %v66_v62 = vmul.f32 %v253_v54, %v338_v1 }
   0xf   :  { %v86_v61 = vadd.f32 %v352_v7, %v63_v53  ;;  %v67_v63 = vmul.f32 %v256_v55, %v338_v1  ;;  %v87_v2 = vadd.f32 %v352_v7, %v64_v57  ;;  %v68_v4 = vmul.f32 %v257_v59, %v338_v1 }
  0x10   :  { %v100_v0 = vmax.f32 %v84_v56, 0.0  ;;  %v88_v3 = vadd.f32 %v352_v7, %v65_v58  ;;  %v101_v5 = vmax.f32 %v85_v60, 0.0  ;;  %v89_v8 = vadd.f32 %v352_v7, %v66_v62 }
  0x11   :  { %v102_v6 = vmax.f32 %v86_v61, 0.0  ;;  %v90_v9 = vadd.f32 %v352_v7, %v67_v63  ;;  %v103_v10 = vmax.f32 %v87_v2, 0.0  ;;  %v91_v12 = vadd.f32 %v352_v7, %v68_v4 }
  0x12   :  { %v104_v11 = vmax.f32 %v88_v3, 0.0  ;;  %v281_v13 = vpack.c.bf16 %v101_v5, %v100_v0  ;;  %v105_v14 = vmax.f32 %v89_v8, 0.0 }
  0x13   :  { %v106_v15 = vmax.f32 %v90_v9, 0.0  ;;  %v286_v16 = vpack.c.bf16 %v103_v10, %v102_v6  ;;  %v107_v17 = vmax.f32 %v91_v12, 0.0 }
  0x14   :  { %308 = vst [vmem:[%s425_s3 + $0x20] sm:$0xff] %v281_v13   ;;  %v291_v1 = vpack.c.bf16 %v105_v14, %v104_v11 }
  0x15   :  { %309 = vst [vmem:[%s425_s3 + $0x28] sm:$0xff] %v286_v16   ;;  %v296_v18 = vpack.c.bf16 %v107_v17, %v106_v15 }
  0x16   :  { %310 = vst [vmem:[%s425_s3 + $0x30] sm:$0xff] %v291_v1  }
  0x17   :  { %311 = vst [vmem:[%s425_s3 + $0x38] sm:$0xff] %v296_v18  }

// kernel: generator_forward.13
= control target key start
LH: loop header
LB: loop body
LE: loop exit
PB: predicated region body
PF: predicated region fallthrough
CT: control target
= control target key end

     0   :  { %s1015_s12 = smov 0   ;;  %s1017_s13 = smov 0   ;;  %s1093_s0 = inlined_call_operand.vmem [shape: bf16[4,128,128], index: 0, kind: input, shape index: {}]   ;;  %s1094_s1 = inlined_call_operand.vmem [shape: bf16[4,128,128], index: 1, kind: input, shape index: {}]   ;;  %s1095_s2 = inlined_call_operand.vmem [shape: bf16[4,128,128], index: 2, kind: output, shape index: {0}]   ;;  %s1096_s3 = inlined_call_operand.vmem [shape: f32[4,2,128], index: 3, kind: output, shape index: {1}]  }
   0x1   :  { %s1019_s14 = smov 0  }
   0x2 LB: > { %s26_s15 = sadd.s32 1, %s989_s13  ;;  %p759_p0 = scmp.ge.s32.totalorder %s993_s14, 1  ;;  %s993_s14 = sphi %s1019_s14, %s14_s14   ;;  %s989_s13 = sphi %s1017_s13, %s1098_s13   ;;  %s985_s12 = sphi %s1015_s12, %s1097_s12  }
   0x3   : > { %p28_p1 = scmp.ge.s32.totalorder %s26_s15, 4  ;;  %p171_p2 = scmp.lt.s32.totalorder %s993_s14, 5 }
   0x5   : > { %s1100_s15 = smov (%p28_p1, %s26_s15), 0  ;;  %p172_p3 = pnand %p759_p0, %p171_p2 }
   0x6   : > { %p213_p4 = scmp.lt.s32.totalorder (!%p172_p3), %s985_s12, 3  ;;  %vm622_vm0 = vcmask (!%p172_p3), 1040384  }
   0x7   : > { %175 = sbr.rel (%p172_p3) target bundleno = 311 (0x137), region = 28 }
   0xe   : > { %s1102_s12 = smov (!%p213_p4, %s985_s12), 3 }
   0xf   : > { %s1036_s16 = sshll.u32 %s1102_s12, 6  ;;  %s766_s26 = sshll.u32 %s1102_s12, 1 }
  0x10   : > { %s1042_s19 = scalar_lea.vmem %s1094_s1, %s1036_s16  ;;  %s1051_s22 = scalar_lea.vmem %s1093_s0, %s1036_s16 }
  0x11   : > { %v955_v0 = vld [vmem:[%s1042_s19] sm:$0xff]   ;;  %v956_v1 = vld [vmem:[%s1042_s19 + $0x8] sm:$0xff]   ;;  %v957_v2 = vld [vmem:[%s1042_s19 + $0x10] sm:$0xff]   ;;  %s1070_s25 = scalar_lea.vmem %s1095_s2, %s1036_s16  ;;  %s240_s29 = scalar_lea.vmem %s1096_s3, %s766_s26 }
  0x12   : > { %883 = vmatprep.subr.bf16.mxu0 %v955_v0  ;;  %915 = vmatprep.subr.bf16.mxu1 %v955_v0  ;;  %v958_v3 = vld [vmem:[%s1042_s19 + $0x18] sm:$0xff]   ;;  %v963_v4 = vld [vmem:[%s1051_s22] sm:$0xff]   ;;  %v960_v7 = vld [vmem:[%s1042_s19 + $0x28] sm:$0xff]  }
  0x13   : > { %884 = vmatpush3.bf16.msra.mxu0 %v955_v0  ;;  %923 = vmatpush3.bf16.msra.mxu1 %v955_v0  ;;  %v959_v5 = vld [vmem:[%s1042_s19 + $0x20] sm:$0xff]   ;;  %v961_v8 = vld [vmem:[%s1042_s19 + $0x30] sm:$0xff]   ;;  %v962_v9 = vld [vmem:[%s1042_s19 + $0x38] sm:$0xff]  }
  0x14   : > { %885 = vmatprep.subr.bf16.mxu0 %v956_v1  ;;  %916 = vmatprep.subr.bf16.mxu1 %v956_v1  ;;  %v967_v6 = vld [vmem:[%s1051_s22 + $0x20] sm:$0xff]   ;;  %v964_v10 = vld [vmem:[%s1051_s22 + $0x8] sm:$0xff]   ;;  %v965_v12 = vld [vmem:[%s1051_s22 + $0x10] sm:$0xff]  }
  0x15   : > { %899 = vmatprep.mubr.bf16.mxu0 %v963_v4  ;;  %907 = vmatprep.mubr.bf16.mxu1 %v967_v6  ;;  %v968_v11 = vld [vmem:[%s1051_s22 + $0x28] sm:$0xff]   ;;  %v969_v13 = vld [vmem:[%s1051_s22 + $0x30] sm:$0xff]   ;;  %v966_v14 = vld [vmem:[%s1051_s22 + $0x18] sm:$0xff]  }
  0x16   : > { %v970_v15 = vld [vmem:[%s1051_s22 + $0x38] sm:$0xff]  }
  0x17   : > { %886 = vmatpush3.bf16.msra.mxu0 %v956_v1  ;;  %924 = vmatpush3.bf16.msra.mxu1 %v956_v1 }
  0x18   : > { %887 = vmatprep.subr.bf16.mxu0 %v957_v2  ;;  %917 = vmatprep.subr.bf16.mxu1 %v957_v2 }
  0x1b   : > { %888 = vmatpush3.bf16.msra.mxu0 %v957_v2  ;;  %925 = vmatpush3.bf16.msra.mxu1 %v957_v2 }
  0x1c   : > { %889 = vmatprep.subr.bf16.mxu0 %v958_v3  ;;  %918 = vmatprep.subr.bf16.mxu1 %v958_v3 }
  0x1f   : > { %890 = vmatpush3.bf16.msra.mxu0 %v958_v3  ;;  %926 = vmatpush3.bf16.msra.mxu1 %v958_v3 }
  0x20   : > { %891 = vmatprep.subr.bf16.mxu0 %v959_v5  ;;  %919 = vmatprep.subr.bf16.mxu1 %v959_v5 }
  0x23   : > { %892 = vmatpush3.bf16.msra.mxu0 %v959_v5  ;;  %927 = vmatpush3.bf16.msra.mxu1 %v959_v5 }
  0x24   : > { %893 = vmatprep.subr.bf16.mxu0 %v960_v7  ;;  %920 = vmatprep.subr.bf16.mxu1 %v960_v7 }
  0x27   : > { %894 = vmatpush3.bf16.msra.mxu0 %v960_v7  ;;  %928 = vmatpush3.bf16.msra.mxu1 %v960_v7 }
  0x28   : > { %895 = vmatprep.subr.bf16.mxu0 %v961_v8  ;;  %921 = vmatprep.subr.bf16.mxu1 %v961_v8 }
  0x2b   : > { %896 = vmatpush3.bf16.msra.mxu0 %v961_v8  ;;  %929 = vmatpush3.bf16.msra.mxu1 %v961_v8 }
  0x2c   : > { %897 = vmatprep.subr.bf16.mxu0 %v962_v9  ;;  %922 = vmatprep.subr.bf16.mxu1 %v962_v9 }
  0x2f   : > { %898 = vmatpush3.bf16.msra.mxu0 %v962_v9  ;;  %930 = vmatpush3.bf16.msra.mxu1 %v962_v9 }
  0x32   : > { %900 = vmatmul.mubr.bf16.vlgmr.msra.gmra.mrb[0].mxu0 %v964_v10  ;;  %908 = vmatmul.mubr.bf16.vlgmr.msra.gmra.mrb[0].mxu1 %v968_v11 }
  0x33   : > { %903 = vmatprep.mubr.bf16.mxu0 %v965_v12  ;;  %911 = vmatprep.mubr.bf16.mxu1 %v969_v13 }
  0x3a   : > { %904 = vmatmul.mubr.bf16.gmra.mrb[4].mxu0 %v966_v14  ;;  %912 = vmatmul.mubr.bf16.gmra.mrb[4].mxu1 %v970_v15 }
 0x105   : > { %v901_v16 = vpop.f32.mrb[0].mxu0  ;;  %v909_v17 = vpop.f32.mrb[0].mxu1 }
 0x106   : > { %v410_v18 = vpop.f32.mrb[1].mxu0  ;;  %v442_v19 = vpop.f32.mrb[1].mxu1  ;;  %v574_v31 = vmul.f32 %v901_v16, %v901_v16  ;;  %v582_v3 = vmul.f32 %v909_v17, %v909_v17 }
 0x107   : > { %v902_v20 = vpop.f32.mrb[2].mxu0  ;;  %v910_v21 = vpop.f32.mrb[2].mxu1  ;;  %v572_v22 = vmul.f32 %v410_v18, %v410_v18  ;;  %v580_v61 = vmul.f32 %v442_v19, %v442_v19 }
 0x108   : > { %v828_v23 = vpack.c.bf16 %v902_v20, %v901_v16  ;;  %v413_v24 = vpop.f32.mrb[3].mxu0  ;;  %v848_v25 = vpack.c.bf16 %v910_v21, %v909_v17  ;;  %v445_v26 = vpop.f32.mrb[3].mxu1  ;;  %v575_v34 = vmul.f32 %v902_v20, %v902_v20  ;;  %v583_v6 = vmul.f32 %v910_v21, %v910_v21 }
 0x109   : > { %v823_v27 = vpack.c.bf16 %v413_v24, %v410_v18  ;;  %v554_v28 = vadd.f32 %v413_v24, %v410_v18  ;;  %v573_v29 = vmul.f32 %v413_v24, %v413_v24  ;;  %v843_v30 = vpack.c.bf16 %v445_v26, %v442_v19 }
 0x10a   : > { %860 = vst [vmem:[%s1070_s25 + $0x8] sm:$0xff] %v828_v23   ;;  %864 = vst [vmem:[%s1070_s25 + $0x28] sm:$0xff] %v848_v25   ;;  %v581_v2 = vmul.f32 %v445_v26, %v445_v26 }
 0x10b   : > { %824 = vst [vmem:[%s1070_s25] sm:$0xff] %v823_v27   ;;  %v555_v32 = vadd.f32 %v901_v16, %v554_v28  ;;  %v588_v33 = vadd.f32 %v573_v29, %v572_v22  ;;  %863 = vst [vmem:[%s1070_s25 + $0x20] sm:$0xff] %v843_v30  }
 0x10d   : > { %v589_v35 = vadd.f32 %v588_v33, %v574_v31  ;;  %v905_v36 = vpop.f32.mrb[4].mxu0  ;;  %v556_v37 = vadd.f32 %v902_v20, %v555_v32  ;;  %v913_v38 = vpop.f32.mrb[4].mxu1 }
 0x10e   : > { %v426_v39 = vpop.f32.mrb[5].mxu0  ;;  %v458_v40 = vpop.f32.mrb[5].mxu1  ;;  %v578_v55 = vmul.f32 %v905_v36, %v905_v36  ;;  %v586_v15 = vmul.f32 %v913_v38, %v913_v38 }
 0x10f   : > { %v557_v41 = vadd.f32 %v556_v37, %v426_v39  ;;  %v576_v42 = vmul.f32 %v426_v39, %v426_v39  ;;  %v590_v43 = vadd.f32 %v589_v35, %v575_v34  ;;  %v906_v44 = vpop.f32.mrb[6].mxu0  ;;  %v914_v45 = vpop.f32.mrb[6].mxu1  ;;  %v584_v9 = vmul.f32 %v458_v40, %v458_v40 }
 0x110   : > { %v838_v46 = vpack.c.bf16 %v906_v44, %v905_v36  ;;  %v429_v47 = vpop.f32.mrb[7].mxu0  ;;  %v858_v48 = vpack.c.bf16 %v914_v45, %v913_v38  ;;  %v461_v49 = vpop.f32.mrb[7].mxu1  ;;  %v579_v58 = vmul.f32 %v906_v44, %v906_v44 }
 0x111   : > { %v591_v50 = vadd.f32 %v590_v43, %v576_v42  ;;  %v833_v51 = vpack.c.bf16 %v429_v47, %v426_v39  ;;  %v558_v52 = vadd.f32 %v557_v41, %v429_v47  ;;  %v577_v53 = vmul.f32 %v429_v47, %v429_v47 }
 0x112   : > { %862 = vst [vmem:[%s1070_s25 + $0x18] sm:$0xff] %v838_v46   ;;  %866 = vst [vmem:[%s1070_s25 + $0x38] sm:$0xff] %v858_v48   ;;  %v853_v54 = vpack.c.bf16 %v461_v49, %v458_v40  ;;  %v585_v14 = vmul.f32 %v461_v49, %v461_v49 }
 0x113   : > { %861 = vst [vmem:[%s1070_s25 + $0x10] sm:$0xff] %v833_v51   ;;  %v559_v56 = vadd.f32 %v905_v36, %v558_v52  ;;  %v592_v57 = vadd.f32 %v591_v50, %v577_v53 }
 0x114   : > { %865 = vst [vmem:[%s1070_s25 + $0x30] sm:$0xff] %v853_v54  }
 0x115   : > { %v593_v59 = vadd.f32 %v592_v57, %v578_v55  ;;  %v560_v60 = vadd.f32 %v906_v44, %v559_v56 }
 0x117   : > { %v561_v62 = vadd.f32 %v560_v60, %v442_v19  ;;  %v594_v63 = vadd.f32 %v593_v59, %v579_v58  ;;  %v587_v19 = vmul.f32 %v914_v45, %v914_v45 }
 0x119   : > { %v595_v0 = vadd.f32 %v594_v63, %v580_v61  ;;  %v562_v1 = vadd.f32 %v561_v62, %v445_v26 }
 0x11b   : > { %v563_v4 = vadd.f32 %v909_v17, %v562_v1  ;;  %v596_v5 = vadd.f32 %v595_v0, %v581_v2 }
 0x11d   : > { %v597_v7 = vadd.f32 %v596_v5, %v582_v3  ;;  %v564_v8 = vadd.f32 %v910_v21, %v563_v4 }
 0x11f   : > { %v565_v10 = vadd.f32 %v564_v8, %v458_v40  ;;  %v598_v11 = vadd.f32 %v597_v7, %v583_v6 }
 0x121   : > { %v599_v12 = vadd.f32 %v598_v11, %v584_v9  ;;  %v566_v13 = vadd.f32 %v565_v10, %v461_v49 }
 0x123   : > { %v567_v16 = vadd.f32 %v913_v38, %v566_v13  ;;  %v600_v18 = vadd.f32 %v599_v12, %v585_v14 }
 0x125   : > { %v568_v20 = vadd.f32 %v914_v45, %v567_v16  ;;  %v601_v22 = vadd.f32 %v600_v18, %v586_v15 }
 0x127   : > { %v602_v23 = vadd.f32 %v601_v22, %v587_v19  ;;  %v609_v24 = vrot.slane %v568_v20, 4 }
 0x129   : > { %v610_v17 = vadd.f32 %v609_v24, %v568_v20  ;;  %v616_v25 = vrot.slane %v602_v23, 4 }
 0x12b   : > { %v611_v26 = vrot.slane %v610_v17, 2  ;;  %v617_v27 = vadd.f32 %v616_v25, %v602_v23 }
 0x12d   : > { %v612_v21 = vadd.f32 %v611_v26, %v610_v17  ;;  %v618_v28 = vrot.slane %v617_v27, 2 }
 0x12f   : > { %v613_v29 = vrot.slane %v612_v21, 1  ;;  %v619_v30 = vadd.f32 %v618_v28, %v617_v27 }
 0x131   : > { %v620_v31 = vrot.slane %v619_v30, 1  ;;  %v614_v32 = vadd.f32 %v613_v29, %v612_v21 }
 0x133   : > { %v621_v33 = vadd.f32 %v620_v31, %v619_v30 }
 0x135   : > { %v623_v34 = vsel %vm622_vm0, %v614_v32, %v621_v33 }
 0x136   : > { %624 = vst [vmem:[%s240_s29] sm:$0x3] %v623_v34 }
 0x137 PF: > { %s14_s14 = sadd.s32 1, %s993_s14   ;;  %s1097_s12 = smov %s989_s13 }
 0x138   : > { %p11_p5 = scmp.ge.s32.totalorder %s14_s14, 6   ;;  %s1098_s13 = smov %s1100_s15 }
 0x13a   :  { %13 = sbr.rel (!%p11_p5) target bundleno = 2 (0x2), region = 81 }

// kernel: generator_forward.15
= control target key start
LH: loop header
LB: loop body
LE: loop exit
PB: predicated region body
PF: predicated region fallthrough
CT: control target
= control target key end

     0   :  { %s2180_s12 = smov 0   ;;  %s2182_s13 = smov 0   ;;  %s2520_s0 = inlined_call_operand.vmem [shape: bf16[4,512,64], index: 0, kind: input, shape index: {}]   ;;  %s2521_s1 = inlined_call_operand.vmem [shape: bf16[4,64,128], index: 1, kind: input, shape index: {}]   ;;  %s2522_s2 = inlined_call_operand.vmem [shape: bf16[4,512,128], index: 2, kind: output, shape index: {0}]   ;;  %s2523_s3 = inlined_call_operand.vmem [shape: f32[4,2,128], index: 3, kind: output, shape index: {1}]  }
   0x1   :  { %s2184_s14 = smov 0  }
   0x2 LB: > { %s26_s15 = sadd.s32 1, %s2154_s13  ;;  %p1560_p0 = scmp.ge.s32.totalorder %s2158_s14, 1  ;;  %s2158_s14 = sphi %s2184_s14, %s14_s14   ;;  %s2154_s13 = sphi %s2182_s13, %s2525_s13   ;;  %s2150_s12 = sphi %s2180_s12, %s2524_s12  }
   0x3   : > { %p28_p1 = scmp.ge.s32.totalorder %s26_s15, 4  ;;  %p171_p2 = scmp.lt.s32.totalorder %s2158_s14, 5 }
   0x5   : > { %s2527_s15 = smov (%p28_p1, %s26_s15), 0  ;;  %p172_p3 = pnand %p1560_p0, %p171_p2 }
   0x6   : > { %p213_p4 = scmp.lt.s32.totalorder (!%p172_p3), %s2150_s12, 3  ;;  %vm504_vm0 = vcmask (!%p172_p3), 523264   ;;  %vm1423_vm1 = vcmask (!%p172_p3), 1040384  }
   0x7   : > { %175 = sbr.rel (%p172_p3) target bundleno = 391 (0x187), region = 28 }
   0xe   : > { %s2529_s12 = smov (!%p213_p4, %s2150_s12), 3 }
   0xf   : > { %s1702_s16 = sshll.u32 %s2529_s12, 8  ;;  %s1703_s17 = sshll.u32 %s2529_s12, 5 }
  0x10   : > { %s226_s20 = scalar_lea.vmem %s2521_s1, %s1703_s17  ;;  %s2210_s23 = scalar_lea.vmem %s2520_s0, %s1702_s16 }
  0x11   : > { %v2100_v0 = vld [vmem:[%s226_s20] sm:$0xff]   ;;  %v2101_v1 = vld [vmem:[%s226_s20 + $0x8] sm:$0xff]   ;;  %v2102_v2 = vld [vmem:[%s226_s20 + $0x10] sm:$0xff]   ;;  %s2281_s26 = scalar_lea.vmem %s2522_s2, %s1702_s16  ;;  %s1567_s27 = sshll.u32 %s2529_s12, 1 }
  0x12   : > { %1996 = vmatprep.subr.bf16.mxu0 %v2100_v0  ;;  %2068 = vmatprep.subr.bf16.mxu1 %v2100_v0  ;;  %v2104_v3 = vld [vmem:[%s2210_s23] sm:$0xff]   ;;  %v2103_v4 = vld [vmem:[%s226_s20 + $0x18] sm:$0xff]   ;;  %v2105_v5 = vld [vmem:[%s2210_s23 + $0x8] sm:$0xff]   ;;  %s240_s30 = scalar_lea.vmem %s2523_s3, %s1567_s27 }
  0x13   : > { %1997 = vmatpush3.bf16.msra.mxu0 %v2100_v0  ;;  %2072 = vmatpush3.bf16.msra.mxu1 %v2100_v0  ;;  %v2106_v6 = vld [vmem:[%s2210_s23 + $0x10] sm:$0xff]   ;;  %v2107_v7 = vld [vmem:[%s2210_s23 + $0x18] sm:$0xff]   ;;  %v2120_v8 = vld [vmem:[%s2210_s23 + $0x80] sm:$0xff]  }
  0x14   : > { %1998 = vmatprep.subr.bf16.mxu0 %v2101_v1  ;;  %2069 = vmatprep.subr.bf16.mxu1 %v2101_v1  ;;  %v2121_v9 = vld [vmem:[%s2210_s23 + $0x88] sm:$0xff]   ;;  %v2122_v10 = vld [vmem:[%s2210_s23 + $0x90] sm:$0xff]   ;;  %v2108_v11 = vld [vmem:[%s2210_s23 + $0x20] sm:$0xff]  }
  0x15   : > { %2004 = vmatprep.mubr.msk.bf16.mxu0 %vm504_vm0, %v2104_v3  ;;  %2036 = vmatprep.mubr.msk.bf16.mxu1 %vm504_vm0, %v2120_v8  ;;  %v2123_v12 = vld [vmem:[%s2210_s23 + $0x98] sm:$0xff]   ;;  %v2124_v13 = vld [vmem:[%s2210_s23 + $0xa0] sm:$0xff]   ;;  %v2109_v14 = vld [vmem:[%s2210_s23 + $0x28] sm:$0xff]  }
  0x16   : > { %v2110_v15 = vld [vmem:[%s2210_s23 + $0x30] sm:$0xff]   ;;  %v2125_v16 = vld [vmem:[%s2210_s23 + $0xa8] sm:$0xff]   ;;  %v2111_v18 = vld [vmem:[%s2210_s23 + $0x38] sm:$0xff]  }
  0x17   : > { %1999 = vmatpush3.bf16.msra.mxu0 %v2101_v1  ;;  %2073 = vmatpush3.bf16.msra.mxu1 %v2101_v1  ;;  %v2126_v17 = vld [vmem:[%s2210_s23 + $0xb0] sm:$0xff]   ;;  %v2112_v19 = vld [vmem:[%s2210_s23 + $0x40] sm:$0xff]   ;;  %v2127_v20 = vld [vmem:[%s2210_s23 + $0xb8] sm:$0xff]  }
  0x18   : > { %2000 = vmatprep.subr.bf16.mxu0 %v2102_v2  ;;  %2070 = vmatprep.subr.bf16.mxu1 %v2102_v2  ;;  %v2128_v21 = vld [vmem:[%s2210_s23 + $0xc0] sm:$0xff]   ;;  %v2113_v22 = vld [vmem:[%s2210_s23 + $0x48] sm:$0xff]   ;;  %v2114_v23 = vld [vmem:[%s2210_s23 + $0x50] sm:$0xff]  }
  0x19   : > { %v2129_v24 = vld [vmem:[%s2210_s23 + $0xc8] sm:$0xff]   ;;  %v2130_v25 = vld [vmem:[%s2210_s23 + $0xd0] sm:$0xff]   ;;  %v2115_v26 = vld [vmem:[%s2210_s23 + $0x58] sm:$0xff]  }
  0x1a   : > { %v2116_v27 = vld [vmem:[%s2210_s23 + $0x60] sm:$0xff]   ;;  %v2131_v28 = vld [vmem:[%s2210_s23 + $0xd8] sm:$0xff]   ;;  %v2117_v30 = vld [vmem:[%s2210_s23 + $0x68] sm:$0xff]  }
  0x1b   : > { %2001 = vmatpush3.bf16.msra.mxu0 %v2102_v2  ;;  %2074 = vmatpush3.bf16.msra.mxu1 %v2102_v2  ;;  %v2132_v29 = vld [vmem:[%s2210_s23 + $0xe0] sm:$0xff]   ;;  %v2118_v31 = vld [vmem:[%s2210_s23 + $0x70] sm:$0xff]   ;;  %v2133_v32 = vld [vmem:[%s2210_s23 + $0xe8] sm:$0xff]  }
  0x1c   : > { %2002 = vmatprep.subr.bf16.mxu0 %v2103_v4  ;;  %2071 = vmatprep.subr.bf16.mxu1 %v2103_v4  ;;  %v2134_v33 = vld [vmem:[%s2210_s23 + $0xf0] sm:$0xff]   ;;  %v2119_v34 = vld [vmem:[%s2210_s23 + $0x78] sm:$0xff]  }
  0x1d   : > { %v2135_v35 = vld [vmem:[%s2210_s23 + $0xf8] sm:$0xff]  }
  0x1f   : > { %2003 = vmatpush3.bf16.msra.mxu0 %v2103_v4  ;;  %2075 = vmatpush3.bf16.msra.mxu1 %v2103_v4 }
  0x22   : > { %2005 = vmatmul.mubr.msk.bf16.vlgmr.msra.gmra.mrb[0].mxu0 %vm504_vm0, %v2105_v5  ;;  %2037 = vmatmul.mubr.msk.bf16.vlgmr.msra.gmra.mrb[0].mxu1 %vm504_vm0, %v2121_v9 }
  0x23   : > { %2008 = vmatprep.mubr.msk.bf16.mxu0 %vm504_vm0, %v2106_v6  ;;  %2040 = vmatprep.mubr.msk.bf16.mxu1 %vm504_vm0, %v2122_v10 }
  0x2a   : > { %2009 = vmatmul.mubr.msk.bf16.gmra.mrb[4].mxu0 %vm504_vm0, %v2107_v7  ;;  %2041 = vmatmul.mubr.msk.bf16.gmra.mrb[4].mxu1 %vm504_vm0, %v2123_v12 }
  0x2b   : > { %2012 = vmatprep.mubr.msk.bf16.mxu0 %vm504_vm0, %v2108_v11  ;;  %2044 = vmatprep.mubr.msk.bf16.mxu1 %vm504_vm0, %v2124_v13 }
  0x32   : > { %2013 = vmatmul.mubr.msk.bf16.gmra.mrb[8].mxu0 %vm504_vm0, %v2109_v14  ;;  %2045 = vmatmul.mubr.msk.bf16.gmra.mrb[8].mxu1 %vm504_vm0, %v2125_v16 }
  0x33   : > { %2016 = vmatprep.mubr.msk.bf16.mxu0 %vm504_vm0, %v2110_v15  ;;  %2048 = vmatprep.mubr.msk.bf16.mxu1 %vm504_vm0, %v2126_v17 }
  0x3a   : > { %2017 = vmatmul.mubr.msk.bf16.gmra.mrb[12].mxu0 %vm504_vm0, %v2111_v18  ;;  %2049 = vmatmul.mubr.msk.bf16.gmra.mrb[12].mxu1 %vm504_vm0, %v2127_v20 }
  0x3b   : > { %2020 = vmatprep.mubr.msk.bf16.mxu0 %vm504_vm0, %v2112_v19  ;;  %2052 = vmatprep.mubr.msk.bf16.mxu1 %vm504_vm0, %v2128_v21 }
  0x42   : > { %2021 = vmatmul.mubr.msk.bf16.gmra.mrb[16].mxu0 %vm504_vm0, %v2113_v22  ;;  %2053 = vmatmul.mubr.msk.bf16.gmra.mrb[16].mxu1 %vm504_vm0, %v2129_v24 }
  0x43   : > { %2024 = vmatprep.mubr.msk.bf16.mxu0 %vm504_vm0, %v2114_v23  ;;  %2056 = vmatprep.mubr.msk.bf16.mxu1 %vm504_vm0, %v2130_v25 }
  0x4a   : > { %2025 = vmatmul.mubr.msk.bf16.gmra.mrb[20].mxu0 %vm504_vm0, %v2115_v26  ;;  %2057 = vmatmul.mubr.msk.bf16.gmra.mrb[20].mxu1 %vm504_vm0, %v2131_v28 }
  0x4b   : > { %2028 = vmatprep.mubr.msk.bf16.mxu0 %vm504_vm0, %v2116_v27  ;;  %2060 = vmatprep.mubr.msk.bf16.mxu1 %vm504_vm0, %v2132_v29 }
  0x52   : > { %2029 = vmatmul.mubr.msk.bf16.gmra.mrb[24].mxu0 %vm504_vm0, %v2117_v30  ;;  %2061 = vmatmul.mubr.msk.bf16.gmra.mrb[24].mxu1 %vm504_vm0, %v2133_v32 }
  0x53   : > { %2032 = vmatprep.mubr.msk.bf16.mxu0 %vm504_vm0, %v2118_v31  ;;  %2064 = vmatprep.mubr.msk.bf16.mxu1 %vm504_vm0, %v2134_v33 }
  0x5a   : > { %2033 = vmatmul.mubr.msk.bf16.gmra.mrb[28].mxu0 %vm504_vm0, %v2119_v34  ;;  %2065 = vmatmul.mubr.msk.bf16.gmra.mrb[28].mxu1 %vm504_vm0, %v2135_v35 }
  0xf5   : > { %v2006_v36 = vpop.f32.mrb[0].mxu0  ;;  %v2284_v45 = vpop.f32.mrb[0].mxu1 }
  0xf6   : > { %v635_v37 = vpop.f32.mrb[1].mxu0  ;;  %v1279_v46 = vmul.f32 %v2006_v36, %v2006_v36  ;;  %v2287_v49 = vpop.f32.mrb[1].mxu1 }
  0xf7   : > { %v2007_v38 = vpop.f32.mrb[2].mxu0  ;;  %v1277_v41 = vmul.f32 %v635_v37, %v635_v37  ;;  %v2289_v50 = vpop.f32.mrb[2].mxu1 }
  0xf8   : > { %v1777_v39 = vpack.c.bf16 %v2007_v38, %v2006_v36  ;;  %v638_v40 = vpop.f32.mrb[3].mxu0  ;;  %v1280_v51 = vmul.f32 %v2007_v38, %v2007_v38  ;;  %v1857_v55 = vpack.c.bf16 %v2289_v50, %v2284_v45  ;;  %v2293_v56 = vpop.f32.mrb[3].mxu1 }
  0xf9   : > { %v1772_v42 = vpack.c.bf16 %v638_v40, %v635_v37  ;;  %v1211_v43 = vadd.f32 %v638_v40, %v635_v37  ;;  %v1278_v44 = vmul.f32 %v638_v40, %v638_v40  ;;  %v1852_v58 = vpack.c.bf16 %v2293_v56, %v2287_v49 }
  0xfa   : > { %1929 = vst [vmem:[%s2281_s26 + $0x8] sm:$0xff] %v1777_v39   ;;  %1945 = vst [vmem:[%s2281_s26 + $0x88] sm:$0xff] %v1857_v55  }
  0xfb   : > { %1773 = vst [vmem:[%s2281_s26] sm:$0xff] %v1772_v42   ;;  %v1212_v47 = vadd.f32 %v2006_v36, %v1211_v43  ;;  %v1341_v48 = vadd.f32 %v1278_v44, %v1277_v41  ;;  %1944 = vst [vmem:[%s2281_s26 + $0x80] sm:$0xff] %v1852_v58  }
  0xfd   : > { %v1342_v52 = vadd.f32 %v1341_v48, %v1279_v46  ;;  %v2010_v53 = vpop.f32.mrb[4].mxu0  ;;  %v1213_v54 = vadd.f32 %v2007_v38, %v1212_v47  ;;  %v2300_v5 = vpop.f32.mrb[4].mxu1 }
  0xfe   : > { %v651_v57 = vpop.f32.mrb[5].mxu0  ;;  %v1283_v6 = vmul.f32 %v2010_v53, %v2010_v53  ;;  %v2303_v9 = vpop.f32.mrb[5].mxu1 }
  0xff   : > { %v1214_v59 = vadd.f32 %v1213_v54, %v651_v57  ;;  %v1281_v60 = vmul.f32 %v651_v57, %v651_v57  ;;  %v1343_v61 = vadd.f32 %v1342_v52, %v1280_v51  ;;  %v2011_v62 = vpop.f32.mrb[6].mxu0  ;;  %v2305_v10 = vpop.f32.mrb[6].mxu1 }
 0x100   : > { %v1787_v63 = vpack.c.bf16 %v2011_v62, %v2010_v53  ;;  %v654_v0 = vpop.f32.mrb[7].mxu0  ;;  %v1284_v11 = vmul.f32 %v2011_v62, %v2011_v62  ;;  %v1867_v15 = vpack.c.bf16 %v2305_v10, %v2300_v5  ;;  %v2309_v16 = vpop.f32.mrb[7].mxu1 }
 0x101   : > { %v1344_v1 = vadd.f32 %v1343_v61, %v1281_v60  ;;  %v1782_v2 = vpack.c.bf16 %v654_v0, %v651_v57  ;;  %v1215_v3 = vadd.f32 %v1214_v59, %v654_v0  ;;  %v1282_v4 = vmul.f32 %v654_v0, %v654_v0 }
 0x102   : > { %1931 = vst [vmem:[%s2281_s26 + $0x18] sm:$0xff] %v1787_v63   ;;  %v1862_v18 = vpack.c.bf16 %v2309_v16, %v2303_v9  ;;  %1947 = vst [vmem:[%s2281_s26 + $0x98] sm:$0xff] %v1867_v15  }
 0x103   : > { %1930 = vst [vmem:[%s2281_s26 + $0x10] sm:$0xff] %v1782_v2   ;;  %v1216_v7 = vadd.f32 %v2010_v53, %v1215_v3  ;;  %v1345_v8 = vadd.f32 %v1344_v1, %v1282_v4 }
 0x104   : > { %1946 = vst [vmem:[%s2281_s26 + $0x90] sm:$0xff] %v1862_v18  }
 0x105   : > { %v1346_v12 = vadd.f32 %v1345_v8, %v1283_v6  ;;  %v2014_v13 = vpop.f32.mrb[8].mxu0  ;;  %v1217_v14 = vadd.f32 %v2011_v62, %v1216_v7  ;;  %v2316_v29 = vpop.f32.mrb[8].mxu1 }
 0x106   : > { %v667_v17 = vpop.f32.mrb[9].mxu0  ;;  %v1287_v30 = vmul.f32 %v2014_v13, %v2014_v13  ;;  %v2319_v33 = vpop.f32.mrb[9].mxu1 }
 0x107   : > { %v1218_v19 = vadd.f32 %v1217_v14, %v667_v17  ;;  %v1285_v20 = vmul.f32 %v667_v17, %v667_v17  ;;  %v1347_v21 = vadd.f32 %v1346_v12, %v1284_v11  ;;  %v2015_v22 = vpop.f32.mrb[10].mxu0  ;;  %v2321_v34 = vpop.f32.mrb[10].mxu1 }
 0x108   : > { %v1797_v23 = vpack.c.bf16 %v2015_v22, %v2014_v13  ;;  %v670_v24 = vpop.f32.mrb[11].mxu0  ;;  %v1288_v35 = vmul.f32 %v2015_v22, %v2015_v22  ;;  %v1877_v39 = vpack.c.bf16 %v2321_v34, %v2316_v29  ;;  %v2325_v40 = vpop.f32.mrb[11].mxu1 }
 0x109   : > { %v1348_v25 = vadd.f32 %v1347_v21, %v1285_v20  ;;  %v1792_v26 = vpack.c.bf16 %v670_v24, %v667_v17  ;;  %v1219_v27 = vadd.f32 %v1218_v19, %v670_v24  ;;  %v1286_v28 = vmul.f32 %v670_v24, %v670_v24 }
 0x10a   : > { %1933 = vst [vmem:[%s2281_s26 + $0x28] sm:$0xff] %v1797_v23   ;;  %v1872_v42 = vpack.c.bf16 %v2325_v40, %v2319_v33  ;;  %1949 = vst [vmem:[%s2281_s26 + $0xa8] sm:$0xff] %v1877_v39  }
 0x10b   : > { %1932 = vst [vmem:[%s2281_s26 + $0x20] sm:$0xff] %v1792_v26   ;;  %v1220_v31 = vadd.f32 %v2014_v13, %v1219_v27  ;;  %v1349_v32 = vadd.f32 %v1348_v25, %v1286_v28 }
 0x10c   : > { %1948 = vst [vmem:[%s2281_s26 + $0xa0] sm:$0xff] %v1872_v42  }
 0x10d   : > { %v1350_v36 = vadd.f32 %v1349_v32, %v1287_v30  ;;  %v2018_v37 = vpop.f32.mrb[12].mxu0  ;;  %v1221_v38 = vadd.f32 %v2015_v22, %v1220_v31  ;;  %v2332_v57 = vpop.f32.mrb[12].mxu1 }
 0x10e   : > { %v683_v41 = vpop.f32.mrb[13].mxu0  ;;  %v1291_v58 = vmul.f32 %v2018_v37, %v2018_v37  ;;  %v2335_v61 = vpop.f32.mrb[13].mxu1 }
 0x10f   : > { %v1222_v43 = vadd.f32 %v1221_v38, %v683_v41  ;;  %v1289_v44 = vmul.f32 %v683_v41, %v683_v41  ;;  %v1351_v46 = vadd.f32 %v1350_v36, %v1288_v35  ;;  %v2019_v47 = vpop.f32.mrb[14].mxu0  ;;  %v2337_v62 = vpop.f32.mrb[14].mxu1 }
 0x110   : > { %v1807_v48 = vpack.c.bf16 %v2019_v47, %v2018_v37  ;;  %v686_v51 = vpop.f32.mrb[15].mxu0  ;;  %v1292_v63 = vmul.f32 %v2019_v47, %v2019_v47  ;;  %v1887_v3 = vpack.c.bf16 %v2337_v62, %v2332_v57  ;;  %v2341_v4 = vpop.f32.mrb[15].mxu1 }
 0x111   : > { %v1352_v52 = vadd.f32 %v1351_v46, %v1289_v44  ;;  %v1802_v53 = vpack.c.bf16 %v686_v51, %v683_v41  ;;  %v1223_v54 = vadd.f32 %v1222_v43, %v686_v51  ;;  %v1290_v55 = vmul.f32 %v686_v51, %v686_v51 }
 0x112   : > { %1935 = vst [vmem:[%s2281_s26 + $0x38] sm:$0xff] %v1807_v48   ;;  %v1882_v7 = vpack.c.bf16 %v2341_v4, %v2335_v61  ;;  %1951 = vst [vmem:[%s2281_s26 + $0xb8] sm:$0xff] %v1887_v3  }
 0x113   : > { %1934 = vst [vmem:[%s2281_s26 + $0x30] sm:$0xff] %v1802_v53   ;;  %v1224_v59 = vadd.f32 %v2018_v37, %v1223_v54  ;;  %v1353_v60 = vadd.f32 %v1352_v52, %v1290_v55 }
 0x114   : > { %1950 = vst [vmem:[%s2281_s26 + $0xb0] sm:$0xff] %v1882_v7  }
 0x115   : > { %v1354_v0 = vadd.f32 %v1353_v60, %v1291_v58  ;;  %v2022_v1 = vpop.f32.mrb[16].mxu0  ;;  %v1225_v2 = vadd.f32 %v2019_v47, %v1224_v59  ;;  %v2348_v21 = vpop.f32.mrb[16].mxu1 }
 0x116   : > { %v699_v6 = vpop.f32.mrb[17].mxu0  ;;  %v1295_v22 = vmul.f32 %v2022_v1, %v2022_v1  ;;  %v2351_v25 = vpop.f32.mrb[17].mxu1 }
 0x117   : > { %v1226_v8 = vadd.f32 %v1225_v2, %v699_v6  ;;  %v1293_v11 = vmul.f32 %v699_v6, %v699_v6  ;;  %v1355_v12 = vadd.f32 %v1354_v0, %v1292_v63  ;;  %v2023_v13 = vpop.f32.mrb[18].mxu0  ;;  %v2353_v26 = vpop.f32.mrb[18].mxu1 }
 0x118   : > { %v1817_v14 = vpack.c.bf16 %v2023_v13, %v2022_v1  ;;  %v702_v15 = vpop.f32.mrb[19].mxu0  ;;  %v1296_v27 = vmul.f32 %v2023_v13, %v2023_v13  ;;  %v1897_v32 = vpack.c.bf16 %v2353_v26, %v2348_v21  ;;  %v2357_v35 = vpop.f32.mrb[19].mxu1 }
 0x119   : > { %v1356_v17 = vadd.f32 %v1355_v12, %v1293_v11  ;;  %v1812_v18 = vpack.c.bf16 %v702_v15, %v699_v6  ;;  %v1227_v19 = vadd.f32 %v1226_v8, %v702_v15  ;;  %v1294_v20 = vmul.f32 %v702_v15, %v702_v15 }
 0x11a   : > { %1937 = vst [vmem:[%s2281_s26 + $0x48] sm:$0xff] %v1817_v14   ;;  %v1892_v37 = vpack.c.bf16 %v2357_v35, %v2351_v25  ;;  %1953 = vst [vmem:[%s2281_s26 + $0xc8] sm:$0xff] %v1897_v32  }
 0x11b   : > { %1936 = vst [vmem:[%s2281_s26 + $0x40] sm:$0xff] %v1812_v18   ;;  %v1228_v23 = vadd.f32 %v2022_v1, %v1227_v19  ;;  %v1357_v24 = vadd.f32 %v1356_v17, %v1294_v20 }
 0x11c   : > { %1952 = vst [vmem:[%s2281_s26 + $0xc0] sm:$0xff] %v1892_v37  }
 0x11d   : > { %v1358_v28 = vadd.f32 %v1357_v24, %v1295_v22  ;;  %v2026_v30 = vpop.f32.mrb[20].mxu0  ;;  %v1229_v31 = vadd.f32 %v2023_v13, %v1228_v23  ;;  %v2364_v52 = vpop.f32.mrb[20].mxu1 }
 0x11e   : > { %v715_v36 = vpop.f32.mrb[21].mxu0  ;;  %v1299_v53 = vmul.f32 %v2026_v30, %v2026_v30  ;;  %v2367_v58 = vpop.f32.mrb[21].mxu1 }
 0x11f   : > { %v1230_v38 = vadd.f32 %v1229_v31, %v715_v36  ;;  %v1297_v39 = vmul.f32 %v715_v36, %v715_v36  ;;  %v1359_v41 = vadd.f32 %v1358_v28, %v1296_v27  ;;  %v2027_v42 = vpop.f32.mrb[22].mxu0  ;;  %v2369_v59 = vpop.f32.mrb[22].mxu1 }
 0x120   : > { %v1827_v43 = vpack.c.bf16 %v2027_v42, %v2026_v30  ;;  %v718_v44 = vpop.f32.mrb[23].mxu0  ;;  %v1300_v60 = vmul.f32 %v2027_v42, %v2027_v42  ;;  %v1907_v2 = vpack.c.bf16 %v2369_v59, %v2364_v52  ;;  %v2373_v3 = vpop.f32.mrb[23].mxu1 }
 0x121   : > { %v1360_v46 = vadd.f32 %v1359_v41, %v1297_v39  ;;  %v1822_v47 = vpack.c.bf16 %v718_v44, %v715_v36  ;;  %v1231_v48 = vadd.f32 %v1230_v38, %v718_v44  ;;  %v1298_v51 = vmul.f32 %v718_v44, %v718_v44 }
 0x122   : > { %1939 = vst [vmem:[%s2281_s26 + $0x58] sm:$0xff] %v1827_v43   ;;  %v1902_v7 = vpack.c.bf16 %v2373_v3, %v2367_v58  ;;  %1955 = vst [vmem:[%s2281_s26 + $0xd8] sm:$0xff] %v1907_v2  }
 0x123   : > { %1938 = vst [vmem:[%s2281_s26 + $0x50] sm:$0xff] %v1822_v47   ;;  %v1232_v54 = vadd.f32 %v2026_v30, %v1231_v48  ;;  %v1361_v55 = vadd.f32 %v1360_v46, %v1298_v51 }
 0x124   : > { %1954 = vst [vmem:[%s2281_s26 + $0xd0] sm:$0xff] %v1902_v7   ;;  %v1309_v7 = vmul.f32 %v2287_v49, %v2287_v49 }
 0x125   : > { %v1362_v63 = vadd.f32 %v1361_v55, %v1299_v53  ;;  %v2030_v0 = vpop.f32.mrb[24].mxu0  ;;  %v1233_v1 = vadd.f32 %v2027_v42, %v1232_v54  ;;  %v2380_v22 = vpop.f32.mrb[24].mxu1 }
 0x126   : > { %v731_v6 = vpop.f32.mrb[25].mxu0  ;;  %v1303_v23 = vmul.f32 %v2030_v0, %v2030_v0  ;;  %v2383_v28 = vpop.f32.mrb[25].mxu1 }
 0x127   : > { %v1234_v8 = vadd.f32 %v1233_v1, %v731_v6  ;;  %v1301_v11 = vmul.f32 %v731_v6, %v731_v6  ;;  %v1363_v12 = vadd.f32 %v1362_v63, %v1300_v60  ;;  %v2031_v13 = vpop.f32.mrb[26].mxu0  ;;  %v2385_v30 = vpop.f32.mrb[26].mxu1 }
 0x128   : > { %v1837_v14 = vpack.c.bf16 %v2031_v13, %v2030_v0  ;;  %v734_v15 = vpop.f32.mrb[27].mxu0  ;;  %v1304_v31 = vmul.f32 %v2031_v13, %v2031_v13  ;;  %v1917_v38 = vpack.c.bf16 %v2385_v30, %v2380_v22  ;;  %v2389_v39 = vpop.f32.mrb[27].mxu1 }
 0x129   : > { %v1364_v17 = vadd.f32 %v1363_v12, %v1301_v11  ;;  %v1832_v18 = vpack.c.bf16 %v734_v15, %v731_v6  ;;  %v1235_v19 = vadd.f32 %v1234_v8, %v734_v15  ;;  %v1302_v20 = vmul.f32 %v734_v15, %v734_v15 }
 0x12a   : > { %1941 = vst [vmem:[%s2281_s26 + $0x68] sm:$0xff] %v1837_v14   ;;  %v1912_v42 = vpack.c.bf16 %v2389_v39, %v2383_v28  ;;  %1957 = vst [vmem:[%s2281_s26 + $0xe8] sm:$0xff] %v1917_v38   ;;  %v1313_v38 = vmul.f32 %v2303_v9, %v2303_v9 }
 0x12b   : > { %1940 = vst [vmem:[%s2281_s26 + $0x60] sm:$0xff] %v1832_v18   ;;  %v1236_v24 = vadd.f32 %v2030_v0, %v1235_v19  ;;  %v1365_v27 = vadd.f32 %v1364_v17, %v1302_v20 }
 0x12c   : > { %1956 = vst [vmem:[%s2281_s26 + $0xe0] sm:$0xff] %v1912_v42  }
 0x12d   : > { %v1366_v32 = vadd.f32 %v1365_v27, %v1303_v23  ;;  %v2034_v36 = vpop.f32.mrb[28].mxu0  ;;  %v1237_v37 = vadd.f32 %v2031_v13, %v1236_v24  ;;  %v2396_v63 = vpop.f32.mrb[28].mxu1  ;;  %v1310_v24 = vmul.f32 %v2293_v56, %v2293_v56  ;;  %v1311_v27 = vmul.f32 %v2284_v45, %v2284_v45 }
 0x12e   : > { %v747_v41 = vpop.f32.mrb[29].mxu0  ;;  %v1307_v0 = vmul.f32 %v2034_v36, %v2034_v36  ;;  %v2399_v6 = vpop.f32.mrb[29].mxu1 }
 0x12f   : > { %v1238_v43 = vadd.f32 %v1237_v37, %v747_v41  ;;  %v1305_v44 = vmul.f32 %v747_v41, %v747_v41  ;;  %v1367_v46 = vadd.f32 %v1366_v32, %v1304_v31  ;;  %v2035_v47 = vpop.f32.mrb[30].mxu0  ;;  %v2403_v8 = vpop.f32.mrb[30].mxu1 }
 0x130   : > { %v1847_v48 = vpack.c.bf16 %v2035_v47, %v2034_v36  ;;  %v750_v51 = vpop.f32.mrb[31].mxu0  ;;  %v1308_v11 = vmul.f32 %v2035_v47, %v2035_v47  ;;  %v1927_v14 = vpack.c.bf16 %v2403_v8, %v2396_v63  ;;  %v2407_v15 = vpop.f32.mrb[31].mxu1 }
 0x131   : > { %v1368_v53 = vadd.f32 %v1367_v46, %v1305_v44  ;;  %v1842_v54 = vpack.c.bf16 %v750_v51, %v747_v41  ;;  %v1239_v55 = vadd.f32 %v1238_v43, %v750_v51  ;;  %v1306_v60 = vmul.f32 %v750_v51, %v750_v51 }
 0x132   : > { %1943 = vst [vmem:[%s2281_s26 + $0x78] sm:$0xff] %v1847_v48   ;;  %v1922_v17 = vpack.c.bf16 %v2407_v15, %v2399_v6  ;;  %1959 = vst [vmem:[%s2281_s26 + $0xf8] sm:$0xff] %v1927_v14   ;;  %v1314_v44 = vmul.f32 %v2309_v16, %v2309_v16  ;;  %v1322_v14 = vmul.f32 %v2341_v4, %v2341_v4 }
 0x133   : > { %1942 = vst [vmem:[%s2281_s26 + $0x70] sm:$0xff] %v1842_v54   ;;  %v1240_v1 = vadd.f32 %v2034_v36, %v1239_v55  ;;  %v1369_v2 = vadd.f32 %v1368_v53, %v1306_v60  ;;  %v1312_v36 = vmul.f32 %v2289_v50, %v2289_v50  ;;  %v1318_v60 = vmul.f32 %v2325_v40, %v2325_v40 }
 0x134   : > { %1958 = vst [vmem:[%s2281_s26 + $0xf0] sm:$0xff] %v1922_v17  }
 0x135   : > { %v1370_v12 = vadd.f32 %v1369_v2, %v1307_v0  ;;  %v1241_v13 = vadd.f32 %v2035_v47, %v1240_v1 }
 0x137   : > { %v1242_v18 = vadd.f32 %v1241_v13, %v2287_v49  ;;  %v1371_v19 = vadd.f32 %v1370_v12, %v1308_v11 }
 0x139   : > { %v1372_v20 = vadd.f32 %v1371_v19, %v1309_v7  ;;  %v1243_v23 = vadd.f32 %v1242_v18, %v2293_v56 }
 0x13b   : > { %v1244_v31 = vadd.f32 %v2284_v45, %v1243_v23  ;;  %v1373_v32 = vadd.f32 %v1372_v20, %v1310_v24  ;;  %v1315_v45 = vmul.f32 %v2300_v5, %v2300_v5 }
 0x13d   : > { %v1374_v37 = vadd.f32 %v1373_v32, %v1311_v27  ;;  %v1245_v49 = vadd.f32 %v2289_v50, %v1244_v31  ;;  %v1316_v50 = vmul.f32 %v2305_v10, %v2305_v10  ;;  %v1326_v31 = vmul.f32 %v2357_v35, %v2357_v35 }
 0x13f   : > { %v1246_v41 = vadd.f32 %v1245_v49, %v2303_v9  ;;  %v1375_v42 = vadd.f32 %v1374_v37, %v1312_v36  ;;  %v1317_v9 = vmul.f32 %v2319_v33, %v2319_v33 }
 0x141   : > { %v1376_v43 = vadd.f32 %v1375_v42, %v1313_v38  ;;  %v1247_v56 = vadd.f32 %v1246_v41, %v2309_v16 }
 0x143   : > { %v1248_v46 = vadd.f32 %v2300_v5, %v1247_v56  ;;  %v1377_v47 = vadd.f32 %v1376_v43, %v1314_v44  ;;  %v1319_v5 = vmul.f32 %v2316_v29, %v2316_v29  ;;  %v1330_v43 = vmul.f32 %v2373_v3, %v2373_v3 }
 0x145   : > { %v1378_v48 = vadd.f32 %v1377_v47, %v1315_v45  ;;  %v1249_v51 = vadd.f32 %v2305_v10, %v1248_v46  ;;  %v1320_v10 = vmul.f32 %v2321_v34, %v2321_v34 }
 0x147   : > { %v1250_v53 = vadd.f32 %v1249_v51, %v2319_v33  ;;  %v1379_v54 = vadd.f32 %v1378_v48, %v1316_v50  ;;  %v1321_v33 = vmul.f32 %v2335_v61, %v2335_v61  ;;  %v1334_v51 = vmul.f32 %v2389_v39, %v2389_v39 }
 0x149   : > { %v1380_v55 = vadd.f32 %v1379_v54, %v1317_v9  ;;  %v1251_v16 = vadd.f32 %v1250_v53, %v2325_v40 }
 0x14b   : > { %v1252_v0 = vadd.f32 %v2316_v29, %v1251_v16  ;;  %v1381_v1 = vadd.f32 %v1380_v55, %v1318_v60  ;;  %v1323_v29 = vmul.f32 %v2332_v57, %v2332_v57 }
 0x14d   : > { %v1382_v2 = vadd.f32 %v1381_v1, %v1319_v5  ;;  %v1253_v7 = vadd.f32 %v2321_v34, %v1252_v0  ;;  %v1324_v34 = vmul.f32 %v2337_v62, %v2337_v62  ;;  %v1338_v0 = vmul.f32 %v2407_v15, %v2407_v15 }
 0x14f   : > { %v1254_v11 = vadd.f32 %v1253_v7, %v2335_v61  ;;  %v1383_v12 = vadd.f32 %v1382_v2, %v1320_v10  ;;  %v1325_v61 = vmul.f32 %v2351_v25, %v2351_v25 }
 0x151   : > { %v1384_v13 = vadd.f32 %v1383_v12, %v1321_v33  ;;  %v1255_v40 = vadd.f32 %v1254_v11, %v2341_v4 }
 0x153   : > { %v1256_v17 = vadd.f32 %v2332_v57, %v1255_v40  ;;  %v1385_v18 = vadd.f32 %v1384_v13, %v1322_v14  ;;  %v1327_v57 = vmul.f32 %v2348_v21, %v2348_v21 }
 0x155   : > { %v1386_v19 = vadd.f32 %v1385_v18, %v1323_v29  ;;  %v1257_v20 = vadd.f32 %v2337_v62, %v1256_v17  ;;  %v1328_v62 = vmul.f32 %v2353_v26, %v2353_v26 }
 0x157   : > { %v1258_v23 = vadd.f32 %v1257_v20, %v2351_v25  ;;  %v1387_v24 = vadd.f32 %v1386_v19, %v1324_v34  ;;  %v1329_v25 = vmul.f32 %v2367_v58, %v2367_v58 }
 0x159   : > { %v1388_v27 = vadd.f32 %v1387_v24, %v1325_v61  ;;  %v1259_v4 = vadd.f32 %v1258_v23, %v2357_v35 }
 0x15b   : > { %v1260_v32 = vadd.f32 %v2348_v21, %v1259_v4  ;;  %v1389_v36 = vadd.f32 %v1388_v27, %v1326_v31  ;;  %v1331_v21 = vmul.f32 %v2364_v52, %v2364_v52 }
 0x15d   : > { %v1390_v37 = vadd.f32 %v1389_v36, %v1327_v57  ;;  %v1261_v49 = vadd.f32 %v2353_v26, %v1260_v32  ;;  %v1332_v26 = vmul.f32 %v2369_v59, %v2369_v59 }
 0x15f   : > { %v1262_v38 = vadd.f32 %v1261_v49, %v2367_v58  ;;  %v1391_v41 = vadd.f32 %v1390_v37, %v1328_v62  ;;  %v1333_v58 = vmul.f32 %v2383_v28, %v2383_v28 }
 0x161   : > { %v1392_v42 = vadd.f32 %v1391_v41, %v1329_v25  ;;  %v1263_v35 = vadd.f32 %v1262_v38, %v2373_v3 }
 0x163   : > { %v1264_v56 = vadd.f32 %v2364_v52, %v1263_v35  ;;  %v1393_v44 = vadd.f32 %v1392_v42, %v1330_v43  ;;  %v1335_v52 = vmul.f32 %v2380_v22, %v2380_v22 }
 0x165   : > { %v1394_v45 = vadd.f32 %v1393_v44, %v1331_v21  ;;  %v1265_v46 = vadd.f32 %v2369_v59, %v1264_v56  ;;  %v1336_v59 = vmul.f32 %v2385_v30, %v2385_v30 }
 0x167   : > { %v1266_v47 = vadd.f32 %v1265_v46, %v2383_v28  ;;  %v1395_v50 = vadd.f32 %v1394_v45, %v1332_v26  ;;  %v1337_v28 = vmul.f32 %v2399_v6, %v2399_v6 }
 0x169   : > { %v1396_v48 = vadd.f32 %v1395_v50, %v1333_v58  ;;  %v1267_v3 = vadd.f32 %v1266_v47, %v2389_v39 }
 0x16b   : > { %v1268_v9 = vadd.f32 %v2380_v22, %v1267_v3  ;;  %v1397_v53 = vadd.f32 %v1396_v48, %v1334_v51  ;;  %v1339_v22 = vmul.f32 %v2396_v63, %v2396_v63 }
 0x16d   : > { %v1398_v54 = vadd.f32 %v1397_v53, %v1335_v52  ;;  %v1269_v55 = vadd.f32 %v2385_v30, %v1268_v9  ;;  %v1340_v30 = vmul.f32 %v2403_v8, %v2403_v8 }
 0x16f   : > { %v1270_v16 = vadd.f32 %v1269_v55, %v2399_v6  ;;  %v1399_v60 = vadd.f32 %v1398_v54, %v1336_v59 }
 0x171   : > { %v1400_v5 = vadd.f32 %v1399_v60, %v1337_v28  ;;  %v1271_v39 = vadd.f32 %v1270_v16, %v2407_v15 }
 0x173   : > { %v1272_v1 = vadd.f32 %v2396_v63, %v1271_v39  ;;  %v1401_v10 = vadd.f32 %v1400_v5, %v1338_v0 }
 0x175   : > { %v1273_v2 = vadd.f32 %v2403_v8, %v1272_v1  ;;  %v1402_v6 = vadd.f32 %v1401_v10, %v1339_v22 }
 0x177   : > { %v1403_v7 = vadd.f32 %v1402_v6, %v1340_v30  ;;  %v1410_v33 = vrot.slane %v1273_v2, 4 }
 0x179   : > { %v1411_v11 = vadd.f32 %v1410_v33, %v1273_v2  ;;  %v1417_v12 = vrot.slane %v1403_v7, 4 }
 0x17b   : > { %v1412_v13 = vrot.slane %v1411_v11, 2  ;;  %v1418_v40 = vadd.f32 %v1417_v12, %v1403_v7 }
 0x17d   : > { %v1413_v15 = vadd.f32 %v1412_v13, %v1411_v11  ;;  %v1419_v14 = vrot.slane %v1418_v40, 2 }
 0x17f   : > { %v1414_v29 = vrot.slane %v1413_v15, 1  ;;  %v1420_v17 = vadd.f32 %v1419_v14, %v1418_v40 }
 0x181   : > { %v1421_v18 = vrot.slane %v1420_v17, 1  ;;  %v1415_v63 = vadd.f32 %v1414_v29, %v1413_v15 }
 0x183   : > { %v1422_v8 = vadd.f32 %v1421_v18, %v1420_v17 }
 0x185   : > { %v1424_v34 = vsel %vm1423_vm1, %v1415_v63, %v1422_v8 }
 0x186   : > { %1425 = vst [vmem:[%s240_s30] sm:$0x3] %v1424_v34 }
 0x187 PF: > { %s14_s14 = sadd.s32 1, %s2158_s14   ;;  %s2524_s12 = smov %s2154_s13 }
 0x188   : > { %p11_p5 = scmp.ge.s32.totalorder %s14_s14, 6   ;;  %s2525_s13 = smov %s2527_s15 }
 0x18a   :  { %13 = sbr.rel (!%p11_p5) target bundleno = 2 (0x2), region = 81 }

// kernel: generator_forward.16
= control target key start
LH: loop header
LB: loop body
LE: loop exit
PB: predicated region body
PF: predicated region fallthrough
CT: control target
= control target key end

     0   :  { %s5846_s0 = inlined_call_operand.vmem [shape: bf16[2048,128], index: 0, kind: input, shape index: {}]   ;;  %s5847_s1 = inlined_call_operand.vmem [shape: f32[1,128], index: 1, kind: input, shape index: {}]   ;;  %s5848_s2 = inlined_call_operand.vmem [shape: f32[1,128], index: 2, kind: input, shape index: {}]   ;;  %s5849_s3 = inlined_call_operand.vmem [shape: bf16[2048,128], index: 3, kind: output, shape index: {}]  }
   0x1   :  { %v3107_v0 = vld [vmem:[%s5846_s0] sm:$0xff]   ;;  %v4258_v4 = vld [vmem:[%s5846_s0 + $0x8] sm:$0xff]   ;;  %v4259_v5 = vld [vmem:[%s5846_s0 + $0x10] sm:$0xff]  }
   0x2   :  { %v4542_v1 = vld [vmem:[%s5847_s1] ss:$0 sm:$0xff]  ;;  %v3108_v2 = vunpack.c.l.bf16 %v3107_v0  ;;  %v3109_v3 = vunpack.c.h.bf16 %v3107_v0  ;;  %v4260_v6 = vld [vmem:[%s5846_s0 + $0x18] sm:$0xff]   ;;  %v3112_v8 = vunpack.c.l.bf16 %v4258_v4  ;;  %v3113_v9 = vunpack.c.h.bf16 %v4258_v4  ;;  %v4262_v33 = vld [vmem:[%s5846_s0 + $0x28] sm:$0xff]  }
   0x3   :  { %v4556_v7 = vld [vmem:[%s5848_s2] ss:$0 sm:$0xff]  ;;  %v3116_v10 = vunpack.c.l.bf16 %v4259_v5  ;;  %v3117_v11 = vunpack.c.h.bf16 %v4259_v5  ;;  %v3120_v14 = vunpack.c.l.bf16 %v4260_v6  ;;  %v3121_v15 = vunpack.c.h.bf16 %v4260_v6  ;;  %v4263_v38 = vld [vmem:[%s5846_s0 + $0x30] sm:$0xff]   ;;  %v4264_v43 = vld [vmem:[%s5846_s0 + $0x38] sm:$0xff]  }
   0x4   :  { %v533_v12 = vmul.f32 %v3108_v2, %v4542_v1  ;;  %v534_v13 = vmul.f32 %v3109_v3, %v4542_v1  ;;  %v535_v16 = vmul.f32 %v3112_v8, %v4542_v1  ;;  %v536_v17 = vmul.f32 %v3113_v9, %v4542_v1  ;;  %v4261_v28 = vld [vmem:[%s5846_s0 + $0x20] sm:$0xff]  }
   0x5   :  { %v537_v18 = vmul.f32 %v3116_v10, %v4542_v1  ;;  %v538_v19 = vmul.f32 %v3117_v11, %v4542_v1  ;;  %v539_v22 = vmul.f32 %v3120_v14, %v4542_v1  ;;  %v540_v23 = vmul.f32 %v3121_v15, %v4542_v1  ;;  %v4265_v0 = vld [vmem:[%s5846_s0 + $0x40] sm:$0xff]   ;;  %v4266_v11 = vld [vmem:[%s5846_s0 + $0x48] sm:$0xff]  }
   0x6   :  { %v796_v20 = vadd.f32 %v4556_v7, %v533_v12  ;;  %v797_v21 = vadd.f32 %v4556_v7, %v534_v13  ;;  %v798_v24 = vadd.f32 %v4556_v7, %v535_v16  ;;  %v799_v25 = vadd.f32 %v4556_v7, %v536_v17  ;;  %v4267_v16 = vld [vmem:[%s5846_s0 + $0x50] sm:$0xff]  }
   0x7   :  { %v800_v26 = vadd.f32 %v4556_v7, %v537_v18  ;;  %v801_v27 = vadd.f32 %v4556_v7, %v538_v19  ;;  %v802_v31 = vadd.f32 %v4556_v7, %v539_v22  ;;  %v803_v32 = vadd.f32 %v4556_v7, %v540_v23 }
   0x8   :  { %v1052_v29 = vmax.f32 %v796_v20, 0.0  ;;  %v1053_v30 = vmax.f32 %v797_v21, 0.0  ;;  %v1054_v34 = vmax.f32 %v798_v24, 0.0  ;;  %v1055_v35 = vmax.f32 %v799_v25, 0.0  ;;  %v4268_v25 = vld [vmem:[%s5846_s0 + $0x58] sm:$0xff]  }
   0x9   :  { %v1056_v36 = vmax.f32 %v800_v26, 0.0  ;;  %v1057_v37 = vmax.f32 %v801_v27, 0.0  ;;  %v1058_v40 = vmax.f32 %v802_v31, 0.0  ;;  %v1059_v41 = vmax.f32 %v803_v32, 0.0 }
   0xa   :  { %v3621_v39 = vpack.c.bf16 %v1053_v30, %v1052_v29  ;;  %v3124_v42 = vunpack.c.l.bf16 %v4261_v28  ;;  %v3626_v44 = vpack.c.bf16 %v1055_v35, %v1054_v34  ;;  %v3125_v46 = vunpack.c.h.bf16 %v4261_v28 }
   0xb   :  { %v3631_v45 = vpack.c.bf16 %v1057_v37, %v1056_v36  ;;  %v3128_v47 = vunpack.c.l.bf16 %v4262_v33  ;;  %v3636_v48 = vpack.c.bf16 %v1059_v41, %v1058_v40  ;;  %v3129_v50 = vunpack.c.h.bf16 %v4262_v33 }
   0xc   :  { %3622 = vst [vmem:[%s5849_s3] sm:$0xff] %v3621_v39   ;;  %v541_v49 = vmul.f32 %v3124_v42, %v4542_v1  ;;  %v3132_v51 = vunpack.c.l.bf16 %v4263_v38  ;;  %4385 = vst [vmem:[%s5849_s3 + $0x8] sm:$0xff] %v3626_v44   ;;  %v542_v52 = vmul.f32 %v3125_v46, %v4542_v1  ;;  %v3133_v54 = vunpack.c.h.bf16 %v4263_v38  ;;  %v4269_v38 = vld [vmem:[%s5846_s0 + $0x60] sm:$0xff]  }
   0xd   :  { %4386 = vst [vmem:[%s5849_s3 + $0x10] sm:$0xff] %v3631_v45   ;;  %v543_v53 = vmul.f32 %v3128_v47, %v4542_v1  ;;  %v3136_v55 = vunpack.c.l.bf16 %v4264_v43  ;;  %4387 = vst [vmem:[%s5849_s3 + $0x18] sm:$0xff] %v3636_v48   ;;  %v544_v57 = vmul.f32 %v3129_v50, %v4542_v1  ;;  %v3137_v59 = vunpack.c.h.bf16 %v4264_v43 }
   0xe   :  { %v804_v56 = vadd.f32 %v4556_v7, %v541_v49  ;;  %v545_v58 = vmul.f32 %v3132_v51, %v4542_v1  ;;  %v805_v60 = vadd.f32 %v4556_v7, %v542_v52  ;;  %v546_v62 = vmul.f32 %v3133_v54, %v4542_v1  ;;  %v4270_v51 = vld [vmem:[%s5846_s0 + $0x68] sm:$0xff]  }
   0xf   :  { %v806_v61 = vadd.f32 %v4556_v7, %v543_v53  ;;  %v547_v63 = vmul.f32 %v3136_v55, %v4542_v1  ;;  %v807_v3 = vadd.f32 %v4556_v7, %v544_v57  ;;  %v548_v5 = vmul.f32 %v3137_v59, %v4542_v1 }
  0x10   :  { %v1060_v2 = vmax.f32 %v804_v56, 0.0  ;;  %v808_v4 = vadd.f32 %v4556_v7, %v545_v58  ;;  %v1061_v6 = vmax.f32 %v805_v60, 0.0  ;;  %v809_v9 = vadd.f32 %v4556_v7, %v546_v62  ;;  %v4271_v60 = vld [vmem:[%s5846_s0 + $0x70] sm:$0xff]  }
  0x11   :  { %v1062_v8 = vmax.f32 %v806_v61, 0.0  ;;  %v810_v10 = vadd.f32 %v4556_v7, %v547_v63  ;;  %v1063_v12 = vmax.f32 %v807_v3, 0.0  ;;  %v811_v14 = vadd.f32 %v4556_v7, %v548_v5 }
  0x12   :  { %v1064_v13 = vmax.f32 %v808_v4, 0.0  ;;  %v3140_v15 = vunpack.c.l.bf16 %v4265_v0  ;;  %v3641_v17 = vpack.c.bf16 %v1061_v6, %v1060_v2  ;;  %v1065_v18 = vmax.f32 %v809_v9, 0.0  ;;  %v4272_v2 = vld [vmem:[%s5846_s0 + $0x78] sm:$0xff]  }
  0x13   :  { %v1066_v19 = vmax.f32 %v810_v10, 0.0  ;;  %v3141_v20 = vunpack.c.h.bf16 %v4265_v0  ;;  %v3646_v21 = vpack.c.bf16 %v1063_v12, %v1062_v8  ;;  %v1067_v22 = vmax.f32 %v811_v14, 0.0  ;;  %v4273_v12 = vld [vmem:[%s5846_s0 + $0x80] sm:$0xff]  }
  0x14   :  { %v549_v23 = vmul.f32 %v3140_v15, %v4542_v1  ;;  %v3144_v24 = vunpack.c.l.bf16 %v4266_v11  ;;  %4388 = vst [vmem:[%s5849_s3 + $0x20] sm:$0xff] %v3641_v17   ;;  %v3651_v26 = vpack.c.bf16 %v1065_v18, %v1064_v13  ;;  %v3145_v28 = vunpack.c.h.bf16 %v4266_v11 }
  0x15   :  { %v550_v27 = vmul.f32 %v3141_v20, %v4542_v1  ;;  %v3148_v29 = vunpack.c.l.bf16 %v4267_v16  ;;  %4389 = vst [vmem:[%s5849_s3 + $0x28] sm:$0xff] %v3646_v21   ;;  %v3656_v30 = vpack.c.bf16 %v1067_v22, %v1066_v19  ;;  %v3149_v33 = vunpack.c.h.bf16 %v4267_v16 }
  0x16   :  { %v812_v31 = vadd.f32 %v4556_v7, %v549_v23  ;;  %v551_v32 = vmul.f32 %v3144_v24, %v4542_v1  ;;  %4390 = vst [vmem:[%s5849_s3 + $0x30] sm:$0xff] %v3651_v26   ;;  %v552_v35 = vmul.f32 %v3145_v28, %v4542_v1  ;;  %v3152_v37 = vunpack.c.l.bf16 %v4268_v25 }
  0x17   :  { %v813_v34 = vadd.f32 %v4556_v7, %v550_v27  ;;  %v553_v36 = vmul.f32 %v3148_v29, %v4542_v1  ;;  %4391 = vst [vmem:[%s5849_s3 + $0x38] sm:$0xff] %v3656_v30   ;;  %v554_v41 = vmul.f32 %v3149_v33, %v4542_v1  ;;  %v3153_v42 = vunpack.c.h.bf16 %v4268_v25  ;;  %v4274_v29 = vld [vmem:[%s5846_s0 + $0x88] sm:$0xff]  }
  0x18   :  { %v1068_v39 = vmax.f32 %v812_v31, 0.0  ;;  %v814_v40 = vadd.f32 %v4556_v7, %v551_v32  ;;  %v815_v44 = vadd.f32 %v4556_v7, %v552_v35  ;;  %v555_v46 = vmul.f32 %v3152_v37, %v4542_v1 }
  0x19   :  { %v1069_v43 = vmax.f32 %v813_v34, 0.0  ;;  %v816_v45 = vadd.f32 %v4556_v7, %v553_v36  ;;  %v817_v48 = vadd.f32 %v4556_v7, %v554_v41  ;;  %v556_v49 = vmul.f32 %v3153_v42, %v4542_v1  ;;  %v4275_v34 = vld [vmem:[%s5846_s0 + $0x90] sm:$0xff]  }
  0x1a   :  { %v1070_v47 = vmax.f32 %v814_v40, 0.0  ;;  %v3156_v50 = vunpack.c.l.bf16 %v4269_v38  ;;  %v1071_v53 = vmax.f32 %v815_v44, 0.0  ;;  %v818_v55 = vadd.f32 %v4556_v7, %v555_v46 }
  0x1b   :  { %v3661_v52 = vpack.c.bf16 %v1069_v43, %v1068_v39  ;;  %v1072_v54 = vmax.f32 %v816_v45, 0.0  ;;  %v1073_v56 = vmax.f32 %v817_v48, 0.0  ;;  %v819_v57 = vadd.f32 %v4556_v7, %v556_v49  ;;  %v4276_v43 = vld [vmem:[%s5846_s0 + $0x98] sm:$0xff]  }
  0x1c   :  { %v3157_v58 = vunpack.c.h.bf16 %v4269_v38  ;;  %v557_v59 = vmul.f32 %v3156_v50, %v4542_v1  ;;  %v3666_v61 = vpack.c.bf16 %v1071_v53, %v1070_v47  ;;  %v1074_v62 = vmax.f32 %v818_v55, 0.0 }
  0x1d   :  { %4392 = vst [vmem:[%s5849_s3 + $0x40] sm:$0xff] %v3661_v52   ;;  %v3160_v63 = vunpack.c.l.bf16 %v4270_v51  ;;  %v3161_v0 = vunpack.c.h.bf16 %v4270_v51  ;;  %v3671_v3 = vpack.c.bf16 %v1073_v56, %v1072_v54  ;;  %v1075_v4 = vmax.f32 %v819_v57, 0.0  ;;  %v4277_v56 = vld [vmem:[%s5846_s0 + $0xa0] sm:$0xff]  }
  0x1e   :  { %v558_v5 = vmul.f32 %v3157_v58, %v4542_v1  ;;  %v820_v6 = vadd.f32 %v4556_v7, %v557_v59  ;;  %4393 = vst [vmem:[%s5849_s3 + $0x48] sm:$0xff] %v3666_v61   ;;  %v3164_v10 = vunpack.c.l.bf16 %v4271_v60  ;;  %v3165_v11 = vunpack.c.h.bf16 %v4271_v60 }
  0x1f   :  { %v559_v8 = vmul.f32 %v3160_v63, %v4542_v1  ;;  %v560_v9 = vmul.f32 %v3161_v0, %v4542_v1  ;;  %4394 = vst [vmem:[%s5849_s3 + $0x50] sm:$0xff] %v3671_v3   ;;  %v3676_v13 = vpack.c.bf16 %v1075_v4, %v1074_v62  ;;  %v3168_v16 = vunpack.c.l.bf16 %v4272_v2 }
  0x20   :  { %v821_v14 = vadd.f32 %v4556_v7, %v558_v5  ;;  %v1076_v15 = vmax.f32 %v820_v6, 0.0  ;;  %v561_v19 = vmul.f32 %v3164_v10, %v4542_v1  ;;  %v562_v20 = vmul.f32 %v3165_v11, %v4542_v1 }
  0x21   :  { %v822_v17 = vadd.f32 %v4556_v7, %v559_v8  ;;  %v823_v18 = vadd.f32 %v4556_v7, %v560_v9  ;;  %4395 = vst [vmem:[%s5849_s3 + $0x58] sm:$0xff] %v3676_v13   ;;  %v3169_v22 = vunpack.c.h.bf16 %v4272_v2  ;;  %v563_v23 = vmul.f32 %v3168_v16, %v4542_v1  ;;  %v4278_v2 = vld [vmem:[%s5846_s0 + $0xa8] sm:$0xff]   ;;  %v4279_v16 = vld [vmem:[%s5846_s0 + $0xb0] sm:$0xff]  }
  0x22   :  { %v1077_v21 = vmax.f32 %v821_v14, 0.0  ;;  %v3172_v24 = vunpack.c.l.bf16 %v4273_v12  ;;  %v824_v27 = vadd.f32 %v4556_v7, %v561_v19  ;;  %v825_v28 = vadd.f32 %v4556_v7, %v562_v20 }
  0x23   :  { %v1078_v25 = vmax.f32 %v822_v17, 0.0  ;;  %v1079_v26 = vmax.f32 %v823_v18, 0.0  ;;  %v564_v31 = vmul.f32 %v3169_v22, %v4542_v1  ;;  %v826_v32 = vadd.f32 %v4556_v7, %v563_v23 }
  0x24   :  { %v3681_v30 = vpack.c.bf16 %v1077_v21, %v1076_v15  ;;  %v3173_v33 = vunpack.c.h.bf16 %v4273_v12  ;;  %v1080_v36 = vmax.f32 %v824_v27, 0.0  ;;  %v1081_v37 = vmax.f32 %v825_v28, 0.0  ;;  %v4280_v21 = vld [vmem:[%s5846_s0 + $0xb8] sm:$0xff]  }
  0x25   :  { %v3686_v35 = vpack.c.bf16 %v1079_v26, %v1078_v25  ;;  %v565_v38 = vmul.f32 %v3172_v24, %v4542_v1  ;;  %v827_v39 = vadd.f32 %v4556_v7, %v564_v31  ;;  %v1082_v40 = vmax.f32 %v826_v32, 0.0 }
  0x26   :  { %4396 = vst [vmem:[%s5849_s3 + $0x60] sm:$0xff] %v3681_v30   ;;  %v566_v41 = vmul.f32 %v3173_v33, %v4542_v1  ;;  %v3176_v42 = vunpack.c.l.bf16 %v4274_v29  ;;  %v3691_v44 = vpack.c.bf16 %v1081_v37, %v1080_v36  ;;  %v3177_v46 = vunpack.c.h.bf16 %v4274_v29 }
  0x27   :  { %4397 = vst [vmem:[%s5849_s3 + $0x68] sm:$0xff] %v3686_v35   ;;  %v828_v45 = vadd.f32 %v4556_v7, %v565_v38  ;;  %v3180_v47 = vunpack.c.l.bf16 %v4275_v34  ;;  %v1083_v48 = vmax.f32 %v827_v39, 0.0  ;;  %v3181_v51 = vunpack.c.h.bf16 %v4275_v34  ;;  %v4281_v34 = vld [vmem:[%s5846_s0 + $0xc0] sm:$0xff]  }
  0x28   :  { %v829_v49 = vadd.f32 %v4556_v7, %v566_v41  ;;  %v567_v50 = vmul.f32 %v3176_v42, %v4542_v1  ;;  %4398 = vst [vmem:[%s5849_s3 + $0x70] sm:$0xff] %v3691_v44   ;;  %v568_v53 = vmul.f32 %v3177_v46, %v4542_v1  ;;  %v3184_v55 = vunpack.c.l.bf16 %v4276_v43 }
  0x29   :  { %v1084_v52 = vmax.f32 %v828_v45, 0.0  ;;  %v569_v54 = vmul.f32 %v3180_v47, %v4542_v1  ;;  %v3696_v57 = vpack.c.bf16 %v1083_v48, %v1082_v40  ;;  %v570_v60 = vmul.f32 %v3181_v51, %v4542_v1  ;;  %v4282_v47 = vld [vmem:[%s5846_s0 + $0xc8] sm:$0xff]  }
  0x2a   :  { %v1085_v58 = vmax.f32 %v829_v49, 0.0  ;;  %v830_v59 = vadd.f32 %v4556_v7, %v567_v50  ;;  %v831_v61 = vadd.f32 %v4556_v7, %v568_v53  ;;  %v3185_v63 = vunpack.c.h.bf16 %v4276_v43 }
  0x2b   :  { %v832_v62 = vadd.f32 %v4556_v7, %v569_v54  ;;  %v571_v0 = vmul.f32 %v3184_v55, %v4542_v1  ;;  %4399 = vst [vmem:[%s5849_s3 + $0x78] sm:$0xff] %v3696_v57   ;;  %v833_v5 = vadd.f32 %v4556_v7, %v570_v60  ;;  %v3188_v6 = vunpack.c.l.bf16 %v4277_v56 }
  0x2c   :  { %v3701_v3 = vpack.c.bf16 %v1085_v58, %v1084_v52  ;;  %v1086_v4 = vmax.f32 %v830_v59, 0.0  ;;  %v1087_v8 = vmax.f32 %v831_v61, 0.0  ;;  %v572_v10 = vmul.f32 %v3185_v63, %v4542_v1  ;;  %v4283_v52 = vld [vmem:[%s5846_s0 + $0xd0] sm:$0xff]   ;;  %v4284_v61 = vld [vmem:[%s5846_s0 + $0xd8] sm:$0xff]  }
  0x2d   :  { %v1088_v9 = vmax.f32 %v832_v62, 0.0  ;;  %v834_v11 = vadd.f32 %v4556_v7, %v571_v0  ;;  %v1089_v12 = vmax.f32 %v833_v5, 0.0  ;;  %v3189_v13 = vunpack.c.h.bf16 %v4277_v56 }
  0x2e   :  { %4400 = vst [vmem:[%s5849_s3 + $0x80] sm:$0xff] %v3701_v3   ;;  %v573_v14 = vmul.f32 %v3188_v6, %v4542_v1  ;;  %v3192_v15 = vunpack.c.l.bf16 %v4278_v2  ;;  %v3706_v17 = vpack.c.bf16 %v1087_v8, %v1086_v4  ;;  %v835_v18 = vadd.f32 %v4556_v7, %v572_v10 }
  0x2f   :  { %v1090_v19 = vmax.f32 %v834_v11, 0.0  ;;  %v3193_v20 = vunpack.c.h.bf16 %v4278_v2  ;;  %v3711_v22 = vpack.c.bf16 %v1089_v12, %v1088_v9  ;;  %v574_v23 = vmul.f32 %v3189_v13, %v4542_v1  ;;  %v4285_v12 = vld [vmem:[%s5846_s0 + $0xe0] sm:$0xff]  }
  0x30   :  { %v836_v24 = vadd.f32 %v4556_v7, %v573_v14  ;;  %v575_v25 = vmul.f32 %v3192_v15, %v4542_v1  ;;  %4401 = vst [vmem:[%s5849_s3 + $0x88] sm:$0xff] %v3706_v17   ;;  %v1091_v26 = vmax.f32 %v835_v18, 0.0  ;;  %v3196_v28 = vunpack.c.l.bf16 %v4279_v16 }
  0x31   :  { %v576_v27 = vmul.f32 %v3193_v20, %v4542_v1  ;;  %v3197_v29 = vunpack.c.h.bf16 %v4279_v16  ;;  %4402 = vst [vmem:[%s5849_s3 + $0x90] sm:$0xff] %v3711_v22   ;;  %v837_v30 = vadd.f32 %v4556_v7, %v574_v23  ;;  %v3200_v33 = vunpack.c.l.bf16 %v4280_v21 }
  0x32   :  { %v1092_v31 = vmax.f32 %v836_v24, 0.0  ;;  %v838_v32 = vadd.f32 %v4556_v7, %v575_v25  ;;  %v3716_v35 = vpack.c.bf16 %v1091_v26, %v1090_v19  ;;  %v577_v37 = vmul.f32 %v3196_v28, %v4542_v1 }
  0x33   :  { %v839_v36 = vadd.f32 %v4556_v7, %v576_v27  ;;  %v578_v38 = vmul.f32 %v3197_v29, %v4542_v1  ;;  %v1093_v39 = vmax.f32 %v837_v30, 0.0  ;;  %v3201_v41 = vunpack.c.h.bf16 %v4280_v21  ;;  %v4286_v21 = vld [vmem:[%s5846_s0 + $0xe8] sm:$0xff]  }
  0x34   :  { %v1094_v40 = vmax.f32 %v838_v32, 0.0  ;;  %v579_v42 = vmul.f32 %v3200_v33, %v4542_v1  ;;  %4403 = vst [vmem:[%s5849_s3 + $0x98] sm:$0xff] %v3716_v35   ;;  %v840_v44 = vadd.f32 %v4556_v7, %v577_v37  ;;  %v3204_v46 = vunpack.c.l.bf16 %v4281_v34 }
  0x35   :  { %v1095_v43 = vmax.f32 %v839_v36, 0.0  ;;  %v841_v45 = vadd.f32 %v4556_v7, %v578_v38  ;;  %v3721_v48 = vpack.c.bf16 %v1093_v39, %v1092_v31  ;;  %v580_v49 = vmul.f32 %v3201_v41, %v4542_v1  ;;  %v4288_v39 = vld [vmem:[%s5846_s0 + $0xf8] sm:$0xff]  }
  0x36   :  { %v842_v50 = vadd.f32 %v4556_v7, %v579_v42  ;;  %v3205_v51 = vunpack.c.h.bf16 %v4281_v34  ;;  %v1096_v54 = vmax.f32 %v840_v44, 0.0  ;;  %v581_v56 = vmul.f32 %v3204_v46, %v4542_v1  ;;  %v4287_v34 = vld [vmem:[%s5846_s0 + $0xf0] sm:$0xff]  }
  0x37   :  { %v3726_v53 = vpack.c.bf16 %v1095_v43, %v1094_v40  ;;  %v1097_v55 = vmax.f32 %v841_v45, 0.0  ;;  %4404 = vst [vmem:[%s5849_s3 + $0xa0] sm:$0xff] %v3721_v48   ;;  %v843_v57 = vadd.f32 %v4556_v7, %v580_v49  ;;  %v3208_v60 = vunpack.c.l.bf16 %v4282_v47 }
  0x38   :  { %v1098_v58 = vmax.f32 %v842_v50, 0.0  ;;  %v582_v59 = vmul.f32 %v3205_v51, %v4542_v1  ;;  %v844_v63 = vadd.f32 %v4556_v7, %v581_v56  ;;  %v3209_v0 = vunpack.c.h.bf16 %v4282_v47 }
  0x39   :  { %4405 = vst [vmem:[%s5849_s3 + $0xa8] sm:$0xff] %v3726_v53   ;;  %v3731_v62 = vpack.c.bf16 %v1097_v55, %v1096_v54  ;;  %v3212_v2 = vunpack.c.l.bf16 %v4283_v52  ;;  %v1099_v3 = vmax.f32 %v843_v57, 0.0  ;;  %v583_v5 = vmul.f32 %v3208_v60, %v4542_v1 }
  0x3a   :  { %v845_v4 = vadd.f32 %v4556_v7, %v582_v59  ;;  %v3213_v6 = vunpack.c.h.bf16 %v4283_v52  ;;  %v1100_v8 = vmax.f32 %v844_v63, 0.0  ;;  %v584_v9 = vmul.f32 %v3209_v0, %v4542_v1  ;;  %v4289_v52 = vld [vmem:[%s5846_s0 + $0x100] sm:$0xff]  }
  0x3b   :  { %4406 = vst [vmem:[%s5849_s3 + $0xb0] sm:$0xff] %v3731_v62   ;;  %v585_v10 = vmul.f32 %v3212_v2, %v4542_v1  ;;  %v3216_v11 = vunpack.c.l.bf16 %v4284_v61  ;;  %v3736_v13 = vpack.c.bf16 %v1099_v3, %v1098_v58  ;;  %v846_v15 = vadd.f32 %v4556_v7, %v583_v5  ;;  %v4290_v2 = vld [vmem:[%s5846_s0 + $0x108] sm:$0xff]  }
  0x3c   :  { %v1101_v14 = vmax.f32 %v845_v4, 0.0  ;;  %v586_v16 = vmul.f32 %v3213_v6, %v4542_v1  ;;  %v847_v17 = vadd.f32 %v4556_v7, %v584_v9  ;;  %v3217_v19 = vunpack.c.h.bf16 %v4284_v61 }
  0x3d   :  { %v848_v18 = vadd.f32 %v4556_v7, %v585_v10  ;;  %v587_v20 = vmul.f32 %v3216_v11, %v4542_v1  ;;  %4407 = vst [vmem:[%s5849_s3 + $0xb8] sm:$0xff] %v3736_v13   ;;  %v1102_v23 = vmax.f32 %v846_v15, 0.0  ;;  %v3220_v25 = vunpack.c.l.bf16 %v4285_v12 }
  0x3e   :  { %v3741_v22 = vpack.c.bf16 %v1101_v14, %v1100_v8  ;;  %v849_v24 = vadd.f32 %v4556_v7, %v586_v16  ;;  %v1103_v26 = vmax.f32 %v847_v17, 0.0  ;;  %v588_v28 = vmul.f32 %v3217_v19, %v4542_v1  ;;  %v4291_v8 = vld [vmem:[%s5846_s0 + $0x110] sm:$0xff]   ;;  %v4292_v17 = vld [vmem:[%s5846_s0 + $0x118] sm:$0xff]  }
  0x3f   :  { %v1104_v27 = vmax.f32 %v848_v18, 0.0  ;;  %v850_v29 = vadd.f32 %v4556_v7, %v587_v20  ;;  %v3221_v31 = vunpack.c.h.bf16 %v4285_v12  ;;  %v589_v32 = vmul.f32 %v3220_v25, %v4542_v1 }
  0x40   :  { %4408 = vst [vmem:[%s5849_s3 + $0xc0] sm:$0xff] %v3741_v22   ;;  %v1105_v30 = vmax.f32 %v849_v24, 0.0  ;;  %v3224_v33 = vunpack.c.l.bf16 %v4286_v21  ;;  %v3746_v35 = vpack.c.bf16 %v1103_v26, %v1102_v23  ;;  %v851_v36 = vadd.f32 %v4556_v7, %v588_v28 }
  0x41   :  { %v1106_v37 = vmax.f32 %v850_v29, 0.0  ;;  %v3225_v38 = vunpack.c.h.bf16 %v4286_v21  ;;  %v590_v41 = vmul.f32 %v3221_v31, %v4542_v1  ;;  %v852_v42 = vadd.f32 %v4556_v7, %v589_v32 }
  0x42   :  { %v3751_v40 = vpack.c.bf16 %v1105_v30, %v1104_v27  ;;  %v591_v43 = vmul.f32 %v3224_v33, %v4542_v1  ;;  %4409 = vst [vmem:[%s5849_s3 + $0xc8] sm:$0xff] %v3746_v35   ;;  %v1107_v44 = vmax.f32 %v851_v36, 0.0  ;;  %v3228_v46 = vunpack.c.l.bf16 %v4287_v34  ;;  %v4293_v30 = vld [vmem:[%s5846_s0 + $0x120] sm:$0xff]  }
  0x43   :  { %v592_v45 = vmul.f32 %v3225_v38, %v4542_v1  ;;  %v3229_v47 = vunpack.c.h.bf16 %v4287_v34  ;;  %v853_v48 = vadd.f32 %v4556_v7, %v590_v41  ;;  %v1108_v49 = vmax.f32 %v852_v42, 0.0 }
  0x44   :  { %4410 = vst [vmem:[%s5849_s3 + $0xd0] sm:$0xff] %v3751_v40   ;;  %v854_v50 = vadd.f32 %v4556_v7, %v591_v43  ;;  %v3232_v51 = vunpack.c.l.bf16 %v4288_v39  ;;  %v3756_v53 = vpack.c.bf16 %v1107_v44, %v1106_v37  ;;  %v593_v55 = vmul.f32 %v3228_v46, %v4542_v1 }
  0x45   :  { %v855_v54 = vadd.f32 %v4556_v7, %v592_v45  ;;  %v594_v56 = vmul.f32 %v3229_v47, %v4542_v1  ;;  %v1109_v57 = vmax.f32 %v853_v48, 0.0  ;;  %v3233_v59 = vunpack.c.h.bf16 %v4288_v39  ;;  %v4294_v39 = vld [vmem:[%s5846_s0 + $0x128] sm:$0xff]  }
  0x46   :  { %v1110_v58 = vmax.f32 %v854_v50, 0.0  ;;  %v595_v60 = vmul.f32 %v3232_v51, %v4542_v1  ;;  %4411 = vst [vmem:[%s5849_s3 + $0xd8] sm:$0xff] %v3756_v53   ;;  %v856_v62 = vadd.f32 %v4556_v7, %v593_v55  ;;  %v3236_v0 = vunpack.c.l.bf16 %v4289_v52 }
  0x47   :  { %v1111_v61 = vmax.f32 %v855_v54, 0.0  ;;  %v857_v63 = vadd.f32 %v4556_v7, %v594_v56  ;;  %v3761_v3 = vpack.c.bf16 %v1109_v57, %v1108_v49  ;;  %v596_v4 = vmul.f32 %v3233_v59, %v4542_v1  ;;  %v4296_v57 = vld [vmem:[%s5846_s0 + $0x138] sm:$0xff]  }
  0x48   :  { %v858_v5 = vadd.f32 %v4556_v7, %v595_v60  ;;  %v3237_v6 = vunpack.c.h.bf16 %v4289_v52  ;;  %v1112_v10 = vmax.f32 %v856_v62, 0.0  ;;  %v597_v12 = vmul.f32 %v3236_v0, %v4542_v1  ;;  %v4295_v52 = vld [vmem:[%s5846_s0 + $0x130] sm:$0xff]  }
  0x49   :  { %v3766_v9 = vpack.c.bf16 %v1111_v61, %v1110_v58  ;;  %v1113_v11 = vmax.f32 %v857_v63, 0.0  ;;  %4412 = vst [vmem:[%s5849_s3 + $0xe0] sm:$0xff] %v3761_v3   ;;  %v859_v13 = vadd.f32 %v4556_v7, %v596_v4  ;;  %v3240_v16 = vunpack.c.l.bf16 %v4290_v2 }
  0x4a   :  { %v1114_v14 = vmax.f32 %v858_v5, 0.0  ;;  %v598_v15 = vmul.f32 %v3237_v6, %v4542_v1  ;;  %v860_v19 = vadd.f32 %v4556_v7, %v597_v12  ;;  %v3241_v20 = vunpack.c.h.bf16 %v4290_v2 }
  0x4b   :  { %4413 = vst [vmem:[%s5849_s3 + $0xe8] sm:$0xff] %v3766_v9   ;;  %v3771_v18 = vpack.c.bf16 %v1113_v11, %v1112_v10  ;;  %v3244_v21 = vunpack.c.l.bf16 %v4291_v8  ;;  %v1115_v22 = vmax.f32 %v859_v13, 0.0  ;;  %v599_v24 = vmul.f32 %v3240_v16, %v4542_v1 }
  0x4c   :  { %v861_v23 = vadd.f32 %v4556_v7, %v598_v15  ;;  %v3245_v25 = vunpack.c.h.bf16 %v4291_v8  ;;  %v1116_v26 = vmax.f32 %v860_v19, 0.0  ;;  %v600_v27 = vmul.f32 %v3241_v20, %v4542_v1  ;;  %v4297_v8 = vld [vmem:[%s5846_s0 + $0x140] sm:$0xff]  }
  0x4d   :  { %4414 = vst [vmem:[%s5849_s3 + $0xf0] sm:$0xff] %v3771_v18   ;;  %v601_v28 = vmul.f32 %v3244_v21, %v4542_v1  ;;  %v3248_v29 = vunpack.c.l.bf16 %v4292_v17  ;;  %v3776_v31 = vpack.c.bf16 %v1115_v22, %v1114_v14  ;;  %v862_v33 = vadd.f32 %v4556_v7, %v599_v24  ;;  %v4298_v21 = vld [vmem:[%s5846_s0 + $0x148] sm:$0xff]  }
  0x4e   :  { %v1117_v32 = vmax.f32 %v861_v23, 0.0  ;;  %v602_v34 = vmul.f32 %v3245_v25, %v4542_v1  ;;  %v863_v35 = vadd.f32 %v4556_v7, %v600_v27  ;;  %v3249_v37 = vunpack.c.h.bf16 %v4292_v17 }
  0x4f   :  { %v864_v36 = vadd.f32 %v4556_v7, %v601_v28  ;;  %v603_v38 = vmul.f32 %v3248_v29, %v4542_v1  ;;  %4415 = vst [vmem:[%s5849_s3 + $0xf8] sm:$0xff] %v3776_v31   ;;  %v1118_v41 = vmax.f32 %v862_v33, 0.0  ;;  %v3252_v43 = vunpack.c.l.bf16 %v4293_v30 }
  0x50   :  { %v3781_v40 = vpack.c.bf16 %v1117_v32, %v1116_v26  ;;  %v865_v42 = vadd.f32 %v4556_v7, %v602_v34  ;;  %v1119_v44 = vmax.f32 %v863_v35, 0.0  ;;  %v604_v46 = vmul.f32 %v3249_v37, %v4542_v1  ;;  %v4299_v26 = vld [vmem:[%s5846_s0 + $0x150] sm:$0xff]   ;;  %v4300_v35 = vld [vmem:[%s5846_s0 + $0x158] sm:$0xff]  }
  0x51   :  { %v1120_v45 = vmax.f32 %v864_v36, 0.0  ;;  %v866_v47 = vadd.f32 %v4556_v7, %v603_v38  ;;  %v3253_v49 = vunpack.c.h.bf16 %v4293_v30  ;;  %v605_v50 = vmul.f32 %v3252_v43, %v4542_v1 }
  0x52   :  { %4416 = vst [vmem:[%s5849_s3 + $0x100] sm:$0xff] %v3781_v40   ;;  %v1121_v48 = vmax.f32 %v865_v42, 0.0  ;;  %v3256_v51 = vunpack.c.l.bf16 %v4294_v39  ;;  %v3786_v53 = vpack.c.bf16 %v1119_v44, %v1118_v41  ;;  %v867_v54 = vadd.f32 %v4556_v7, %v604_v46 }
  0x53   :  { %v1122_v55 = vmax.f32 %v866_v47, 0.0  ;;  %v3257_v56 = vunpack.c.h.bf16 %v4294_v39  ;;  %v606_v59 = vmul.f32 %v3253_v49, %v4542_v1  ;;  %v868_v60 = vadd.f32 %v4556_v7, %v605_v50 }
  0x54   :  { %v3791_v58 = vpack.c.bf16 %v1121_v48, %v1120_v45  ;;  %v607_v61 = vmul.f32 %v3256_v51, %v4542_v1  ;;  %4417 = vst [vmem:[%s5849_s3 + $0x108] sm:$0xff] %v3786_v53   ;;  %v1123_v62 = vmax.f32 %v867_v54, 0.0  ;;  %v3260_v0 = vunpack.c.l.bf16 %v4295_v52  ;;  %v4301_v48 = vld [vmem:[%s5846_s0 + $0x160] sm:$0xff]  }
  0x55   :  { %v608_v63 = vmul.f32 %v3257_v56, %v4542_v1  ;;  %v3261_v2 = vunpack.c.h.bf16 %v4295_v52  ;;  %v869_v3 = vadd.f32 %v4556_v7, %v606_v59  ;;  %v1124_v4 = vmax.f32 %v868_v60, 0.0 }
  0x56   :  { %4418 = vst [vmem:[%s5849_s3 + $0x110] sm:$0xff] %v3791_v58   ;;  %v870_v5 = vadd.f32 %v4556_v7, %v607_v61  ;;  %v3264_v6 = vunpack.c.l.bf16 %v4296_v57  ;;  %v3796_v9 = vpack.c.bf16 %v1123_v62, %v1122_v55  ;;  %v609_v11 = vmul.f32 %v3260_v0, %v4542_v1 }
  0x57   :  { %v871_v10 = vadd.f32 %v4556_v7, %v608_v63  ;;  %v610_v12 = vmul.f32 %v3261_v2, %v4542_v1  ;;  %v1125_v13 = vmax.f32 %v869_v3, 0.0  ;;  %v3265_v15 = vunpack.c.h.bf16 %v4296_v57  ;;  %v4302_v57 = vld [vmem:[%s5846_s0 + $0x168] sm:$0xff]  }
  0x58   :  { %v1126_v14 = vmax.f32 %v870_v5, 0.0  ;;  %v611_v16 = vmul.f32 %v3264_v6, %v4542_v1  ;;  %4419 = vst [vmem:[%s5849_s3 + $0x118] sm:$0xff] %v3796_v9   ;;  %v872_v18 = vadd.f32 %v4556_v7, %v609_v11  ;;  %v3268_v20 = vunpack.c.l.bf16 %v4297_v8 }
  0x59   :  { %v1127_v17 = vmax.f32 %v871_v10, 0.0  ;;  %v873_v19 = vadd.f32 %v4556_v7, %v610_v12  ;;  %v3801_v22 = vpack.c.bf16 %v1125_v13, %v1124_v4  ;;  %v612_v23 = vmul.f32 %v3265_v15, %v4542_v1  ;;  %v4304_v13 = vld [vmem:[%s5846_s0 + $0x178] sm:$0xff]  }
  0x5a   :  { %v874_v24 = vadd.f32 %v4556_v7, %v611_v16  ;;  %v3269_v25 = vunpack.c.h.bf16 %v4297_v8  ;;  %v1128_v28 = vmax.f32 %v872_v18, 0.0  ;;  %v613_v30 = vmul.f32 %v3268_v20, %v4542_v1  ;;  %v4303_v8 = vld [vmem:[%s5846_s0 + $0x170] sm:$0xff]  }
  0x5b   :  { %v3806_v27 = vpack.c.bf16 %v1127_v17, %v1126_v14  ;;  %v1129_v29 = vmax.f32 %v873_v19, 0.0  ;;  %4420 = vst [vmem:[%s5849_s3 + $0x120] sm:$0xff] %v3801_v22   ;;  %v875_v31 = vadd.f32 %v4556_v7, %v612_v23  ;;  %v3272_v34 = vunpack.c.l.bf16 %v4298_v21 }
  0x5c   :  { %v1130_v32 = vmax.f32 %v874_v24, 0.0  ;;  %v614_v33 = vmul.f32 %v3269_v25, %v4542_v1  ;;  %v876_v37 = vadd.f32 %v4556_v7, %v613_v30  ;;  %v3273_v38 = vunpack.c.h.bf16 %v4298_v21 }
  0x5d   :  { %4421 = vst [vmem:[%s5849_s3 + $0x128] sm:$0xff] %v3806_v27   ;;  %v3811_v36 = vpack.c.bf16 %v1129_v29, %v1128_v28  ;;  %v3276_v39 = vunpack.c.l.bf16 %v4299_v26  ;;  %v1131_v40 = vmax.f32 %v875_v31, 0.0  ;;  %v615_v42 = vmul.f32 %v3272_v34, %v4542_v1 }
  0x5e   :  { %v877_v41 = vadd.f32 %v4556_v7, %v614_v33  ;;  %v3277_v43 = vunpack.c.h.bf16 %v4299_v26  ;;  %v1132_v44 = vmax.f32 %v876_v37, 0.0  ;;  %v616_v45 = vmul.f32 %v3273_v38, %v4542_v1  ;;  %v4305_v26 = vld [vmem:[%s5846_s0 + $0x180] sm:$0xff]  }
  0x5f   :  { %4422 = vst [vmem:[%s5849_s3 + $0x130] sm:$0xff] %v3811_v36   ;;  %v617_v46 = vmul.f32 %v3276_v39, %v4542_v1  ;;  %v3280_v47 = vunpack.c.l.bf16 %v4300_v35  ;;  %v3816_v49 = vpack.c.bf16 %v1131_v40, %v1130_v32  ;;  %v878_v51 = vadd.f32 %v4556_v7, %v615_v42  ;;  %v4306_v39 = vld [vmem:[%s5846_s0 + $0x188] sm:$0xff]   ;;  %v5026_v42 = vld [vmem:[%s5848_s2] ss:$0 sm:$0xff] }
  0x60   :  { %v1133_v50 = vmax.f32 %v877_v41, 0.0  ;;  %v618_v52 = vmul.f32 %v3277_v43, %v4542_v1  ;;  %v879_v53 = vadd.f32 %v4556_v7, %v616_v45  ;;  %v3281_v55 = vunpack.c.h.bf16 %v4300_v35  ;;  %v5020_v41 = vld [vmem:[%s5847_s1] ss:$0 sm:$0xff] }
  0x61   :  { %v880_v54 = vadd.f32 %v4556_v7, %v617_v46  ;;  %v619_v56 = vmul.f32 %v3280_v47, %v4542_v1  ;;  %4423 = vst [vmem:[%s5849_s3 + $0x138] sm:$0xff] %v3816_v49   ;;  %v1134_v59 = vmax.f32 %v878_v51, 0.0  ;;  %v3284_v61 = vunpack.c.l.bf16 %v4301_v48 }
  0x62   :  { %v3821_v58 = vpack.c.bf16 %v1133_v50, %v1132_v44  ;;  %v881_v60 = vadd.f32 %v4556_v7, %v618_v52  ;;  %v1135_v62 = vmax.f32 %v879_v53, 0.0  ;;  %v620_v0 = vmul.f32 %v3281_v55, %v4542_v1  ;;  %v4307_v44 = vld [vmem:[%s5846_s0 + $0x190] sm:$0xff]   ;;  %v4308_v53 = vld [vmem:[%s5846_s0 + $0x198] sm:$0xff]  }
  0x63   :  { %v1136_v63 = vmax.f32 %v880_v54, 0.0  ;;  %v882_v2 = vadd.f32 %v4556_v7, %v619_v56  ;;  %v3285_v4 = vunpack.c.h.bf16 %v4301_v48  ;;  %v621_v5 = vmul.f32 %v3284_v61, %v4542_v1 }
  0x64   :  { %4424 = vst [vmem:[%s5849_s3 + $0x140] sm:$0xff] %v3821_v58   ;;  %v1137_v3 = vmax.f32 %v881_v60, 0.0  ;;  %v3288_v6 = vunpack.c.l.bf16 %v4302_v57  ;;  %v3826_v9 = vpack.c.bf16 %v1135_v62, %v1134_v59  ;;  %v883_v10 = vadd.f32 %v4556_v7, %v620_v0 }
  0x65   :  { %v1138_v11 = vmax.f32 %v882_v2, 0.0  ;;  %v3289_v12 = vunpack.c.h.bf16 %v4302_v57  ;;  %v622_v15 = vmul.f32 %v3285_v4, %v4542_v1  ;;  %v884_v16 = vadd.f32 %v4556_v7, %v621_v5 }
  0x66   :  { %v3831_v14 = vpack.c.bf16 %v1137_v3, %v1136_v63  ;;  %v623_v17 = vmul.f32 %v3288_v6, %v4542_v1  ;;  %4425 = vst [vmem:[%s5849_s3 + $0x148] sm:$0xff] %v3826_v9   ;;  %v1139_v18 = vmax.f32 %v883_v10, 0.0  ;;  %v3292_v20 = vunpack.c.l.bf16 %v4303_v8  ;;  %v4309_v3 = vld [vmem:[%s5846_s0 + $0x1a0] sm:$0xff]  }
  0x67   :  { %v624_v19 = vmul.f32 %v3289_v12, %v4542_v1  ;;  %v3293_v21 = vunpack.c.h.bf16 %v4303_v8  ;;  %v885_v22 = vadd.f32 %v4556_v7, %v622_v15  ;;  %v1140_v23 = vmax.f32 %v884_v16, 0.0 }
  0x68   :  { %4426 = vst [vmem:[%s5849_s3 + $0x150] sm:$0xff] %v3831_v14   ;;  %v886_v24 = vadd.f32 %v4556_v7, %v623_v17  ;;  %v3296_v25 = vunpack.c.l.bf16 %v4304_v13  ;;  %v3836_v27 = vpack.c.bf16 %v1139_v18, %v1138_v11  ;;  %v625_v29 = vmul.f32 %v3292_v20, %v4542_v1 }
  0x69   :  { %v887_v28 = vadd.f32 %v4556_v7, %v624_v19  ;;  %v626_v30 = vmul.f32 %v3293_v21, %v4542_v1  ;;  %v1141_v31 = vmax.f32 %v885_v22, 0.0  ;;  %v3297_v33 = vunpack.c.h.bf16 %v4304_v13  ;;  %v4310_v13 = vld [vmem:[%s5846_s0 + $0x1a8] sm:$0xff]  }
  0x6a   :  { %v1142_v32 = vmax.f32 %v886_v24, 0.0  ;;  %v627_v34 = vmul.f32 %v3296_v25, %v4542_v1  ;;  %4427 = vst [vmem:[%s5849_s3 + $0x158] sm:$0xff] %v3836_v27   ;;  %v888_v36 = vadd.f32 %v4556_v7, %v625_v29  ;;  %v3300_v38 = vunpack.c.l.bf16 %v4305_v26 }
  0x6b   :  { %v1143_v35 = vmax.f32 %v887_v28, 0.0  ;;  %v889_v37 = vadd.f32 %v4556_v7, %v626_v30  ;;  %v3841_v40 = vpack.c.bf16 %v1141_v31, %v1140_v23  ;;  %v628_v1 = vmul.f32 %v5020_v41, %v3297_v33  ;;  %v4312_v31 = vld [vmem:[%s5846_s0 + $0x1b8] sm:$0xff]  }
  0x6c   :  { %v890_v7 = vadd.f32 %v5026_v42, %v627_v34  ;;  %v3301_v43 = vunpack.c.h.bf16 %v4305_v26  ;;  %v1144_v46 = vmax.f32 %v888_v36, 0.0  ;;  %v629_v48 = vmul.f32 %v5020_v41, %v3300_v38  ;;  %v4311_v26 = vld [vmem:[%s5846_s0 + $0x1b0] sm:$0xff]  }
  0x6d   :  { %v3846_v45 = vpack.c.bf16 %v1143_v35, %v1142_v32  ;;  %v1145_v47 = vmax.f32 %v889_v37, 0.0  ;;  %4428 = vst [vmem:[%s5849_s3 + $0x160] sm:$0xff] %v3841_v40   ;;  %v891_v49 = vadd.f32 %v5026_v42, %v628_v1  ;;  %v3304_v52 = vunpack.c.l.bf16 %v4306_v39 }
  0x6e   :  { %v1146_v50 = vmax.f32 %v890_v7, 0.0  ;;  %v630_v51 = vmul.f32 %v5020_v41, %v3301_v43  ;;  %v892_v55 = vadd.f32 %v5026_v42, %v629_v48  ;;  %v3305_v56 = vunpack.c.h.bf16 %v4306_v39 }
  0x6f   :  { %4429 = vst [vmem:[%s5849_s3 + $0x168] sm:$0xff] %v3846_v45   ;;  %v3851_v54 = vpack.c.bf16 %v1145_v47, %v1144_v46  ;;  %v3308_v57 = vunpack.c.l.bf16 %v4307_v44  ;;  %v1147_v58 = vmax.f32 %v891_v49, 0.0  ;;  %v631_v60 = vmul.f32 %v5020_v41, %v3304_v52 }
  0x70   :  { %v893_v59 = vadd.f32 %v5026_v42, %v630_v51  ;;  %v3309_v61 = vunpack.c.h.bf16 %v4307_v44  ;;  %v1148_v62 = vmax.f32 %v892_v55, 0.0  ;;  %v632_v63 = vmul.f32 %v5020_v41, %v3305_v56  ;;  %v4313_v44 = vld [vmem:[%s5846_s0 + $0x1c0] sm:$0xff]  }
  0x71   :  { %4430 = vst [vmem:[%s5849_s3 + $0x170] sm:$0xff] %v3851_v54   ;;  %v633_v0 = vmul.f32 %v5020_v41, %v3308_v57  ;;  %v3312_v2 = vunpack.c.l.bf16 %v4308_v53  ;;  %v3856_v4 = vpack.c.bf16 %v1147_v58, %v1146_v50  ;;  %v894_v6 = vadd.f32 %v5026_v42, %v631_v60  ;;  %v4314_v57 = vld [vmem:[%s5846_s0 + $0x1c8] sm:$0xff]  }
  0x72   :  { %v1149_v5 = vmax.f32 %v893_v59, 0.0  ;;  %v634_v8 = vmul.f32 %v5020_v41, %v3309_v61  ;;  %v895_v9 = vadd.f32 %v5026_v42, %v632_v63  ;;  %v3313_v11 = vunpack.c.h.bf16 %v4308_v53 }
  0x73   :  { %v896_v10 = vadd.f32 %v5026_v42, %v633_v0  ;;  %v635_v12 = vmul.f32 %v5020_v41, %v3312_v2  ;;  %4431 = vst [vmem:[%s5849_s3 + $0x178] sm:$0xff] %v3856_v4   ;;  %v1150_v15 = vmax.f32 %v894_v6, 0.0  ;;  %v3316_v17 = vunpack.c.l.bf16 %v4309_v3 }
  0x74   :  { %v3861_v14 = vpack.c.bf16 %v1149_v5, %v1148_v62  ;;  %v897_v16 = vadd.f32 %v5026_v42, %v634_v8  ;;  %v1151_v18 = vmax.f32 %v895_v9, 0.0  ;;  %v636_v20 = vmul.f32 %v5020_v41, %v3313_v11  ;;  %v4315_v62 = vld [vmem:[%s5846_s0 + $0x1d0] sm:$0xff]   ;;  %v4316_v9 = vld [vmem:[%s5846_s0 + $0x1d8] sm:$0xff]  }
  0x75   :  { %v1152_v19 = vmax.f32 %v896_v10, 0.0  ;;  %v898_v21 = vadd.f32 %v5026_v42, %v635_v12  ;;  %v3317_v23 = vunpack.c.h.bf16 %v4309_v3  ;;  %v637_v24 = vmul.f32 %v5020_v41, %v3316_v17 }
  0x76   :  { %4432 = vst [vmem:[%s5849_s3 + $0x180] sm:$0xff] %v3861_v14   ;;  %v1153_v22 = vmax.f32 %v897_v16, 0.0  ;;  %v3320_v25 = vunpack.c.l.bf16 %v4310_v13  ;;  %v3866_v27 = vpack.c.bf16 %v1151_v18, %v1150_v15  ;;  %v899_v28 = vadd.f32 %v5026_v42, %v636_v20 }
  0x77   :  { %v1154_v29 = vmax.f32 %v898_v21, 0.0  ;;  %v3321_v30 = vunpack.c.h.bf16 %v4310_v13  ;;  %v638_v33 = vmul.f32 %v5020_v41, %v3317_v23  ;;  %v900_v34 = vadd.f32 %v5026_v42, %v637_v24 }
  0x78   :  { %v3871_v32 = vpack.c.bf16 %v1153_v22, %v1152_v19  ;;  %v639_v35 = vmul.f32 %v5020_v41, %v3320_v25  ;;  %4433 = vst [vmem:[%s5849_s3 + $0x188] sm:$0xff] %v3866_v27   ;;  %v1155_v36 = vmax.f32 %v899_v28, 0.0  ;;  %v3324_v38 = vunpack.c.l.bf16 %v4311_v26  ;;  %v4317_v22 = vld [vmem:[%s5846_s0 + $0x1e0] sm:$0xff]  }
  0x79   :  { %v640_v37 = vmul.f32 %v5020_v41, %v3321_v30  ;;  %v3325_v39 = vunpack.c.h.bf16 %v4311_v26  ;;  %v901_v40 = vadd.f32 %v5026_v42, %v638_v33  ;;  %v1156_v1 = vmax.f32 %v900_v34, 0.0 }
  0x7a   :  { %4434 = vst [vmem:[%s5849_s3 + $0x190] sm:$0xff] %v3871_v32   ;;  %v902_v7 = vadd.f32 %v5026_v42, %v639_v35  ;;  %v3328_v43 = vunpack.c.l.bf16 %v4312_v31  ;;  %v3876_v45 = vpack.c.bf16 %v1155_v36, %v1154_v29  ;;  %v641_v47 = vmul.f32 %v5020_v41, %v3324_v38 }
  0x7b   :  { %v903_v46 = vadd.f32 %v5026_v42, %v640_v37  ;;  %v642_v48 = vmul.f32 %v5020_v41, %v3325_v39  ;;  %v1157_v49 = vmax.f32 %v901_v40, 0.0  ;;  %v3329_v51 = vunpack.c.h.bf16 %v4312_v31  ;;  %v4318_v31 = vld [vmem:[%s5846_s0 + $0x1e8] sm:$0xff]  }
  0x7c   :  { %v1158_v50 = vmax.f32 %v902_v7, 0.0  ;;  %v643_v52 = vmul.f32 %v5020_v41, %v3328_v43  ;;  %4435 = vst [vmem:[%s5849_s3 + $0x198] sm:$0xff] %v3876_v45   ;;  %v904_v54 = vadd.f32 %v5026_v42, %v641_v47  ;;  %v3332_v56 = vunpack.c.l.bf16 %v4313_v44 }
  0x7d   :  { %v1159_v53 = vmax.f32 %v903_v46, 0.0  ;;  %v905_v55 = vadd.f32 %v5026_v42, %v642_v48  ;;  %v3881_v58 = vpack.c.bf16 %v1157_v49, %v1156_v1  ;;  %v644_v59 = vmul.f32 %v5020_v41, %v3329_v51  ;;  %v4320_v49 = vld [vmem:[%s5846_s0 + $0x1f8] sm:$0xff]  }
  0x7e   :  { %v906_v60 = vadd.f32 %v5026_v42, %v643_v52  ;;  %v3333_v61 = vunpack.c.h.bf16 %v4313_v44  ;;  %v1160_v0 = vmax.f32 %v904_v54, 0.0  ;;  %v645_v3 = vmul.f32 %v5020_v41, %v3332_v56  ;;  %v4319_v44 = vld [vmem:[%s5846_s0 + $0x1f0] sm:$0xff]  }
  0x7f   :  { %v3886_v63 = vpack.c.bf16 %v1159_v53, %v1158_v50  ;;  %v1161_v2 = vmax.f32 %v905_v55, 0.0  ;;  %4436 = vst [vmem:[%s5849_s3 + $0x1a0] sm:$0xff] %v3881_v58   ;;  %v907_v4 = vadd.f32 %v5026_v42, %v644_v59  ;;  %v3336_v8 = vunpack.c.l.bf16 %v4314_v57 }
  0x80   :  { %v1162_v5 = vmax.f32 %v906_v60, 0.0  ;;  %v646_v6 = vmul.f32 %v5020_v41, %v3333_v61  ;;  %v908_v11 = vadd.f32 %v5026_v42, %v645_v3  ;;  %v3337_v12 = vunpack.c.h.bf16 %v4314_v57 }
  0x81   :  { %4437 = vst [vmem:[%s5849_s3 + $0x1a8] sm:$0xff] %v3886_v63   ;;  %v3891_v10 = vpack.c.bf16 %v1161_v2, %v1160_v0  ;;  %v3340_v13 = vunpack.c.l.bf16 %v4315_v62  ;;  %v1163_v14 = vmax.f32 %v907_v4, 0.0  ;;  %v647_v16 = vmul.f32 %v5020_v41, %v3336_v8 }
  0x82   :  { %v909_v15 = vadd.f32 %v5026_v42, %v646_v6  ;;  %v3341_v17 = vunpack.c.h.bf16 %v4315_v62  ;;  %v1164_v18 = vmax.f32 %v908_v11, 0.0  ;;  %v648_v19 = vmul.f32 %v5020_v41, %v3337_v12  ;;  %v4321_v62 = vld [vmem:[%s5846_s0 + $0x200] sm:$0xff]  }
  0x83   :  { %4438 = vst [vmem:[%s5849_s3 + $0x1b0] sm:$0xff] %v3891_v10   ;;  %v649_v20 = vmul.f32 %v5020_v41, %v3340_v13  ;;  %v3344_v21 = vunpack.c.l.bf16 %v4316_v9  ;;  %v3896_v23 = vpack.c.bf16 %v1163_v14, %v1162_v5  ;;  %v910_v25 = vadd.f32 %v5026_v42, %v647_v16  ;;  %v4322_v13 = vld [vmem:[%s5846_s0 + $0x208] sm:$0xff]  }
  0x84   :  { %v1165_v24 = vmax.f32 %v909_v15, 0.0  ;;  %v650_v26 = vmul.f32 %v5020_v41, %v3341_v17  ;;  %v911_v27 = vadd.f32 %v5026_v42, %v648_v19  ;;  %v3345_v29 = vunpack.c.h.bf16 %v4316_v9 }
  0x85   :  { %v912_v28 = vadd.f32 %v5026_v42, %v649_v20  ;;  %v651_v30 = vmul.f32 %v5020_v41, %v3344_v21  ;;  %4439 = vst [vmem:[%s5849_s3 + $0x1b8] sm:$0xff] %v3896_v23   ;;  %v1166_v33 = vmax.f32 %v910_v25, 0.0  ;;  %v3348_v35 = vunpack.c.l.bf16 %v4317_v22 }
  0x86   :  { %v3901_v32 = vpack.c.bf16 %v1165_v24, %v1164_v18  ;;  %v913_v34 = vadd.f32 %v5026_v42, %v650_v26  ;;  %v1167_v36 = vmax.f32 %v911_v27, 0.0  ;;  %v652_v38 = vmul.f32 %v5020_v41, %v3345_v29  ;;  %v4323_v18 = vld [vmem:[%s5846_s0 + $0x210] sm:$0xff]   ;;  %v4324_v27 = vld [vmem:[%s5846_s0 + $0x218] sm:$0xff]  }
  0x87   :  { %v1168_v37 = vmax.f32 %v912_v28, 0.0  ;;  %v914_v39 = vadd.f32 %v5026_v42, %v651_v30  ;;  %v3349_v1 = vunpack.c.h.bf16 %v4317_v22  ;;  %v653_v7 = vmul.f32 %v5020_v41, %v3348_v35 }
  0x88   :  { %4440 = vst [vmem:[%s5849_s3 + $0x1c0] sm:$0xff] %v3901_v32   ;;  %v1169_v40 = vmax.f32 %v913_v34, 0.0  ;;  %v3352_v43 = vunpack.c.l.bf16 %v4318_v31  ;;  %v3906_v45 = vpack.c.bf16 %v1167_v36, %v1166_v33  ;;  %v915_v46 = vadd.f32 %v5026_v42, %v652_v38 }
  0x89   :  { %v1170_v47 = vmax.f32 %v914_v39, 0.0  ;;  %v3353_v48 = vunpack.c.h.bf16 %v4318_v31  ;;  %v654_v51 = vmul.f32 %v5020_v41, %v3349_v1  ;;  %v916_v52 = vadd.f32 %v5026_v42, %v653_v7 }
  0x8a   :  { %v3911_v50 = vpack.c.bf16 %v1169_v40, %v1168_v37  ;;  %v655_v53 = vmul.f32 %v5020_v41, %v3352_v43  ;;  %4441 = vst [vmem:[%s5849_s3 + $0x1c8] sm:$0xff] %v3906_v45   ;;  %v1171_v54 = vmax.f32 %v915_v46, 0.0  ;;  %v3356_v56 = vunpack.c.l.bf16 %v4319_v44  ;;  %v4325_v40 = vld [vmem:[%s5846_s0 + $0x220] sm:$0xff]  }
  0x8b   :  { %v656_v55 = vmul.f32 %v5020_v41, %v3353_v48  ;;  %v3357_v57 = vunpack.c.h.bf16 %v4319_v44  ;;  %v917_v58 = vadd.f32 %v5026_v42, %v654_v51  ;;  %v1172_v59 = vmax.f32 %v916_v52, 0.0 }
  0x8c   :  { %4442 = vst [vmem:[%s5849_s3 + $0x1d0] sm:$0xff] %v3911_v50   ;;  %v918_v60 = vadd.f32 %v5026_v42, %v655_v53  ;;  %v3360_v61 = vunpack.c.l.bf16 %v4320_v49  ;;  %v3916_v63 = vpack.c.bf16 %v1171_v54, %v1170_v47  ;;  %v657_v2 = vmul.f32 %v5020_v41, %v3356_v56 }
  0x8d   :  { %v919_v0 = vadd.f32 %v5026_v42, %v656_v55  ;;  %v658_v3 = vmul.f32 %v5020_v41, %v3357_v57  ;;  %v1173_v4 = vmax.f32 %v917_v58, 0.0  ;;  %v3361_v6 = vunpack.c.h.bf16 %v4320_v49  ;;  %v4326_v49 = vld [vmem:[%s5846_s0 + $0x228] sm:$0xff]  }
  0x8e   :  { %v1174_v5 = vmax.f32 %v918_v60, 0.0  ;;  %v659_v8 = vmul.f32 %v5020_v41, %v3360_v61  ;;  %4443 = vst [vmem:[%s5849_s3 + $0x1d8] sm:$0xff] %v3916_v63   ;;  %v920_v10 = vadd.f32 %v5026_v42, %v657_v2  ;;  %v3364_v12 = vunpack.c.l.bf16 %v4321_v62 }
  0x8f   :  { %v1175_v9 = vmax.f32 %v919_v0, 0.0  ;;  %v921_v11 = vadd.f32 %v5026_v42, %v658_v3  ;;  %v3921_v14 = vpack.c.bf16 %v1173_v4, %v1172_v59  ;;  %v660_v15 = vmul.f32 %v5020_v41, %v3361_v6  ;;  %v4328_v4 = vld [vmem:[%s5846_s0 + $0x238] sm:$0xff]  }
  0x90   :  { %v922_v16 = vadd.f32 %v5026_v42, %v659_v8  ;;  %v3365_v17 = vunpack.c.h.bf16 %v4321_v62  ;;  %v1176_v20 = vmax.f32 %v920_v10, 0.0  ;;  %v661_v22 = vmul.f32 %v5020_v41, %v3364_v12  ;;  %v4327_v62 = vld [vmem:[%s5846_s0 + $0x230] sm:$0xff]  }
  0x91   :  { %v3926_v19 = vpack.c.bf16 %v1175_v9, %v1174_v5  ;;  %v1177_v21 = vmax.f32 %v921_v11, 0.0  ;;  %4444 = vst [vmem:[%s5849_s3 + $0x1e0] sm:$0xff] %v3921_v14   ;;  %v923_v23 = vadd.f32 %v5026_v42, %v660_v15  ;;  %v3368_v26 = vunpack.c.l.bf16 %v4322_v13 }
  0x92   :  { %v1178_v24 = vmax.f32 %v922_v16, 0.0  ;;  %v662_v25 = vmul.f32 %v5020_v41, %v3365_v17  ;;  %v924_v29 = vadd.f32 %v5026_v42, %v661_v22  ;;  %v3369_v30 = vunpack.c.h.bf16 %v4322_v13 }
  0x93   :  { %4445 = vst [vmem:[%s5849_s3 + $0x1e8] sm:$0xff] %v3926_v19   ;;  %v3931_v28 = vpack.c.bf16 %v1177_v21, %v1176_v20  ;;  %v3372_v31 = vunpack.c.l.bf16 %v4323_v18  ;;  %v1179_v32 = vmax.f32 %v923_v23, 0.0  ;;  %v663_v34 = vmul.f32 %v5020_v41, %v3368_v26 }
  0x94   :  { %v925_v33 = vadd.f32 %v5026_v42, %v662_v25  ;;  %v3373_v35 = vunpack.c.h.bf16 %v4323_v18  ;;  %v1180_v36 = vmax.f32 %v924_v29, 0.0  ;;  %v664_v37 = vmul.f32 %v5020_v41, %v3369_v30  ;;  %v4329_v18 = vld [vmem:[%s5846_s0 + $0x240] sm:$0xff]  }
  0x95   :  { %4446 = vst [vmem:[%s5849_s3 + $0x1f0] sm:$0xff] %v3931_v28   ;;  %v665_v38 = vmul.f32 %v5020_v41, %v3372_v31  ;;  %v3376_v39 = vunpack.c.l.bf16 %v4324_v27  ;;  %v3936_v1 = vpack.c.bf16 %v1179_v32, %v1178_v24  ;;  %v926_v43 = vadd.f32 %v5026_v42, %v663_v34  ;;  %v4330_v31 = vld [vmem:[%s5846_s0 + $0x248] sm:$0xff]  }
  0x96   :  { %v1181_v7 = vmax.f32 %v925_v33, 0.0  ;;  %v666_v44 = vmul.f32 %v5020_v41, %v3373_v35  ;;  %v927_v45 = vadd.f32 %v5026_v42, %v664_v37  ;;  %v3377_v47 = vunpack.c.h.bf16 %v4324_v27 }
  0x97   :  { %v928_v46 = vadd.f32 %v5026_v42, %v665_v38  ;;  %v667_v48 = vmul.f32 %v5020_v41, %v3376_v39  ;;  %4447 = vst [vmem:[%s5849_s3 + $0x1f8] sm:$0xff] %v3936_v1   ;;  %v1182_v51 = vmax.f32 %v926_v43, 0.0  ;;  %v3380_v53 = vunpack.c.l.bf16 %v4325_v40 }
  0x98   :  { %v3941_v50 = vpack.c.bf16 %v1181_v7, %v1180_v36  ;;  %v929_v52 = vadd.f32 %v5026_v42, %v666_v44  ;;  %v1183_v54 = vmax.f32 %v927_v45, 0.0  ;;  %v668_v56 = vmul.f32 %v5020_v41, %v3377_v47  ;;  %v4331_v36 = vld [vmem:[%s5846_s0 + $0x250] sm:$0xff]   ;;  %v4332_v45 = vld [vmem:[%s5846_s0 + $0x258] sm:$0xff]  }
  0x99   :  { %v1184_v55 = vmax.f32 %v928_v46, 0.0  ;;  %v930_v57 = vadd.f32 %v5026_v42, %v667_v48  ;;  %v3381_v59 = vunpack.c.h.bf16 %v4325_v40  ;;  %v669_v60 = vmul.f32 %v5020_v41, %v3380_v53 }
  0x9a   :  { %4448 = vst [vmem:[%s5849_s3 + $0x200] sm:$0xff] %v3941_v50   ;;  %v1185_v58 = vmax.f32 %v929_v52, 0.0  ;;  %v3384_v61 = vunpack.c.l.bf16 %v4326_v49  ;;  %v3946_v63 = vpack.c.bf16 %v1183_v54, %v1182_v51  ;;  %v931_v0 = vadd.f32 %v5026_v42, %v668_v56 }
  0x9b   :  { %v1186_v2 = vmax.f32 %v930_v57, 0.0  ;;  %v3385_v3 = vunpack.c.h.bf16 %v4326_v49  ;;  %v670_v6 = vmul.f32 %v5020_v41, %v3381_v59  ;;  %v932_v8 = vadd.f32 %v5026_v42, %v669_v60 }
  0x9c   :  { %v3951_v5 = vpack.c.bf16 %v1185_v58, %v1184_v55  ;;  %v671_v9 = vmul.f32 %v5020_v41, %v3384_v61  ;;  %4449 = vst [vmem:[%s5849_s3 + $0x208] sm:$0xff] %v3946_v63   ;;  %v1187_v10 = vmax.f32 %v931_v0, 0.0  ;;  %v3388_v12 = vunpack.c.l.bf16 %v4327_v62  ;;  %v4333_v58 = vld [vmem:[%s5846_s0 + $0x260] sm:$0xff]  }
  0x9d   :  { %v672_v11 = vmul.f32 %v5020_v41, %v3385_v3  ;;  %v3389_v13 = vunpack.c.h.bf16 %v4327_v62  ;;  %v933_v14 = vadd.f32 %v5026_v42, %v670_v6  ;;  %v1188_v15 = vmax.f32 %v932_v8, 0.0 }
  0x9e   :  { %4450 = vst [vmem:[%s5849_s3 + $0x210] sm:$0xff] %v3951_v5   ;;  %v934_v16 = vadd.f32 %v5026_v42, %v671_v9  ;;  %v3392_v17 = vunpack.c.l.bf16 %v4328_v4  ;;  %v3956_v19 = vpack.c.bf16 %v1187_v10, %v1186_v2  ;;  %v673_v21 = vmul.f32 %v5020_v41, %v3388_v12 }
  0x9f   :  { %v935_v20 = vadd.f32 %v5026_v42, %v672_v11  ;;  %v674_v22 = vmul.f32 %v5020_v41, %v3389_v13  ;;  %v1189_v23 = vmax.f32 %v933_v14, 0.0  ;;  %v3393_v25 = vunpack.c.h.bf16 %v4328_v4  ;;  %v4334_v4 = vld [vmem:[%s5846_s0 + $0x268] sm:$0xff]  }
  0xa0   :  { %v1190_v24 = vmax.f32 %v934_v16, 0.0  ;;  %v675_v26 = vmul.f32 %v5020_v41, %v3392_v17  ;;  %4451 = vst [vmem:[%s5849_s3 + $0x218] sm:$0xff] %v3956_v19   ;;  %v936_v28 = vadd.f32 %v5026_v42, %v673_v21  ;;  %v3396_v30 = vunpack.c.l.bf16 %v4329_v18 }
  0xa1   :  { %v1191_v27 = vmax.f32 %v935_v20, 0.0  ;;  %v937_v29 = vadd.f32 %v5026_v42, %v674_v22  ;;  %v3961_v32 = vpack.c.bf16 %v1189_v23, %v1188_v15  ;;  %v676_v33 = vmul.f32 %v5020_v41, %v3393_v25  ;;  %v4336_v23 = vld [vmem:[%s5846_s0 + $0x278] sm:$0xff]  }
  0xa2   :  { %v938_v34 = vadd.f32 %v5026_v42, %v675_v26  ;;  %v3397_v35 = vunpack.c.h.bf16 %v4329_v18  ;;  %v1192_v38 = vmax.f32 %v936_v28, 0.0  ;;  %v677_v40 = vmul.f32 %v5020_v41, %v3396_v30  ;;  %v4335_v18 = vld [vmem:[%s5846_s0 + $0x270] sm:$0xff]  }
  0xa3   :  { %v3966_v37 = vpack.c.bf16 %v1191_v27, %v1190_v24  ;;  %v1193_v39 = vmax.f32 %v937_v29, 0.0  ;;  %4452 = vst [vmem:[%s5849_s3 + $0x220] sm:$0xff] %v3961_v32   ;;  %v939_v1 = vadd.f32 %v5026_v42, %v676_v33  ;;  %v3400_v44 = vunpack.c.l.bf16 %v4330_v31 }
  0xa4   :  { %v1194_v7 = vmax.f32 %v938_v34, 0.0  ;;  %v678_v43 = vmul.f32 %v5020_v41, %v3397_v35  ;;  %v940_v47 = vadd.f32 %v5026_v42, %v677_v40  ;;  %v3401_v48 = vunpack.c.h.bf16 %v4330_v31 }
  0xa5   :  { %4453 = vst [vmem:[%s5849_s3 + $0x228] sm:$0xff] %v3966_v37   ;;  %v3971_v46 = vpack.c.bf16 %v1193_v39, %v1192_v38  ;;  %v3404_v49 = vunpack.c.l.bf16 %v4331_v36  ;;  %v1195_v50 = vmax.f32 %v939_v1, 0.0  ;;  %v679_v52 = vmul.f32 %v5020_v41, %v3400_v44 }
  0xa6   :  { %v941_v51 = vadd.f32 %v5026_v42, %v678_v43  ;;  %v3405_v53 = vunpack.c.h.bf16 %v4331_v36  ;;  %v1196_v54 = vmax.f32 %v940_v47, 0.0  ;;  %v680_v55 = vmul.f32 %v5020_v41, %v3401_v48  ;;  %v4337_v36 = vld [vmem:[%s5846_s0 + $0x280] sm:$0xff]  }
  0xa7   :  { %4454 = vst [vmem:[%s5849_s3 + $0x230] sm:$0xff] %v3971_v46   ;;  %v681_v56 = vmul.f32 %v5020_v41, %v3404_v49  ;;  %v3408_v57 = vunpack.c.l.bf16 %v4332_v45  ;;  %v3976_v59 = vpack.c.bf16 %v1195_v50, %v1194_v7  ;;  %v942_v61 = vadd.f32 %v5026_v42, %v679_v52  ;;  %v4338_v49 = vld [vmem:[%s5846_s0 + $0x288] sm:$0xff]  }
  0xa8   :  { %v1197_v60 = vmax.f32 %v941_v51, 0.0  ;;  %v682_v62 = vmul.f32 %v5020_v41, %v3405_v53  ;;  %v943_v63 = vadd.f32 %v5026_v42, %v680_v55  ;;  %v3409_v2 = vunpack.c.h.bf16 %v4332_v45 }
  0xa9   :  { %v944_v0 = vadd.f32 %v5026_v42, %v681_v56  ;;  %v683_v3 = vmul.f32 %v5020_v41, %v3408_v57  ;;  %4455 = vst [vmem:[%s5849_s3 + $0x238] sm:$0xff] %v3976_v59   ;;  %v1198_v6 = vmax.f32 %v942_v61, 0.0  ;;  %v3412_v9 = vunpack.c.l.bf16 %v4333_v58 }
  0xaa   :  { %v3981_v5 = vpack.c.bf16 %v1197_v60, %v1196_v54  ;;  %v945_v8 = vadd.f32 %v5026_v42, %v682_v62  ;;  %v1199_v10 = vmax.f32 %v943_v63, 0.0  ;;  %v684_v12 = vmul.f32 %v5020_v41, %v3409_v2  ;;  %v4339_v54 = vld [vmem:[%s5846_s0 + $0x290] sm:$0xff]   ;;  %v4340_v63 = vld [vmem:[%s5846_s0 + $0x298] sm:$0xff]  }
  0xab   :  { %v1200_v11 = vmax.f32 %v944_v0, 0.0  ;;  %v946_v13 = vadd.f32 %v5026_v42, %v683_v3  ;;  %v3413_v15 = vunpack.c.h.bf16 %v4333_v58  ;;  %v685_v16 = vmul.f32 %v5020_v41, %v3412_v9 }
  0xac   :  { %4456 = vst [vmem:[%s5849_s3 + $0x240] sm:$0xff] %v3981_v5   ;;  %v1201_v14 = vmax.f32 %v945_v8, 0.0  ;;  %v3416_v17 = vunpack.c.l.bf16 %v4334_v4  ;;  %v3986_v19 = vpack.c.bf16 %v1199_v10, %v1198_v6  ;;  %v947_v20 = vadd.f32 %v5026_v42, %v684_v12 }
  0xad   :  { %v1202_v21 = vmax.f32 %v946_v13, 0.0  ;;  %v3417_v22 = vunpack.c.h.bf16 %v4334_v4  ;;  %v686_v25 = vmul.f32 %v5020_v41, %v3413_v15  ;;  %v948_v26 = vadd.f32 %v5026_v42, %v685_v16 }
  0xae   :  { %v3991_v24 = vpack.c.bf16 %v1201_v14, %v1200_v11  ;;  %v687_v27 = vmul.f32 %v5020_v41, %v3416_v17  ;;  %4457 = vst [vmem:[%s5849_s3 + $0x248] sm:$0xff] %v3986_v19   ;;  %v1203_v28 = vmax.f32 %v947_v20, 0.0  ;;  %v3420_v30 = vunpack.c.l.bf16 %v4335_v18  ;;  %v4341_v14 = vld [vmem:[%s5846_s0 + $0x2a0] sm:$0xff]  }
  0xaf   :  { %v688_v29 = vmul.f32 %v5020_v41, %v3417_v22  ;;  %v3421_v31 = vunpack.c.h.bf16 %v4335_v18  ;;  %v949_v32 = vadd.f32 %v5026_v42, %v686_v25  ;;  %v1204_v33 = vmax.f32 %v948_v26, 0.0 }
  0xb0   :  { %4458 = vst [vmem:[%s5849_s3 + $0x250] sm:$0xff] %v3991_v24   ;;  %v950_v34 = vadd.f32 %v5026_v42, %v687_v27  ;;  %v3424_v35 = vunpack.c.l.bf16 %v4336_v23  ;;  %v3996_v37 = vpack.c.bf16 %v1203_v28, %v1202_v21  ;;  %v689_v39 = vmul.f32 %v5020_v41, %v3420_v30 }
  0xb1   :  { %v951_v38 = vadd.f32 %v5026_v42, %v688_v29  ;;  %v690_v40 = vmul.f32 %v5020_v41, %v3421_v31  ;;  %v1205_v1 = vmax.f32 %v949_v32, 0.0  ;;  %v3425_v43 = vunpack.c.h.bf16 %v4336_v23  ;;  %v4342_v23 = vld [vmem:[%s5846_s0 + $0x2a8] sm:$0xff]  }
  0xb2   :  { %v1206_v7 = vmax.f32 %v950_v34, 0.0  ;;  %v691_v44 = vmul.f32 %v5020_v41, %v3424_v35  ;;  %4459 = vst [vmem:[%s5849_s3 + $0x258] sm:$0xff] %v3996_v37   ;;  %v952_v46 = vadd.f32 %v5026_v42, %v689_v39  ;;  %v3428_v48 = vunpack.c.l.bf16 %v4337_v36 }
  0xb3   :  { %v1207_v45 = vmax.f32 %v951_v38, 0.0  ;;  %v953_v47 = vadd.f32 %v5026_v42, %v690_v40  ;;  %v4001_v50 = vpack.c.bf16 %v1205_v1, %v1204_v33  ;;  %v692_v51 = vmul.f32 %v5020_v41, %v3425_v43  ;;  %v4344_v1 = vld [vmem:[%s5846_s0 + $0x2b8] sm:$0xff]  }
  0xb4   :  { %v954_v52 = vadd.f32 %v5026_v42, %v691_v44  ;;  %v3429_v53 = vunpack.c.h.bf16 %v4337_v36  ;;  %v1208_v56 = vmax.f32 %v952_v46, 0.0  ;;  %v693_v58 = vmul.f32 %v5020_v41, %v3428_v48  ;;  %v4343_v36 = vld [vmem:[%s5846_s0 + $0x2b0] sm:$0xff]  }
  0xb5   :  { %v4006_v55 = vpack.c.bf16 %v1207_v45, %v1206_v7  ;;  %v1209_v57 = vmax.f32 %v953_v47, 0.0  ;;  %4460 = vst [vmem:[%s5849_s3 + $0x260] sm:$0xff] %v4001_v50   ;;  %v955_v59 = vadd.f32 %v5026_v42, %v692_v51  ;;  %v3432_v62 = vunpack.c.l.bf16 %v4338_v49 }
  0xb6   :  { %v1210_v60 = vmax.f32 %v954_v52, 0.0  ;;  %v694_v61 = vmul.f32 %v5020_v41, %v3429_v53  ;;  %v956_v2 = vadd.f32 %v5026_v42, %v693_v58  ;;  %v3433_v3 = vunpack.c.h.bf16 %v4338_v49 }
  0xb7   :  { %4461 = vst [vmem:[%s5849_s3 + $0x268] sm:$0xff] %v4006_v55   ;;  %v4011_v0 = vpack.c.bf16 %v1209_v57, %v1208_v56  ;;  %v3436_v4 = vunpack.c.l.bf16 %v4339_v54  ;;  %v1211_v5 = vmax.f32 %v955_v59, 0.0  ;;  %v695_v8 = vmul.f32 %v5020_v41, %v3432_v62 }
  0xb8   :  { %v957_v6 = vadd.f32 %v5026_v42, %v694_v61  ;;  %v3437_v9 = vunpack.c.h.bf16 %v4339_v54  ;;  %v1212_v10 = vmax.f32 %v956_v2, 0.0  ;;  %v696_v11 = vmul.f32 %v5020_v41, %v3433_v3  ;;  %v4345_v54 = vld [vmem:[%s5846_s0 + $0x2c0] sm:$0xff]  }
  0xb9   :  { %4462 = vst [vmem:[%s5849_s3 + $0x270] sm:$0xff] %v4011_v0   ;;  %v697_v12 = vmul.f32 %v5020_v41, %v3436_v4  ;;  %v3440_v13 = vunpack.c.l.bf16 %v4340_v63  ;;  %v4016_v15 = vpack.c.bf16 %v1211_v5, %v1210_v60  ;;  %v958_v17 = vadd.f32 %v5026_v42, %v695_v8  ;;  %v4346_v4 = vld [vmem:[%s5846_s0 + $0x2c8] sm:$0xff]  }
  0xba   :  { %v1213_v16 = vmax.f32 %v957_v6, 0.0  ;;  %v698_v18 = vmul.f32 %v5020_v41, %v3437_v9  ;;  %v959_v19 = vadd.f32 %v5026_v42, %v696_v11  ;;  %v3441_v21 = vunpack.c.h.bf16 %v4340_v63 }
  0xbb   :  { %v960_v20 = vadd.f32 %v5026_v42, %v697_v12  ;;  %v699_v22 = vmul.f32 %v5020_v41, %v3440_v13  ;;  %4463 = vst [vmem:[%s5849_s3 + $0x278] sm:$0xff] %v4016_v15   ;;  %v1214_v25 = vmax.f32 %v958_v17, 0.0  ;;  %v3444_v27 = vunpack.c.l.bf16 %v4341_v14 }
  0xbc   :  { %v4021_v24 = vpack.c.bf16 %v1213_v16, %v1212_v10  ;;  %v961_v26 = vadd.f32 %v5026_v42, %v698_v18  ;;  %v1215_v28 = vmax.f32 %v959_v19, 0.0  ;;  %v700_v30 = vmul.f32 %v5020_v41, %v3441_v21  ;;  %v4347_v10 = vld [vmem:[%s5846_s0 + $0x2d0] sm:$0xff]   ;;  %v4348_v19 = vld [vmem:[%s5846_s0 + $0x2d8] sm:$0xff]  }
  0xbd   :  { %v1216_v29 = vmax.f32 %v960_v20, 0.0  ;;  %v962_v31 = vadd.f32 %v5026_v42, %v699_v22  ;;  %v3445_v33 = vunpack.c.h.bf16 %v4341_v14  ;;  %v701_v34 = vmul.f32 %v5020_v41, %v3444_v27 }
  0xbe   :  { %4464 = vst [vmem:[%s5849_s3 + $0x280] sm:$0xff] %v4021_v24   ;;  %v1217_v32 = vmax.f32 %v961_v26, 0.0  ;;  %v3448_v35 = vunpack.c.l.bf16 %v4342_v23  ;;  %v4026_v37 = vpack.c.bf16 %v1215_v28, %v1214_v25  ;;  %v963_v38 = vadd.f32 %v5026_v42, %v700_v30 }
  0xbf   :  { %v1218_v39 = vmax.f32 %v962_v31, 0.0  ;;  %v3449_v40 = vunpack.c.h.bf16 %v4342_v23  ;;  %v702_v43 = vmul.f32 %v5020_v41, %v3445_v33  ;;  %v964_v44 = vadd.f32 %v5026_v42, %v701_v34 }
  0xc0   :  { %v4031_v7 = vpack.c.bf16 %v1217_v32, %v1216_v29  ;;  %v703_v45 = vmul.f32 %v5020_v41, %v3448_v35  ;;  %4465 = vst [vmem:[%s5849_s3 + $0x288] sm:$0xff] %v4026_v37   ;;  %v1219_v46 = vmax.f32 %v963_v38, 0.0  ;;  %v3452_v48 = vunpack.c.l.bf16 %v4343_v36  ;;  %v4349_v32 = vld [vmem:[%s5846_s0 + $0x2e0] sm:$0xff]  }
  0xc1   :  { %v704_v47 = vmul.f32 %v5020_v41, %v3449_v40  ;;  %v3453_v49 = vunpack.c.h.bf16 %v4343_v36  ;;  %v965_v50 = vadd.f32 %v5026_v42, %v702_v43  ;;  %v1220_v51 = vmax.f32 %v964_v44, 0.0 }
  0xc2   :  { %4466 = vst [vmem:[%s5849_s3 + $0x290] sm:$0xff] %v4031_v7   ;;  %v966_v52 = vadd.f32 %v5026_v42, %v703_v45  ;;  %v3456_v53 = vunpack.c.l.bf16 %v4344_v1  ;;  %v4036_v55 = vpack.c.bf16 %v1219_v46, %v1218_v39  ;;  %v705_v57 = vmul.f32 %v5020_v41, %v3452_v48 }
  0xc3   :  { %v967_v56 = vadd.f32 %v5026_v42, %v704_v47  ;;  %v706_v58 = vmul.f32 %v5020_v41, %v3453_v49  ;;  %v1221_v59 = vmax.f32 %v965_v50, 0.0  ;;  %v3457_v61 = vunpack.c.h.bf16 %v4344_v1  ;;  %v4350_v1 = vld [vmem:[%s5846_s0 + $0x2e8] sm:$0xff]  }
  0xc4   :  { %v1222_v60 = vmax.f32 %v966_v52, 0.0  ;;  %v707_v62 = vmul.f32 %v5020_v41, %v3456_v53  ;;  %4467 = vst [vmem:[%s5849_s3 + $0x298] sm:$0xff] %v4036_v55   ;;  %v968_v0 = vadd.f32 %v5026_v42, %v705_v57  ;;  %v3460_v3 = vunpack.c.l.bf16 %v4345_v54 }
  0xc5   :  { %v1223_v63 = vmax.f32 %v967_v56, 0.0  ;;  %v969_v2 = vadd.f32 %v5026_v42, %v706_v58  ;;  %v4041_v5 = vpack.c.bf16 %v1221_v59, %v1220_v51  ;;  %v708_v6 = vmul.f32 %v5020_v41, %v3457_v61  ;;  %v4352_v59 = vld [vmem:[%s5846_s0 + $0x2f8] sm:$0xff]  }
  0xc6   :  { %v970_v8 = vadd.f32 %v5026_v42, %v707_v62  ;;  %v3461_v9 = vunpack.c.h.bf16 %v4345_v54  ;;  %v1224_v12 = vmax.f32 %v968_v0, 0.0  ;;  %v709_v14 = vmul.f32 %v5020_v41, %v3460_v3  ;;  %v4351_v54 = vld [vmem:[%s5846_s0 + $0x2f0] sm:$0xff]  }
  0xc7   :  { %v4046_v11 = vpack.c.bf16 %v1223_v63, %v1222_v60  ;;  %v1225_v13 = vmax.f32 %v969_v2, 0.0  ;;  %4468 = vst [vmem:[%s5849_s3 + $0x2a0] sm:$0xff] %v4041_v5   ;;  %v971_v15 = vadd.f32 %v5026_v42, %v708_v6  ;;  %v3464_v18 = vunpack.c.l.bf16 %v4346_v4 }
  0xc8   :  { %v1226_v16 = vmax.f32 %v970_v8, 0.0  ;;  %v710_v17 = vmul.f32 %v5020_v41, %v3461_v9  ;;  %v972_v21 = vadd.f32 %v5026_v42, %v709_v14  ;;  %v3465_v22 = vunpack.c.h.bf16 %v4346_v4 }
  0xc9   :  { %4469 = vst [vmem:[%s5849_s3 + $0x2a8] sm:$0xff] %v4046_v11   ;;  %v4051_v20 = vpack.c.bf16 %v1225_v13, %v1224_v12  ;;  %v3468_v23 = vunpack.c.l.bf16 %v4347_v10  ;;  %v1227_v24 = vmax.f32 %v971_v15, 0.0  ;;  %v711_v26 = vmul.f32 %v5020_v41, %v3464_v18  ;;  %v5504_v13 = vld [vmem:[%s5847_s1] ss:$0 sm:$0xff] }
  0xca   :  { %v973_v25 = vadd.f32 %v5026_v42, %v710_v17  ;;  %v3469_v27 = vunpack.c.h.bf16 %v4347_v10  ;;  %v1228_v28 = vmax.f32 %v972_v21, 0.0  ;;  %v712_v29 = vmul.f32 %v5020_v41, %v3465_v22  ;;  %v4353_v10 = vld [vmem:[%s5846_s0 + $0x300] sm:$0xff]  }
  0xcb   :  { %4470 = vst [vmem:[%s5849_s3 + $0x2b0] sm:$0xff] %v4051_v20   ;;  %v713_v30 = vmul.f32 %v5020_v41, %v3468_v23  ;;  %v3472_v31 = vunpack.c.l.bf16 %v4348_v19  ;;  %v4056_v33 = vpack.c.bf16 %v1227_v24, %v1226_v16  ;;  %v974_v35 = vadd.f32 %v5026_v42, %v711_v26  ;;  %v4354_v23 = vld [vmem:[%s5846_s0 + $0x308] sm:$0xff]  }
  0xcc   :  { %v1229_v34 = vmax.f32 %v973_v25, 0.0  ;;  %v714_v36 = vmul.f32 %v5020_v41, %v3469_v27  ;;  %v975_v37 = vadd.f32 %v5026_v42, %v712_v29  ;;  %v3473_v39 = vunpack.c.h.bf16 %v4348_v19 }
  0xcd   :  { %v976_v38 = vadd.f32 %v5026_v42, %v713_v30  ;;  %v715_v40 = vmul.f32 %v5020_v41, %v3472_v31  ;;  %4471 = vst [vmem:[%s5849_s3 + $0x2b8] sm:$0xff] %v4056_v33   ;;  %v1230_v43 = vmax.f32 %v974_v35, 0.0  ;;  %v3476_v45 = vunpack.c.l.bf16 %v4349_v32 }
  0xce   :  { %v4061_v7 = vpack.c.bf16 %v1229_v34, %v1228_v28  ;;  %v977_v44 = vadd.f32 %v5026_v42, %v714_v36  ;;  %v1231_v46 = vmax.f32 %v975_v37, 0.0  ;;  %v716_v48 = vmul.f32 %v5020_v41, %v3473_v39  ;;  %v4355_v28 = vld [vmem:[%s5846_s0 + $0x310] sm:$0xff]   ;;  %v4356_v37 = vld [vmem:[%s5846_s0 + $0x318] sm:$0xff]  }
  0xcf   :  { %v1232_v47 = vmax.f32 %v976_v38, 0.0  ;;  %v978_v49 = vadd.f32 %v5026_v42, %v715_v40  ;;  %v3477_v51 = vunpack.c.h.bf16 %v4349_v32  ;;  %v717_v52 = vmul.f32 %v5020_v41, %v3476_v45 }
  0xd0   :  { %4472 = vst [vmem:[%s5849_s3 + $0x2c0] sm:$0xff] %v4061_v7   ;;  %v1233_v50 = vmax.f32 %v977_v44, 0.0  ;;  %v3480_v53 = vunpack.c.l.bf16 %v4350_v1  ;;  %v4066_v55 = vpack.c.bf16 %v1231_v46, %v1230_v43  ;;  %v979_v56 = vadd.f32 %v5026_v42, %v716_v48 }
  0xd1   :  { %v1234_v57 = vmax.f32 %v978_v49, 0.0  ;;  %v3481_v58 = vunpack.c.h.bf16 %v4350_v1  ;;  %v718_v61 = vmul.f32 %v5020_v41, %v3477_v51  ;;  %v980_v62 = vadd.f32 %v5026_v42, %v717_v52 }
  0xd2   :  { %v4071_v60 = vpack.c.bf16 %v1233_v50, %v1232_v47  ;;  %v719_v63 = vmul.f32 %v5020_v41, %v3480_v53  ;;  %4473 = vst [vmem:[%s5849_s3 + $0x2c8] sm:$0xff] %v4066_v55   ;;  %v1235_v0 = vmax.f32 %v979_v56, 0.0  ;;  %v3484_v3 = vunpack.c.l.bf16 %v4351_v54  ;;  %v4357_v50 = vld [vmem:[%s5846_s0 + $0x320] sm:$0xff]  }
  0xd3   :  { %v720_v2 = vmul.f32 %v5020_v41, %v3481_v58  ;;  %v3485_v4 = vunpack.c.h.bf16 %v4351_v54  ;;  %v981_v5 = vadd.f32 %v5026_v42, %v718_v61  ;;  %v1236_v6 = vmax.f32 %v980_v62, 0.0  ;;  %v5498_v41 = vld [vmem:[%s5848_s2] ss:$0 sm:$0xff] }
  0xd4   :  { %4474 = vst [vmem:[%s5849_s3 + $0x2d0] sm:$0xff] %v4071_v60   ;;  %v982_v8 = vadd.f32 %v5026_v42, %v719_v63  ;;  %v3488_v9 = vunpack.c.l.bf16 %v4352_v59  ;;  %v4076_v11 = vpack.c.bf16 %v1235_v0, %v1234_v57  ;;  %v721_v42 = vmul.f32 %v5504_v13, %v3484_v3 }
  0xd5   :  { %v983_v12 = vadd.f32 %v5498_v41, %v720_v2  ;;  %v722_v14 = vmul.f32 %v5504_v13, %v3485_v4  ;;  %v1237_v15 = vmax.f32 %v981_v5, 0.0  ;;  %v3489_v17 = vunpack.c.h.bf16 %v4352_v59  ;;  %v4358_v59 = vld [vmem:[%s5846_s0 + $0x328] sm:$0xff]  }
  0xd6   :  { %v1238_v16 = vmax.f32 %v982_v8, 0.0  ;;  %v723_v18 = vmul.f32 %v5504_v13, %v3488_v9  ;;  %4475 = vst [vmem:[%s5849_s3 + $0x2d8] sm:$0xff] %v4076_v11   ;;  %v984_v20 = vadd.f32 %v5498_v41, %v721_v42  ;;  %v3492_v22 = vunpack.c.l.bf16 %v4353_v10 }
  0xd7   :  { %v1239_v19 = vmax.f32 %v983_v12, 0.0  ;;  %v985_v21 = vadd.f32 %v5498_v41, %v722_v14  ;;  %v4081_v24 = vpack.c.bf16 %v1237_v15, %v1236_v6  ;;  %v724_v25 = vmul.f32 %v5504_v13, %v3489_v17  ;;  %v4360_v15 = vld [vmem:[%s5846_s0 + $0x338] sm:$0xff]  }
  0xd8   :  { %v986_v26 = vadd.f32 %v5498_v41, %v723_v18  ;;  %v3493_v27 = vunpack.c.h.bf16 %v4353_v10  ;;  %v1240_v30 = vmax.f32 %v984_v20, 0.0  ;;  %v725_v32 = vmul.f32 %v5504_v13, %v3492_v22  ;;  %v4359_v10 = vld [vmem:[%s5846_s0 + $0x330] sm:$0xff]  }
  0xd9   :  { %v4086_v29 = vpack.c.bf16 %v1239_v19, %v1238_v16  ;;  %v1241_v31 = vmax.f32 %v985_v21, 0.0  ;;  %4476 = vst [vmem:[%s5849_s3 + $0x2e0] sm:$0xff] %v4081_v24   ;;  %v987_v33 = vadd.f32 %v5498_v41, %v724_v25  ;;  %v3496_v36 = vunpack.c.l.bf16 %v4354_v23 }
  0xda   :  { %v1242_v34 = vmax.f32 %v986_v26, 0.0  ;;  %v726_v35 = vmul.f32 %v5504_v13, %v3493_v27  ;;  %v988_v39 = vadd.f32 %v5498_v41, %v725_v32  ;;  %v3497_v40 = vunpack.c.h.bf16 %v4354_v23 }
  0xdb   :  { %4477 = vst [vmem:[%s5849_s3 + $0x2e8] sm:$0xff] %v4086_v29   ;;  %v4091_v38 = vpack.c.bf16 %v1241_v31, %v1240_v30  ;;  %v3500_v1 = vunpack.c.l.bf16 %v4355_v28  ;;  %v1243_v7 = vmax.f32 %v987_v33, 0.0  ;;  %v727_v44 = vmul.f32 %v5504_v13, %v3496_v36 }
  0xdc   :  { %v989_v43 = vadd.f32 %v5498_v41, %v726_v35  ;;  %v3501_v45 = vunpack.c.h.bf16 %v4355_v28  ;;  %v1244_v46 = vmax.f32 %v988_v39, 0.0  ;;  %v728_v47 = vmul.f32 %v5504_v13, %v3497_v40  ;;  %v4361_v28 = vld [vmem:[%s5846_s0 + $0x340] sm:$0xff]  }
  0xdd   :  { %4478 = vst [vmem:[%s5849_s3 + $0x2f0] sm:$0xff] %v4091_v38   ;;  %v729_v48 = vmul.f32 %v5504_v13, %v3500_v1  ;;  %v3504_v49 = vunpack.c.l.bf16 %v4356_v37  ;;  %v4096_v51 = vpack.c.bf16 %v1243_v7, %v1242_v34  ;;  %v990_v53 = vadd.f32 %v5498_v41, %v727_v44  ;;  %v4362_v1 = vld [vmem:[%s5846_s0 + $0x348] sm:$0xff]  }
  0xde   :  { %v1245_v52 = vmax.f32 %v989_v43, 0.0  ;;  %v730_v54 = vmul.f32 %v5504_v13, %v3501_v45  ;;  %v991_v55 = vadd.f32 %v5498_v41, %v728_v47  ;;  %v3505_v57 = vunpack.c.h.bf16 %v4356_v37 }
  0xdf   :  { %v992_v56 = vadd.f32 %v5498_v41, %v729_v48  ;;  %v731_v58 = vmul.f32 %v5504_v13, %v3504_v49  ;;  %4479 = vst [vmem:[%s5849_s3 + $0x2f8] sm:$0xff] %v4096_v51   ;;  %v1246_v61 = vmax.f32 %v990_v53, 0.0  ;;  %v3508_v63 = vunpack.c.l.bf16 %v4357_v50 }
  0xe0   :  { %v4101_v60 = vpack.c.bf16 %v1245_v52, %v1244_v46  ;;  %v993_v62 = vadd.f32 %v5498_v41, %v730_v54  ;;  %v1247_v0 = vmax.f32 %v991_v55, 0.0  ;;  %v732_v3 = vmul.f32 %v5504_v13, %v3505_v57  ;;  %v4363_v46 = vld [vmem:[%s5846_s0 + $0x350] sm:$0xff]   ;;  %v4364_v55 = vld [vmem:[%s5846_s0 + $0x358] sm:$0xff]  }
  0xe1   :  { %v1248_v2 = vmax.f32 %v992_v56, 0.0  ;;  %v994_v4 = vadd.f32 %v5498_v41, %v731_v58  ;;  %v3509_v6 = vunpack.c.h.bf16 %v4357_v50  ;;  %v733_v8 = vmul.f32 %v5504_v13, %v3508_v63 }
  0xe2   :  { %4480 = vst [vmem:[%s5849_s3 + $0x300] sm:$0xff] %v4101_v60   ;;  %v1249_v5 = vmax.f32 %v993_v62, 0.0  ;;  %v3512_v9 = vunpack.c.l.bf16 %v4358_v59  ;;  %v4106_v11 = vpack.c.bf16 %v1247_v0, %v1246_v61  ;;  %v995_v12 = vadd.f32 %v5498_v41, %v732_v3 }
  0xe3   :  { %v1250_v42 = vmax.f32 %v994_v4, 0.0  ;;  %v3513_v14 = vunpack.c.h.bf16 %v4358_v59  ;;  %v734_v17 = vmul.f32 %v5504_v13, %v3509_v6  ;;  %v996_v18 = vadd.f32 %v5498_v41, %v733_v8 }
  0xe4   :  { %v4111_v16 = vpack.c.bf16 %v1249_v5, %v1248_v2  ;;  %v735_v19 = vmul.f32 %v5504_v13, %v3512_v9  ;;  %4481 = vst [vmem:[%s5849_s3 + $0x308] sm:$0xff] %v4106_v11   ;;  %v1251_v20 = vmax.f32 %v995_v12, 0.0  ;;  %v3516_v22 = vunpack.c.l.bf16 %v4359_v10  ;;  %v4365_v5 = vld [vmem:[%s5846_s0 + $0x360] sm:$0xff]  }
  0xe5   :  { %v736_v21 = vmul.f32 %v5504_v13, %v3513_v14  ;;  %v3517_v23 = vunpack.c.h.bf16 %v4359_v10  ;;  %v997_v24 = vadd.f32 %v5498_v41, %v734_v17  ;;  %v1252_v25 = vmax.f32 %v996_v18, 0.0 }
  0xe6   :  { %4482 = vst [vmem:[%s5849_s3 + $0x310] sm:$0xff] %v4111_v16   ;;  %v998_v26 = vadd.f32 %v5498_v41, %v735_v19  ;;  %v3520_v27 = vunpack.c.l.bf16 %v4360_v15  ;;  %v4116_v29 = vpack.c.bf16 %v1251_v20, %v1250_v42  ;;  %v737_v31 = vmul.f32 %v5504_v13, %v3516_v22 }
  0xe7   :  { %v999_v30 = vadd.f32 %v5498_v41, %v736_v21  ;;  %v738_v32 = vmul.f32 %v5504_v13, %v3517_v23  ;;  %v1253_v33 = vmax.f32 %v997_v24, 0.0  ;;  %v3521_v35 = vunpack.c.h.bf16 %v4360_v15  ;;  %v4366_v15 = vld [vmem:[%s5846_s0 + $0x368] sm:$0xff]  }
  0xe8   :  { %v1254_v34 = vmax.f32 %v998_v26, 0.0  ;;  %v739_v36 = vmul.f32 %v5504_v13, %v3520_v27  ;;  %4483 = vst [vmem:[%s5849_s3 + $0x318] sm:$0xff] %v4116_v29   ;;  %v1000_v38 = vadd.f32 %v5498_v41, %v737_v31  ;;  %v3524_v40 = vunpack.c.l.bf16 %v4361_v28 }
  0xe9   :  { %v1255_v37 = vmax.f32 %v999_v30, 0.0  ;;  %v1001_v39 = vadd.f32 %v5498_v41, %v738_v32  ;;  %v4121_v7 = vpack.c.bf16 %v1253_v33, %v1252_v25  ;;  %v740_v43 = vmul.f32 %v5504_v13, %v3521_v35  ;;  %v4368_v33 = vld [vmem:[%s5846_s0 + $0x378] sm:$0xff]  }
  0xea   :  { %v1002_v44 = vadd.f32 %v5498_v41, %v739_v36  ;;  %v3525_v45 = vunpack.c.h.bf16 %v4361_v28  ;;  %v1256_v48 = vmax.f32 %v1000_v38, 0.0  ;;  %v741_v50 = vmul.f32 %v5504_v13, %v3524_v40  ;;  %v4367_v28 = vld [vmem:[%s5846_s0 + $0x370] sm:$0xff]  }
  0xeb   :  { %v4126_v47 = vpack.c.bf16 %v1255_v37, %v1254_v34  ;;  %v1257_v49 = vmax.f32 %v1001_v39, 0.0  ;;  %4484 = vst [vmem:[%s5849_s3 + $0x320] sm:$0xff] %v4121_v7   ;;  %v1003_v51 = vadd.f32 %v5498_v41, %v740_v43  ;;  %v3528_v54 = vunpack.c.l.bf16 %v4362_v1 }
  0xec   :  { %v1258_v52 = vmax.f32 %v1002_v44, 0.0  ;;  %v742_v53 = vmul.f32 %v5504_v13, %v3525_v45  ;;  %v1004_v57 = vadd.f32 %v5498_v41, %v741_v50  ;;  %v3529_v58 = vunpack.c.h.bf16 %v4362_v1 }
  0xed   :  { %4485 = vst [vmem:[%s5849_s3 + $0x328] sm:$0xff] %v4126_v47   ;;  %v4131_v56 = vpack.c.bf16 %v1257_v49, %v1256_v48  ;;  %v3532_v59 = vunpack.c.l.bf16 %v4363_v46  ;;  %v1259_v60 = vmax.f32 %v1003_v51, 0.0  ;;  %v743_v62 = vmul.f32 %v5504_v13, %v3528_v54 }
  0xee   :  { %v1005_v61 = vadd.f32 %v5498_v41, %v742_v53  ;;  %v3533_v63 = vunpack.c.h.bf16 %v4363_v46  ;;  %v1260_v0 = vmax.f32 %v1004_v57, 0.0  ;;  %v744_v2 = vmul.f32 %v5504_v13, %v3529_v58  ;;  %v4369_v46 = vld [vmem:[%s5846_s0 + $0x380] sm:$0xff]  }
  0xef   :  { %4486 = vst [vmem:[%s5849_s3 + $0x330] sm:$0xff] %v4131_v56   ;;  %v745_v3 = vmul.f32 %v5504_v13, %v3532_v59  ;;  %v3536_v4 = vunpack.c.l.bf16 %v4364_v55  ;;  %v4136_v6 = vpack.c.bf16 %v1259_v60, %v1258_v52  ;;  %v1006_v9 = vadd.f32 %v5498_v41, %v743_v62  ;;  %v4370_v59 = vld [vmem:[%s5846_s0 + $0x388] sm:$0xff]  }
  0xf0   :  { %v1261_v8 = vmax.f32 %v1005_v61, 0.0  ;;  %v746_v10 = vmul.f32 %v5504_v13, %v3533_v63  ;;  %v1007_v11 = vadd.f32 %v5498_v41, %v744_v2  ;;  %v3537_v42 = vunpack.c.h.bf16 %v4364_v55 }
  0xf1   :  { %v1008_v12 = vadd.f32 %v5498_v41, %v745_v3  ;;  %v747_v14 = vmul.f32 %v5504_v13, %v3536_v4  ;;  %4487 = vst [vmem:[%s5849_s3 + $0x338] sm:$0xff] %v4136_v6   ;;  %v1262_v17 = vmax.f32 %v1006_v9, 0.0  ;;  %v3540_v19 = vunpack.c.l.bf16 %v4365_v5 }
  0xf2   :  { %v4141_v16 = vpack.c.bf16 %v1261_v8, %v1260_v0  ;;  %v1009_v18 = vadd.f32 %v5498_v41, %v746_v10  ;;  %v1263_v20 = vmax.f32 %v1007_v11, 0.0  ;;  %v748_v22 = vmul.f32 %v5504_v13, %v3537_v42  ;;  %v4371_v0 = vld [vmem:[%s5846_s0 + $0x390] sm:$0xff]   ;;  %v4372_v11 = vld [vmem:[%s5846_s0 + $0x398] sm:$0xff]  }
  0xf3   :  { %v1264_v21 = vmax.f32 %v1008_v12, 0.0  ;;  %v1010_v23 = vadd.f32 %v5498_v41, %v747_v14  ;;  %v3541_v25 = vunpack.c.h.bf16 %v4365_v5  ;;  %v749_v26 = vmul.f32 %v5504_v13, %v3540_v19 }
  0xf4   :  { %4488 = vst [vmem:[%s5849_s3 + $0x340] sm:$0xff] %v4141_v16   ;;  %v1265_v24 = vmax.f32 %v1009_v18, 0.0  ;;  %v3544_v27 = vunpack.c.l.bf16 %v4366_v15  ;;  %v4146_v29 = vpack.c.bf16 %v1263_v20, %v1262_v17  ;;  %v1011_v30 = vadd.f32 %v5498_v41, %v748_v22 }
  0xf5   :  { %v1266_v31 = vmax.f32 %v1010_v23, 0.0  ;;  %v3545_v32 = vunpack.c.h.bf16 %v4366_v15  ;;  %v750_v35 = vmul.f32 %v5504_v13, %v3541_v25  ;;  %v1012_v36 = vadd.f32 %v5498_v41, %v749_v26 }
  0xf6   :  { %v4151_v34 = vpack.c.bf16 %v1265_v24, %v1264_v21  ;;  %v751_v37 = vmul.f32 %v5504_v13, %v3544_v27  ;;  %4489 = vst [vmem:[%s5849_s3 + $0x348] sm:$0xff] %v4146_v29   ;;  %v1267_v38 = vmax.f32 %v1011_v30, 0.0  ;;  %v3548_v40 = vunpack.c.l.bf16 %v4367_v28  ;;  %v4373_v24 = vld [vmem:[%s5846_s0 + $0x3a0] sm:$0xff]  }
  0xf7   :  { %v752_v39 = vmul.f32 %v5504_v13, %v3545_v32  ;;  %v3549_v1 = vunpack.c.h.bf16 %v4367_v28  ;;  %v1013_v7 = vadd.f32 %v5498_v41, %v750_v35  ;;  %v1268_v43 = vmax.f32 %v1012_v36, 0.0 }
  0xf8   :  { %4490 = vst [vmem:[%s5849_s3 + $0x350] sm:$0xff] %v4151_v34   ;;  %v1014_v44 = vadd.f32 %v5498_v41, %v751_v37  ;;  %v3552_v45 = vunpack.c.l.bf16 %v4368_v33  ;;  %v4156_v47 = vpack.c.bf16 %v1267_v38, %v1266_v31  ;;  %v753_v49 = vmul.f32 %v5504_v13, %v3548_v40 }
  0xf9   :  { %v1015_v48 = vadd.f32 %v5498_v41, %v752_v39  ;;  %v754_v50 = vmul.f32 %v5504_v13, %v3549_v1  ;;  %v1269_v51 = vmax.f32 %v1013_v7, 0.0  ;;  %v3553_v53 = vunpack.c.h.bf16 %v4368_v33  ;;  %v4374_v33 = vld [vmem:[%s5846_s0 + $0x3a8] sm:$0xff]  }
  0xfa   :  { %v1270_v52 = vmax.f32 %v1014_v44, 0.0  ;;  %v755_v54 = vmul.f32 %v5504_v13, %v3552_v45  ;;  %4491 = vst [vmem:[%s5849_s3 + $0x358] sm:$0xff] %v4156_v47   ;;  %v1016_v56 = vadd.f32 %v5498_v41, %v753_v49  ;;  %v3556_v58 = vunpack.c.l.bf16 %v4369_v46 }
  0xfb   :  { %v1271_v55 = vmax.f32 %v1015_v48, 0.0  ;;  %v1017_v57 = vadd.f32 %v5498_v41, %v754_v50  ;;  %v4161_v60 = vpack.c.bf16 %v1269_v51, %v1268_v43  ;;  %v756_v61 = vmul.f32 %v5504_v13, %v3553_v53  ;;  %v4376_v51 = vld [vmem:[%s5846_s0 + $0x3b8] sm:$0xff]  }
  0xfc   :  { %v1018_v62 = vadd.f32 %v5498_v41, %v755_v54  ;;  %v3557_v63 = vunpack.c.h.bf16 %v4369_v46  ;;  %v1272_v3 = vmax.f32 %v1016_v56, 0.0  ;;  %v757_v5 = vmul.f32 %v5504_v13, %v3556_v58  ;;  %v4375_v46 = vld [vmem:[%s5846_s0 + $0x3b0] sm:$0xff]  }
  0xfd   :  { %v4166_v2 = vpack.c.bf16 %v1271_v55, %v1270_v52  ;;  %v1273_v4 = vmax.f32 %v1017_v57, 0.0  ;;  %4492 = vst [vmem:[%s5849_s3 + $0x360] sm:$0xff] %v4161_v60   ;;  %v1019_v6 = vadd.f32 %v5498_v41, %v756_v61  ;;  %v3560_v10 = vunpack.c.l.bf16 %v4370_v59 }
  0xfe   :  { %v1274_v8 = vmax.f32 %v1018_v62, 0.0  ;;  %v758_v9 = vmul.f32 %v5504_v13, %v3557_v63  ;;  %v1020_v42 = vadd.f32 %v5498_v41, %v757_v5  ;;  %v3561_v14 = vunpack.c.h.bf16 %v4370_v59 }
  0xff   :  { %4493 = vst [vmem:[%s5849_s3 + $0x368] sm:$0xff] %v4166_v2   ;;  %v4171_v12 = vpack.c.bf16 %v1273_v4, %v1272_v3  ;;  %v3564_v15 = vunpack.c.l.bf16 %v4371_v0  ;;  %v1275_v16 = vmax.f32 %v1019_v6, 0.0  ;;  %v759_v18 = vmul.f32 %v5504_v13, %v3560_v10 }
 0x100   :  { %v1021_v17 = vadd.f32 %v5498_v41, %v758_v9  ;;  %v3565_v19 = vunpack.c.h.bf16 %v4371_v0  ;;  %v1276_v20 = vmax.f32 %v1020_v42, 0.0  ;;  %v760_v21 = vmul.f32 %v5504_v13, %v3561_v14  ;;  %v4377_v0 = vld [vmem:[%s5846_s0 + $0x3c0] sm:$0xff]  }
 0x101   :  { %4494 = vst [vmem:[%s5849_s3 + $0x370] sm:$0xff] %v4171_v12   ;;  %v761_v22 = vmul.f32 %v5504_v13, %v3564_v15  ;;  %v3568_v23 = vunpack.c.l.bf16 %v4372_v11  ;;  %v4176_v25 = vpack.c.bf16 %v1275_v16, %v1274_v8  ;;  %v1022_v27 = vadd.f32 %v5498_v41, %v759_v18  ;;  %v4378_v15 = vld [vmem:[%s5846_s0 + $0x3c8] sm:$0xff]  }
 0x102   :  { %v1277_v26 = vmax.f32 %v1021_v17, 0.0  ;;  %v762_v28 = vmul.f32 %v5504_v13, %v3565_v19  ;;  %v1023_v29 = vadd.f32 %v5498_v41, %v760_v21  ;;  %v3569_v31 = vunpack.c.h.bf16 %v4372_v11 }
 0x103   :  { %v1024_v30 = vadd.f32 %v5498_v41, %v761_v22  ;;  %v763_v32 = vmul.f32 %v5504_v13, %v3568_v23  ;;  %4495 = vst [vmem:[%s5849_s3 + $0x378] sm:$0xff] %v4176_v25   ;;  %v1278_v35 = vmax.f32 %v1022_v27, 0.0  ;;  %v3572_v37 = vunpack.c.l.bf16 %v4373_v24 }
 0x104   :  { %v4181_v34 = vpack.c.bf16 %v1277_v26, %v1276_v20  ;;  %v1025_v36 = vadd.f32 %v5498_v41, %v762_v28  ;;  %v1279_v38 = vmax.f32 %v1023_v29, 0.0  ;;  %v764_v40 = vmul.f32 %v5504_v13, %v3569_v31  ;;  %v4379_v20 = vld [vmem:[%s5846_s0 + $0x3d0] sm:$0xff]   ;;  %v4380_v29 = vld [vmem:[%s5846_s0 + $0x3d8] sm:$0xff]  }
 0x105   :  { %v1280_v39 = vmax.f32 %v1024_v30, 0.0  ;;  %v1026_v1 = vadd.f32 %v5498_v41, %v763_v32  ;;  %v3573_v43 = vunpack.c.h.bf16 %v4373_v24  ;;  %v765_v44 = vmul.f32 %v5504_v13, %v3572_v37 }
 0x106   :  { %4496 = vst [vmem:[%s5849_s3 + $0x380] sm:$0xff] %v4181_v34   ;;  %v1281_v7 = vmax.f32 %v1025_v36, 0.0  ;;  %v3576_v45 = vunpack.c.l.bf16 %v4374_v33  ;;  %v4186_v47 = vpack.c.bf16 %v1279_v38, %v1278_v35  ;;  %v1027_v48 = vadd.f32 %v5498_v41, %v764_v40 }
 0x107   :  { %v1282_v49 = vmax.f32 %v1026_v1, 0.0  ;;  %v3577_v50 = vunpack.c.h.bf16 %v4374_v33  ;;  %v766_v53 = vmul.f32 %v5504_v13, %v3573_v43  ;;  %v1028_v54 = vadd.f32 %v5498_v41, %v765_v44 }
 0x108   :  { %v4191_v52 = vpack.c.bf16 %v1281_v7, %v1280_v39  ;;  %v767_v55 = vmul.f32 %v5504_v13, %v3576_v45  ;;  %4497 = vst [vmem:[%s5849_s3 + $0x388] sm:$0xff] %v4186_v47   ;;  %v1283_v56 = vmax.f32 %v1027_v48, 0.0  ;;  %v3580_v58 = vunpack.c.l.bf16 %v4375_v46  ;;  %v4381_v7 = vld [vmem:[%s5846_s0 + $0x3e0] sm:$0xff]  }
 0x109   :  { %v768_v57 = vmul.f32 %v5504_v13, %v3577_v50  ;;  %v3581_v59 = vunpack.c.h.bf16 %v4375_v46  ;;  %v1029_v60 = vadd.f32 %v5498_v41, %v766_v53  ;;  %v1284_v61 = vmax.f32 %v1028_v54, 0.0 }
 0x10a   :  { %4498 = vst [vmem:[%s5849_s3 + $0x390] sm:$0xff] %v4191_v52   ;;  %v1030_v62 = vadd.f32 %v5498_v41, %v767_v55  ;;  %v3584_v63 = vunpack.c.l.bf16 %v4376_v51  ;;  %v4196_v2 = vpack.c.bf16 %v1283_v56, %v1282_v49  ;;  %v769_v4 = vmul.f32 %v5504_v13, %v3580_v58 }
 0x10b   :  { %v1031_v3 = vadd.f32 %v5498_v41, %v768_v57  ;;  %v770_v5 = vmul.f32 %v5504_v13, %v3581_v59  ;;  %v1285_v6 = vmax.f32 %v1029_v60, 0.0  ;;  %v3585_v9 = vunpack.c.h.bf16 %v4376_v51  ;;  %v4382_v51 = vld [vmem:[%s5846_s0 + $0x3e8] sm:$0xff]  }
 0x10c   :  { %v1286_v8 = vmax.f32 %v1030_v62, 0.0  ;;  %v771_v10 = vmul.f32 %v5504_v13, %v3584_v63  ;;  %4499 = vst [vmem:[%s5849_s3 + $0x398] sm:$0xff] %v4196_v2   ;;  %v1032_v12 = vadd.f32 %v5498_v41, %v769_v4  ;;  %v3588_v14 = vunpack.c.l.bf16 %v4377_v0 }
 0x10d   :  { %v1287_v11 = vmax.f32 %v1031_v3, 0.0  ;;  %v1033_v42 = vadd.f32 %v5498_v41, %v770_v5  ;;  %v4201_v16 = vpack.c.bf16 %v1285_v6, %v1284_v61  ;;  %v772_v17 = vmul.f32 %v5504_v13, %v3585_v9  ;;  %v4384_v6 = vld [vmem:[%s5846_s0 + $0x3f8] sm:$0xff]  }
 0x10e   :  { %v1034_v18 = vadd.f32 %v5498_v41, %v771_v10  ;;  %v3589_v19 = vunpack.c.h.bf16 %v4377_v0  ;;  %v1288_v22 = vmax.f32 %v1032_v12, 0.0  ;;  %v773_v24 = vmul.f32 %v5504_v13, %v3588_v14  ;;  %v4383_v0 = vld [vmem:[%s5846_s0 + $0x3f0] sm:$0xff]  }
 0x10f   :  { %v4206_v21 = vpack.c.bf16 %v1287_v11, %v1286_v8  ;;  %v1289_v23 = vmax.f32 %v1033_v42, 0.0  ;;  %4500 = vst [vmem:[%s5849_s3 + $0x3a0] sm:$0xff] %v4201_v16   ;;  %v1035_v25 = vadd.f32 %v5498_v41, %v772_v17  ;;  %v3592_v28 = vunpack.c.l.bf16 %v4378_v15 }
 0x110   :  { %v1290_v26 = vmax.f32 %v1034_v18, 0.0  ;;  %v774_v27 = vmul.f32 %v5504_v13, %v3589_v19  ;;  %v1036_v31 = vadd.f32 %v5498_v41, %v773_v24  ;;  %v3593_v32 = vunpack.c.h.bf16 %v4378_v15 }
 0x111   :  { %4501 = vst [vmem:[%s5849_s3 + $0x3a8] sm:$0xff] %v4206_v21   ;;  %v4211_v30 = vpack.c.bf16 %v1289_v23, %v1288_v22  ;;  %v3596_v33 = vunpack.c.l.bf16 %v4379_v20  ;;  %v1291_v34 = vmax.f32 %v1035_v25, 0.0  ;;  %v775_v36 = vmul.f32 %v5504_v13, %v3592_v28 }
 0x112   :  { %v1037_v35 = vadd.f32 %v5498_v41, %v774_v27  ;;  %v3597_v37 = vunpack.c.h.bf16 %v4379_v20  ;;  %v1292_v38 = vmax.f32 %v1036_v31, 0.0  ;;  %v776_v39 = vmul.f32 %v5504_v13, %v3593_v32 }
 0x113   :  { %4502 = vst [vmem:[%s5849_s3 + $0x3b0] sm:$0xff] %v4211_v30   ;;  %v777_v40 = vmul.f32 %v5504_v13, %v3596_v33  ;;  %v3600_v1 = vunpack.c.l.bf16 %v4380_v29  ;;  %v4216_v43 = vpack.c.bf16 %v1291_v34, %v1290_v26  ;;  %v1038_v45 = vadd.f32 %v5498_v41, %v775_v36 }
 0x114   :  { %v1293_v44 = vmax.f32 %v1037_v35, 0.0  ;;  %v778_v46 = vmul.f32 %v5504_v13, %v3597_v37  ;;  %v1039_v47 = vadd.f32 %v5498_v41, %v776_v39  ;;  %v3601_v49 = vunpack.c.h.bf16 %v4380_v29 }
 0x115   :  { %v1040_v48 = vadd.f32 %v5498_v41, %v777_v40  ;;  %v779_v50 = vmul.f32 %v5504_v13, %v3600_v1  ;;  %4503 = vst [vmem:[%s5849_s3 + $0x3b8] sm:$0xff] %v4216_v43   ;;  %v1294_v53 = vmax.f32 %v1038_v45, 0.0  ;;  %v3604_v55 = vunpack.c.l.bf16 %v4381_v7 }
 0x116   :  { %v4221_v52 = vpack.c.bf16 %v1293_v44, %v1292_v38  ;;  %v1041_v54 = vadd.f32 %v5498_v41, %v778_v46  ;;  %v1295_v56 = vmax.f32 %v1039_v47, 0.0  ;;  %v780_v58 = vmul.f32 %v5504_v13, %v3601_v49 }
 0x117   :  { %v1296_v57 = vmax.f32 %v1040_v48, 0.0  ;;  %v1042_v59 = vadd.f32 %v5498_v41, %v779_v50  ;;  %v3605_v61 = vunpack.c.h.bf16 %v4381_v7  ;;  %v781_v62 = vmul.f32 %v5504_v13, %v3604_v55 }
 0x118   :  { %4504 = vst [vmem:[%s5849_s3 + $0x3c0] sm:$0xff] %v4221_v52   ;;  %v1297_v60 = vmax.f32 %v1041_v54, 0.0  ;;  %v3608_v63 = vunpack.c.l.bf16 %v4382_v51  ;;  %v4226_v2 = vpack.c.bf16 %v1295_v56, %v1294_v53  ;;  %v1043_v3 = vadd.f32 %v5498_v41, %v780_v58 }
 0x119   :  { %v1298_v4 = vmax.f32 %v1042_v59, 0.0  ;;  %v3609_v5 = vunpack.c.h.bf16 %v4382_v51  ;;  %v782_v9 = vmul.f32 %v5504_v13, %v3605_v61  ;;  %v1044_v10 = vadd.f32 %v5498_v41, %v781_v62 }
 0x11a   :  { %v4231_v8 = vpack.c.bf16 %v1297_v60, %v1296_v57  ;;  %v783_v11 = vmul.f32 %v5504_v13, %v3608_v63  ;;  %4505 = vst [vmem:[%s5849_s3 + $0x3c8] sm:$0xff] %v4226_v2   ;;  %v1299_v12 = vmax.f32 %v1043_v3, 0.0  ;;  %v3612_v14 = vunpack.c.l.bf16 %v4383_v0 }
 0x11b   :  { %v784_v42 = vmul.f32 %v5504_v13, %v3609_v5  ;;  %v3613_v15 = vunpack.c.h.bf16 %v4383_v0  ;;  %v1045_v16 = vadd.f32 %v5498_v41, %v782_v9  ;;  %v1300_v17 = vmax.f32 %v1044_v10, 0.0 }
 0x11c   :  { %4506 = vst [vmem:[%s5849_s3 + $0x3d0] sm:$0xff] %v4231_v8   ;;  %v1046_v18 = vadd.f32 %v5498_v41, %v783_v11  ;;  %v3616_v19 = vunpack.c.l.bf16 %v4384_v6  ;;  %v4236_v20 = vpack.c.bf16 %v1299_v12, %v1298_v4  ;;  %v785_v22 = vmul.f32 %v5504_v13, %v3612_v14 }
 0x11d   :  { %v1047_v21 = vadd.f32 %v5498_v41, %v784_v42  ;;  %v786_v23 = vmul.f32 %v5504_v13, %v3613_v15  ;;  %v1301_v24 = vmax.f32 %v1045_v16, 0.0  ;;  %v3617_v26 = vunpack.c.h.bf16 %v4384_v6 }
 0x11e   :  { %v1302_v25 = vmax.f32 %v1046_v18, 0.0  ;;  %v787_v27 = vmul.f32 %v5504_v13, %v3616_v19  ;;  %4507 = vst [vmem:[%s5849_s3 + $0x3d8] sm:$0xff] %v4236_v20   ;;  %v1048_v29 = vadd.f32 %v5498_v41, %v785_v22 }
 0x11f   :  { %v1303_v28 = vmax.f32 %v1047_v21, 0.0  ;;  %v1049_v30 = vadd.f32 %v5498_v41, %v786_v23  ;;  %v4241_v31 = vpack.c.bf16 %v1301_v24, %v1300_v17  ;;  %v788_v32 = vmul.f32 %v5504_v13, %v3617_v26 }
 0x120   :  { %v1050_v33 = vadd.f32 %v5498_v41, %v787_v27  ;;  %v1304_v35 = vmax.f32 %v1048_v29, 0.0 }
 0x121   :  { %v4246_v34 = vpack.c.bf16 %v1303_v28, %v1302_v25  ;;  %v1305_v36 = vmax.f32 %v1049_v30, 0.0  ;;  %4508 = vst [vmem:[%s5849_s3 + $0x3e0] sm:$0xff] %v4241_v31   ;;  %v1051_v37 = vadd.f32 %v5498_v41, %v788_v32 }
 0x122   :  { %v1306_v38 = vmax.f32 %v1050_v33, 0.0 }
 0x123   :  { %4509 = vst [vmem:[%s5849_s3 + $0x3e8] sm:$0xff] %v4246_v34   ;;  %v4251_v39 = vpack.c.bf16 %v1305_v36, %v1304_v35  ;;  %v1307_v40 = vmax.f32 %v1051_v37, 0.0 }
 0x125   :  { %4510 = vst [vmem:[%s5849_s3 + $0x3f0] sm:$0xff] %v4251_v39   ;;  %v4256_v13 = vpack.c.bf16 %v1307_v40, %v1306_v38 }
 0x127   :  { %4511 = vst [vmem:[%s5849_s3 + $0x3f8] sm:$0xff] %v4256_v13  }

// kernel: generator_forward.17
= control target key start
LH: loop header
LB: loop body
LE: loop exit
PB: predicated region body
PF: predicated region fallthrough
CT: control target
= control target key end

     0   :  { %s4543_s9 = smov 0   ;;  %s4545_s10 = smov 0   ;;  %s5356_s0 = inlined_call_operand.vmem [shape: bf16[4,2048,32], index: 0, kind: input, shape index: {}]   ;;  %s5357_s1 = inlined_call_operand.vmem [shape: bf16[4,32,128], index: 1, kind: input, shape index: {}]   ;;  %s5358_s2 = inlined_call_operand.vmem [shape: f32[4,2048,3], index: 2, kind: output, shape index: {}]  }
   0x1   :  { %s4547_s11 = smov 0  }
   0x2 LB: > { %s24_s12 = sadd.s32 1, %s4522_s10  ;;  %p3174_p0 = scmp.ge.s32.totalorder %s4526_s11, 1  ;;  %s4526_s11 = sphi %s4547_s11, %s12_s11   ;;  %s4522_s10 = sphi %s4545_s10, %s5360_s10   ;;  %s4518_s9 = sphi %s4543_s9, %s5359_s9  }
   0x3   : > { %p26_p1 = scmp.ge.s32.totalorder %s24_s12, 4  ;;  %p143_p2 = scmp.lt.s32.totalorder %s4526_s11, 5 }
   0x5   : > { %s5362_s12 = smov (%p26_p1, %s24_s12), 0  ;;  %p144_p3 = pnand %p3174_p0, %p143_p2 }
   0x6   : > { %p179_p4 = scmp.lt.s32.totalorder (!%p144_p3), %s4518_s9, 3  ;;  %vm1116_vm0 = vcmask (!%p144_p3), 261120   ;;  %vm2814_vm1 = vcmask (!%p144_p3), 23552  }
   0x7   : > { %147 = sbr.rel (%p144_p3) target bundleno = 508 (0x1fc), region = 28 }
   0xe   : > { %s5364_s9 = smov (!%p179_p4, %s4518_s9), 3 }
   0xf   : > { %s3441_s13 = sshll.u32 %s5364_s9, 10  ;;  %s3442_s14 = sshll.u32 %s5364_s9, 4 }
  0x10   : > { %s4568_s17 = scalar_lea.vmem %s5356_s0, %s3441_s13  ;;  %s192_s20 = scalar_lea.vmem %s5357_s1, %s3442_s14 }
  0x11   : > { %v3862_v0 = vld [vmem:[%s192_s20] sm:$0xff]   ;;  %v3863_v1 = vld [vmem:[%s192_s20 + $0x8] sm:$0xff]   ;;  %v3868_v6 = vld [vmem:[%s4568_s17 + $0x10] sm:$0xff]   ;;  %s3443_s21 = sshll.u32 %s5364_s9, 11 }
  0x12   : > { %3574 = vmatprep.subr.bf16.mxu0 %v3862_v0  ;;  %3834 = vmatprep.subr.bf16.mxu1 %v3862_v0  ;;  %v3864_v2 = vld [vmem:[%s4568_s17] sm:$0xff]   ;;  %v3866_v4 = vld [vmem:[%s4568_s17 + $0x8] sm:$0xff]   ;;  %v3869_v7 = vld [vmem:[%s4568_s17 + $0x210] sm:$0xff]   ;;  %s4805_s24 = scalar_lea.vmem %s5358_s2, %s3443_s21 }
  0x13   : > { %3575 = vmatpush3.bf16.msra.mxu0 %v3862_v0  ;;  %3836 = vmatpush3.bf16.msra.mxu1 %v3862_v0  ;;  %v3865_v3 = vld [vmem:[%s4568_s17 + $0x200] sm:$0xff]   ;;  %v3867_v5 = vld [vmem:[%s4568_s17 + $0x208] sm:$0xff]   ;;  %v3870_v8 = vld [vmem:[%s4568_s17 + $0x18] sm:$0xff]  }
  0x14   : > { %3576 = vmatprep.subr.bf16.mxu0 %v3863_v1  ;;  %3835 = vmatprep.subr.bf16.mxu1 %v3863_v1  ;;  %v3871_v9 = vld [vmem:[%s4568_s17 + $0x218] sm:$0xff]   ;;  %v3872_v10 = vld [vmem:[%s4568_s17 + $0x20] sm:$0xff]   ;;  %v3874_v12 = vld [vmem:[%s4568_s17 + $0x28] sm:$0xff]  }
  0x15   : > { %3578 = vmatprep.mubr.msk.bf16.mxu0 %vm1116_vm0, %v3864_v2  ;;  %3706 = vmatprep.mubr.msk.bf16.mxu1 %vm1116_vm0, %v3865_v3  ;;  %v3873_v11 = vld [vmem:[%s4568_s17 + $0x220] sm:$0xff]   ;;  %v3875_v13 = vld [vmem:[%s4568_s17 + $0x228] sm:$0xff]   ;;  %v3876_v14 = vld [vmem:[%s4568_s17 + $0x30] sm:$0xff]  }
  0x16   : > { %v3877_v15 = vld [vmem:[%s4568_s17 + $0x230] sm:$0xff]   ;;  %v3878_v16 = vld [vmem:[%s4568_s17 + $0x38] sm:$0xff]   ;;  %v3880_v18 = vld [vmem:[%s4568_s17 + $0x40] sm:$0xff]  }
  0x17   : > { %3577 = vmatpush3.bf16.msra.mxu0 %v3863_v1  ;;  %3837 = vmatpush3.bf16.msra.mxu1 %v3863_v1  ;;  %v3879_v17 = vld [vmem:[%s4568_s17 + $0x238] sm:$0xff]   ;;  %v3881_v19 = vld [vmem:[%s4568_s17 + $0x240] sm:$0xff]   ;;  %v3882_v20 = vld [vmem:[%s4568_s17 + $0x48] sm:$0xff]  }
  0x18   : > { %v3883_v21 = vld [vmem:[%s4568_s17 + $0x248] sm:$0xff]   ;;  %v3884_v22 = vld [vmem:[%s4568_s17 + $0x50] sm:$0xff]   ;;  %v3886_v24 = vld [vmem:[%s4568_s17 + $0x58] sm:$0xff]  }
  0x19   : > { %v3885_v23 = vld [vmem:[%s4568_s17 + $0x250] sm:$0xff]   ;;  %v3887_v25 = vld [vmem:[%s4568_s17 + $0x258] sm:$0xff]   ;;  %v3888_v26 = vld [vmem:[%s4568_s17 + $0x60] sm:$0xff]  }
  0x1a   : > { %3579 = vmatmul.mubr.msk.bf16.vlgmr.msra.gmra.mrb[0].mxu0 %vm1116_vm0, %v3866_v4  ;;  %3707 = vmatmul.mubr.msk.bf16.vlgmr.msra.gmra.mrb[0].mxu1 %vm1116_vm0, %v3867_v5  ;;  %v3889_v27 = vld [vmem:[%s4568_s17 + $0x260] sm:$0xff]   ;;  %v3890_v28 = vld [vmem:[%s4568_s17 + $0x68] sm:$0xff]   ;;  %v3892_v30 = vld [vmem:[%s4568_s17 + $0x70] sm:$0xff]  }
  0x1b   : > { %3582 = vmatprep.mubr.msk.bf16.mxu0 %vm1116_vm0, %v3868_v6  ;;  %3710 = vmatprep.mubr.msk.bf16.mxu1 %vm1116_vm0, %v3869_v7  ;;  %v3891_v29 = vld [vmem:[%s4568_s17 + $0x268] sm:$0xff]   ;;  %v3893_v31 = vld [vmem:[%s4568_s17 + $0x270] sm:$0xff]   ;;  %v3894_v32 = vld [vmem:[%s4568_s17 + $0x78] sm:$0xff]  }
  0x1c   : > { %v3895_v33 = vld [vmem:[%s4568_s17 + $0x278] sm:$0xff]   ;;  %v3896_v34 = vld [vmem:[%s4568_s17 + $0x80] sm:$0xff]   ;;  %v3898_v36 = vld [vmem:[%s4568_s17 + $0x88] sm:$0xff]  }
  0x1d   : > { %v3897_v35 = vld [vmem:[%s4568_s17 + $0x280] sm:$0xff]   ;;  %v3899_v37 = vld [vmem:[%s4568_s17 + $0x288] sm:$0xff]   ;;  %v3900_v38 = vld [vmem:[%s4568_s17 + $0x90] sm:$0xff]  }
  0x1e   : > { %v3901_v39 = vld [vmem:[%s4568_s17 + $0x290] sm:$0xff]   ;;  %v3902_v40 = vld [vmem:[%s4568_s17 + $0x98] sm:$0xff]   ;;  %v3904_v42 = vld [vmem:[%s4568_s17 + $0xa0] sm:$0xff]  }
  0x1f   : > { %v3903_v41 = vld [vmem:[%s4568_s17 + $0x298] sm:$0xff]   ;;  %v3905_v43 = vld [vmem:[%s4568_s17 + $0x2a0] sm:$0xff]   ;;  %v3906_v44 = vld [vmem:[%s4568_s17 + $0xa8] sm:$0xff]  }
  0x20   : > { %v3907_v45 = vld [vmem:[%s4568_s17 + $0x2a8] sm:$0xff]   ;;  %v3908_v46 = vld [vmem:[%s4568_s17 + $0xb0] sm:$0xff]   ;;  %v3910_v48 = vld [vmem:[%s4568_s17 + $0xb8] sm:$0xff]  }
  0x21   : > { %v3909_v47 = vld [vmem:[%s4568_s17 + $0x2b0] sm:$0xff]   ;;  %v3911_v49 = vld [vmem:[%s4568_s17 + $0x2b8] sm:$0xff]   ;;  %v3912_v50 = vld [vmem:[%s4568_s17 + $0xc0] sm:$0xff]  }
  0x22   : > { %3583 = vmatmul.mubr.msk.bf16.gmra.mrb[4].mxu0 %vm1116_vm0, %v3870_v8  ;;  %3711 = vmatmul.mubr.msk.bf16.gmra.mrb[4].mxu1 %vm1116_vm0, %v3871_v9  ;;  %v3913_v51 = vld [vmem:[%s4568_s17 + $0x2c0] sm:$0xff]   ;;  %v3914_v52 = vld [vmem:[%s4568_s17 + $0xc8] sm:$0xff]   ;;  %v3916_v54 = vld [vmem:[%s4568_s17 + $0xd0] sm:$0xff]  }
  0x23   : > { %3586 = vmatprep.mubr.msk.bf16.mxu0 %vm1116_vm0, %v3872_v10  ;;  %3714 = vmatprep.mubr.msk.bf16.mxu1 %vm1116_vm0, %v3873_v11  ;;  %v3915_v53 = vld [vmem:[%s4568_s17 + $0x2c8] sm:$0xff]   ;;  %v3917_v55 = vld [vmem:[%s4568_s17 + $0x2d0] sm:$0xff]   ;;  %v3918_v56 = vld [vmem:[%s4568_s17 + $0xd8] sm:$0xff]  }
  0x24   : > { %v3919_v57 = vld [vmem:[%s4568_s17 + $0x2d8] sm:$0xff]   ;;  %v3920_v58 = vld [vmem:[%s4568_s17 + $0xe0] sm:$0xff]   ;;  %v3922_v60 = vld [vmem:[%s4568_s17 + $0xe8] sm:$0xff]  }
  0x25   : > { %v3921_v59 = vld [vmem:[%s4568_s17 + $0x2e0] sm:$0xff]   ;;  %v3923_v61 = vld [vmem:[%s4568_s17 + $0x2e8] sm:$0xff]   ;;  %v3924_v62 = vld [vmem:[%s4568_s17 + $0xf0] sm:$0xff]  }
  0x26   : > { %v3925_v63 = vld [vmem:[%s4568_s17 + $0x2f0] sm:$0xff]   ;;  %v3926_v0 = vld [vmem:[%s4568_s17 + $0xf8] sm:$0xff]   ;;  %v3928_v2 = vld [vmem:[%s4568_s17 + $0x100] sm:$0xff]  }
  0x27   : > { %v3927_v1 = vld [vmem:[%s4568_s17 + $0x2f8] sm:$0xff]   ;;  %v3929_v3 = vld [vmem:[%s4568_s17 + $0x300] sm:$0xff]   ;;  %v3930_v4 = vld [vmem:[%s4568_s17 + $0x108] sm:$0xff]  }
  0x28   : > { %v3931_v5 = vld [vmem:[%s4568_s17 + $0x308] sm:$0xff]   ;;  %v3932_v6 = vld [vmem:[%s4568_s17 + $0x110] sm:$0xff]   ;;  %v3934_v8 = vld [vmem:[%s4568_s17 + $0x118] sm:$0xff]  }
  0x29   : > { %v3933_v7 = vld [vmem:[%s4568_s17 + $0x310] sm:$0xff]   ;;  %v3935_v9 = vld [vmem:[%s4568_s17 + $0x318] sm:$0xff]   ;;  %v3936_v10 = vld [vmem:[%s4568_s17 + $0x120] sm:$0xff]  }
  0x2a   : > { %3587 = vmatmul.mubr.msk.bf16.gmra.mrb[8].mxu0 %vm1116_vm0, %v3874_v12  ;;  %3715 = vmatmul.mubr.msk.bf16.gmra.mrb[8].mxu1 %vm1116_vm0, %v3875_v13  ;;  %v3937_v11 = vld [vmem:[%s4568_s17 + $0x320] sm:$0xff]   ;;  %v3938_v12 = vld [vmem:[%s4568_s17 + $0x128] sm:$0xff]  }
  0x2b   : > { %3590 = vmatprep.mubr.msk.bf16.mxu0 %vm1116_vm0, %v3876_v14  ;;  %3718 = vmatprep.mubr.msk.bf16.mxu1 %vm1116_vm0, %v3877_v15  ;;  %v3939_v13 = vld [vmem:[%s4568_s17 + $0x328] sm:$0xff]   ;;  %v3940_v14 = vld [vmem:[%s4568_s17 + $0x130] sm:$0xff]  }
  0x2c   : > { %v3941_v15 = vld [vmem:[%s4568_s17 + $0x330] sm:$0xff]  }
  0x32   : > { %3591 = vmatmul.mubr.msk.bf16.gmra.mrb[12].mxu0 %vm1116_vm0, %v3878_v16  ;;  %3719 = vmatmul.mubr.msk.bf16.gmra.mrb[12].mxu1 %vm1116_vm0, %v3879_v17  ;;  %v3942_v16 = vld [vmem:[%s4568_s17 + $0x138] sm:$0xff]  }
  0x33   : > { %3594 = vmatprep.mubr.msk.bf16.mxu0 %vm1116_vm0, %v3880_v18  ;;  %3722 = vmatprep.mubr.msk.bf16.mxu1 %vm1116_vm0, %v3881_v19  ;;  %v3943_v17 = vld [vmem:[%s4568_s17 + $0x338] sm:$0xff]   ;;  %v3944_v18 = vld [vmem:[%s4568_s17 + $0x140] sm:$0xff]  }
  0x34   : > { %v3945_v19 = vld [vmem:[%s4568_s17 + $0x340] sm:$0xff]  }
  0x3a   : > { %3595 = vmatmul.mubr.msk.bf16.gmra.mrb[16].mxu0 %vm1116_vm0, %v3882_v20  ;;  %3723 = vmatmul.mubr.msk.bf16.gmra.mrb[16].mxu1 %vm1116_vm0, %v3883_v21  ;;  %v3946_v20 = vld [vmem:[%s4568_s17 + $0x148] sm:$0xff]  }
  0x3b   : > { %3598 = vmatprep.mubr.msk.bf16.mxu0 %vm1116_vm0, %v3884_v22  ;;  %3726 = vmatprep.mubr.msk.bf16.mxu1 %vm1116_vm0, %v3885_v23  ;;  %v3947_v21 = vld [vmem:[%s4568_s17 + $0x348] sm:$0xff]   ;;  %v3948_v22 = vld [vmem:[%s4568_s17 + $0x150] sm:$0xff]  }
  0x3c   : > { %v3949_v23 = vld [vmem:[%s4568_s17 + $0x350] sm:$0xff]  }
  0x42   : > { %3599 = vmatmul.mubr.msk.bf16.gmra.mrb[20].mxu0 %vm1116_vm0, %v3886_v24  ;;  %3727 = vmatmul.mubr.msk.bf16.gmra.mrb[20].mxu1 %vm1116_vm0, %v3887_v25  ;;  %v3950_v24 = vld [vmem:[%s4568_s17 + $0x158] sm:$0xff]  }
  0x43   : > { %3602 = vmatprep.mubr.msk.bf16.mxu0 %vm1116_vm0, %v3888_v26  ;;  %3730 = vmatprep.mubr.msk.bf16.mxu1 %vm1116_vm0, %v3889_v27  ;;  %v3951_v25 = vld [vmem:[%s4568_s17 + $0x358] sm:$0xff]   ;;  %v3952_v26 = vld [vmem:[%s4568_s17 + $0x160] sm:$0xff]  }
  0x44   : > { %v3953_v27 = vld [vmem:[%s4568_s17 + $0x360] sm:$0xff]  }
  0x4a   : > { %3603 = vmatmul.mubr.msk.bf16.gmra.mrb[24].mxu0 %vm1116_vm0, %v3890_v28  ;;  %3731 = vmatmul.mubr.msk.bf16.gmra.mrb[24].mxu1 %vm1116_vm0, %v3891_v29  ;;  %v3954_v28 = vld [vmem:[%s4568_s17 + $0x168] sm:$0xff]  }
  0x4b   : > { %3606 = vmatprep.mubr.msk.bf16.mxu0 %vm1116_vm0, %v3892_v30  ;;  %3734 = vmatprep.mubr.msk.bf16.mxu1 %vm1116_vm0, %v3893_v31  ;;  %v3955_v29 = vld [vmem:[%s4568_s17 + $0x368] sm:$0xff]   ;;  %v3956_v30 = vld [vmem:[%s4568_s17 + $0x170] sm:$0xff]  }
  0x4c   : > { %v3957_v31 = vld [vmem:[%s4568_s17 + $0x370] sm:$0xff]  }
  0x52   : > { %3607 = vmatmul.mubr.msk.bf16.gmra.mrb[28].mxu0 %vm1116_vm0, %v3894_v32  ;;  %3735 = vmatmul.mubr.msk.bf16.gmra.mrb[28].mxu1 %vm1116_vm0, %v3895_v33  ;;  %v3958_v32 = vld [vmem:[%s4568_s17 + $0x178] sm:$0xff]  }
  0x53   : > { %3610 = vmatprep.mubr.msk.bf16.mxu0 %vm1116_vm0, %v3896_v34  ;;  %3738 = vmatprep.mubr.msk.bf16.mxu1 %vm1116_vm0, %v3897_v35  ;;  %v3959_v33 = vld [vmem:[%s4568_s17 + $0x378] sm:$0xff]   ;;  %v3960_v34 = vld [vmem:[%s4568_s17 + $0x180] sm:$0xff]  }
  0x54   : > { %v3961_v35 = vld [vmem:[%s4568_s17 + $0x380] sm:$0xff]  }
  0x5a   : > { %3611 = vmatmul.mubr.msk.bf16.gmra.mrb[32].mxu0 %vm1116_vm0, %v3898_v36  ;;  %3739 = vmatmul.mubr.msk.bf16.gmra.mrb[32].mxu1 %vm1116_vm0, %v3899_v37  ;;  %v3962_v36 = vld [vmem:[%s4568_s17 + $0x188] sm:$0xff]  }
  0x5b   : > { %3614 = vmatprep.mubr.msk.bf16.mxu0 %vm1116_vm0, %v3900_v38  ;;  %3742 = vmatprep.mubr.msk.bf16.mxu1 %vm1116_vm0, %v3901_v39  ;;  %v3963_v37 = vld [vmem:[%s4568_s17 + $0x388] sm:$0xff]   ;;  %v3964_v38 = vld [vmem:[%s4568_s17 + $0x190] sm:$0xff]  }
  0x5c   : > { %v3965_v39 = vld [vmem:[%s4568_s17 + $0x390] sm:$0xff]  }
  0x62   : > { %3615 = vmatmul.mubr.msk.bf16.gmra.mrb[36].mxu0 %vm1116_vm0, %v3902_v40  ;;  %3743 = vmatmul.mubr.msk.bf16.gmra.mrb[36].mxu1 %vm1116_vm0, %v3903_v41  ;;  %v3966_v40 = vld [vmem:[%s4568_s17 + $0x198] sm:$0xff]  }
  0x63   : > { %3618 = vmatprep.mubr.msk.bf16.mxu0 %vm1116_vm0, %v3904_v42  ;;  %3746 = vmatprep.mubr.msk.bf16.mxu1 %vm1116_vm0, %v3905_v43  ;;  %v3967_v41 = vld [vmem:[%s4568_s17 + $0x398] sm:$0xff]   ;;  %v3968_v42 = vld [vmem:[%s4568_s17 + $0x1a0] sm:$0xff]  }
  0x64   : > { %v3969_v43 = vld [vmem:[%s4568_s17 + $0x3a0] sm:$0xff]  }
  0x6a   : > { %3619 = vmatmul.mubr.msk.bf16.gmra.mrb[40].mxu0 %vm1116_vm0, %v3906_v44  ;;  %3747 = vmatmul.mubr.msk.bf16.gmra.mrb[40].mxu1 %vm1116_vm0, %v3907_v45  ;;  %v3970_v44 = vld [vmem:[%s4568_s17 + $0x1a8] sm:$0xff]  }
  0x6b   : > { %3622 = vmatprep.mubr.msk.bf16.mxu0 %vm1116_vm0, %v3908_v46  ;;  %3750 = vmatprep.mubr.msk.bf16.mxu1 %vm1116_vm0, %v3909_v47  ;;  %v3971_v45 = vld [vmem:[%s4568_s17 + $0x3a8] sm:$0xff]   ;;  %v3972_v46 = vld [vmem:[%s4568_s17 + $0x1b0] sm:$0xff]  }
  0x6c   : > { %v3973_v47 = vld [vmem:[%s4568_s17 + $0x3b0] sm:$0xff]  }
  0x72   : > { %3623 = vmatmul.mubr.msk.bf16.gmra.mrb[44].mxu0 %vm1116_vm0, %v3910_v48  ;;  %3751 = vmatmul.mubr.msk.bf16.gmra.mrb[44].mxu1 %vm1116_vm0, %v3911_v49 }
  0x73   : > { %3626 = vmatprep.mubr.msk.bf16.mxu0 %vm1116_vm0, %v3912_v50  ;;  %3754 = vmatprep.mubr.msk.bf16.mxu1 %vm1116_vm0, %v3913_v51 }
  0x7a   : > { %3627 = vmatmul.mubr.msk.bf16.gmra.mrb[48].mxu0 %vm1116_vm0, %v3914_v52  ;;  %3755 = vmatmul.mubr.msk.bf16.gmra.mrb[48].mxu1 %vm1116_vm0, %v3915_v53  ;;  %v3974_v52 = vld [vmem:[%s4568_s17 + $0x1b8] sm:$0xff]  }
  0x7b   : > { %3630 = vmatprep.mubr.msk.bf16.mxu0 %vm1116_vm0, %v3916_v54  ;;  %3758 = vmatprep.mubr.msk.bf16.mxu1 %vm1116_vm0, %v3917_v55  ;;  %v3975_v53 = vld [vmem:[%s4568_s17 + $0x3b8] sm:$0xff]  }
  0x82   : > { %3631 = vmatmul.mubr.msk.bf16.gmra.mrb[52].mxu0 %vm1116_vm0, %v3918_v56  ;;  %3759 = vmatmul.mubr.msk.bf16.gmra.mrb[52].mxu1 %vm1116_vm0, %v3919_v57  ;;  %v3976_v56 = vld [vmem:[%s4568_s17 + $0x1c0] sm:$0xff]  }
  0x83   : > { %3634 = vmatprep.mubr.msk.bf16.mxu0 %vm1116_vm0, %v3920_v58  ;;  %3762 = vmatprep.mubr.msk.bf16.mxu1 %vm1116_vm0, %v3921_v59  ;;  %v3977_v57 = vld [vmem:[%s4568_s17 + $0x3c0] sm:$0xff]  }
  0x8a   : > { %3635 = vmatmul.mubr.msk.bf16.gmra.mrb[56].mxu0 %vm1116_vm0, %v3922_v60  ;;  %3763 = vmatmul.mubr.msk.bf16.gmra.mrb[56].mxu1 %vm1116_vm0, %v3923_v61 }
  0x8b   : > { %3638 = vmatprep.mubr.msk.bf16.mxu0 %vm1116_vm0, %v3924_v62  ;;  %3766 = vmatprep.mubr.msk.bf16.mxu1 %vm1116_vm0, %v3925_v63 }
  0x92   : > { %3639 = vmatmul.mubr.msk.bf16.gmra.mrb[60].mxu0 %vm1116_vm0, %v3926_v0  ;;  %3767 = vmatmul.mubr.msk.bf16.gmra.mrb[60].mxu1 %vm1116_vm0, %v3927_v1  ;;  %v3978_v0 = vld [vmem:[%s4568_s17 + $0x1c8] sm:$0xff]  }
  0x93   : > { %3642 = vmatprep.mubr.msk.bf16.mxu0 %vm1116_vm0, %v3928_v2  ;;  %3770 = vmatprep.mubr.msk.bf16.mxu1 %vm1116_vm0, %v3929_v3  ;;  %v3979_v1 = vld [vmem:[%s4568_s17 + $0x3c8] sm:$0xff]  }
  0x9a   : > { %3643 = vmatmul.mubr.msk.bf16.gmra.mrb[64].mxu0 %vm1116_vm0, %v3930_v4  ;;  %3771 = vmatmul.mubr.msk.bf16.gmra.mrb[64].mxu1 %vm1116_vm0, %v3931_v5  ;;  %v3980_v4 = vld [vmem:[%s4568_s17 + $0x1d0] sm:$0xff]  }
  0x9b   : > { %3646 = vmatprep.mubr.msk.bf16.mxu0 %vm1116_vm0, %v3932_v6  ;;  %3774 = vmatprep.mubr.msk.bf16.mxu1 %vm1116_vm0, %v3933_v7  ;;  %v3981_v5 = vld [vmem:[%s4568_s17 + $0x3d0] sm:$0xff]  }
  0xa2   : > { %3647 = vmatmul.mubr.msk.bf16.gmra.mrb[68].mxu0 %vm1116_vm0, %v3934_v8  ;;  %3775 = vmatmul.mubr.msk.bf16.gmra.mrb[68].mxu1 %vm1116_vm0, %v3935_v9 }
  0xa3   : > { %3650 = vmatprep.mubr.msk.bf16.mxu0 %vm1116_vm0, %v3936_v10  ;;  %3778 = vmatprep.mubr.msk.bf16.mxu1 %vm1116_vm0, %v3937_v11 }
  0xaa   : > { %3651 = vmatmul.mubr.msk.bf16.gmra.mrb[72].mxu0 %vm1116_vm0, %v3938_v12  ;;  %3779 = vmatmul.mubr.msk.bf16.gmra.mrb[72].mxu1 %vm1116_vm0, %v3939_v13 }
  0xab   : > { %3654 = vmatprep.mubr.msk.bf16.mxu0 %vm1116_vm0, %v3940_v14  ;;  %3782 = vmatprep.mubr.msk.bf16.mxu1 %vm1116_vm0, %v3941_v15 }
  0xb2   : > { %3655 = vmatmul.mubr.msk.bf16.gmra.mrb[76].mxu0 %vm1116_vm0, %v3942_v16  ;;  %3783 = vmatmul.mubr.msk.bf16.gmra.mrb[76].mxu1 %vm1116_vm0, %v3943_v17 }
  0xb3   : > { %3658 = vmatprep.mubr.msk.bf16.mxu0 %vm1116_vm0, %v3944_v18  ;;  %3786 = vmatprep.mubr.msk.bf16.mxu1 %vm1116_vm0, %v3945_v19  ;;  %v3982_v19 = vld [vmem:[%s4568_s17 + $0x1d8] sm:$0xff]  }
  0xba   : > { %3659 = vmatmul.mubr.msk.bf16.gmra.mrb[80].mxu0 %vm1116_vm0, %v3946_v20  ;;  %3787 = vmatmul.mubr.msk.bf16.gmra.mrb[80].mxu1 %vm1116_vm0, %v3947_v21  ;;  %v3983_v20 = vld [vmem:[%s4568_s17 + $0x3d8] sm:$0xff]  }
  0xbb   : > { %3662 = vmatprep.mubr.msk.bf16.mxu0 %vm1116_vm0, %v3948_v22  ;;  %3790 = vmatprep.mubr.msk.bf16.mxu1 %vm1116_vm0, %v3949_v23 }
  0xc2   : > { %3663 = vmatmul.mubr.msk.bf16.gmra.mrb[84].mxu0 %vm1116_vm0, %v3950_v24  ;;  %3791 = vmatmul.mubr.msk.bf16.gmra.mrb[84].mxu1 %vm1116_vm0, %v3951_v25  ;;  %v3984_v24 = vld [vmem:[%s4568_s17 + $0x1e0] sm:$0xff]  }
  0xc3   : > { %3666 = vmatprep.mubr.msk.bf16.mxu0 %vm1116_vm0, %v3952_v26  ;;  %3794 = vmatprep.mubr.msk.bf16.mxu1 %vm1116_vm0, %v3953_v27  ;;  %v3985_v25 = vld [vmem:[%s4568_s17 + $0x3e0] sm:$0xff]  }
  0xca   : > { %3667 = vmatmul.mubr.msk.bf16.gmra.mrb[88].mxu0 %vm1116_vm0, %v3954_v28  ;;  %3795 = vmatmul.mubr.msk.bf16.gmra.mrb[88].mxu1 %vm1116_vm0, %v3955_v29 }
  0xcb   : > { %3670 = vmatprep.mubr.msk.bf16.mxu0 %vm1116_vm0, %v3956_v30  ;;  %3798 = vmatprep.mubr.msk.bf16.mxu1 %vm1116_vm0, %v3957_v31 }
  0xd2   : > { %3671 = vmatmul.mubr.msk.bf16.gmra.mrb[92].mxu0 %vm1116_vm0, %v3958_v32  ;;  %3799 = vmatmul.mubr.msk.bf16.gmra.mrb[92].mxu1 %vm1116_vm0, %v3959_v33 }
  0xd3   : > { %3674 = vmatprep.mubr.msk.bf16.mxu0 %vm1116_vm0, %v3960_v34  ;;  %3802 = vmatprep.mubr.msk.bf16.mxu1 %vm1116_vm0, %v3961_v35 }
  0xda   : > { %3675 = vmatmul.mubr.msk.bf16.gmra.mrb[96].mxu0 %vm1116_vm0, %v3962_v36  ;;  %3803 = vmatmul.mubr.msk.bf16.gmra.mrb[96].mxu1 %vm1116_vm0, %v3963_v37 }
  0xdb   : > { %3678 = vmatprep.mubr.msk.bf16.mxu0 %vm1116_vm0, %v3964_v38  ;;  %3806 = vmatprep.mubr.msk.bf16.mxu1 %vm1116_vm0, %v3965_v39  ;;  %v3986_v39 = vld [vmem:[%s4568_s17 + $0x1e8] sm:$0xff]  }
  0xe2   : > { %3679 = vmatmul.mubr.msk.bf16.gmra.mrb[100].mxu0 %vm1116_vm0, %v3966_v40  ;;  %3807 = vmatmul.mubr.msk.bf16.gmra.mrb[100].mxu1 %vm1116_vm0, %v3967_v41  ;;  %v3987_v40 = vld [vmem:[%s4568_s17 + $0x3e8] sm:$0xff]  }
  0xe3   : > { %3682 = vmatprep.mubr.msk.bf16.mxu0 %vm1116_vm0, %v3968_v42  ;;  %3810 = vmatprep.mubr.msk.bf16.mxu1 %vm1116_vm0, %v3969_v43 }
  0xea   : > { %3683 = vmatmul.mubr.msk.bf16.gmra.mrb[104].mxu0 %vm1116_vm0, %v3970_v44  ;;  %3811 = vmatmul.mubr.msk.bf16.gmra.mrb[104].mxu1 %vm1116_vm0, %v3971_v45  ;;  %v3988_v44 = vld [vmem:[%s4568_s17 + $0x1f0] sm:$0xff]  }
  0xeb   : > { %3686 = vmatprep.mubr.msk.bf16.mxu0 %vm1116_vm0, %v3972_v46  ;;  %3814 = vmatprep.mubr.msk.bf16.mxu1 %vm1116_vm0, %v3973_v47  ;;  %v3989_v45 = vld [vmem:[%s4568_s17 + $0x3f0] sm:$0xff]  }
  0xed   : > { %v3580_v48 = vpop.f32.mrb[0].mxu0  ;;  %v3708_v49 = vpop.f32.mrb[0].mxu1 }
  0xee   : > { %3992 = vtanh.f32 %v3580_v48  ;;  %v1535_v50 = vpop.f32.mrb[1].mxu0  ;;  %v2047_v51 = vpop.f32.mrb[1].mxu1 }
  0xef   : > { %3994 = vtanh.f32 %v3708_v49  ;;  %v3581_v54 = vpop.f32.mrb[2].mxu0  ;;  %v3709_v55 = vpop.f32.mrb[2].mxu1 }
  0xf0   : > { %3996 = vtanh.f32 %v1535_v50  ;;  %v1538_v58 = vpop.f32.mrb[3].mxu0  ;;  %v2050_v59 = vpop.f32.mrb[3].mxu1 }
  0xf1   : > { %3998 = vtanh.f32 %v2047_v51 }
  0xf2   : > { %4000 = vtanh.f32 %v3581_v54  ;;  %3687 = vmatmul.mubr.msk.bf16.gmra.mrb[108].mxu0 %vm1116_vm0, %v3974_v52  ;;  %3815 = vmatmul.mubr.msk.bf16.gmra.mrb[108].mxu1 %vm1116_vm0, %v3975_v53 }
  0xf3   : > { %4002 = vtanh.f32 %v3709_v55  ;;  %3690 = vmatprep.mubr.msk.bf16.mxu0 %vm1116_vm0, %v3976_v56  ;;  %3818 = vmatprep.mubr.msk.bf16.mxu1 %vm1116_vm0, %v3977_v57 }
  0xf4   : > { %4004 = vtanh.f32 %v1538_v58 }
  0xf5   : > { %4006 = vtanh.f32 %v2050_v59  ;;  %v3584_v60 = vpop.f32.mrb[4].mxu0  ;;  %v3712_v61 = vpop.f32.mrb[4].mxu1  ;;  %v3990_v59 = vld [vmem:[%s4568_s17 + $0x1f8] sm:$0xff]  }
  0xf6   : > { %4008 = vtanh.f32 %v3584_v60  ;;  %v1551_v62 = vpop.f32.mrb[5].mxu0  ;;  %v2063_v63 = vpop.f32.mrb[5].mxu1  ;;  %v3991_v60 = vld [vmem:[%s4568_s17 + $0x3f8] sm:$0xff]  }
  0xf7   : > { %4010 = vtanh.f32 %v3712_v61  ;;  %v3585_v2 = vpop.f32.mrb[6].mxu0  ;;  %v3713_v3 = vpop.f32.mrb[6].mxu1 }
  0xf8   : > { %v3993_v6 = vpop.eup %3992  ;;  %4012 = vtanh.f32 %v1551_v62  ;;  %v1554_v7 = vpop.f32.mrb[7].mxu0 }
  0xf9   : > { %v2066_v8 = vpop.f32.mrb[7].mxu1  ;;  %v3995_v9 = vpop.eup %3994  ;;  %2817 = vst.msk [vmem:[%s4805_s24 + $0x10] sm:$0xff] %vm2814_vm1, %v3993_v6  ;;  %4014 = vtanh.f32 %v2063_v63 }
  0xfa   : > { %v3997_v10 = vpop.eup %3996  ;;  %2945 = vst.msk [vmem:[%s4805_s24 + $0x410] sm:$0xff] %vm2814_vm1, %v3995_v9  ;;  %4016 = vtanh.f32 %v3585_v2  ;;  %3691 = vmatmul.mubr.msk.bf16.gmra.mrb[112].mxu0 %vm1116_vm0, %v3978_v0  ;;  %3819 = vmatmul.mubr.msk.bf16.gmra.mrb[112].mxu1 %vm1116_vm0, %v3979_v1 }
  0xfb   : > { %v3999_v11 = vpop.eup %3998  ;;  %2815 = vst.msk [vmem:[%s4805_s24] sm:$0xff] %vm2814_vm1, %v3997_v10  ;;  %4018 = vtanh.f32 %v3713_v3  ;;  %3694 = vmatprep.mubr.msk.bf16.mxu0 %vm1116_vm0, %v3980_v4  ;;  %3822 = vmatprep.mubr.msk.bf16.mxu1 %vm1116_vm0, %v3981_v5 }
  0xfc   : > { %v4001_v12 = vpop.eup %4000  ;;  %2943 = vst.msk [vmem:[%s4805_s24 + $0x400] sm:$0xff] %vm2814_vm1, %v3999_v11  ;;  %4020 = vtanh.f32 %v1554_v7 }
  0xfd   : > { %v4003_v13 = vpop.eup %4002  ;;  %2818 = vst.msk [vmem:[%s4805_s24 + $0x18] sm:$0xff] %vm2814_vm1, %v4001_v12  ;;  %4022 = vtanh.f32 %v2066_v8  ;;  %v3588_v14 = vpop.f32.mrb[8].mxu0 }
  0xfe   : > { %v3716_v15 = vpop.f32.mrb[8].mxu1  ;;  %v4005_v16 = vpop.eup %4004  ;;  %2946 = vst.msk [vmem:[%s4805_s24 + $0x418] sm:$0xff] %vm2814_vm1, %v4003_v13  ;;  %4024 = vtanh.f32 %v3588_v14 }
  0xff   : > { %v1567_v17 = vpop.f32.mrb[9].mxu0  ;;  %v2079_v18 = vpop.f32.mrb[9].mxu1  ;;  %2816 = vst.msk [vmem:[%s4805_s24 + $0x8] sm:$0xff] %vm2814_vm1, %v4005_v16  ;;  %4026 = vtanh.f32 %v3716_v15 }
 0x100   : > { %v4007_v21 = vpop.eup %4006  ;;  %v3589_v22 = vpop.f32.mrb[10].mxu0  ;;  %4028 = vtanh.f32 %v1567_v17 }
 0x101   : > { %v3717_v23 = vpop.f32.mrb[10].mxu1  ;;  %v4009_v26 = vpop.eup %4008  ;;  %2944 = vst.msk [vmem:[%s4805_s24 + $0x408] sm:$0xff] %vm2814_vm1, %v4007_v21  ;;  %4030 = vtanh.f32 %v2079_v18 }
 0x102   : > { %v1570_v27 = vpop.f32.mrb[11].mxu0  ;;  %v2082_v28 = vpop.f32.mrb[11].mxu1  ;;  %2821 = vst.msk [vmem:[%s4805_s24 + $0x30] sm:$0xff] %vm2814_vm1, %v4009_v26  ;;  %4032 = vtanh.f32 %v3589_v22  ;;  %3695 = vmatmul.mubr.msk.bf16.gmra.mrb[116].mxu0 %vm1116_vm0, %v3982_v19  ;;  %3823 = vmatmul.mubr.msk.bf16.gmra.mrb[116].mxu1 %vm1116_vm0, %v3983_v20 }
 0x103   : > { %v4011_v29 = vpop.eup %4010  ;;  %4034 = vtanh.f32 %v3717_v23  ;;  %3698 = vmatprep.mubr.msk.bf16.mxu0 %vm1116_vm0, %v3984_v24  ;;  %3826 = vmatprep.mubr.msk.bf16.mxu1 %vm1116_vm0, %v3985_v25 }
 0x104   : > { %v4013_v30 = vpop.eup %4012  ;;  %2949 = vst.msk [vmem:[%s4805_s24 + $0x430] sm:$0xff] %vm2814_vm1, %v4011_v29  ;;  %4036 = vtanh.f32 %v1570_v27 }
 0x105   : > { %v4015_v31 = vpop.eup %4014  ;;  %2819 = vst.msk [vmem:[%s4805_s24 + $0x20] sm:$0xff] %vm2814_vm1, %v4013_v30  ;;  %4038 = vtanh.f32 %v2082_v28  ;;  %v3592_v34 = vpop.f32.mrb[12].mxu0 }
 0x106   : > { %v4017_v32 = vpop.eup %4016  ;;  %2947 = vst.msk [vmem:[%s4805_s24 + $0x420] sm:$0xff] %vm2814_vm1, %v4015_v31  ;;  %v3720_v35 = vpop.f32.mrb[12].mxu1  ;;  %4040 = vtanh.f32 %v3592_v34 }
 0x107   : > { %v4019_v33 = vpop.eup %4018  ;;  %2822 = vst.msk [vmem:[%s4805_s24 + $0x38] sm:$0xff] %vm2814_vm1, %v4017_v32  ;;  %v1583_v37 = vpop.f32.mrb[13].mxu0  ;;  %4042 = vtanh.f32 %v3720_v35 }
 0x108   : > { %v4021_v36 = vpop.eup %4020  ;;  %2950 = vst.msk [vmem:[%s4805_s24 + $0x438] sm:$0xff] %vm2814_vm1, %v4019_v33  ;;  %v2095_v38 = vpop.f32.mrb[13].mxu1  ;;  %4044 = vtanh.f32 %v1583_v37 }
 0x109   : > { %v4023_v41 = vpop.eup %4022  ;;  %2820 = vst.msk [vmem:[%s4805_s24 + $0x28] sm:$0xff] %vm2814_vm1, %v4021_v36  ;;  %v3593_v42 = vpop.f32.mrb[14].mxu0  ;;  %4046 = vtanh.f32 %v2095_v38 }
 0x10a   : > { %v3721_v43 = vpop.f32.mrb[14].mxu1  ;;  %v4025_v46 = vpop.eup %4024  ;;  %2948 = vst.msk [vmem:[%s4805_s24 + $0x428] sm:$0xff] %vm2814_vm1, %v4023_v41  ;;  %4048 = vtanh.f32 %v3593_v42  ;;  %3699 = vmatmul.mubr.msk.bf16.gmra.mrb[120].mxu0 %vm1116_vm0, %v3986_v39  ;;  %3827 = vmatmul.mubr.msk.bf16.gmra.mrb[120].mxu1 %vm1116_vm0, %v3987_v40 }
 0x10b   : > { %v1586_v47 = vpop.f32.mrb[15].mxu0  ;;  %v2098_v48 = vpop.f32.mrb[15].mxu1  ;;  %2825 = vst.msk [vmem:[%s4805_s24 + $0x50] sm:$0xff] %vm2814_vm1, %v4025_v46  ;;  %4050 = vtanh.f32 %v3721_v43  ;;  %3702 = vmatprep.mubr.msk.bf16.mxu0 %vm1116_vm0, %v3988_v44  ;;  %3830 = vmatprep.mubr.msk.bf16.mxu1 %vm1116_vm0, %v3989_v45 }
 0x10c   : > { %v4027_v49 = vpop.eup %4026  ;;  %4052 = vtanh.f32 %v1586_v47 }
 0x10d   : > { %v4029_v50 = vpop.eup %4028  ;;  %2953 = vst.msk [vmem:[%s4805_s24 + $0x450] sm:$0xff] %vm2814_vm1, %v4027_v49  ;;  %4054 = vtanh.f32 %v2098_v48  ;;  %v3596_v54 = vpop.f32.mrb[16].mxu0 }
 0x10e   : > { %v4031_v51 = vpop.eup %4030  ;;  %2823 = vst.msk [vmem:[%s4805_s24 + $0x40] sm:$0xff] %vm2814_vm1, %v4029_v50  ;;  %v3724_v55 = vpop.f32.mrb[16].mxu1  ;;  %4056 = vtanh.f32 %v3596_v54 }
 0x10f   : > { %v4033_v52 = vpop.eup %4032  ;;  %2951 = vst.msk [vmem:[%s4805_s24 + $0x440] sm:$0xff] %vm2814_vm1, %v4031_v51  ;;  %v1599_v57 = vpop.f32.mrb[17].mxu0  ;;  %4058 = vtanh.f32 %v3724_v55 }
 0x110   : > { %v4035_v53 = vpop.eup %4034  ;;  %2826 = vst.msk [vmem:[%s4805_s24 + $0x58] sm:$0xff] %vm2814_vm1, %v4033_v52  ;;  %v2111_v58 = vpop.f32.mrb[17].mxu1  ;;  %4060 = vtanh.f32 %v1599_v57 }
 0x111   : > { %v4037_v56 = vpop.eup %4036  ;;  %2954 = vst.msk [vmem:[%s4805_s24 + $0x458] sm:$0xff] %vm2814_vm1, %v4035_v53  ;;  %v3597_v62 = vpop.f32.mrb[18].mxu0  ;;  %4062 = vtanh.f32 %v2111_v58 }
 0x112   : > { %v4039_v61 = vpop.eup %4038  ;;  %2824 = vst.msk [vmem:[%s4805_s24 + $0x48] sm:$0xff] %vm2814_vm1, %v4037_v56  ;;  %v3725_v63 = vpop.f32.mrb[18].mxu1  ;;  %4064 = vtanh.f32 %v3597_v62  ;;  %3703 = vmatmul.mubr.msk.bf16.gmra.mrb[124].mxu0 %vm1116_vm0, %v3990_v59  ;;  %3831 = vmatmul.mubr.msk.bf16.gmra.mrb[124].mxu1 %vm1116_vm0, %v3991_v60 }
 0x113   : > { %v4041_v0 = vpop.eup %4040  ;;  %2952 = vst.msk [vmem:[%s4805_s24 + $0x448] sm:$0xff] %vm2814_vm1, %v4039_v61  ;;  %v1602_v1 = vpop.f32.mrb[19].mxu0  ;;  %4066 = vtanh.f32 %v3725_v63 }
 0x114   : > { %v2114_v2 = vpop.f32.mrb[19].mxu1  ;;  %v4043_v3 = vpop.eup %4042  ;;  %2829 = vst.msk [vmem:[%s4805_s24 + $0x70] sm:$0xff] %vm2814_vm1, %v4041_v0  ;;  %4068 = vtanh.f32 %v1602_v1 }
 0x115   : > { %v4045_v4 = vpop.eup %4044  ;;  %2957 = vst.msk [vmem:[%s4805_s24 + $0x470] sm:$0xff] %vm2814_vm1, %v4043_v3  ;;  %4070 = vtanh.f32 %v2114_v2  ;;  %v3600_v8 = vpop.f32.mrb[20].mxu0 }
 0x116   : > { %v4047_v5 = vpop.eup %4046  ;;  %2827 = vst.msk [vmem:[%s4805_s24 + $0x60] sm:$0xff] %vm2814_vm1, %v4045_v4  ;;  %v3728_v9 = vpop.f32.mrb[20].mxu1  ;;  %4072 = vtanh.f32 %v3600_v8 }
 0x117   : > { %v4049_v6 = vpop.eup %4048  ;;  %2955 = vst.msk [vmem:[%s4805_s24 + $0x460] sm:$0xff] %vm2814_vm1, %v4047_v5  ;;  %v1615_v11 = vpop.f32.mrb[21].mxu0  ;;  %4074 = vtanh.f32 %v3728_v9 }
 0x118   : > { %v4051_v7 = vpop.eup %4050  ;;  %2830 = vst.msk [vmem:[%s4805_s24 + $0x78] sm:$0xff] %vm2814_vm1, %v4049_v6  ;;  %v2127_v12 = vpop.f32.mrb[21].mxu1  ;;  %4076 = vtanh.f32 %v1615_v11 }
 0x119   : > { %v4053_v10 = vpop.eup %4052  ;;  %2958 = vst.msk [vmem:[%s4805_s24 + $0x478] sm:$0xff] %vm2814_vm1, %v4051_v7  ;;  %v3601_v14 = vpop.f32.mrb[22].mxu0  ;;  %4078 = vtanh.f32 %v2127_v12 }
 0x11a   : > { %v4055_v13 = vpop.eup %4054  ;;  %2828 = vst.msk [vmem:[%s4805_s24 + $0x68] sm:$0xff] %vm2814_vm1, %v4053_v10  ;;  %v3729_v15 = vpop.f32.mrb[22].mxu1  ;;  %4080 = vtanh.f32 %v3601_v14 }
 0x11b   : > { %v4057_v16 = vpop.eup %4056  ;;  %2956 = vst.msk [vmem:[%s4805_s24 + $0x468] sm:$0xff] %vm2814_vm1, %v4055_v13  ;;  %v1618_v17 = vpop.f32.mrb[23].mxu0  ;;  %4082 = vtanh.f32 %v3729_v15 }
 0x11c   : > { %v2130_v18 = vpop.f32.mrb[23].mxu1  ;;  %v4059_v19 = vpop.eup %4058  ;;  %2833 = vst.msk [vmem:[%s4805_s24 + $0x90] sm:$0xff] %vm2814_vm1, %v4057_v16  ;;  %4084 = vtanh.f32 %v1618_v17 }
 0x11d   : > { %v4061_v20 = vpop.eup %4060  ;;  %2961 = vst.msk [vmem:[%s4805_s24 + $0x490] sm:$0xff] %vm2814_vm1, %v4059_v19  ;;  %4086 = vtanh.f32 %v2130_v18  ;;  %v3604_v24 = vpop.f32.mrb[24].mxu0 }
 0x11e   : > { %v4063_v21 = vpop.eup %4062  ;;  %2831 = vst.msk [vmem:[%s4805_s24 + $0x80] sm:$0xff] %vm2814_vm1, %v4061_v20  ;;  %v3732_v25 = vpop.f32.mrb[24].mxu1  ;;  %4088 = vtanh.f32 %v3604_v24 }
 0x11f   : > { %v4065_v22 = vpop.eup %4064  ;;  %2959 = vst.msk [vmem:[%s4805_s24 + $0x480] sm:$0xff] %vm2814_vm1, %v4063_v21  ;;  %v1631_v27 = vpop.f32.mrb[25].mxu0  ;;  %4090 = vtanh.f32 %v3732_v25 }
 0x120   : > { %v4067_v23 = vpop.eup %4066  ;;  %2834 = vst.msk [vmem:[%s4805_s24 + $0x98] sm:$0xff] %vm2814_vm1, %v4065_v22  ;;  %v2143_v28 = vpop.f32.mrb[25].mxu1  ;;  %4092 = vtanh.f32 %v1631_v27 }
 0x121   : > { %v4069_v26 = vpop.eup %4068  ;;  %2962 = vst.msk [vmem:[%s4805_s24 + $0x498] sm:$0xff] %vm2814_vm1, %v4067_v23  ;;  %v3605_v30 = vpop.f32.mrb[26].mxu0  ;;  %4094 = vtanh.f32 %v2143_v28 }
 0x122   : > { %v4071_v29 = vpop.eup %4070  ;;  %2832 = vst.msk [vmem:[%s4805_s24 + $0x88] sm:$0xff] %vm2814_vm1, %v4069_v26  ;;  %v3733_v31 = vpop.f32.mrb[26].mxu1  ;;  %4096 = vtanh.f32 %v3605_v30 }
 0x123   : > { %v4073_v32 = vpop.eup %4072  ;;  %2960 = vst.msk [vmem:[%s4805_s24 + $0x488] sm:$0xff] %vm2814_vm1, %v4071_v29  ;;  %v1634_v33 = vpop.f32.mrb[27].mxu0  ;;  %4098 = vtanh.f32 %v3733_v31 }
 0x124   : > { %v2146_v34 = vpop.f32.mrb[27].mxu1  ;;  %v4075_v35 = vpop.eup %4074  ;;  %2837 = vst.msk [vmem:[%s4805_s24 + $0xb0] sm:$0xff] %vm2814_vm1, %v4073_v32  ;;  %4100 = vtanh.f32 %v1634_v33 }
 0x125   : > { %v4077_v36 = vpop.eup %4076  ;;  %2965 = vst.msk [vmem:[%s4805_s24 + $0x4b0] sm:$0xff] %vm2814_vm1, %v4075_v35  ;;  %4102 = vtanh.f32 %v2146_v34  ;;  %v3608_v40 = vpop.f32.mrb[28].mxu0 }
 0x126   : > { %v4079_v37 = vpop.eup %4078  ;;  %2835 = vst.msk [vmem:[%s4805_s24 + $0xa0] sm:$0xff] %vm2814_vm1, %v4077_v36  ;;  %v3736_v41 = vpop.f32.mrb[28].mxu1  ;;  %4104 = vtanh.f32 %v3608_v40 }
 0x127   : > { %v4081_v38 = vpop.eup %4080  ;;  %2963 = vst.msk [vmem:[%s4805_s24 + $0x4a0] sm:$0xff] %vm2814_vm1, %v4079_v37  ;;  %v1647_v43 = vpop.f32.mrb[29].mxu0  ;;  %4106 = vtanh.f32 %v3736_v41 }
 0x128   : > { %v4083_v39 = vpop.eup %4082  ;;  %2838 = vst.msk [vmem:[%s4805_s24 + $0xb8] sm:$0xff] %vm2814_vm1, %v4081_v38  ;;  %v2159_v44 = vpop.f32.mrb[29].mxu1  ;;  %4108 = vtanh.f32 %v1647_v43 }
 0x129   : > { %v4085_v42 = vpop.eup %4084  ;;  %2966 = vst.msk [vmem:[%s4805_s24 + $0x4b8] sm:$0xff] %vm2814_vm1, %v4083_v39  ;;  %v3609_v46 = vpop.f32.mrb[30].mxu0  ;;  %4110 = vtanh.f32 %v2159_v44 }
 0x12a   : > { %v4087_v45 = vpop.eup %4086  ;;  %2836 = vst.msk [vmem:[%s4805_s24 + $0xa8] sm:$0xff] %vm2814_vm1, %v4085_v42  ;;  %v3737_v47 = vpop.f32.mrb[30].mxu1  ;;  %4112 = vtanh.f32 %v3609_v46 }
 0x12b   : > { %v4089_v48 = vpop.eup %4088  ;;  %2964 = vst.msk [vmem:[%s4805_s24 + $0x4a8] sm:$0xff] %vm2814_vm1, %v4087_v45  ;;  %v1650_v49 = vpop.f32.mrb[31].mxu0  ;;  %4114 = vtanh.f32 %v3737_v47 }
 0x12c   : > { %v2162_v50 = vpop.f32.mrb[31].mxu1  ;;  %v4091_v51 = vpop.eup %4090  ;;  %2841 = vst.msk [vmem:[%s4805_s24 + $0xd0] sm:$0xff] %vm2814_vm1, %v4089_v48  ;;  %4116 = vtanh.f32 %v1650_v49 }
 0x12d   : > { %v4093_v52 = vpop.eup %4092  ;;  %2969 = vst.msk [vmem:[%s4805_s24 + $0x4d0] sm:$0xff] %vm2814_vm1, %v4091_v51  ;;  %4118 = vtanh.f32 %v2162_v50  ;;  %v3612_v56 = vpop.f32.mrb[32].mxu0 }
 0x12e   : > { %v4095_v53 = vpop.eup %4094  ;;  %2839 = vst.msk [vmem:[%s4805_s24 + $0xc0] sm:$0xff] %vm2814_vm1, %v4093_v52  ;;  %v3740_v57 = vpop.f32.mrb[32].mxu1  ;;  %4120 = vtanh.f32 %v3612_v56 }
 0x12f   : > { %v4097_v54 = vpop.eup %4096  ;;  %2967 = vst.msk [vmem:[%s4805_s24 + $0x4c0] sm:$0xff] %vm2814_vm1, %v4095_v53  ;;  %v1663_v59 = vpop.f32.mrb[33].mxu0  ;;  %4122 = vtanh.f32 %v3740_v57 }
 0x130   : > { %v4099_v55 = vpop.eup %4098  ;;  %2842 = vst.msk [vmem:[%s4805_s24 + $0xd8] sm:$0xff] %vm2814_vm1, %v4097_v54  ;;  %v2175_v60 = vpop.f32.mrb[33].mxu1  ;;  %4124 = vtanh.f32 %v1663_v59 }
 0x131   : > { %v4101_v58 = vpop.eup %4100  ;;  %2970 = vst.msk [vmem:[%s4805_s24 + $0x4d8] sm:$0xff] %vm2814_vm1, %v4099_v55  ;;  %v3613_v62 = vpop.f32.mrb[34].mxu0  ;;  %4126 = vtanh.f32 %v2175_v60 }
 0x132   : > { %v4103_v61 = vpop.eup %4102  ;;  %2840 = vst.msk [vmem:[%s4805_s24 + $0xc8] sm:$0xff] %vm2814_vm1, %v4101_v58  ;;  %v3741_v63 = vpop.f32.mrb[34].mxu1  ;;  %4128 = vtanh.f32 %v3613_v62 }
 0x133   : > { %v4105_v0 = vpop.eup %4104  ;;  %2968 = vst.msk [vmem:[%s4805_s24 + $0x4c8] sm:$0xff] %vm2814_vm1, %v4103_v61  ;;  %v1666_v1 = vpop.f32.mrb[35].mxu0  ;;  %4130 = vtanh.f32 %v3741_v63 }
 0x134   : > { %v2178_v2 = vpop.f32.mrb[35].mxu1  ;;  %v4107_v3 = vpop.eup %4106  ;;  %2845 = vst.msk [vmem:[%s4805_s24 + $0xf0] sm:$0xff] %vm2814_vm1, %v4105_v0  ;;  %4132 = vtanh.f32 %v1666_v1 }
 0x135   : > { %v4109_v4 = vpop.eup %4108  ;;  %2973 = vst.msk [vmem:[%s4805_s24 + $0x4f0] sm:$0xff] %vm2814_vm1, %v4107_v3  ;;  %4134 = vtanh.f32 %v2178_v2  ;;  %v3616_v8 = vpop.f32.mrb[36].mxu0 }
 0x136   : > { %v4111_v5 = vpop.eup %4110  ;;  %2843 = vst.msk [vmem:[%s4805_s24 + $0xe0] sm:$0xff] %vm2814_vm1, %v4109_v4  ;;  %v3744_v9 = vpop.f32.mrb[36].mxu1  ;;  %4136 = vtanh.f32 %v3616_v8 }
 0x137   : > { %v4113_v6 = vpop.eup %4112  ;;  %2971 = vst.msk [vmem:[%s4805_s24 + $0x4e0] sm:$0xff] %vm2814_vm1, %v4111_v5  ;;  %v1679_v11 = vpop.f32.mrb[37].mxu0  ;;  %4138 = vtanh.f32 %v3744_v9 }
 0x138   : > { %v4115_v7 = vpop.eup %4114  ;;  %2846 = vst.msk [vmem:[%s4805_s24 + $0xf8] sm:$0xff] %vm2814_vm1, %v4113_v6  ;;  %v2191_v12 = vpop.f32.mrb[37].mxu1  ;;  %4140 = vtanh.f32 %v1679_v11 }
 0x139   : > { %v4117_v10 = vpop.eup %4116  ;;  %2974 = vst.msk [vmem:[%s4805_s24 + $0x4f8] sm:$0xff] %vm2814_vm1, %v4115_v7  ;;  %v3617_v14 = vpop.f32.mrb[38].mxu0  ;;  %4142 = vtanh.f32 %v2191_v12 }
 0x13a   : > { %v4119_v13 = vpop.eup %4118  ;;  %2844 = vst.msk [vmem:[%s4805_s24 + $0xe8] sm:$0xff] %vm2814_vm1, %v4117_v10  ;;  %v3745_v15 = vpop.f32.mrb[38].mxu1  ;;  %4144 = vtanh.f32 %v3617_v14 }
 0x13b   : > { %v4121_v16 = vpop.eup %4120  ;;  %2972 = vst.msk [vmem:[%s4805_s24 + $0x4e8] sm:$0xff] %vm2814_vm1, %v4119_v13  ;;  %v1682_v17 = vpop.f32.mrb[39].mxu0  ;;  %4146 = vtanh.f32 %v3745_v15 }
 0x13c   : > { %v2194_v18 = vpop.f32.mrb[39].mxu1  ;;  %v4123_v19 = vpop.eup %4122  ;;  %2849 = vst.msk [vmem:[%s4805_s24 + $0x110] sm:$0xff] %vm2814_vm1, %v4121_v16  ;;  %4148 = vtanh.f32 %v1682_v17 }
 0x13d   : > { %v4125_v20 = vpop.eup %4124  ;;  %2977 = vst.msk [vmem:[%s4805_s24 + $0x510] sm:$0xff] %vm2814_vm1, %v4123_v19  ;;  %4150 = vtanh.f32 %v2194_v18  ;;  %v3620_v24 = vpop.f32.mrb[40].mxu0 }
 0x13e   : > { %v4127_v21 = vpop.eup %4126  ;;  %2847 = vst.msk [vmem:[%s4805_s24 + $0x100] sm:$0xff] %vm2814_vm1, %v4125_v20  ;;  %v3748_v25 = vpop.f32.mrb[40].mxu1  ;;  %4152 = vtanh.f32 %v3620_v24 }
 0x13f   : > { %v4129_v22 = vpop.eup %4128  ;;  %2975 = vst.msk [vmem:[%s4805_s24 + $0x500] sm:$0xff] %vm2814_vm1, %v4127_v21  ;;  %v1695_v27 = vpop.f32.mrb[41].mxu0  ;;  %4154 = vtanh.f32 %v3748_v25 }
 0x140   : > { %v4131_v23 = vpop.eup %4130  ;;  %2850 = vst.msk [vmem:[%s4805_s24 + $0x118] sm:$0xff] %vm2814_vm1, %v4129_v22  ;;  %v2207_v28 = vpop.f32.mrb[41].mxu1  ;;  %4156 = vtanh.f32 %v1695_v27 }
 0x141   : > { %v4133_v26 = vpop.eup %4132  ;;  %2978 = vst.msk [vmem:[%s4805_s24 + $0x518] sm:$0xff] %vm2814_vm1, %v4131_v23  ;;  %v3621_v30 = vpop.f32.mrb[42].mxu0  ;;  %4158 = vtanh.f32 %v2207_v28 }
 0x142   : > { %v4135_v29 = vpop.eup %4134  ;;  %2848 = vst.msk [vmem:[%s4805_s24 + $0x108] sm:$0xff] %vm2814_vm1, %v4133_v26  ;;  %v3749_v31 = vpop.f32.mrb[42].mxu1  ;;  %4160 = vtanh.f32 %v3621_v30 }
 0x143   : > { %v4137_v32 = vpop.eup %4136  ;;  %2976 = vst.msk [vmem:[%s4805_s24 + $0x508] sm:$0xff] %vm2814_vm1, %v4135_v29  ;;  %v1698_v33 = vpop.f32.mrb[43].mxu0  ;;  %4162 = vtanh.f32 %v3749_v31 }
 0x144   : > { %v2210_v34 = vpop.f32.mrb[43].mxu1  ;;  %v4139_v35 = vpop.eup %4138  ;;  %2853 = vst.msk [vmem:[%s4805_s24 + $0x130] sm:$0xff] %vm2814_vm1, %v4137_v32  ;;  %4164 = vtanh.f32 %v1698_v33 }
 0x145   : > { %v4141_v36 = vpop.eup %4140  ;;  %2981 = vst.msk [vmem:[%s4805_s24 + $0x530] sm:$0xff] %vm2814_vm1, %v4139_v35  ;;  %4166 = vtanh.f32 %v2210_v34  ;;  %v3624_v40 = vpop.f32.mrb[44].mxu0 }
 0x146   : > { %v4143_v37 = vpop.eup %4142  ;;  %2851 = vst.msk [vmem:[%s4805_s24 + $0x120] sm:$0xff] %vm2814_vm1, %v4141_v36  ;;  %v3752_v41 = vpop.f32.mrb[44].mxu1  ;;  %4168 = vtanh.f32 %v3624_v40 }
 0x147   : > { %v4145_v38 = vpop.eup %4144  ;;  %2979 = vst.msk [vmem:[%s4805_s24 + $0x520] sm:$0xff] %vm2814_vm1, %v4143_v37  ;;  %v1711_v43 = vpop.f32.mrb[45].mxu0  ;;  %4170 = vtanh.f32 %v3752_v41 }
 0x148   : > { %v4147_v39 = vpop.eup %4146  ;;  %2854 = vst.msk [vmem:[%s4805_s24 + $0x138] sm:$0xff] %vm2814_vm1, %v4145_v38  ;;  %v2223_v44 = vpop.f32.mrb[45].mxu1  ;;  %4172 = vtanh.f32 %v1711_v43 }
 0x149   : > { %v4149_v42 = vpop.eup %4148  ;;  %2982 = vst.msk [vmem:[%s4805_s24 + $0x538] sm:$0xff] %vm2814_vm1, %v4147_v39  ;;  %v3625_v46 = vpop.f32.mrb[46].mxu0  ;;  %4174 = vtanh.f32 %v2223_v44 }
 0x14a   : > { %v4151_v45 = vpop.eup %4150  ;;  %2852 = vst.msk [vmem:[%s4805_s24 + $0x128] sm:$0xff] %vm2814_vm1, %v4149_v42  ;;  %v3753_v47 = vpop.f32.mrb[46].mxu1  ;;  %4176 = vtanh.f32 %v3625_v46 }
 0x14b   : > { %v4153_v48 = vpop.eup %4152  ;;  %2980 = vst.msk [vmem:[%s4805_s24 + $0x528] sm:$0xff] %vm2814_vm1, %v4151_v45  ;;  %v1714_v49 = vpop.f32.mrb[47].mxu0  ;;  %4178 = vtanh.f32 %v3753_v47 }
 0x14c   : > { %v2226_v50 = vpop.f32.mrb[47].mxu1  ;;  %v4155_v51 = vpop.eup %4154  ;;  %2857 = vst.msk [vmem:[%s4805_s24 + $0x150] sm:$0xff] %vm2814_vm1, %v4153_v48  ;;  %4180 = vtanh.f32 %v1714_v49 }
 0x14d   : > { %v4157_v52 = vpop.eup %4156  ;;  %2985 = vst.msk [vmem:[%s4805_s24 + $0x550] sm:$0xff] %vm2814_vm1, %v4155_v51  ;;  %4182 = vtanh.f32 %v2226_v50  ;;  %v3628_v56 = vpop.f32.mrb[48].mxu0 }
 0x14e   : > { %v4159_v53 = vpop.eup %4158  ;;  %2855 = vst.msk [vmem:[%s4805_s24 + $0x140] sm:$0xff] %vm2814_vm1, %v4157_v52  ;;  %v3756_v57 = vpop.f32.mrb[48].mxu1  ;;  %4184 = vtanh.f32 %v3628_v56 }
 0x14f   : > { %v4161_v54 = vpop.eup %4160  ;;  %2983 = vst.msk [vmem:[%s4805_s24 + $0x540] sm:$0xff] %vm2814_vm1, %v4159_v53  ;;  %v1727_v59 = vpop.f32.mrb[49].mxu0  ;;  %4186 = vtanh.f32 %v3756_v57 }
 0x150   : > { %v4163_v55 = vpop.eup %4162  ;;  %2858 = vst.msk [vmem:[%s4805_s24 + $0x158] sm:$0xff] %vm2814_vm1, %v4161_v54  ;;  %v2239_v60 = vpop.f32.mrb[49].mxu1  ;;  %4188 = vtanh.f32 %v1727_v59 }
 0x151   : > { %v4165_v58 = vpop.eup %4164  ;;  %2986 = vst.msk [vmem:[%s4805_s24 + $0x558] sm:$0xff] %vm2814_vm1, %v4163_v55  ;;  %v3629_v62 = vpop.f32.mrb[50].mxu0  ;;  %4190 = vtanh.f32 %v2239_v60 }
 0x152   : > { %v4167_v61 = vpop.eup %4166  ;;  %2856 = vst.msk [vmem:[%s4805_s24 + $0x148] sm:$0xff] %vm2814_vm1, %v4165_v58  ;;  %v3757_v63 = vpop.f32.mrb[50].mxu1  ;;  %4192 = vtanh.f32 %v3629_v62 }
 0x153   : > { %v4169_v0 = vpop.eup %4168  ;;  %2984 = vst.msk [vmem:[%s4805_s24 + $0x548] sm:$0xff] %vm2814_vm1, %v4167_v61  ;;  %v1730_v1 = vpop.f32.mrb[51].mxu0  ;;  %4194 = vtanh.f32 %v3757_v63 }
 0x154   : > { %v2242_v2 = vpop.f32.mrb[51].mxu1  ;;  %v4171_v3 = vpop.eup %4170  ;;  %2861 = vst.msk [vmem:[%s4805_s24 + $0x170] sm:$0xff] %vm2814_vm1, %v4169_v0  ;;  %4196 = vtanh.f32 %v1730_v1 }
 0x155   : > { %v4173_v4 = vpop.eup %4172  ;;  %2989 = vst.msk [vmem:[%s4805_s24 + $0x570] sm:$0xff] %vm2814_vm1, %v4171_v3  ;;  %4198 = vtanh.f32 %v2242_v2  ;;  %v3632_v8 = vpop.f32.mrb[52].mxu0 }
 0x156   : > { %v4175_v5 = vpop.eup %4174  ;;  %2859 = vst.msk [vmem:[%s4805_s24 + $0x160] sm:$0xff] %vm2814_vm1, %v4173_v4  ;;  %v3760_v9 = vpop.f32.mrb[52].mxu1  ;;  %4200 = vtanh.f32 %v3632_v8 }
 0x157   : > { %v4177_v6 = vpop.eup %4176  ;;  %2987 = vst.msk [vmem:[%s4805_s24 + $0x560] sm:$0xff] %vm2814_vm1, %v4175_v5  ;;  %v1743_v11 = vpop.f32.mrb[53].mxu0  ;;  %4202 = vtanh.f32 %v3760_v9 }
 0x158   : > { %v4179_v7 = vpop.eup %4178  ;;  %2862 = vst.msk [vmem:[%s4805_s24 + $0x178] sm:$0xff] %vm2814_vm1, %v4177_v6  ;;  %v2255_v12 = vpop.f32.mrb[53].mxu1  ;;  %4204 = vtanh.f32 %v1743_v11 }
 0x159   : > { %v4181_v10 = vpop.eup %4180  ;;  %2990 = vst.msk [vmem:[%s4805_s24 + $0x578] sm:$0xff] %vm2814_vm1, %v4179_v7  ;;  %v3633_v14 = vpop.f32.mrb[54].mxu0  ;;  %4206 = vtanh.f32 %v2255_v12 }
 0x15a   : > { %v4183_v13 = vpop.eup %4182  ;;  %2860 = vst.msk [vmem:[%s4805_s24 + $0x168] sm:$0xff] %vm2814_vm1, %v4181_v10  ;;  %v3761_v15 = vpop.f32.mrb[54].mxu1  ;;  %4208 = vtanh.f32 %v3633_v14 }
 0x15b   : > { %v4185_v16 = vpop.eup %4184  ;;  %2988 = vst.msk [vmem:[%s4805_s24 + $0x568] sm:$0xff] %vm2814_vm1, %v4183_v13  ;;  %v1746_v17 = vpop.f32.mrb[55].mxu0  ;;  %4210 = vtanh.f32 %v3761_v15 }
 0x15c   : > { %v2258_v18 = vpop.f32.mrb[55].mxu1  ;;  %v4187_v19 = vpop.eup %4186  ;;  %2865 = vst.msk [vmem:[%s4805_s24 + $0x190] sm:$0xff] %vm2814_vm1, %v4185_v16  ;;  %4212 = vtanh.f32 %v1746_v17 }
 0x15d   : > { %v4189_v20 = vpop.eup %4188  ;;  %2993 = vst.msk [vmem:[%s4805_s24 + $0x590] sm:$0xff] %vm2814_vm1, %v4187_v19  ;;  %4214 = vtanh.f32 %v2258_v18  ;;  %v3636_v24 = vpop.f32.mrb[56].mxu0 }
 0x15e   : > { %v4191_v21 = vpop.eup %4190  ;;  %2863 = vst.msk [vmem:[%s4805_s24 + $0x180] sm:$0xff] %vm2814_vm1, %v4189_v20  ;;  %v3764_v25 = vpop.f32.mrb[56].mxu1  ;;  %4216 = vtanh.f32 %v3636_v24 }
 0x15f   : > { %v4193_v22 = vpop.eup %4192  ;;  %2991 = vst.msk [vmem:[%s4805_s24 + $0x580] sm:$0xff] %vm2814_vm1, %v4191_v21  ;;  %v1759_v27 = vpop.f32.mrb[57].mxu0  ;;  %4218 = vtanh.f32 %v3764_v25 }
 0x160   : > { %v4195_v23 = vpop.eup %4194  ;;  %2866 = vst.msk [vmem:[%s4805_s24 + $0x198] sm:$0xff] %vm2814_vm1, %v4193_v22  ;;  %v2271_v28 = vpop.f32.mrb[57].mxu1  ;;  %4220 = vtanh.f32 %v1759_v27 }
 0x161   : > { %v4197_v26 = vpop.eup %4196  ;;  %2994 = vst.msk [vmem:[%s4805_s24 + $0x598] sm:$0xff] %vm2814_vm1, %v4195_v23  ;;  %v3637_v30 = vpop.f32.mrb[58].mxu0  ;;  %4222 = vtanh.f32 %v2271_v28 }
 0x162   : > { %v4199_v29 = vpop.eup %4198  ;;  %2864 = vst.msk [vmem:[%s4805_s24 + $0x188] sm:$0xff] %vm2814_vm1, %v4197_v26  ;;  %v3765_v31 = vpop.f32.mrb[58].mxu1  ;;  %4224 = vtanh.f32 %v3637_v30 }
 0x163   : > { %v4201_v32 = vpop.eup %4200  ;;  %2992 = vst.msk [vmem:[%s4805_s24 + $0x588] sm:$0xff] %vm2814_vm1, %v4199_v29  ;;  %v1762_v33 = vpop.f32.mrb[59].mxu0  ;;  %4226 = vtanh.f32 %v3765_v31 }
 0x164   : > { %v2274_v34 = vpop.f32.mrb[59].mxu1  ;;  %v4203_v35 = vpop.eup %4202  ;;  %2869 = vst.msk [vmem:[%s4805_s24 + $0x1b0] sm:$0xff] %vm2814_vm1, %v4201_v32  ;;  %4228 = vtanh.f32 %v1762_v33 }
 0x165   : > { %v4205_v36 = vpop.eup %4204  ;;  %2997 = vst.msk [vmem:[%s4805_s24 + $0x5b0] sm:$0xff] %vm2814_vm1, %v4203_v35  ;;  %4230 = vtanh.f32 %v2274_v34  ;;  %v3640_v40 = vpop.f32.mrb[60].mxu0 }
 0x166   : > { %v4207_v37 = vpop.eup %4206  ;;  %2867 = vst.msk [vmem:[%s4805_s24 + $0x1a0] sm:$0xff] %vm2814_vm1, %v4205_v36  ;;  %v3768_v41 = vpop.f32.mrb[60].mxu1  ;;  %4232 = vtanh.f32 %v3640_v40 }
 0x167   : > { %v4209_v38 = vpop.eup %4208  ;;  %2995 = vst.msk [vmem:[%s4805_s24 + $0x5a0] sm:$0xff] %vm2814_vm1, %v4207_v37  ;;  %v1775_v43 = vpop.f32.mrb[61].mxu0  ;;  %4234 = vtanh.f32 %v3768_v41 }
 0x168   : > { %v4211_v39 = vpop.eup %4210  ;;  %2870 = vst.msk [vmem:[%s4805_s24 + $0x1b8] sm:$0xff] %vm2814_vm1, %v4209_v38  ;;  %v2287_v44 = vpop.f32.mrb[61].mxu1  ;;  %4236 = vtanh.f32 %v1775_v43 }
 0x169   : > { %v4213_v42 = vpop.eup %4212  ;;  %2998 = vst.msk [vmem:[%s4805_s24 + $0x5b8] sm:$0xff] %vm2814_vm1, %v4211_v39  ;;  %v3641_v46 = vpop.f32.mrb[62].mxu0  ;;  %4238 = vtanh.f32 %v2287_v44 }
 0x16a   : > { %v4215_v45 = vpop.eup %4214  ;;  %2868 = vst.msk [vmem:[%s4805_s24 + $0x1a8] sm:$0xff] %vm2814_vm1, %v4213_v42  ;;  %v3769_v47 = vpop.f32.mrb[62].mxu1  ;;  %4240 = vtanh.f32 %v3641_v46 }
 0x16b   : > { %v4217_v48 = vpop.eup %4216  ;;  %2996 = vst.msk [vmem:[%s4805_s24 + $0x5a8] sm:$0xff] %vm2814_vm1, %v4215_v45  ;;  %v1778_v49 = vpop.f32.mrb[63].mxu0  ;;  %4242 = vtanh.f32 %v3769_v47 }
 0x16c   : > { %v2290_v50 = vpop.f32.mrb[63].mxu1  ;;  %v4219_v51 = vpop.eup %4218  ;;  %2873 = vst.msk [vmem:[%s4805_s24 + $0x1d0] sm:$0xff] %vm2814_vm1, %v4217_v48  ;;  %4244 = vtanh.f32 %v1778_v49 }
 0x16d   : > { %v4221_v52 = vpop.eup %4220  ;;  %3001 = vst.msk [vmem:[%s4805_s24 + $0x5d0] sm:$0xff] %vm2814_vm1, %v4219_v51  ;;  %4246 = vtanh.f32 %v2290_v50  ;;  %v3644_v56 = vpop.f32.mrb[64].mxu0 }
 0x16e   : > { %v4223_v53 = vpop.eup %4222  ;;  %2871 = vst.msk [vmem:[%s4805_s24 + $0x1c0] sm:$0xff] %vm2814_vm1, %v4221_v52  ;;  %v3772_v57 = vpop.f32.mrb[64].mxu1  ;;  %4248 = vtanh.f32 %v3644_v56 }
 0x16f   : > { %v4225_v54 = vpop.eup %4224  ;;  %2999 = vst.msk [vmem:[%s4805_s24 + $0x5c0] sm:$0xff] %vm2814_vm1, %v4223_v53  ;;  %v1791_v59 = vpop.f32.mrb[65].mxu0  ;;  %4250 = vtanh.f32 %v3772_v57 }
 0x170   : > { %v4227_v55 = vpop.eup %4226  ;;  %2874 = vst.msk [vmem:[%s4805_s24 + $0x1d8] sm:$0xff] %vm2814_vm1, %v4225_v54  ;;  %v2303_v60 = vpop.f32.mrb[65].mxu1  ;;  %4252 = vtanh.f32 %v1791_v59 }
 0x171   : > { %v4229_v58 = vpop.eup %4228  ;;  %3002 = vst.msk [vmem:[%s4805_s24 + $0x5d8] sm:$0xff] %vm2814_vm1, %v4227_v55  ;;  %v3645_v62 = vpop.f32.mrb[66].mxu0  ;;  %4254 = vtanh.f32 %v2303_v60 }
 0x172   : > { %v4231_v61 = vpop.eup %4230  ;;  %2872 = vst.msk [vmem:[%s4805_s24 + $0x1c8] sm:$0xff] %vm2814_vm1, %v4229_v58  ;;  %v3773_v63 = vpop.f32.mrb[66].mxu1  ;;  %4256 = vtanh.f32 %v3645_v62 }
 0x173   : > { %v4233_v0 = vpop.eup %4232  ;;  %3000 = vst.msk [vmem:[%s4805_s24 + $0x5c8] sm:$0xff] %vm2814_vm1, %v4231_v61  ;;  %v1794_v1 = vpop.f32.mrb[67].mxu0  ;;  %4258 = vtanh.f32 %v3773_v63 }
 0x174   : > { %v2306_v2 = vpop.f32.mrb[67].mxu1  ;;  %v4235_v3 = vpop.eup %4234  ;;  %2877 = vst.msk [vmem:[%s4805_s24 + $0x1f0] sm:$0xff] %vm2814_vm1, %v4233_v0  ;;  %4260 = vtanh.f32 %v1794_v1 }
 0x175   : > { %v4237_v4 = vpop.eup %4236  ;;  %3005 = vst.msk [vmem:[%s4805_s24 + $0x5f0] sm:$0xff] %vm2814_vm1, %v4235_v3  ;;  %4262 = vtanh.f32 %v2306_v2  ;;  %v3648_v8 = vpop.f32.mrb[68].mxu0 }
 0x176   : > { %v4239_v5 = vpop.eup %4238  ;;  %2875 = vst.msk [vmem:[%s4805_s24 + $0x1e0] sm:$0xff] %vm2814_vm1, %v4237_v4  ;;  %v3776_v9 = vpop.f32.mrb[68].mxu1  ;;  %4264 = vtanh.f32 %v3648_v8 }
 0x177   : > { %v4241_v6 = vpop.eup %4240  ;;  %3003 = vst.msk [vmem:[%s4805_s24 + $0x5e0] sm:$0xff] %vm2814_vm1, %v4239_v5  ;;  %v1807_v11 = vpop.f32.mrb[69].mxu0  ;;  %4266 = vtanh.f32 %v3776_v9 }
 0x178   : > { %v4243_v7 = vpop.eup %4242  ;;  %2878 = vst.msk [vmem:[%s4805_s24 + $0x1f8] sm:$0xff] %vm2814_vm1, %v4241_v6  ;;  %v2319_v12 = vpop.f32.mrb[69].mxu1  ;;  %4268 = vtanh.f32 %v1807_v11 }
 0x179   : > { %v4245_v10 = vpop.eup %4244  ;;  %3006 = vst.msk [vmem:[%s4805_s24 + $0x5f8] sm:$0xff] %vm2814_vm1, %v4243_v7  ;;  %v3649_v14 = vpop.f32.mrb[70].mxu0  ;;  %4270 = vtanh.f32 %v2319_v12 }
 0x17a   : > { %v4247_v13 = vpop.eup %4246  ;;  %2876 = vst.msk [vmem:[%s4805_s24 + $0x1e8] sm:$0xff] %vm2814_vm1, %v4245_v10  ;;  %v3777_v15 = vpop.f32.mrb[70].mxu1  ;;  %4272 = vtanh.f32 %v3649_v14 }
 0x17b   : > { %v4249_v16 = vpop.eup %4248  ;;  %3004 = vst.msk [vmem:[%s4805_s24 + $0x5e8] sm:$0xff] %vm2814_vm1, %v4247_v13  ;;  %v1810_v17 = vpop.f32.mrb[71].mxu0  ;;  %4274 = vtanh.f32 %v3777_v15 }
 0x17c   : > { %v2322_v18 = vpop.f32.mrb[71].mxu1  ;;  %v4251_v19 = vpop.eup %4250  ;;  %2881 = vst.msk [vmem:[%s4805_s24 + $0x210] sm:$0xff] %vm2814_vm1, %v4249_v16  ;;  %4276 = vtanh.f32 %v1810_v17 }
 0x17d   : > { %v4253_v20 = vpop.eup %4252  ;;  %3009 = vst.msk [vmem:[%s4805_s24 + $0x610] sm:$0xff] %vm2814_vm1, %v4251_v19  ;;  %4278 = vtanh.f32 %v2322_v18  ;;  %v3652_v24 = vpop.f32.mrb[72].mxu0 }
 0x17e   : > { %v4255_v21 = vpop.eup %4254  ;;  %2879 = vst.msk [vmem:[%s4805_s24 + $0x200] sm:$0xff] %vm2814_vm1, %v4253_v20  ;;  %v3780_v25 = vpop.f32.mrb[72].mxu1  ;;  %4280 = vtanh.f32 %v3652_v24 }
 0x17f   : > { %v4257_v22 = vpop.eup %4256  ;;  %3007 = vst.msk [vmem:[%s4805_s24 + $0x600] sm:$0xff] %vm2814_vm1, %v4255_v21  ;;  %v1823_v27 = vpop.f32.mrb[73].mxu0  ;;  %4282 = vtanh.f32 %v3780_v25 }
 0x180   : > { %v4259_v23 = vpop.eup %4258  ;;  %2882 = vst.msk [vmem:[%s4805_s24 + $0x218] sm:$0xff] %vm2814_vm1, %v4257_v22  ;;  %v2335_v28 = vpop.f32.mrb[73].mxu1  ;;  %4284 = vtanh.f32 %v1823_v27 }
 0x181   : > { %v4261_v26 = vpop.eup %4260  ;;  %3010 = vst.msk [vmem:[%s4805_s24 + $0x618] sm:$0xff] %vm2814_vm1, %v4259_v23  ;;  %v3653_v30 = vpop.f32.mrb[74].mxu0  ;;  %4286 = vtanh.f32 %v2335_v28 }
 0x182   : > { %v4263_v29 = vpop.eup %4262  ;;  %2880 = vst.msk [vmem:[%s4805_s24 + $0x208] sm:$0xff] %vm2814_vm1, %v4261_v26  ;;  %v3781_v31 = vpop.f32.mrb[74].mxu1  ;;  %4288 = vtanh.f32 %v3653_v30 }
 0x183   : > { %v4265_v32 = vpop.eup %4264  ;;  %3008 = vst.msk [vmem:[%s4805_s24 + $0x608] sm:$0xff] %vm2814_vm1, %v4263_v29  ;;  %v1826_v33 = vpop.f32.mrb[75].mxu0  ;;  %4290 = vtanh.f32 %v3781_v31 }
 0x184   : > { %v2338_v34 = vpop.f32.mrb[75].mxu1  ;;  %v4267_v35 = vpop.eup %4266  ;;  %2885 = vst.msk [vmem:[%s4805_s24 + $0x230] sm:$0xff] %vm2814_vm1, %v4265_v32  ;;  %4292 = vtanh.f32 %v1826_v33 }
 0x185   : > { %v4269_v36 = vpop.eup %4268  ;;  %3013 = vst.msk [vmem:[%s4805_s24 + $0x630] sm:$0xff] %vm2814_vm1, %v4267_v35  ;;  %4294 = vtanh.f32 %v2338_v34  ;;  %v3656_v40 = vpop.f32.mrb[76].mxu0 }
 0x186   : > { %v4271_v37 = vpop.eup %4270  ;;  %2883 = vst.msk [vmem:[%s4805_s24 + $0x220] sm:$0xff] %vm2814_vm1, %v4269_v36  ;;  %v3784_v41 = vpop.f32.mrb[76].mxu1  ;;  %4296 = vtanh.f32 %v3656_v40 }
 0x187   : > { %v4273_v38 = vpop.eup %4272  ;;  %3011 = vst.msk [vmem:[%s4805_s24 + $0x620] sm:$0xff] %vm2814_vm1, %v4271_v37  ;;  %v1839_v43 = vpop.f32.mrb[77].mxu0  ;;  %4298 = vtanh.f32 %v3784_v41 }
 0x188   : > { %v4275_v39 = vpop.eup %4274  ;;  %2886 = vst.msk [vmem:[%s4805_s24 + $0x238] sm:$0xff] %vm2814_vm1, %v4273_v38  ;;  %v2351_v44 = vpop.f32.mrb[77].mxu1  ;;  %4300 = vtanh.f32 %v1839_v43 }
 0x189   : > { %v4277_v42 = vpop.eup %4276  ;;  %3014 = vst.msk [vmem:[%s4805_s24 + $0x638] sm:$0xff] %vm2814_vm1, %v4275_v39  ;;  %v3657_v46 = vpop.f32.mrb[78].mxu0  ;;  %4302 = vtanh.f32 %v2351_v44 }
 0x18a   : > { %v4279_v45 = vpop.eup %4278  ;;  %2884 = vst.msk [vmem:[%s4805_s24 + $0x228] sm:$0xff] %vm2814_vm1, %v4277_v42  ;;  %v3785_v47 = vpop.f32.mrb[78].mxu1  ;;  %4304 = vtanh.f32 %v3657_v46 }
 0x18b   : > { %v4281_v48 = vpop.eup %4280  ;;  %3012 = vst.msk [vmem:[%s4805_s24 + $0x628] sm:$0xff] %vm2814_vm1, %v4279_v45  ;;  %v1842_v49 = vpop.f32.mrb[79].mxu0  ;;  %4306 = vtanh.f32 %v3785_v47 }
 0x18c   : > { %v2354_v50 = vpop.f32.mrb[79].mxu1  ;;  %v4283_v51 = vpop.eup %4282  ;;  %2889 = vst.msk [vmem:[%s4805_s24 + $0x250] sm:$0xff] %vm2814_vm1, %v4281_v48  ;;  %4308 = vtanh.f32 %v1842_v49 }
 0x18d   : > { %v4285_v52 = vpop.eup %4284  ;;  %3017 = vst.msk [vmem:[%s4805_s24 + $0x650] sm:$0xff] %vm2814_vm1, %v4283_v51  ;;  %4310 = vtanh.f32 %v2354_v50  ;;  %v3660_v56 = vpop.f32.mrb[80].mxu0 }
 0x18e   : > { %v4287_v53 = vpop.eup %4286  ;;  %2887 = vst.msk [vmem:[%s4805_s24 + $0x240] sm:$0xff] %vm2814_vm1, %v4285_v52  ;;  %v3788_v57 = vpop.f32.mrb[80].mxu1  ;;  %4312 = vtanh.f32 %v3660_v56 }
 0x18f   : > { %v4289_v54 = vpop.eup %4288  ;;  %3015 = vst.msk [vmem:[%s4805_s24 + $0x640] sm:$0xff] %vm2814_vm1, %v4287_v53  ;;  %v1855_v59 = vpop.f32.mrb[81].mxu0  ;;  %4314 = vtanh.f32 %v3788_v57 }
 0x190   : > { %v4291_v55 = vpop.eup %4290  ;;  %2890 = vst.msk [vmem:[%s4805_s24 + $0x258] sm:$0xff] %vm2814_vm1, %v4289_v54  ;;  %v2367_v60 = vpop.f32.mrb[81].mxu1  ;;  %4316 = vtanh.f32 %v1855_v59 }
 0x191   : > { %v4293_v58 = vpop.eup %4292  ;;  %3018 = vst.msk [vmem:[%s4805_s24 + $0x658] sm:$0xff] %vm2814_vm1, %v4291_v55  ;;  %v3661_v62 = vpop.f32.mrb[82].mxu0  ;;  %4318 = vtanh.f32 %v2367_v60 }
 0x192   : > { %v4295_v61 = vpop.eup %4294  ;;  %2888 = vst.msk [vmem:[%s4805_s24 + $0x248] sm:$0xff] %vm2814_vm1, %v4293_v58  ;;  %v3789_v63 = vpop.f32.mrb[82].mxu1  ;;  %4320 = vtanh.f32 %v3661_v62 }
 0x193   : > { %v4297_v0 = vpop.eup %4296  ;;  %3016 = vst.msk [vmem:[%s4805_s24 + $0x648] sm:$0xff] %vm2814_vm1, %v4295_v61  ;;  %v1858_v1 = vpop.f32.mrb[83].mxu0  ;;  %4322 = vtanh.f32 %v3789_v63 }
 0x194   : > { %v2370_v2 = vpop.f32.mrb[83].mxu1  ;;  %v4299_v3 = vpop.eup %4298  ;;  %2893 = vst.msk [vmem:[%s4805_s24 + $0x270] sm:$0xff] %vm2814_vm1, %v4297_v0  ;;  %4324 = vtanh.f32 %v1858_v1 }
 0x195   : > { %v4301_v4 = vpop.eup %4300  ;;  %3021 = vst.msk [vmem:[%s4805_s24 + $0x670] sm:$0xff] %vm2814_vm1, %v4299_v3  ;;  %4326 = vtanh.f32 %v2370_v2  ;;  %v3664_v8 = vpop.f32.mrb[84].mxu0 }
 0x196   : > { %v4303_v5 = vpop.eup %4302  ;;  %2891 = vst.msk [vmem:[%s4805_s24 + $0x260] sm:$0xff] %vm2814_vm1, %v4301_v4  ;;  %v3792_v9 = vpop.f32.mrb[84].mxu1  ;;  %4328 = vtanh.f32 %v3664_v8 }
 0x197   : > { %v4305_v6 = vpop.eup %4304  ;;  %3019 = vst.msk [vmem:[%s4805_s24 + $0x660] sm:$0xff] %vm2814_vm1, %v4303_v5  ;;  %v1871_v11 = vpop.f32.mrb[85].mxu0  ;;  %4330 = vtanh.f32 %v3792_v9 }
 0x198   : > { %v4307_v7 = vpop.eup %4306  ;;  %2894 = vst.msk [vmem:[%s4805_s24 + $0x278] sm:$0xff] %vm2814_vm1, %v4305_v6  ;;  %v2383_v12 = vpop.f32.mrb[85].mxu1  ;;  %4332 = vtanh.f32 %v1871_v11 }
 0x199   : > { %v4309_v10 = vpop.eup %4308  ;;  %3022 = vst.msk [vmem:[%s4805_s24 + $0x678] sm:$0xff] %vm2814_vm1, %v4307_v7  ;;  %v3665_v14 = vpop.f32.mrb[86].mxu0  ;;  %4334 = vtanh.f32 %v2383_v12 }
 0x19a   : > { %v4311_v13 = vpop.eup %4310  ;;  %2892 = vst.msk [vmem:[%s4805_s24 + $0x268] sm:$0xff] %vm2814_vm1, %v4309_v10  ;;  %v3793_v15 = vpop.f32.mrb[86].mxu1  ;;  %4336 = vtanh.f32 %v3665_v14 }
 0x19b   : > { %v4313_v16 = vpop.eup %4312  ;;  %3020 = vst.msk [vmem:[%s4805_s24 + $0x668] sm:$0xff] %vm2814_vm1, %v4311_v13  ;;  %v1874_v17 = vpop.f32.mrb[87].mxu0  ;;  %4338 = vtanh.f32 %v3793_v15 }
 0x19c   : > { %v2386_v18 = vpop.f32.mrb[87].mxu1  ;;  %v4315_v19 = vpop.eup %4314  ;;  %2897 = vst.msk [vmem:[%s4805_s24 + $0x290] sm:$0xff] %vm2814_vm1, %v4313_v16  ;;  %4340 = vtanh.f32 %v1874_v17 }
 0x19d   : > { %v4317_v20 = vpop.eup %4316  ;;  %3025 = vst.msk [vmem:[%s4805_s24 + $0x690] sm:$0xff] %vm2814_vm1, %v4315_v19  ;;  %4342 = vtanh.f32 %v2386_v18  ;;  %v3668_v24 = vpop.f32.mrb[88].mxu0 }
 0x19e   : > { %v4319_v21 = vpop.eup %4318  ;;  %2895 = vst.msk [vmem:[%s4805_s24 + $0x280] sm:$0xff] %vm2814_vm1, %v4317_v20  ;;  %v3796_v25 = vpop.f32.mrb[88].mxu1  ;;  %4344 = vtanh.f32 %v3668_v24 }
 0x19f   : > { %v4321_v22 = vpop.eup %4320  ;;  %3023 = vst.msk [vmem:[%s4805_s24 + $0x680] sm:$0xff] %vm2814_vm1, %v4319_v21  ;;  %v1887_v27 = vpop.f32.mrb[89].mxu0  ;;  %4346 = vtanh.f32 %v3796_v25 }
 0x1a0   : > { %v4323_v23 = vpop.eup %4322  ;;  %2898 = vst.msk [vmem:[%s4805_s24 + $0x298] sm:$0xff] %vm2814_vm1, %v4321_v22  ;;  %v2399_v28 = vpop.f32.mrb[89].mxu1  ;;  %4348 = vtanh.f32 %v1887_v27 }
 0x1a1   : > { %v4325_v26 = vpop.eup %4324  ;;  %3026 = vst.msk [vmem:[%s4805_s24 + $0x698] sm:$0xff] %vm2814_vm1, %v4323_v23  ;;  %v3669_v30 = vpop.f32.mrb[90].mxu0  ;;  %4350 = vtanh.f32 %v2399_v28 }
 0x1a2   : > { %v4327_v29 = vpop.eup %4326  ;;  %2896 = vst.msk [vmem:[%s4805_s24 + $0x288] sm:$0xff] %vm2814_vm1, %v4325_v26  ;;  %v3797_v31 = vpop.f32.mrb[90].mxu1  ;;  %4352 = vtanh.f32 %v3669_v30 }
 0x1a3   : > { %v4329_v32 = vpop.eup %4328  ;;  %3024 = vst.msk [vmem:[%s4805_s24 + $0x688] sm:$0xff] %vm2814_vm1, %v4327_v29  ;;  %v1890_v33 = vpop.f32.mrb[91].mxu0  ;;  %4354 = vtanh.f32 %v3797_v31 }
 0x1a4   : > { %v2402_v34 = vpop.f32.mrb[91].mxu1  ;;  %v4331_v35 = vpop.eup %4330  ;;  %2901 = vst.msk [vmem:[%s4805_s24 + $0x2b0] sm:$0xff] %vm2814_vm1, %v4329_v32  ;;  %4356 = vtanh.f32 %v1890_v33 }
 0x1a5   : > { %v4333_v36 = vpop.eup %4332  ;;  %3029 = vst.msk [vmem:[%s4805_s24 + $0x6b0] sm:$0xff] %vm2814_vm1, %v4331_v35  ;;  %4358 = vtanh.f32 %v2402_v34  ;;  %v3672_v40 = vpop.f32.mrb[92].mxu0 }
 0x1a6   : > { %v4335_v37 = vpop.eup %4334  ;;  %2899 = vst.msk [vmem:[%s4805_s24 + $0x2a0] sm:$0xff] %vm2814_vm1, %v4333_v36  ;;  %v3800_v41 = vpop.f32.mrb[92].mxu1  ;;  %4360 = vtanh.f32 %v3672_v40 }
 0x1a7   : > { %v4337_v38 = vpop.eup %4336  ;;  %3027 = vst.msk [vmem:[%s4805_s24 + $0x6a0] sm:$0xff] %vm2814_vm1, %v4335_v37  ;;  %v1903_v43 = vpop.f32.mrb[93].mxu0  ;;  %4362 = vtanh.f32 %v3800_v41 }
 0x1a8   : > { %v4339_v39 = vpop.eup %4338  ;;  %2902 = vst.msk [vmem:[%s4805_s24 + $0x2b8] sm:$0xff] %vm2814_vm1, %v4337_v38  ;;  %v2415_v44 = vpop.f32.mrb[93].mxu1  ;;  %4364 = vtanh.f32 %v1903_v43 }
 0x1a9   : > { %v4341_v42 = vpop.eup %4340  ;;  %3030 = vst.msk [vmem:[%s4805_s24 + $0x6b8] sm:$0xff] %vm2814_vm1, %v4339_v39  ;;  %v3673_v46 = vpop.f32.mrb[94].mxu0  ;;  %4366 = vtanh.f32 %v2415_v44 }
 0x1aa   : > { %v4343_v45 = vpop.eup %4342  ;;  %2900 = vst.msk [vmem:[%s4805_s24 + $0x2a8] sm:$0xff] %vm2814_vm1, %v4341_v42  ;;  %v3801_v47 = vpop.f32.mrb[94].mxu1  ;;  %4368 = vtanh.f32 %v3673_v46 }
 0x1ab   : > { %v4345_v48 = vpop.eup %4344  ;;  %3028 = vst.msk [vmem:[%s4805_s24 + $0x6a8] sm:$0xff] %vm2814_vm1, %v4343_v45  ;;  %v1906_v49 = vpop.f32.mrb[95].mxu0  ;;  %4370 = vtanh.f32 %v3801_v47 }
 0x1ac   : > { %v2418_v50 = vpop.f32.mrb[95].mxu1  ;;  %v4347_v51 = vpop.eup %4346  ;;  %2905 = vst.msk [vmem:[%s4805_s24 + $0x2d0] sm:$0xff] %vm2814_vm1, %v4345_v48  ;;  %4372 = vtanh.f32 %v1906_v49 }
 0x1ad   : > { %v4349_v52 = vpop.eup %4348  ;;  %3033 = vst.msk [vmem:[%s4805_s24 + $0x6d0] sm:$0xff] %vm2814_vm1, %v4347_v51  ;;  %4374 = vtanh.f32 %v2418_v50  ;;  %v3676_v56 = vpop.f32.mrb[96].mxu0 }
 0x1ae   : > { %v4351_v53 = vpop.eup %4350  ;;  %2903 = vst.msk [vmem:[%s4805_s24 + $0x2c0] sm:$0xff] %vm2814_vm1, %v4349_v52  ;;  %v3804_v57 = vpop.f32.mrb[96].mxu1  ;;  %4376 = vtanh.f32 %v3676_v56 }
 0x1af   : > { %v4353_v54 = vpop.eup %4352  ;;  %3031 = vst.msk [vmem:[%s4805_s24 + $0x6c0] sm:$0xff] %vm2814_vm1, %v4351_v53  ;;  %v1919_v59 = vpop.f32.mrb[97].mxu0  ;;  %4378 = vtanh.f32 %v3804_v57 }
 0x1b0   : > { %v4355_v55 = vpop.eup %4354  ;;  %2906 = vst.msk [vmem:[%s4805_s24 + $0x2d8] sm:$0xff] %vm2814_vm1, %v4353_v54  ;;  %v2431_v60 = vpop.f32.mrb[97].mxu1  ;;  %4380 = vtanh.f32 %v1919_v59 }
 0x1b1   : > { %v4357_v58 = vpop.eup %4356  ;;  %3034 = vst.msk [vmem:[%s4805_s24 + $0x6d8] sm:$0xff] %vm2814_vm1, %v4355_v55  ;;  %v3677_v62 = vpop.f32.mrb[98].mxu0  ;;  %4382 = vtanh.f32 %v2431_v60 }
 0x1b2   : > { %v4359_v61 = vpop.eup %4358  ;;  %2904 = vst.msk [vmem:[%s4805_s24 + $0x2c8] sm:$0xff] %vm2814_vm1, %v4357_v58  ;;  %v3805_v63 = vpop.f32.mrb[98].mxu1  ;;  %4384 = vtanh.f32 %v3677_v62 }
 0x1b3   : > { %v4361_v0 = vpop.eup %4360  ;;  %3032 = vst.msk [vmem:[%s4805_s24 + $0x6c8] sm:$0xff] %vm2814_vm1, %v4359_v61  ;;  %v1922_v1 = vpop.f32.mrb[99].mxu0  ;;  %4386 = vtanh.f32 %v3805_v63 }
 0x1b4   : > { %v2434_v2 = vpop.f32.mrb[99].mxu1  ;;  %v4363_v3 = vpop.eup %4362  ;;  %2909 = vst.msk [vmem:[%s4805_s24 + $0x2f0] sm:$0xff] %vm2814_vm1, %v4361_v0  ;;  %4388 = vtanh.f32 %v1922_v1 }
 0x1b5   : > { %v4365_v4 = vpop.eup %4364  ;;  %3037 = vst.msk [vmem:[%s4805_s24 + $0x6f0] sm:$0xff] %vm2814_vm1, %v4363_v3  ;;  %4390 = vtanh.f32 %v2434_v2  ;;  %v3680_v8 = vpop.f32.mrb[100].mxu0 }
 0x1b6   : > { %v4367_v5 = vpop.eup %4366  ;;  %2907 = vst.msk [vmem:[%s4805_s24 + $0x2e0] sm:$0xff] %vm2814_vm1, %v4365_v4  ;;  %v3808_v9 = vpop.f32.mrb[100].mxu1  ;;  %4392 = vtanh.f32 %v3680_v8 }
 0x1b7   : > { %v4369_v6 = vpop.eup %4368  ;;  %3035 = vst.msk [vmem:[%s4805_s24 + $0x6e0] sm:$0xff] %vm2814_vm1, %v4367_v5  ;;  %v1935_v11 = vpop.f32.mrb[101].mxu0  ;;  %4394 = vtanh.f32 %v3808_v9 }
 0x1b8   : > { %v4371_v7 = vpop.eup %4370  ;;  %2910 = vst.msk [vmem:[%s4805_s24 + $0x2f8] sm:$0xff] %vm2814_vm1, %v4369_v6  ;;  %v2447_v12 = vpop.f32.mrb[101].mxu1  ;;  %4396 = vtanh.f32 %v1935_v11 }
 0x1b9   : > { %v4373_v10 = vpop.eup %4372  ;;  %3038 = vst.msk [vmem:[%s4805_s24 + $0x6f8] sm:$0xff] %vm2814_vm1, %v4371_v7  ;;  %v3681_v14 = vpop.f32.mrb[102].mxu0  ;;  %4398 = vtanh.f32 %v2447_v12 }
 0x1ba   : > { %v4375_v13 = vpop.eup %4374  ;;  %2908 = vst.msk [vmem:[%s4805_s24 + $0x2e8] sm:$0xff] %vm2814_vm1, %v4373_v10  ;;  %v3809_v15 = vpop.f32.mrb[102].mxu1  ;;  %4400 = vtanh.f32 %v3681_v14 }
 0x1bb   : > { %v4377_v16 = vpop.eup %4376  ;;  %3036 = vst.msk [vmem:[%s4805_s24 + $0x6e8] sm:$0xff] %vm2814_vm1, %v4375_v13  ;;  %v1938_v17 = vpop.f32.mrb[103].mxu0  ;;  %4402 = vtanh.f32 %v3809_v15 }
 0x1bc   : > { %v2450_v18 = vpop.f32.mrb[103].mxu1  ;;  %v4379_v19 = vpop.eup %4378  ;;  %2913 = vst.msk [vmem:[%s4805_s24 + $0x310] sm:$0xff] %vm2814_vm1, %v4377_v16  ;;  %4404 = vtanh.f32 %v1938_v17 }
 0x1bd   : > { %v4381_v20 = vpop.eup %4380  ;;  %3041 = vst.msk [vmem:[%s4805_s24 + $0x710] sm:$0xff] %vm2814_vm1, %v4379_v19  ;;  %4406 = vtanh.f32 %v2450_v18  ;;  %v3684_v24 = vpop.f32.mrb[104].mxu0 }
 0x1be   : > { %v4383_v21 = vpop.eup %4382  ;;  %2911 = vst.msk [vmem:[%s4805_s24 + $0x300] sm:$0xff] %vm2814_vm1, %v4381_v20  ;;  %v3812_v25 = vpop.f32.mrb[104].mxu1  ;;  %4408 = vtanh.f32 %v3684_v24 }
 0x1bf   : > { %v4385_v22 = vpop.eup %4384  ;;  %3039 = vst.msk [vmem:[%s4805_s24 + $0x700] sm:$0xff] %vm2814_vm1, %v4383_v21  ;;  %v1951_v27 = vpop.f32.mrb[105].mxu0  ;;  %4410 = vtanh.f32 %v3812_v25 }
 0x1c0   : > { %v4387_v23 = vpop.eup %4386  ;;  %2914 = vst.msk [vmem:[%s4805_s24 + $0x318] sm:$0xff] %vm2814_vm1, %v4385_v22  ;;  %v2463_v28 = vpop.f32.mrb[105].mxu1  ;;  %4412 = vtanh.f32 %v1951_v27 }
 0x1c1   : > { %v4389_v26 = vpop.eup %4388  ;;  %3042 = vst.msk [vmem:[%s4805_s24 + $0x718] sm:$0xff] %vm2814_vm1, %v4387_v23  ;;  %v3685_v30 = vpop.f32.mrb[106].mxu0  ;;  %4414 = vtanh.f32 %v2463_v28 }
 0x1c2   : > { %v4391_v29 = vpop.eup %4390  ;;  %2912 = vst.msk [vmem:[%s4805_s24 + $0x308] sm:$0xff] %vm2814_vm1, %v4389_v26  ;;  %v3813_v31 = vpop.f32.mrb[106].mxu1  ;;  %4416 = vtanh.f32 %v3685_v30 }
 0x1c3   : > { %v4393_v32 = vpop.eup %4392  ;;  %3040 = vst.msk [vmem:[%s4805_s24 + $0x708] sm:$0xff] %vm2814_vm1, %v4391_v29  ;;  %v1954_v33 = vpop.f32.mrb[107].mxu0  ;;  %4418 = vtanh.f32 %v3813_v31 }
 0x1c4   : > { %v2466_v34 = vpop.f32.mrb[107].mxu1  ;;  %v4395_v35 = vpop.eup %4394  ;;  %2917 = vst.msk [vmem:[%s4805_s24 + $0x330] sm:$0xff] %vm2814_vm1, %v4393_v32  ;;  %4420 = vtanh.f32 %v1954_v33 }
 0x1c5   : > { %v4397_v36 = vpop.eup %4396  ;;  %3045 = vst.msk [vmem:[%s4805_s24 + $0x730] sm:$0xff] %vm2814_vm1, %v4395_v35  ;;  %4422 = vtanh.f32 %v2466_v34  ;;  %v3688_v40 = vpop.f32.mrb[108].mxu0 }
 0x1c6   : > { %v4399_v37 = vpop.eup %4398  ;;  %2915 = vst.msk [vmem:[%s4805_s24 + $0x320] sm:$0xff] %vm2814_vm1, %v4397_v36  ;;  %v3816_v41 = vpop.f32.mrb[108].mxu1  ;;  %4424 = vtanh.f32 %v3688_v40 }
 0x1c7   : > { %v4401_v38 = vpop.eup %4400  ;;  %3043 = vst.msk [vmem:[%s4805_s24 + $0x720] sm:$0xff] %vm2814_vm1, %v4399_v37  ;;  %v1967_v43 = vpop.f32.mrb[109].mxu0  ;;  %4426 = vtanh.f32 %v3816_v41 }
 0x1c8   : > { %v4403_v39 = vpop.eup %4402  ;;  %2918 = vst.msk [vmem:[%s4805_s24 + $0x338] sm:$0xff] %vm2814_vm1, %v4401_v38  ;;  %v2479_v44 = vpop.f32.mrb[109].mxu1  ;;  %4428 = vtanh.f32 %v1967_v43 }
 0x1c9   : > { %v4405_v42 = vpop.eup %4404  ;;  %3046 = vst.msk [vmem:[%s4805_s24 + $0x738] sm:$0xff] %vm2814_vm1, %v4403_v39  ;;  %v3689_v46 = vpop.f32.mrb[110].mxu0  ;;  %4430 = vtanh.f32 %v2479_v44 }
 0x1ca   : > { %v4407_v45 = vpop.eup %4406  ;;  %2916 = vst.msk [vmem:[%s4805_s24 + $0x328] sm:$0xff] %vm2814_vm1, %v4405_v42  ;;  %v3817_v47 = vpop.f32.mrb[110].mxu1  ;;  %4432 = vtanh.f32 %v3689_v46 }
 0x1cb   : > { %v4409_v48 = vpop.eup %4408  ;;  %3044 = vst.msk [vmem:[%s4805_s24 + $0x728] sm:$0xff] %vm2814_vm1, %v4407_v45  ;;  %v1970_v49 = vpop.f32.mrb[111].mxu0  ;;  %4434 = vtanh.f32 %v3817_v47 }
 0x1cc   : > { %v2482_v50 = vpop.f32.mrb[111].mxu1  ;;  %v4411_v51 = vpop.eup %4410  ;;  %2921 = vst.msk [vmem:[%s4805_s24 + $0x350] sm:$0xff] %vm2814_vm1, %v4409_v48  ;;  %4436 = vtanh.f32 %v1970_v49 }
 0x1cd   : > { %v4413_v52 = vpop.eup %4412  ;;  %3049 = vst.msk [vmem:[%s4805_s24 + $0x750] sm:$0xff] %vm2814_vm1, %v4411_v51  ;;  %4438 = vtanh.f32 %v2482_v50  ;;  %v3692_v56 = vpop.f32.mrb[112].mxu0 }
 0x1ce   : > { %v4415_v53 = vpop.eup %4414  ;;  %2919 = vst.msk [vmem:[%s4805_s24 + $0x340] sm:$0xff] %vm2814_vm1, %v4413_v52  ;;  %v3820_v57 = vpop.f32.mrb[112].mxu1  ;;  %4440 = vtanh.f32 %v3692_v56 }
 0x1cf   : > { %v4417_v54 = vpop.eup %4416  ;;  %3047 = vst.msk [vmem:[%s4805_s24 + $0x740] sm:$0xff] %vm2814_vm1, %v4415_v53  ;;  %v1983_v59 = vpop.f32.mrb[113].mxu0  ;;  %4442 = vtanh.f32 %v3820_v57 }
 0x1d0   : > { %v4419_v55 = vpop.eup %4418  ;;  %2922 = vst.msk [vmem:[%s4805_s24 + $0x358] sm:$0xff] %vm2814_vm1, %v4417_v54  ;;  %v2495_v60 = vpop.f32.mrb[113].mxu1  ;;  %4444 = vtanh.f32 %v1983_v59 }
 0x1d1   : > { %v4421_v58 = vpop.eup %4420  ;;  %3050 = vst.msk [vmem:[%s4805_s24 + $0x758] sm:$0xff] %vm2814_vm1, %v4419_v55  ;;  %v3693_v62 = vpop.f32.mrb[114].mxu0  ;;  %4446 = vtanh.f32 %v2495_v60 }
 0x1d2   : > { %v4423_v61 = vpop.eup %4422  ;;  %2920 = vst.msk [vmem:[%s4805_s24 + $0x348] sm:$0xff] %vm2814_vm1, %v4421_v58  ;;  %v3821_v63 = vpop.f32.mrb[114].mxu1  ;;  %4448 = vtanh.f32 %v3693_v62 }
 0x1d3   : > { %v4425_v0 = vpop.eup %4424  ;;  %3048 = vst.msk [vmem:[%s4805_s24 + $0x748] sm:$0xff] %vm2814_vm1, %v4423_v61  ;;  %v1986_v1 = vpop.f32.mrb[115].mxu0  ;;  %4450 = vtanh.f32 %v3821_v63 }
 0x1d4   : > { %v2498_v2 = vpop.f32.mrb[115].mxu1  ;;  %v4427_v3 = vpop.eup %4426  ;;  %2925 = vst.msk [vmem:[%s4805_s24 + $0x370] sm:$0xff] %vm2814_vm1, %v4425_v0  ;;  %4452 = vtanh.f32 %v1986_v1 }
 0x1d5   : > { %v4429_v4 = vpop.eup %4428  ;;  %3053 = vst.msk [vmem:[%s4805_s24 + $0x770] sm:$0xff] %vm2814_vm1, %v4427_v3  ;;  %4454 = vtanh.f32 %v2498_v2  ;;  %v3696_v8 = vpop.f32.mrb[116].mxu0 }
 0x1d6   : > { %v4431_v5 = vpop.eup %4430  ;;  %2923 = vst.msk [vmem:[%s4805_s24 + $0x360] sm:$0xff] %vm2814_vm1, %v4429_v4  ;;  %v3824_v9 = vpop.f32.mrb[116].mxu1  ;;  %4456 = vtanh.f32 %v3696_v8 }
 0x1d7   : > { %v4433_v6 = vpop.eup %4432  ;;  %3051 = vst.msk [vmem:[%s4805_s24 + $0x760] sm:$0xff] %vm2814_vm1, %v4431_v5  ;;  %v1999_v11 = vpop.f32.mrb[117].mxu0  ;;  %4458 = vtanh.f32 %v3824_v9 }
 0x1d8   : > { %v4435_v7 = vpop.eup %4434  ;;  %2926 = vst.msk [vmem:[%s4805_s24 + $0x378] sm:$0xff] %vm2814_vm1, %v4433_v6  ;;  %v2511_v12 = vpop.f32.mrb[117].mxu1  ;;  %4460 = vtanh.f32 %v1999_v11 }
 0x1d9   : > { %v4437_v10 = vpop.eup %4436  ;;  %3054 = vst.msk [vmem:[%s4805_s24 + $0x778] sm:$0xff] %vm2814_vm1, %v4435_v7  ;;  %v3697_v14 = vpop.f32.mrb[118].mxu0  ;;  %4462 = vtanh.f32 %v2511_v12 }
 0x1da   : > { %v4439_v13 = vpop.eup %4438  ;;  %2924 = vst.msk [vmem:[%s4805_s24 + $0x368] sm:$0xff] %vm2814_vm1, %v4437_v10  ;;  %v3825_v15 = vpop.f32.mrb[118].mxu1  ;;  %4464 = vtanh.f32 %v3697_v14 }
 0x1db   : > { %v4441_v16 = vpop.eup %4440  ;;  %3052 = vst.msk [vmem:[%s4805_s24 + $0x768] sm:$0xff] %vm2814_vm1, %v4439_v13  ;;  %v2002_v17 = vpop.f32.mrb[119].mxu0  ;;  %4466 = vtanh.f32 %v3825_v15 }
 0x1dc   : > { %v2514_v18 = vpop.f32.mrb[119].mxu1  ;;  %v4443_v19 = vpop.eup %4442  ;;  %2929 = vst.msk [vmem:[%s4805_s24 + $0x390] sm:$0xff] %vm2814_vm1, %v4441_v16  ;;  %4468 = vtanh.f32 %v2002_v17 }
 0x1dd   : > { %v4445_v20 = vpop.eup %4444  ;;  %3057 = vst.msk [vmem:[%s4805_s24 + $0x790] sm:$0xff] %vm2814_vm1, %v4443_v19  ;;  %4470 = vtanh.f32 %v2514_v18  ;;  %v3700_v24 = vpop.f32.mrb[120].mxu0 }
 0x1de   : > { %v4447_v21 = vpop.eup %4446  ;;  %2927 = vst.msk [vmem:[%s4805_s24 + $0x380] sm:$0xff] %vm2814_vm1, %v4445_v20  ;;  %v3828_v25 = vpop.f32.mrb[120].mxu1  ;;  %4472 = vtanh.f32 %v3700_v24 }
 0x1df   : > { %v4449_v22 = vpop.eup %4448  ;;  %3055 = vst.msk [vmem:[%s4805_s24 + $0x780] sm:$0xff] %vm2814_vm1, %v4447_v21  ;;  %v2015_v27 = vpop.f32.mrb[121].mxu0  ;;  %4474 = vtanh.f32 %v3828_v25 }
 0x1e0   : > { %v4451_v23 = vpop.eup %4450  ;;  %2930 = vst.msk [vmem:[%s4805_s24 + $0x398] sm:$0xff] %vm2814_vm1, %v4449_v22  ;;  %v2527_v28 = vpop.f32.mrb[121].mxu1  ;;  %4476 = vtanh.f32 %v2015_v27 }
 0x1e1   : > { %v4453_v26 = vpop.eup %4452  ;;  %3058 = vst.msk [vmem:[%s4805_s24 + $0x798] sm:$0xff] %vm2814_vm1, %v4451_v23  ;;  %v3701_v30 = vpop.f32.mrb[122].mxu0  ;;  %4478 = vtanh.f32 %v2527_v28 }
 0x1e2   : > { %v4455_v29 = vpop.eup %4454  ;;  %2928 = vst.msk [vmem:[%s4805_s24 + $0x388] sm:$0xff] %vm2814_vm1, %v4453_v26  ;;  %v3829_v31 = vpop.f32.mrb[122].mxu1  ;;  %4480 = vtanh.f32 %v3701_v30 }
 0x1e3   : > { %v4457_v32 = vpop.eup %4456  ;;  %3056 = vst.msk [vmem:[%s4805_s24 + $0x788] sm:$0xff] %vm2814_vm1, %v4455_v29  ;;  %v2018_v33 = vpop.f32.mrb[123].mxu0  ;;  %4482 = vtanh.f32 %v3829_v31 }
 0x1e4   : > { %v2530_v34 = vpop.f32.mrb[123].mxu1  ;;  %v4459_v35 = vpop.eup %4458  ;;  %2933 = vst.msk [vmem:[%s4805_s24 + $0x3b0] sm:$0xff] %vm2814_vm1, %v4457_v32  ;;  %4484 = vtanh.f32 %v2018_v33 }
 0x1e5   : > { %v4461_v36 = vpop.eup %4460  ;;  %3061 = vst.msk [vmem:[%s4805_s24 + $0x7b0] sm:$0xff] %vm2814_vm1, %v4459_v35  ;;  %4486 = vtanh.f32 %v2530_v34  ;;  %v3704_v40 = vpop.f32.mrb[124].mxu0 }
 0x1e6   : > { %v4463_v37 = vpop.eup %4462  ;;  %2931 = vst.msk [vmem:[%s4805_s24 + $0x3a0] sm:$0xff] %vm2814_vm1, %v4461_v36  ;;  %v3832_v41 = vpop.f32.mrb[124].mxu1  ;;  %4488 = vtanh.f32 %v3704_v40 }
 0x1e7   : > { %v4465_v38 = vpop.eup %4464  ;;  %3059 = vst.msk [vmem:[%s4805_s24 + $0x7a0] sm:$0xff] %vm2814_vm1, %v4463_v37  ;;  %v2031_v43 = vpop.f32.mrb[125].mxu0  ;;  %4490 = vtanh.f32 %v3832_v41 }
 0x1e8   : > { %v4467_v39 = vpop.eup %4466  ;;  %2934 = vst.msk [vmem:[%s4805_s24 + $0x3b8] sm:$0xff] %vm2814_vm1, %v4465_v38  ;;  %v2543_v44 = vpop.f32.mrb[125].mxu1  ;;  %4492 = vtanh.f32 %v2031_v43 }
 0x1e9   : > { %v4469_v42 = vpop.eup %4468  ;;  %3062 = vst.msk [vmem:[%s4805_s24 + $0x7b8] sm:$0xff] %vm2814_vm1, %v4467_v39  ;;  %v3705_v46 = vpop.f32.mrb[126].mxu0  ;;  %4494 = vtanh.f32 %v2543_v44 }
 0x1ea   : > { %v4471_v45 = vpop.eup %4470  ;;  %2932 = vst.msk [vmem:[%s4805_s24 + $0x3a8] sm:$0xff] %vm2814_vm1, %v4469_v42  ;;  %v3833_v47 = vpop.f32.mrb[126].mxu1  ;;  %4496 = vtanh.f32 %v3705_v46 }
 0x1eb   : > { %v4473_v48 = vpop.eup %4472  ;;  %3060 = vst.msk [vmem:[%s4805_s24 + $0x7a8] sm:$0xff] %vm2814_vm1, %v4471_v45  ;;  %v2034_v49 = vpop.f32.mrb[127].mxu0  ;;  %4498 = vtanh.f32 %v3833_v47 }
 0x1ec   : > { %v2546_v50 = vpop.f32.mrb[127].mxu1  ;;  %v4475_v51 = vpop.eup %4474  ;;  %2937 = vst.msk [vmem:[%s4805_s24 + $0x3d0] sm:$0xff] %vm2814_vm1, %v4473_v48  ;;  %4500 = vtanh.f32 %v2034_v49 }
 0x1ed   : > { %v4477_v52 = vpop.eup %4476  ;;  %3065 = vst.msk [vmem:[%s4805_s24 + $0x7d0] sm:$0xff] %vm2814_vm1, %v4475_v51  ;;  %4502 = vtanh.f32 %v2546_v50 }
 0x1ee   : > { %v4479_v53 = vpop.eup %4478  ;;  %2935 = vst.msk [vmem:[%s4805_s24 + $0x3c0] sm:$0xff] %vm2814_vm1, %v4477_v52 }
 0x1ef   : > { %v4481_v54 = vpop.eup %4480  ;;  %3063 = vst.msk [vmem:[%s4805_s24 + $0x7c0] sm:$0xff] %vm2814_vm1, %v4479_v53 }
 0x1f0   : > { %v4483_v55 = vpop.eup %4482  ;;  %2938 = vst.msk [vmem:[%s4805_s24 + $0x3d8] sm:$0xff] %vm2814_vm1, %v4481_v54 }
 0x1f1   : > { %v4485_v56 = vpop.eup %4484  ;;  %3066 = vst.msk [vmem:[%s4805_s24 + $0x7d8] sm:$0xff] %vm2814_vm1, %v4483_v55 }
 0x1f2   : > { %v4487_v57 = vpop.eup %4486  ;;  %2936 = vst.msk [vmem:[%s4805_s24 + $0x3c8] sm:$0xff] %vm2814_vm1, %v4485_v56 }
 0x1f3   : > { %v4489_v58 = vpop.eup %4488  ;;  %3064 = vst.msk [vmem:[%s4805_s24 + $0x7c8] sm:$0xff] %vm2814_vm1, %v4487_v57 }
 0x1f4   : > { %v4491_v59 = vpop.eup %4490  ;;  %2941 = vst.msk [vmem:[%s4805_s24 + $0x3f0] sm:$0xff] %vm2814_vm1, %v4489_v58 }
 0x1f5   : > { %v4493_v60 = vpop.eup %4492  ;;  %3069 = vst.msk [vmem:[%s4805_s24 + $0x7f0] sm:$0xff] %vm2814_vm1, %v4491_v59 }
 0x1f6   : > { %v4495_v61 = vpop.eup %4494  ;;  %2939 = vst.msk [vmem:[%s4805_s24 + $0x3e0] sm:$0xff] %vm2814_vm1, %v4493_v60 }
 0x1f7   : > { %v4497_v62 = vpop.eup %4496  ;;  %3067 = vst.msk [vmem:[%s4805_s24 + $0x7e0] sm:$0xff] %vm2814_vm1, %v4495_v61 }
 0x1f8   : > { %v4499_v63 = vpop.eup %4498  ;;  %2942 = vst.msk [vmem:[%s4805_s24 + $0x3f8] sm:$0xff] %vm2814_vm1, %v4497_v62 }
 0x1f9   : > { %v4501_v0 = vpop.eup %4500  ;;  %3070 = vst.msk [vmem:[%s4805_s24 + $0x7f8] sm:$0xff] %vm2814_vm1, %v4499_v63 }
 0x1fa   : > { %v4503_v1 = vpop.eup %4502  ;;  %2940 = vst.msk [vmem:[%s4805_s24 + $0x3e8] sm:$0xff] %vm2814_vm1, %v4501_v0 }
 0x1fb   : > { %3068 = vst.msk [vmem:[%s4805_s24 + $0x7e8] sm:$0xff] %vm2814_vm1, %v4503_v1 }
 0x1fc PF: > { %s12_s11 = sadd.s32 1, %s4526_s11   ;;  %s5359_s9 = smov %s4522_s10 }
 0x1fd   : > { %p9_p5 = scmp.ge.s32.totalorder %s12_s11, 6   ;;  %s5360_s10 = smov %s5362_s12 }
 0x1ff   :  { %11 = sbr.rel (!%p9_p5) target bundleno = 2 (0x2), region = 61 }

</bundles_post_ra>
